<compile_context>
chip_gen: v7x
topology: tpu7x:2x2x1
jax: 0.10.0
libtpu: 0.0.40
codegen_flags: <defaults>
</compile_context>

<pallas_src>
import functools

import jax
import jax.numpy as jnp
from jax import lax
from jax.experimental import pallas as pl
from jax.experimental.pallas import tpu as pltpu

AUDIO_DIM = 768
VIDEO_DIM = 3                     # conv in_channels for the demo
HIDDEN = 512
TIME_STEPS = 10
CONV_D, CONV_H, CONV_W = 4, 8, 8  # spatial sizes implied by video_fc in_features = 512*4*4*4
POOL_D, POOL_H, POOL_W = CONV_D, CONV_H // 2, CONV_W // 2
VFC_IN = HIDDEN * POOL_D * POOL_H * POOL_W   # 32768
BN_EPS = 1e-5

_VMEM_BYTES = 32 * 1024 * 1024    # safe ceiling on v7x (64 MiB physical), raises v5e default
_TK_VFC = 4096                    # K tile for the video_fc contraction (32768 / 4096 = 8 steps)


def _is_v5_device():
    try:
        return "v5" in jax.devices()[0].device_kind.lower()
    except Exception:
        return False


def _pick_tile(n, candidates, prefer_multi_step=False):
    """Largest candidate dividing n (optionally with >=2 grid steps so both v7x
    TensorCores get work); fall back to the full extent (always legal)."""
    if prefer_multi_step:
        for c in candidates:
            if n % c == 0 and n // c >= 2:
                return c
    for c in candidates:
        if n >= c and n % c == 0:
            return c
    return n


# ----------------------------------------------------------------------------
# Kernel 1: audio path.  fc1 (768->512), then the time-step-mean-folded 512x512
# projection.  mean_t(a1 @ W2[t] + b2[t]) == a1 @ mean_t(W2[t]) + mean_t(b2[t]).
# ----------------------------------------------------------------------------
def _audio_kernel(x_ref, w1_ref, b1_ref, w2m_ref, b2m_ref, o_ref):
    a1 = jnp.dot(x_ref[...], w1_ref[...], preferred_element_type=jnp.float32)
    a1 = (a1 + b1_ref[...]).astype(jnp.bfloat16)           # no activation between the two FCs
    a2 = jnp.dot(a1, w2m_ref[...], preferred_element_type=jnp.float32) + b2m_ref[...]
    o_ref[...] = a2.astype(o_ref.dtype)


def _audio_forward(x_bf16, w1, b1, w2m, b2m, *, bm):
    B = x_bf16.shape[0]
    return pl.pallas_call(
        _audio_kernel,
        out_shape=jax.ShapeDtypeStruct((B, HIDDEN), jnp.float32),
        grid_spec=pltpu.PrefetchScalarGridSpec(
            num_scalar_prefetch=0,
            grid=(B // bm,),
            in_specs=[
                pl.BlockSpec((bm, AUDIO_DIM), lambda i: (i, 0)),
                pl.BlockSpec((AUDIO_DIM, HIDDEN), lambda i: (0, 0)),      # resident W1
                pl.BlockSpec((1, HIDDEN), lambda i: (0, 0)),
                pl.BlockSpec((HIDDEN, HIDDEN), lambda i: (0, 0)),         # resident W2_mean
                pl.BlockSpec((1, HIDDEN), lambda i: (0, 0)),
            ],
            out_specs=pl.BlockSpec((bm, HIDDEN), lambda i: (i, 0)),
        ),
        compiler_params=pltpu.CompilerParams(
            dimension_semantics=("parallel",),
            vmem_limit_bytes=_VMEM_BYTES,
        ),
    )(x_bf16, w1, b1, w2m, b2m)


# ----------------------------------------------------------------------------
# Kernel 2: Conv3d (im2col GEMM, BN scale pre-folded into weights) + shift + ReLU
# + MaxPool3d((1,2,2)).  The 4 pooling-window taps arrive as one (4, br, Kp) block;
# the pool is a running max over 4 GEMMs sharing the resident weight tile.
# Output is channels-last: rows ordered (b, f, d, ph, pw), 512 lanes per row.
# ----------------------------------------------------------------------------
def _conv_pool_kernel(p_ref, w_ref, shift_ref, o_ref):
    w = w_ref[...]
    pooled = jnp.dot(p_ref[0], w, preferred_element_type=jnp.float32)
    for t in range(1, 4):                                   # running max: fewer live f32 tiles
        pooled = jnp.maximum(
            pooled, jnp.dot(p_ref[t], w, preferred_element_type=jnp.float32))
    # ReLU and the per-channel shift commute with max, so apply them once after the pool.
    o_ref[...] = jnp.maximum(pooled + shift_ref[...], 0.0).astype(o_ref.dtype)


def _conv_bn_relu_pool(patches4, wc_scaled, shift2d, *, br):
    _, R, Kp = patches4.shape
    return pl.pallas_call(
        _conv_pool_kernel,
        out_shape=jax.ShapeDtypeStruct((R, HIDDEN), jnp.bfloat16),
        grid_spec=pltpu.PrefetchScalarGridSpec(
            num_scalar_prefetch=0,
            grid=(R // br,),
            in_specs=[
                pl.BlockSpec((4, br, Kp), lambda i: (0, i, 0)),           # one DMA for 4 taps
                pl.BlockSpec((Kp, HIDDEN), lambda i: (0, 0)),
                pl.BlockSpec((1, HIDDEN), lambda i: (0, 0)),
            ],
            out_specs=pl.BlockSpec((br, HIDDEN), lambda i: (i, 0)),
        ),
        compiler_params=pltpu.CompilerParams(
            dimension_semantics=("parallel",),
            vmem_limit_bytes=_VMEM_BYTES,
        ),
    )(patches4, wc_scaled, shift2d)


# ----------------------------------------------------------------------------
# Kernel 3: video_fc (32768 -> 512) with the contraction streamed in K tiles and the
# mean over frames fused into the accumulator.  Input is (B, F*32768) bf16 (a free
# contiguous reshape of the pooled rows); the frame axis lives in the index_map and is
# innermost in the grid so each weight K-tile is reused across frames.
# ----------------------------------------------------------------------------
def _video_fc_mean_kernel(x_ref, w_ref, b_ref, o_ref, acc_ref, *, num_frames):
    k = pl.program_id(1)
    f = pl.program_id(2)

    @pl.when((k == 0) & (f == 0))
    def _init():
        acc_ref[...] = jnp.zeros_like(acc_ref)

    acc_ref[...] += jnp.dot(x_ref[...], w_ref[...], preferred_element_type=jnp.float32)

    @pl.when((k == pl.num_programs(1) - 1) & (f == pl.num_programs(2) - 1))
    def _done():
        o_ref[...] = (acc_ref[...] * (1.0 / num_frames) + b_ref[...]).astype(o_ref.dtype)


def _video_fc_mean(pooled_bfk, w_fc, b_fc, *, num_frames, bm, tk):
    B, FK = pooled_bfk.shape
    K = VFC_IN
    assert FK == num_frames * K and K % tk == 0
    kb = K // tk
    kernel = functools.partial(_video_fc_mean_kernel, num_frames=num_frames)

    w_spec = pl.BlockSpec((tk, HIDDEN), lambda i, k, f: (k, 0))
    if _is_v5_device():
        # v5e HBM is slowest of the three: 3-deep buffering on the (binding) weight stream.
        try:
            w_spec = pl.BlockSpec((tk, HIDDEN), lambda i, k, f: (k, 0),
                                  pipeline_mode=pl.Buffered(3))
        except Exception:
            pass

    return pl.pallas_call(
        kernel,
        out_shape=jax.ShapeDtypeStruct((B, HIDDEN), jnp.float32),
        grid_spec=pltpu.PrefetchScalarGridSpec(
            num_scalar_prefetch=0,
            grid=(B // bm, kb, num_frames),      # f innermost: weight K-tile reused across frames
            in_specs=[
                pl.BlockSpec((bm, tk), lambda i, k, f: (i, f * kb + k)),
                w_spec,
                pl.BlockSpec((1, HIDDEN), lambda i, k, f: (0, 0)),
            ],
            out_specs=pl.BlockSpec((bm, HIDDEN), lambda i, k, f: (i, 0)),
            scratch_shapes=[pltpu.VMEM((bm, HIDDEN), jnp.float32)],
        ),
        compiler_params=pltpu.CompilerParams(
            dimension_semantics=("parallel", "arbitrary", "arbitrary"),
            vmem_limit_bytes=_VMEM_BYTES,
        ),
    )(pooled_bfk, w_fc, b_fc)


# ----------------------------------------------------------------------------
# Wrapper-side layout plumbing (im2col, pool-window split, weight permutes/folds, concat).
# ----------------------------------------------------------------------------
def _im2col_pool_windows(video_ncdhw_bf16):
    """(N, C, D, H, W) -> (4, N*D*(H//2)*(W//2), Kpad) bf16; the leading 4 are the
    (1,2,2) pool-window taps; K index order is (c, kd, kh, kw) padded to a 128 multiple."""
    N, C, D, H, W = video_ncdhw_bf16.shape
    xp = jnp.pad(video_ncdhw_bf16, ((0, 0), (0, 0), (1, 1), (1, 1), (1, 1)))
    taps = []
    for kd in range(3):
        for kh in range(3):
            for kw in range(3):
                taps.append(xp[:, :, kd:kd + D, kh:kh + H, kw:kw + W])
    pat = jnp.stack(taps, axis=2)                          # (N, C, 27, D, H, W)
    pat = pat.reshape(N, C * 27, D, H // 2, 2, W // 2, 2)
    pat = pat.transpose(4, 6, 0, 2, 3, 5, 1)               # (2, 2, N, D, H/2, W/2, C*27)
    R = N * D * (H // 2) * (W // 2)
    Kc = C * 27
    Kpad = ((Kc + 127) // 128) * 128                       # lane-dense contraction dim
    pat = pat.reshape(4, R, Kc)
    return jnp.pad(pat, ((0, 0), (0, 0), (0, Kpad - Kc)))


def feature_extractor_forward(audio, video, params):
    f32 = jnp.float32

    # ---- audio path: fc1 -> (time-step-mean folded) fc2 ----
    a = audio.reshape(-1, AUDIO_DIM)
    B = a.shape[0]
    w1 = params["audio_fc_w"].T                                           # (768, 512) bf16
    b1 = params["audio_fc_b"].reshape(1, HIDDEN)                          # f32
    # Fold mean over the 10 time steps into the weights (exact; f32 math, single bf16 cast).
    w2m = (params["audio_to_time_w"].astype(f32)
           .reshape(TIME_STEPS, HIDDEN, HIDDEN)            # (t, out_c, in)
           .mean(axis=0).T                                  # (in, out_c)
           .astype(jnp.bfloat16))
    b2m = (params["audio_to_time_b"].reshape(TIME_STEPS, HIDDEN)
           .mean(axis=0).reshape(1, HIDDEN))                              # f32
    bm_a = _pick_tile(B, (256, 128, 64, 32, 16, 8), prefer_multi_step=True)
    audio_feat = _audio_forward(a.astype(jnp.bfloat16), w1, b1, w2m, b2m, bm=bm_a)

    # ---- video path ----
    Bv, F, C, D, H, W = video.shape
    assert Bv == B and (D, H, W) == (CONV_D, CONV_H, CONV_W)
    v = video.reshape(Bv * F, C, D, H, W).astype(jnp.bfloat16)
    patches4 = _im2col_pool_windows(v)                                    # (4, R, Kpad) bf16
    Kc = C * 27
    Kp = patches4.shape[-1]
    # Fold Conv bias + eval-mode BatchNorm: scale into the weight columns, shift stays.
    scale = params["bn_gamma"] * lax.rsqrt(params["bn_var"] + BN_EPS)     # f32
    shift = params["bn_beta"] + scale * (params["conv_b"] - params["bn_mean"])
    wc_scaled = (params["conv_w"].astype(f32).reshape(HIDDEN, Kc).T
                 * scale[None, :]).astype(jnp.bfloat16)                   # (Kc, 512) bf16
    wc = jnp.zeros((Kp, HIDDEN), jnp.bfloat16).at[:Kc, :].set(wc_scaled)  # (Kpad, 512)
    R = patches4.shape[1]
    br = _pick_tile(R, (1024, 512, 256, 128, 64, 32, 16), prefer_multi_step=True)
    pooled = _conv_bn_relu_pool(
        patches4, wc, shift.reshape(1, HIDDEN).astype(f32), br=br)        # (R, 512) bf16

    # Rows are (b, f, d, ph, pw) channels-last -> free contiguous reshape to (B, F*32768);
    # the (batch, frame) handling moves into kernel-3's index_map (no materialized transpose).
    pooled_bfk = pooled.reshape(Bv, F * VFC_IN)
    # Permute video_fc weight from torch (C,D,H,W)-flatten to our channels-last flatten.
    w_fc = (params["video_fc_w"]
            .reshape(HIDDEN, HIDDEN, POOL_D, POOL_H, POOL_W)
            .transpose(2, 3, 4, 1, 0)
            .reshape(VFC_IN, HIDDEN))                                     # (32768, 512) bf16
    # Single batch tile whenever it fits VMEM so the 32 MiB weight streams exactly once.
    bm_v = Bv if Bv <= 512 else _pick_tile(Bv, (512, 256, 128, 64, 32, 16, 8))
    video_feat = _video_fc_mean(pooled_bfk, w_fc,
                                params["video_fc_b"].reshape(1, HIDDEN),
                                num_frames=F, bm=bm_v, tk=_TK_VFC)

    # ---- fusion: concat([audio_mean, video_mean], dim=1) ----
    return jnp.concatenate([audio_feat, video_feat], axis=1)


# ----------------------------------------------------------------------------
# Pure-JAX reference (literal torch semantics; weights kept in the same bf16 values).
# ----------------------------------------------------------------------------
def reference_forward(audio, video, params):
    f32 = jnp.float32
    a = audio.reshape(-1, AUDIO_DIM).astype(f32)
    a1 = a @ params["audio_fc_w"].astype(f32).T + params["audio_fc_b"]
    a2 = a1 @ params["audio_to_time_w"].astype(f32).T + params["audio_to_time_b"]
    a3 = a2.reshape(-1, TIME_STEPS, HIDDEN).transpose(1, 0, 2).mean(axis=0)

    Bv, F, C, D, H, W = video.shape
    v = video.reshape(Bv * F, C, D, H, W).astype(f32)
    conv = lax.conv_general_dilated(
        v, params["conv_w"].astype(f32), window_strides=(1, 1, 1),
        padding=((1, 1), (1, 1), (1, 1)),
        dimension_numbers=("NCDHW", "OIDHW", "NCDHW"))
    conv = conv + params["conv_b"][None, :, None, None, None]
    bn = (params["bn_gamma"][None, :, None, None, None]
          * (conv - params["bn_mean"][None, :, None, None, None])
          * lax.rsqrt(params["bn_var"] + BN_EPS)[None, :, None, None, None]
          + params["bn_beta"][None, :, None, None, None])
    act = jnp.maximum(bn, 0.0)
    pool = act.reshape(Bv * F, HIDDEN, D, H // 2, 2, W // 2, 2).max(axis=(4, 6))
    flat = pool.reshape(Bv, F, -1)                                        # torch flatten order
    vfc = flat @ params["video_fc_w"].astype(f32).T + params["video_fc_b"]
    vmean = vfc.transpose(1, 0, 2).mean(axis=0)
    return jnp.concatenate([a3, vmean], axis=1)


def init_params(key, video_dim=VIDEO_DIM):
    """torch-default-style init; weights stored bf16, biases/BN stats f32."""
    ks = jax.random.split(key, 12)

    def linear(kw, kb, fan_in, fan_out):
        bound = 1.0 / (fan_in ** 0.5)
        w = jax.random.uniform(kw, (fan_out, fan_in), jnp.float32, -bound, bound)
        b = jax.random.uniform(kb, (fan_out,), jnp.float32, -bound, bound)
        return w, b

    w_afc, b_afc = linear(ks[0], ks[1], AUDIO_DIM, HIDDEN)
    w_a2t, b_a2t = linear(ks[2], ks[3], HIDDEN, HIDDEN * TIME_STEPS)
    bc = 1.0 / ((video_dim * 27) ** 0.5)
    w_conv = jax.random.uniform(ks[4], (HIDDEN, video_dim, 3, 3, 3), jnp.float32, -bc, bc)
    b_conv = jax.random.uniform(ks[5], (HIDDEN,), jnp.float32, -bc, bc)
    w_vfc, b_vfc = linear(ks[6], ks[7], VFC_IN, HIDDEN)
    gamma = jax.random.uniform(ks[8], (HIDDEN,), jnp.float32, 0.5, 1.5)
    beta = jax.random.uniform(ks[9], (HIDDEN,), jnp.float32, -0.2, 0.2)
    rmean = 0.1 * jax.random.normal(ks[10], (HIDDEN,), jnp.float32)
    rvar = jax.random.uniform(ks[11], (HIDDEN,), jnp.float32, 0.5, 1.5)
    return dict(
        audio_fc_w=w_afc.astype(jnp.bfloat16), audio_fc_b=b_afc,
        audio_to_time_w=w_a2t.astype(jnp.bfloat16), audio_to_time_b=b_a2t,
        conv_w=w_conv.astype(jnp.bfloat16), conv_b=b_conv,
        bn_gamma=gamma, bn_beta=beta, bn_mean=rmean, bn_var=rvar,
        video_fc_w=w_vfc.astype(jnp.bfloat16), video_fc_b=b_vfc,
    )


if __name__ == "__main__":
    key = jax.random.PRNGKey(0)
    ka, kv, kp = jax.random.split(key, 3)

    B, F = 2, 2
    audio = jax.random.normal(ka, (B, AUDIO_DIM), jnp.float32)
    video = jax.random.normal(kv, (B, F, VIDEO_DIM, CONV_D, CONV_H, CONV_W), jnp.float32)
    # Round inputs to bf16-representable values so the kernel and reference see identical data.
    audio = audio.astype(jnp.bfloat16).astype(jnp.float32)
    video = video.astype(jnp.bfloat16).astype(jnp.float32)
    params = init_params(kp)

    fwd = jax.jit(feature_extractor_forward)
    out = jax.block_until_ready(fwd(audio, video, params))

    ref = reference_forward(audio, video, params)
    assert out.shape == (B, 2 * HIDDEN)
    max_err = float(jnp.max(jnp.abs(out - ref)))
    assert jnp.allclose(out, ref, atol=2e-2, rtol=2e-2), max_err

    print("KERNEL_OK")
</pallas_src>

<mosaic_0001>
module attributes {stable_mosaic.version = 11 : i64} {
  func.func private @main(%arg0: i32) attributes {dimension_semantics = [#tpu.dimension_semantics<core_parallel>], iteration_bounds = array<i64: 2>, tpu.core_type = #tpu.core_type<sc_scalar_subcore>, window_params = []} {
    return
  }
}

module attributes {stable_mosaic.version = 11 : i64} {
  func.func private @main(%arg0: i32) attributes {dimension_semantics = [#tpu.dimension_semantics<core_parallel>], iteration_bounds = array<i64: 2>, tpu.core_type = #tpu.core_type<sc_scalar_subcore>, window_params = []} {
    return
  }
}

module attributes {stable_mosaic.version = 11 : i64} {
  func.func @_conv_pool_kernel(%arg0: i32, %arg1: memref<4x128x128xbf16, #tpu.memory_space<vmem>>, %arg2: memref<128x512xbf16, #tpu.memory_space<vmem>>, %arg3: memref<1x512xf32, #tpu.memory_space<vmem>>, %arg4: memref<128x512xbf16, #tpu.memory_space<vmem>>) attributes {dimension_semantics = [#tpu.dimension_semantics<parallel>], iteration_bounds = array<i64: 2>, scalar_prefetch = 0 : i64, scratch_operands = 0 : i64, tpu.core_type = #tpu.core_type<tc>, window_params = [{transform_indices = @transform_0, window_bounds = array<i64: 4, 128, 128>}, {pipeline_mode = #tpu.pipeline_mode<synchronous>, transform_indices = @transform_1, window_bounds = array<i64: 128, 512>}, {pipeline_mode = #tpu.pipeline_mode<synchronous>, transform_indices = @transform_2, window_bounds = array<i64: 1, 512>}, {transform_indices = @transform_3, window_bounds = array<i64: 128, 512>}]} {
    %c0 = arith.constant 0 : index
    %c0_0 = arith.constant 0 : index
    %0 = vector.load %arg2[%c0, %c0_0] : memref<128x512xbf16, #tpu.memory_space<vmem>>, vector<128x512xbf16>
    %c0_1 = arith.constant 0 : index
    %c0_2 = arith.constant 0 : index
    %c0_3 = arith.constant 0 : index
    %1 = vector.load %arg1[%c0_1, %c0_2, %c0_3] : memref<4x128x128xbf16, #tpu.memory_space<vmem>>, vector<1x128x128xbf16>
    %2 = vector.shape_cast %1 : vector<1x128x128xbf16> to vector<128x128xbf16>
    %cst = arith.constant dense<0.000000e+00> : vector<128x512xf32>
    %3 = tpu.matmul %2, %0, %cst {dimension_numbers = #tpu.dot_dimension_numbers<[1], [0], [0], [1], [0, 0, 1, 1], [], []>} : vector<128x128xbf16>, vector<128x512xbf16>, vector<128x512xf32> -> vector<128x512xf32>
    %c1 = arith.constant 1 : index
    %c0_4 = arith.constant 0 : index
    %c0_5 = arith.constant 0 : index
    %4 = vector.load %arg1[%c1, %c0_4, %c0_5] : memref<4x128x128xbf16, #tpu.memory_space<vmem>>, vector<1x128x128xbf16>
    %5 = vector.shape_cast %4 : vector<1x128x128xbf16> to vector<128x128xbf16>
    %cst_6 = arith.constant dense<0.000000e+00> : vector<128x512xf32>
    %6 = tpu.matmul %5, %0, %cst_6 {dimension_numbers = #tpu.dot_dimension_numbers<[1], [0], [0], [1], [0, 0, 1, 1], [], []>} : vector<128x128xbf16>, vector<128x512xbf16>, vector<128x512xf32> -> vector<128x512xf32>
    %7 = arith.maximumf %3, %6 : vector<128x512xf32>
    %c2 = arith.constant 2 : index
    %c0_7 = arith.constant 0 : index
    %c0_8 = arith.constant 0 : index
    %8 = vector.load %arg1[%c2, %c0_7, %c0_8] : memref<4x128x128xbf16, #tpu.memory_space<vmem>>, vector<1x128x128xbf16>
    %9 = vector.shape_cast %8 : vector<1x128x128xbf16> to vector<128x128xbf16>
    %cst_9 = arith.constant dense<0.000000e+00> : vector<128x512xf32>
    %10 = tpu.matmul %9, %0, %cst_9 {dimension_numbers = #tpu.dot_dimension_numbers<[1], [0], [0], [1], [0, 0, 1, 1], [], []>} : vector<128x128xbf16>, vector<128x512xbf16>, vector<128x512xf32> -> vector<128x512xf32>
    %11 = arith.maximumf %7, %10 : vector<128x512xf32>
    %c3 = arith.constant 3 : index
    %c0_10 = arith.constant 0 : index
    %c0_11 = arith.constant 0 : index
    %12 = vector.load %arg1[%c3, %c0_10, %c0_11] : memref<4x128x128xbf16, #tpu.memory_space<vmem>>, vector<1x128x128xbf16>
    %13 = vector.shape_cast %12 : vector<1x128x128xbf16> to vector<128x128xbf16>
    %cst_12 = arith.constant dense<0.000000e+00> : vector<128x512xf32>
    %14 = tpu.matmul %13, %0, %cst_12 {dimension_numbers = #tpu.dot_dimension_numbers<[1], [0], [0], [1], [0, 0, 1, 1], [], []>} : vector<128x128xbf16>, vector<128x512xbf16>, vector<128x512xf32> -> vector<128x512xf32>
    %15 = arith.maximumf %11, %14 : vector<128x512xf32>
    %c0_13 = arith.constant 0 : index
    %c0_14 = arith.constant 0 : index
    %16 = vector.load %arg3[%c0_13, %c0_14] : memref<1x512xf32, #tpu.memory_space<vmem>>, vector<1x512xf32>
    %17 = vector.broadcast %16 : vector<1x512xf32> to vector<128x512xf32>
    %18 = arith.addf %15, %17 : vector<128x512xf32>
    %cst_15 = arith.constant 0.000000e+00 : f32
    %19 = vector.broadcast %cst_15 : f32 to vector<128x512xf32>
    %20 = arith.maximumf %18, %19 : vector<128x512xf32>
    %21 = arith.truncf %20 : vector<128x512xf32> to vector<128x512xbf16>
    %c0_16 = arith.constant 0 : index
    %c0_17 = arith.constant 0 : index
    %22 = vector.load %arg4[%c0_16, %c0_17] : memref<128x512xbf16, #tpu.memory_space<vmem>>, vector<128x512xbf16>
    tpu.vector_store %arg4[%c0_16, %c0_17], %21 {strides = array<i32>} : memref<128x512xbf16, #tpu.memory_space<vmem>>, vector<128x512xbf16>,
    return
  }
  func.func @transform_0(%arg0: i32) -> (i32, i32, i32) {
    %c0_i32 = arith.constant 0 : i32
    %c0_i32_0 = arith.constant 0 : i32
    %c0_i32_1 = arith.constant 0 : i32
    return %c0_i32, %arg0, %c0_i32_0 : i32, i32, i32
  }
  func.func @transform_1(%arg0: i32) -> (i32, i32) {
    %c0_i32 = arith.constant 0 : i32
    %c0_i32_0 = arith.constant 0 : i32
    %c0_i32_1 = arith.constant 0 : i32
    return %c0_i32, %c0_i32_0 : i32, i32
  }
  func.func @transform_2(%arg0: i32) -> (i32, i32) {
    %c0_i32 = arith.constant 0 : i32
    %c0_i32_0 = arith.constant 0 : i32
    %c0_i32_1 = arith.constant 0 : i32
    return %c0_i32, %c0_i32_0 : i32, i32
  }
  func.func @transform_3(%arg0: i32) -> (i32, i32) {
    %c0_i32 = arith.constant 0 : i32
    %c0_i32_0 = arith.constant 0 : i32
    return %arg0, %c0_i32 : i32, i32
  }
}

module attributes {stable_mosaic.version = 11 : i64} {
  func.func @_audio_kernel(%arg0: i32, %arg1: memref<2x768xbf16, #tpu.memory_space<vmem>>, %arg2: memref<768x512xbf16, #tpu.memory_space<vmem>>, %arg3: memref<1x512xf32, #tpu.memory_space<vmem>>, %arg4: memref<512x512xbf16, #tpu.memory_space<vmem>>, %arg5: memref<1x512xf32, #tpu.memory_space<vmem>>, %arg6: memref<2x512xf32, #tpu.memory_space<vmem>>) attributes {dimension_semantics = [#tpu.dimension_semantics<parallel>], iteration_bounds = array<i64: 1>, scalar_prefetch = 0 : i64, scratch_operands = 0 : i64, tpu.core_type = #tpu.core_type<tc>, window_params = [{transform_indices = @transform_0, window_bounds = array<i64: 2, 768>}, {pipeline_mode = #tpu.pipeline_mode<synchronous>, transform_indices = @transform_1, window_bounds = array<i64: 768, 512>}, {pipeline_mode = #tpu.pipeline_mode<synchronous>, transform_indices = @transform_2, window_bounds = array<i64: 1, 512>}, {pipeline_mode = #tpu.pipeline_mode<synchronous>, transform_indices = @transform_3, window_bounds = array<i64: 512, 512>}, {pipeline_mode = #tpu.pipeline_mode<synchronous>, transform_indices = @transform_4, window_bounds = array<i64: 1, 512>}, {transform_indices = @transform_5, window_bounds = array<i64: 2, 512>}]} {
    %c0 = arith.constant 0 : index
    %c0_0 = arith.constant 0 : index
    %0 = vector.load %arg1[%c0, %c0_0] : memref<2x768xbf16, #tpu.memory_space<vmem>>, vector<2x768xbf16>
    %c0_1 = arith.constant 0 : index
    %c0_2 = arith.constant 0 : index
    %1 = vector.load %arg2[%c0_1, %c0_2] : memref<768x512xbf16, #tpu.memory_space<vmem>>, vector<768x512xbf16>
    %cst = arith.constant dense<0.000000e+00> : vector<2x512xf32>
    %2 = tpu.matmul %0, %1, %cst {dimension_numbers = #tpu.dot_dimension_numbers<[1], [0], [0], [1], [0, 0, 1, 1], [], []>} : vector<2x768xbf16>, vector<768x512xbf16>, vector<2x512xf32> -> vector<2x512xf32>
    %c0_3 = arith.constant 0 : index
    %c0_4 = arith.constant 0 : index
    %3 = vector.load %arg3[%c0_3, %c0_4] : memref<1x512xf32, #tpu.memory_space<vmem>>, vector<1x512xf32>
    %4 = vector.broadcast %3 : vector<1x512xf32> to vector<2x512xf32>
    %5 = arith.addf %2, %4 : vector<2x512xf32>
    %6 = arith.truncf %5 : vector<2x512xf32> to vector<2x512xbf16>
    %c0_5 = arith.constant 0 : index
    %c0_6 = arith.constant 0 : index
    %7 = vector.load %arg4[%c0_5, %c0_6] : memref<512x512xbf16, #tpu.memory_space<vmem>>, vector<512x512xbf16>
    %cst_7 = arith.constant dense<0.000000e+00> : vector<2x512xf32>
    %8 = tpu.matmul %6, %7, %cst_7 {dimension_numbers = #tpu.dot_dimension_numbers<[1], [0], [0], [1], [0, 0, 1, 1], [], []>} : vector<2x512xbf16>, vector<512x512xbf16>, vector<2x512xf32> -> vector<2x512xf32>
    %c0_8 = arith.constant 0 : index
    %c0_9 = arith.constant 0 : index
    %9 = vector.load %arg5[%c0_8, %c0_9] : memref<1x512xf32, #tpu.memory_space<vmem>>, vector<1x512xf32>
    %10 = vector.broadcast %9 : vector<1x512xf32> to vector<2x512xf32>
    %11 = arith.addf %8, %10 : vector<2x512xf32>
    %c0_10 = arith.constant 0 : index
    %c0_11 = arith.constant 0 : index
    %12 = vector.load %arg6[%c0_10, %c0_11] : memref<2x512xf32, #tpu.memory_space<vmem>>, vector<2x512xf32>
    tpu.vector_store %arg6[%c0_10, %c0_11], %11 {strides = array<i32>} : memref<2x512xf32, #tpu.memory_space<vmem>>, vector<2x512xf32>,
    return
  }
  func.func @transform_0(%arg0: i32) -> (i32, i32) {
    %c0_i32 = arith.constant 0 : i32
    %c0_i32_0 = arith.constant 0 : i32
    return %arg0, %c0_i32 : i32, i32
  }
  func.func @transform_1(%arg0: i32) -> (i32, i32) {
    %c0_i32 = arith.constant 0 : i32
    %c0_i32_0 = arith.constant 0 : i32
    %c0_i32_1 = arith.constant 0 : i32
    return %c0_i32, %c0_i32_0 : i32, i32
  }
  func.func @transform_2(%arg0: i32) -> (i32, i32) {
    %c0_i32 = arith.constant 0 : i32
    %c0_i32_0 = arith.constant 0 : i32
    %c0_i32_1 = arith.constant 0 : i32
    return %c0_i32, %c0_i32_0 : i32, i32
  }
  func.func @transform_3(%arg0: i32) -> (i32, i32) {
    %c0_i32 = arith.constant 0 : i32
    %c0_i32_0 = arith.constant 0 : i32
    %c0_i32_1 = arith.constant 0 : i32
    return %c0_i32, %c0_i32_0 : i32, i32
  }
  func.func @transform_4(%arg0: i32) -> (i32, i32) {
    %c0_i32 = arith.constant 0 : i32
    %c0_i32_0 = arith.constant 0 : i32
    %c0_i32_1 = arith.constant 0 : i32
    return %c0_i32, %c0_i32_0 : i32, i32
  }
  func.func @transform_5(%arg0: i32) -> (i32, i32) {
    %c0_i32 = arith.constant 0 : i32
    %c0_i32_0 = arith.constant 0 : i32
    return %arg0, %c0_i32 : i32, i32
  }
}

module attributes {stable_mosaic.version = 11 : i64} {
  func.func @_video_fc_mean_kernel(%arg0: i32, %arg1: i32, %arg2: i32, %arg3: memref<2x4096xbf16, #tpu.memory_space<vmem>>, %arg4: memref<4096x512xbf16, #tpu.memory_space<vmem>>, %arg5: memref<1x512xf32, #tpu.memory_space<vmem>>, %arg6: memref<2x512xf32, #tpu.memory_space<vmem>>, %arg7: memref<2x512xf32, #tpu.memory_space<vmem>>) attributes {dimension_semantics = [#tpu.dimension_semantics<parallel>, #tpu.dimension_semantics<arbitrary>, #tpu.dimension_semantics<arbitrary>], iteration_bounds = array<i64: 1, 8, 2>, scalar_prefetch = 0 : i64, scratch_operands = 1 : i64, tpu.core_type = #tpu.core_type<tc>, window_params = [{transform_indices = @transform_0, window_bounds = array<i64: 2, 4096>}, {transform_indices = @transform_1, window_bounds = array<i64: 4096, 512>}, {pipeline_mode = #tpu.pipeline_mode<synchronous>, transform_indices = @transform_2, window_bounds = array<i64: 1, 512>}, {transform_indices = @transform_3, window_bounds = array<i64: 2, 512>}]} {
    %c0_i32 = arith.constant 0 : i32
    %0 = arith.cmpi eq, %arg1, %c0_i32 : i32
    %c0_i32_0 = arith.constant 0 : i32
    %1 = arith.cmpi eq, %arg2, %c0_i32_0 : i32
    %2 = arith.andi %0, %1 : i1
    %3 = arith.extui %2 : i1 to i32
    %c0_i32_1 = arith.constant 0 : i32
    %4 = arith.cmpi ne, %3, %c0_i32_1 : i32
    scf.if %4 {
      %cst_10 = arith.constant 0.000000e+00 : f32
      %16 = vector.broadcast %cst_10 : f32 to vector<2x512xf32>
      %c0_11 = arith.constant 0 : index
      %c0_12 = arith.constant 0 : index
      %17 = vector.load %arg7[%c0_11, %c0_12] : memref<2x512xf32, #tpu.memory_space<vmem>>, vector<2x512xf32>
      tpu.vector_store %arg7[%c0_11, %c0_12], %16 {strides = array<i32>} : memref<2x512xf32, #tpu.memory_space<vmem>>, vector<2x512xf32>,
    } else {
    }
    %c0 = arith.constant 0 : index
    %c0_2 = arith.constant 0 : index
    %5 = vector.load %arg7[%c0, %c0_2] : memref<2x512xf32, #tpu.memory_space<vmem>>, vector<2x512xf32>
    %c0_3 = arith.constant 0 : index
    %c0_4 = arith.constant 0 : index
    %6 = vector.load %arg3[%c0_3, %c0_4] : memref<2x4096xbf16, #tpu.memory_space<vmem>>, vector<2x4096xbf16>
    %c0_5 = arith.constant 0 : index
    %c0_6 = arith.constant 0 : index
    %7 = vector.load %arg4[%c0_5, %c0_6] : memref<4096x512xbf16, #tpu.memory_space<vmem>>, vector<4096x512xbf16>
    %cst = arith.constant dense<0.000000e+00> : vector<2x512xf32>
    %8 = tpu.matmul %6, %7, %cst {dimension_numbers = #tpu.dot_dimension_numbers<[1], [0], [0], [1], [0, 0, 1, 1], [], []>} : vector<2x4096xbf16>, vector<4096x512xbf16>, vector<2x512xf32> -> vector<2x512xf32>
    %9 = arith.addf %5, %8 : vector<2x512xf32>
    %c0_7 = arith.constant 0 : index
    %c0_8 = arith.constant 0 : index
    %10 = vector.load %arg7[%c0_7, %c0_8] : memref<2x512xf32, #tpu.memory_space<vmem>>, vector<2x512xf32>
    tpu.vector_store %arg7[%c0_7, %c0_8], %9 {strides = array<i32>} : memref<2x512xf32, #tpu.memory_space<vmem>>, vector<2x512xf32>,
    %c7_i32 = arith.constant 7 : i32
    %11 = arith.cmpi eq, %arg1, %c7_i32 : i32
    %c1_i32 = arith.constant 1 : i32
    %12 = arith.cmpi eq, %arg2, %c1_i32 : i32
    %13 = arith.andi %11, %12 : i1
    %14 = arith.extui %13 : i1 to i32
    %c0_i32_9 = arith.constant 0 : i32
    %15 = arith.cmpi ne, %14, %c0_i32_9 : i32
    scf.if %15 {
      %c0_10 = arith.constant 0 : index
      %c0_11 = arith.constant 0 : index
      %16 = vector.load %arg7[%c0_10, %c0_11] : memref<2x512xf32, #tpu.memory_space<vmem>>, vector<2x512xf32>
      %cst_12 = arith.constant 5.000000e-01 : f32
      %17 = vector.broadcast %cst_12 : f32 to vector<2x512xf32>
      %18 = arith.mulf %16, %17 : vector<2x512xf32>
      %c0_13 = arith.constant 0 : index
      %c0_14 = arith.constant 0 : index
      %19 = vector.load %arg5[%c0_13, %c0_14] : memref<1x512xf32, #tpu.memory_space<vmem>>, vector<1x512xf32>
      %20 = vector.broadcast %19 : vector<1x512xf32> to vector<2x512xf32>
      %21 = arith.addf %18, %20 : vector<2x512xf32>
      %c0_15 = arith.constant 0 : index
      %c0_16 = arith.constant 0 : index
      %22 = vector.load %arg6[%c0_15, %c0_16] : memref<2x512xf32, #tpu.memory_space<vmem>>, vector<2x512xf32>
      tpu.vector_store %arg6[%c0_15, %c0_16], %21 {strides = array<i32>} : memref<2x512xf32, #tpu.memory_space<vmem>>, vector<2x512xf32>,
    } else {
    }
    return
  }
  func.func @transform_0(%arg0: i32, %arg1: i32, %arg2: i32) -> (i32, i32) {
    %c8_i32 = arith.constant 8 : i32
    %0 = arith.muli %arg2, %c8_i32 : i32
    %1 = arith.addi %0, %arg1 : i32
    %c0_i32 = arith.constant 0 : i32
    return %arg0, %1 : i32, i32
  }
  func.func @transform_1(%arg0: i32, %arg1: i32, %arg2: i32) -> (i32, i32) {
    %c0_i32 = arith.constant 0 : i32
    %c0_i32_0 = arith.constant 0 : i32
    return %arg1, %c0_i32 : i32, i32
  }
  func.func @transform_2(%arg0: i32, %arg1: i32, %arg2: i32) -> (i32, i32) {
    %c0_i32 = arith.constant 0 : i32
    %c0_i32_0 = arith.constant 0 : i32
    %c0_i32_1 = arith.constant 0 : i32
    return %c0_i32, %c0_i32_0 : i32, i32
  }
  func.func @transform_3(%arg0: i32, %arg1: i32, %arg2: i32) -> (i32, i32) {
    %c0_i32 = arith.constant 0 : i32
    %c0_i32_0 = arith.constant 0 : i32
    return %arg0, %c0_i32 : i32, i32
  }
}

</mosaic_0001>

<bundles_post_ra>
// kernel: feature_extractor_forward.4
= control target key start
LH: loop header
LB: loop body
LE: loop exit
PB: predicated region body
PF: predicated region fallthrough
CT: control target
= control target key end

     0   :  { %s2797_s12 = smov 0   ;;  %s2799_s13 = smov 0   ;;  %s4183_s0 = inlined_call_operand.vmem [shape: bf16[4,256,128], index: 0, kind: input, shape index: {}]   ;;  %s4184_s1 = inlined_call_operand.vmem [shape: bf16[128,512], index: 1, kind: input, shape index: {}]   ;;  %s4185_s2 = inlined_call_operand.vmem [shape: f32[1,512], index: 2, kind: input, shape index: {}]   ;;  %s4186_s3 = inlined_call_operand.vmem [shape: bf16[256,512], index: 3, kind: output, shape index: {}]  }
   0x1   :  { %s2801_s14 = smov 0  }
   0x2 LB: > { %s2455_s15 = sadd.s32 4294967295, %s2774_s14   ;;  %s2814_s16 = sadd.s32 1, %s2774_s14   ;;  %s2774_s14 = sphi %s2801_s14, %s4541_s14   ;;  %s2770_s13 = sphi %s2799_s13, %s4540_s13   ;;  %s2766_s12 = sphi %s2797_s12, %s4539_s12  }
   0x3   : > { %s17_s17 = ssub.s32 %s2774_s14, %s2814_s16  ;;  %s20_s18 = sadd.s32 1, %s2770_s13 }
   0x4   : > { %p18_p0 = scmp.eq.s32.totalorder %s17_s17, 0  ;;  %p27_p1 = scmp.ne.s32.totalorder %s2770_s13, %s2766_s12 }
   0x5   : > { %p28_p2 = scmp.eq.s32.totalorder %s2774_s14, 0  ;;  %p2458_p4 = scmp.ge.s32.totalorder %s2774_s14, 2 }
   0x6   : > { %s2823_s19 = scalar_select %p18_p0, %s2770_s13, %s20_s18  }
   0x7   : > { %p29_p3 = por %p28_p2, %p27_p1  ;;  %127 = sbr.rel (%p2458_p4) target bundleno = 34 (0x22), region = 24 }
   0xe   : > { %130 = sbr.rel (!%p29_p3) target bundleno = 34 (0x22), region = 28  ;;  %s132_s20 = sand.u32 (%p29_p3), 1, %s2770_s13  }
   0xf   : > { %s2613_s21 = sshll.u32 (%p29_p3), %s2774_s14, 6  ;;  %s2459_s22 = sshll.u32 (%p29_p3), %s132_s20, 8 }
  0x10   : > { %s2831_s25 = scalar_lea.vmem (%p29_p3), %s4183_s0, %s2613_s21  ;;  %s2836_s26 = scalar_lea.vmem (%p29_p3), [#allocation2], %s2459_s22 }
  0x11   : > { %v153_v0 = vld [vmem:[%s2831_s25] sm:$0xff] (%p29_p3)   ;;  %v157_v1 = vld [vmem:[%s2831_s25 + $0x8] sm:$0xff] (%p29_p3)   ;;  %v161_v2 = vld [vmem:[%s2831_s25 + $0x10] sm:$0xff] (%p29_p3)  }
  0x12   : > { %154 = vst [vmem:[%s2836_s26] sm:$0xff] (%p29_p3), %v153_v0   ;;  %158 = vst [vmem:[%s2836_s26 + $0x8] sm:$0xff] (%p29_p3), %v157_v1   ;;  %v165_v3 = vld [vmem:[%s2831_s25 + $0x18] sm:$0xff] (%p29_p3)   ;;  %v169_v4 = vld [vmem:[%s2831_s25 + $0x20] sm:$0xff] (%p29_p3)  }
  0x13   : > { %162 = vst [vmem:[%s2836_s26 + $0x10] sm:$0xff] (%p29_p3), %v161_v2   ;;  %v173_v5 = vld [vmem:[%s2831_s25 + $0x28] sm:$0xff] (%p29_p3)   ;;  %166 = vst [vmem:[%s2836_s26 + $0x18] sm:$0xff] (%p29_p3), %v165_v3   ;;  %v177_v6 = vld [vmem:[%s2831_s25 + $0x30] sm:$0xff] (%p29_p3)  }
  0x14   : > { %170 = vst [vmem:[%s2836_s26 + $0x20] sm:$0xff] (%p29_p3), %v169_v4   ;;  %174 = vst [vmem:[%s2836_s26 + $0x28] sm:$0xff] (%p29_p3), %v173_v5   ;;  %v181_v7 = vld [vmem:[%s2831_s25 + $0x38] sm:$0xff] (%p29_p3)   ;;  %v185_v8 = vld [vmem:[%s2831_s25 + $0x80] sm:$0xff] (%p29_p3)  }
  0x15   : > { %178 = vst [vmem:[%s2836_s26 + $0x30] sm:$0xff] %v177_v6   ;;  %182 = vst [vmem:[%s2836_s26 + $0x38] sm:$0xff] %v181_v7   ;;  %v189_v9 = vld [vmem:[%s2831_s25 + $0x88] sm:$0xff]   ;;  %v193_v10 = vld [vmem:[%s2831_s25 + $0x90] sm:$0xff]  }
  0x16   : > { %186 = vst [vmem:[%s2836_s26 + $0x40] sm:$0xff] %v185_v8   ;;  %v197_v11 = vld [vmem:[%s2831_s25 + $0x98] sm:$0xff]   ;;  %190 = vst [vmem:[%s2836_s26 + $0x48] sm:$0xff] %v189_v9   ;;  %v201_v12 = vld [vmem:[%s2831_s25 + $0xa0] sm:$0xff]  }
  0x17   : > { %194 = vst [vmem:[%s2836_s26 + $0x50] sm:$0xff] %v193_v10   ;;  %198 = vst [vmem:[%s2836_s26 + $0x58] sm:$0xff] %v197_v11   ;;  %v205_v13 = vld [vmem:[%s2831_s25 + $0xa8] sm:$0xff]   ;;  %v209_v14 = vld [vmem:[%s2831_s25 + $0xb0] sm:$0xff]  }
  0x18   : > { %202 = vst [vmem:[%s2836_s26 + $0x60] sm:$0xff] %v201_v12   ;;  %206 = vst [vmem:[%s2836_s26 + $0x68] sm:$0xff] %v205_v13   ;;  %v213_v15 = vld [vmem:[%s2831_s25 + $0xb8] sm:$0xff]   ;;  %v217_v16 = vld [vmem:[%s2831_s25 + $0x100] sm:$0xff]  }
  0x19   : > { %210 = vst [vmem:[%s2836_s26 + $0x70] sm:$0xff] %v209_v14   ;;  %v221_v17 = vld [vmem:[%s2831_s25 + $0x108] sm:$0xff]   ;;  %214 = vst [vmem:[%s2836_s26 + $0x78] sm:$0xff] %v213_v15   ;;  %v225_v18 = vld [vmem:[%s2831_s25 + $0x110] sm:$0xff]  }
  0x1a   : > { %218 = vst [vmem:[%s2836_s26 + $0x80] sm:$0xff] %v217_v16   ;;  %222 = vst [vmem:[%s2836_s26 + $0x88] sm:$0xff] %v221_v17   ;;  %v229_v19 = vld [vmem:[%s2831_s25 + $0x118] sm:$0xff]   ;;  %v233_v20 = vld [vmem:[%s2831_s25 + $0x120] sm:$0xff]  }
  0x1b   : > { %226 = vst [vmem:[%s2836_s26 + $0x90] sm:$0xff] %v225_v18   ;;  %230 = vst [vmem:[%s2836_s26 + $0x98] sm:$0xff] %v229_v19   ;;  %v237_v21 = vld [vmem:[%s2831_s25 + $0x128] sm:$0xff]   ;;  %v241_v22 = vld [vmem:[%s2831_s25 + $0x130] sm:$0xff]  }
  0x1c   : > { %234 = vst [vmem:[%s2836_s26 + $0xa0] sm:$0xff] %v233_v20   ;;  %v245_v23 = vld [vmem:[%s2831_s25 + $0x138] sm:$0xff]   ;;  %238 = vst [vmem:[%s2836_s26 + $0xa8] sm:$0xff] %v237_v21   ;;  %v249_v24 = vld [vmem:[%s2831_s25 + $0x180] sm:$0xff]  }
  0x1d   : > { %242 = vst [vmem:[%s2836_s26 + $0xb0] sm:$0xff] %v241_v22   ;;  %246 = vst [vmem:[%s2836_s26 + $0xb8] sm:$0xff] %v245_v23   ;;  %v253_v25 = vld [vmem:[%s2831_s25 + $0x188] sm:$0xff]   ;;  %v257_v26 = vld [vmem:[%s2831_s25 + $0x190] sm:$0xff]  }
  0x1e   : > { %250 = vst [vmem:[%s2836_s26 + $0xc0] sm:$0xff] %v249_v24   ;;  %254 = vst [vmem:[%s2836_s26 + $0xc8] sm:$0xff] %v253_v25   ;;  %v261_v27 = vld [vmem:[%s2831_s25 + $0x198] sm:$0xff]   ;;  %v265_v28 = vld [vmem:[%s2831_s25 + $0x1a0] sm:$0xff]  }
  0x1f   : > { %258 = vst [vmem:[%s2836_s26 + $0xd0] sm:$0xff] %v257_v26   ;;  %v269_v29 = vld [vmem:[%s2831_s25 + $0x1a8] sm:$0xff]   ;;  %262 = vst [vmem:[%s2836_s26 + $0xd8] sm:$0xff] %v261_v27   ;;  %v273_v30 = vld [vmem:[%s2831_s25 + $0x1b0] sm:$0xff]  }
  0x20   : > { %266 = vst [vmem:[%s2836_s26 + $0xe0] sm:$0xff] %v265_v28   ;;  %270 = vst [vmem:[%s2836_s26 + $0xe8] sm:$0xff] %v269_v29   ;;  %v277_v31 = vld [vmem:[%s2831_s25 + $0x1b8] sm:$0xff]  }
  0x21   : > { %274 = vst [vmem:[%s2836_s26 + $0xf0] sm:$0xff] %v273_v30   ;;  %278 = vst [vmem:[%s2836_s26 + $0xf8] sm:$0xff] %v277_v31  }
  0x22 PF: > { %p2462_p5 = scmp.ge.s32.totalorder %s2774_s14, 1  ;;  %p430_p6 = scmp.lt.s32.totalorder %s2774_s14, 3 }
  0x24   : > { %p431_p7 = pnand %p2462_p5, %p430_p6 }
  0x26   : > { %434 = sbr.rel (%p431_p7) target bundleno = 552 (0x228), region = 69 }
  0x2d   : > { %v2904_v32 = vld [vmem:[%s4184_s1 + $0x4] ss:$16 sps:$4 sm:$0xff]   ;;  %v2909_v33 = vld [vmem:[%s4184_s1 + $0xc] ss:$16 sps:$4 sm:$0xff]   ;;  %v2776_v34 = vmov 0   ;;  %s437_s21 = sand.u32 1, %s2766_s12  }
  0x2e   : > { %758 = vmatprep.mubr.bf16.mxu0 %v2776_v34  ;;  %871 = vmatprep.mubr.bf16.mxu1 %v2776_v34  ;;  %v2917_v35 = vld [vmem:[%s4184_s1] ss:$16 sps:$4 sm:$0xff]   ;;  %v2922_v36 = vld [vmem:[%s4184_s1 + $0x8] ss:$16 sps:$4 sm:$0xff]   ;;  %v2928_v37 = vld [vmem:[%s4184_s1 + $0x24] ss:$16 sps:$4 sm:$0xff]  }
  0x2f   : > { %726 = vmatprep.subr.bf16.mxu0 %v2904_v32  ;;  %839 = vmatprep.subr.bf16.mxu1 %v2909_v33  ;;  %v2935_v38 = vld [vmem:[%s4184_s1 + $0x2c] ss:$16 sps:$4 sm:$0xff]   ;;  %v2940_v39 = vld [vmem:[%s4184_s1 + $0x20] ss:$16 sps:$4 sm:$0xff]   ;;  %v2946_v40 = vld [vmem:[%s4184_s1 + $0x28] ss:$16 sps:$4 sm:$0xff]  }
  0x30   : > { %727 = vmatpush1.bf16.msra.mxu0 %v2917_v35  ;;  %840 = vmatpush1.bf16.msra.mxu1 %v2922_v36  ;;  %v2952_v41 = vld [vmem:[%s4184_s1 + $0x44] ss:$16 sps:$4 sm:$0xff]   ;;  %v2957_v42 = vld [vmem:[%s4184_s1 + $0x4c] ss:$16 sps:$4 sm:$0xff]   ;;  %v2962_v43 = vld [vmem:[%s4184_s1 + $0x40] ss:$16 sps:$4 sm:$0xff]  }
  0x31   : > { %728 = vmatprep.subr.bf16.mxu0 %v2928_v37  ;;  %841 = vmatprep.subr.bf16.mxu1 %v2935_v38  ;;  %v2967_v44 = vld [vmem:[%s4184_s1 + $0x48] ss:$16 sps:$4 sm:$0xff]   ;;  %v2974_v45 = vld [vmem:[%s4184_s1 + $0x64] ss:$16 sps:$4 sm:$0xff]   ;;  %v2981_v46 = vld [vmem:[%s4184_s1 + $0x6c] ss:$16 sps:$4 sm:$0xff]  }
  0x32   : > { %v2986_v47 = vld [vmem:[%s4184_s1 + $0x60] ss:$16 sps:$4 sm:$0xff]   ;;  %v2993_v48 = vld [vmem:[%s4184_s1 + $0x68] ss:$16 sps:$4 sm:$0xff]   ;;  %v2998_v49 = vld [vmem:[%s4184_s1 + $0x84] ss:$16 sps:$4 sm:$0xff]  }
  0x33   : > { %v3005_v50 = vld [vmem:[%s4184_s1 + $0x8c] ss:$16 sps:$4 sm:$0xff]   ;;  %v3011_v51 = vld [vmem:[%s4184_s1 + $0x80] ss:$16 sps:$4 sm:$0xff]   ;;  %v3016_v52 = vld [vmem:[%s4184_s1 + $0x88] ss:$16 sps:$4 sm:$0xff]  }
  0x34   : > { %729 = vmatpush1.bf16.msra.mxu0 %v2940_v39  ;;  %842 = vmatpush1.bf16.msra.mxu1 %v2946_v40  ;;  %v3023_v53 = vld [vmem:[%s4184_s1 + $0xa4] ss:$16 sps:$4 sm:$0xff]   ;;  %v3030_v54 = vld [vmem:[%s4184_s1 + $0xac] ss:$16 sps:$4 sm:$0xff]   ;;  %s2463_s29 = sshll.u32 %s437_s21, 8 }
  0x35   : > { %730 = vmatprep.subr.bf16.mxu0 %v2952_v41  ;;  %843 = vmatprep.subr.bf16.mxu1 %v2957_v42  ;;  %v3035_v55 = vld [vmem:[%s4184_s1 + $0xa0] ss:$16 sps:$4 sm:$0xff]   ;;  %v3042_v56 = vld [vmem:[%s4184_s1 + $0xa8] ss:$16 sps:$4 sm:$0xff]   ;;  %v3047_v57 = vld [vmem:[%s4184_s1 + $0xc4] ss:$16 sps:$4 sm:$0xff]  }
  0x36   : > { %v3054_v58 = vld [vmem:[%s4184_s1 + $0xcc] ss:$16 sps:$4 sm:$0xff]   ;;  %s3056_s11 = scalar_lea.vmem [#allocation2], %s2463_s29  ;;  %v3061_v59 = vld [vmem:[%s4184_s1 + $0xc0] ss:$16 sps:$4 sm:$0xff]   ;;  %s2464_s29 = sshll.u32 %s2455_s15, 4 }
  0x37   : > { %v3066_v60 = vld [vmem:[%s4184_s1 + $0xc8] ss:$16 sps:$4 sm:$0xff]   ;;  %v3073_v61 = vld [vmem:[%s4184_s1 + $0xe4] ss:$16 sps:$4 sm:$0xff]   ;;  %v3080_v62 = vld [vmem:[%s4184_s1 + $0xec] ss:$16 sps:$4 sm:$0xff]  }
  0x38   : > { %731 = vmatpush1.bf16.msra.mxu0 %v2962_v43  ;;  %844 = vmatpush1.bf16.msra.mxu1 %v2967_v44  ;;  %v3085_v63 = vld [vmem:[%s4184_s1 + $0xe0] ss:$16 sps:$4 sm:$0xff]   ;;  %v3092_v0 = vld [vmem:[%s4184_s1 + $0xe8] ss:$16 sps:$4 sm:$0xff]   ;;  %p463_p8 = scmp.lt.s32.totalorder %s2464_s29, 31 }
  0x39   : > { %732 = vmatprep.subr.bf16.mxu0 %v2974_v45  ;;  %845 = vmatprep.subr.bf16.mxu1 %v2981_v46  ;;  %v2720_v1 = vld [vmem:[%s3056_s11] sm:$0xff]   ;;  %v2721_v2 = vld [vmem:[%s3056_s11 + $0x8] sm:$0xff]   ;;  %v2722_v3 = vld [vmem:[%s3056_s11 + $0x10] sm:$0xff]  }
  0x3a   : > { %v2723_v4 = vld [vmem:[%s3056_s11 + $0x18] sm:$0xff]   ;;  %v2724_v5 = vld [vmem:[%s3056_s11 + $0x20] sm:$0xff]   ;;  %v2725_v6 = vld [vmem:[%s3056_s11 + $0x28] sm:$0xff]   ;;  %s4543_s29 = smov (!%p463_p8, %s2464_s29), 31 }
  0x3b   : > { %v2726_v7 = vld [vmem:[%s3056_s11 + $0x30] sm:$0xff]   ;;  %v2727_v8 = vld [vmem:[%s3056_s11 + $0x38] sm:$0xff]   ;;  %v2728_v9 = vld [vmem:[%s3056_s11 + $0x40] sm:$0xff]   ;;  %s2614_s30 = sshll.u32 %s4543_s29, 4 }
  0x3c   : > { %733 = vmatpush1.bf16.msra.mxu0 %v2986_v47  ;;  %846 = vmatpush1.bf16.msra.mxu1 %v2993_v48  ;;  %v2729_v10 = vld [vmem:[%s3056_s11 + $0x48] sm:$0xff]   ;;  %v2730_v11 = vld [vmem:[%s3056_s11 + $0x50] sm:$0xff]   ;;  %v2731_v12 = vld [vmem:[%s3056_s11 + $0x58] sm:$0xff]   ;;  %s4027_s6 = scalar_lea.vmem %s4186_s3, %s2614_s30 }
  0x3d   : > { %734 = vmatprep.subr.bf16.mxu0 %v2998_v49  ;;  %847 = vmatprep.subr.bf16.mxu1 %v3005_v50  ;;  %v2732_v13 = vld [vmem:[%s3056_s11 + $0x60] sm:$0xff]   ;;  %v2733_v14 = vld [vmem:[%s3056_s11 + $0x68] sm:$0xff]   ;;  %v2734_v15 = vld [vmem:[%s3056_s11 + $0x70] sm:$0xff]  }
  0x3e   : > { %v2735_v16 = vld [vmem:[%s3056_s11 + $0x78] sm:$0xff]   ;;  %v2736_v17 = vld [vmem:[%s3056_s11 + $0x80] sm:$0xff]   ;;  %v2737_v18 = vld [vmem:[%s3056_s11 + $0x88] sm:$0xff]  }
  0x3f   : > { %v2738_v19 = vld [vmem:[%s3056_s11 + $0x90] sm:$0xff]   ;;  %v2739_v20 = vld [vmem:[%s3056_s11 + $0x98] sm:$0xff]   ;;  %v2740_v21 = vld [vmem:[%s3056_s11 + $0xa0] sm:$0xff]  }
  0x40   : > { %735 = vmatpush1.bf16.msra.mxu0 %v3011_v51  ;;  %848 = vmatpush1.bf16.msra.mxu1 %v3016_v52  ;;  %v2741_v22 = vld [vmem:[%s3056_s11 + $0xa8] sm:$0xff]   ;;  %v2742_v23 = vld [vmem:[%s3056_s11 + $0xb0] sm:$0xff]   ;;  %v2743_v24 = vld [vmem:[%s3056_s11 + $0xb8] sm:$0xff]  }
  0x41   : > { %736 = vmatprep.subr.bf16.mxu0 %v3023_v53  ;;  %849 = vmatprep.subr.bf16.mxu1 %v3030_v54  ;;  %v2744_v25 = vld [vmem:[%s3056_s11 + $0xc0] sm:$0xff]   ;;  %v2745_v26 = vld [vmem:[%s3056_s11 + $0xc8] sm:$0xff]   ;;  %v2746_v27 = vld [vmem:[%s3056_s11 + $0xd0] sm:$0xff]  }
  0x44   : > { %737 = vmatpush1.bf16.msra.mxu0 %v3035_v55  ;;  %850 = vmatpush1.bf16.msra.mxu1 %v3042_v56 }
  0x45   : > { %738 = vmatprep.subr.bf16.mxu0 %v3047_v57  ;;  %851 = vmatprep.subr.bf16.mxu1 %v3054_v58 }
  0x48   : > { %739 = vmatpush1.bf16.msra.mxu0 %v3061_v59  ;;  %852 = vmatpush1.bf16.msra.mxu1 %v3066_v60 }
  0x49   : > { %740 = vmatprep.subr.bf16.mxu0 %v3073_v61  ;;  %853 = vmatprep.subr.bf16.mxu1 %v3080_v62 }
  0x4c   : > { %741 = vmatpush1.bf16.msra.mxu0 %v3085_v63  ;;  %854 = vmatpush1.bf16.msra.mxu1 %v3092_v0 }
  0x4d   : > { %1017 = vmatprep.subr.bf16.mxu0 %v2904_v32  ;;  %1130 = vmatprep.subr.bf16.mxu1 %v2909_v33 }
  0x4f   : > { %759 = vmatmul.mubr.bf16.vlgmr.msra.gmra.mrb[0].mxu0 %v2720_v1  ;;  %872 = vmatmul.mubr.bf16.vlgmr.msra.gmra.mrb[0].mxu1 %v2720_v1 }
  0x50   : > { %1018 = vmatpush1.bf16.msra.mxu0 %v2917_v35  ;;  %1131 = vmatpush1.bf16.msra.mxu1 %v2922_v36 }
  0x51   : > { %768 = vmatprep.mubr.bf16.mxu0 %v2776_v34  ;;  %881 = vmatprep.mubr.bf16.mxu1 %v2776_v34 }
  0x52   : > { %1019 = vmatprep.subr.bf16.mxu0 %v2928_v37  ;;  %1132 = vmatprep.subr.bf16.mxu1 %v2935_v38 }
  0x54   : > { %1020 = vmatpush1.bf16.msra.mxu0 %v2940_v39  ;;  %1133 = vmatpush1.bf16.msra.mxu1 %v2946_v40 }
  0x55   : > { %1021 = vmatprep.subr.bf16.mxu0 %v2952_v41  ;;  %1134 = vmatprep.subr.bf16.mxu1 %v2957_v42 }
  0x57   : > { %769 = vmatmul.mubr.bf16.gmra.mrb[4].mxu0 %v2721_v2  ;;  %882 = vmatmul.mubr.bf16.gmra.mrb[4].mxu1 %v2721_v2 }
  0x58   : > { %778 = vmatprep.mubr.bf16.mxu0 %v2776_v34  ;;  %891 = vmatprep.mubr.bf16.mxu1 %v2776_v34 }
  0x59   : > { %1022 = vmatpush1.bf16.msra.mxu0 %v2962_v43  ;;  %1135 = vmatpush1.bf16.msra.mxu1 %v2967_v44 }
  0x5a   : > { %1023 = vmatprep.subr.bf16.mxu0 %v2974_v45  ;;  %1136 = vmatprep.subr.bf16.mxu1 %v2981_v46 }
  0x5d   : > { %1024 = vmatpush1.bf16.msra.mxu0 %v2986_v47  ;;  %1137 = vmatpush1.bf16.msra.mxu1 %v2993_v48 }
  0x5e   : > { %1025 = vmatprep.subr.bf16.mxu0 %v2998_v49  ;;  %1138 = vmatprep.subr.bf16.mxu1 %v3005_v50 }
  0x5f   : > { %779 = vmatmul.mubr.bf16.gmra.mrb[8].mxu0 %v2722_v3  ;;  %892 = vmatmul.mubr.bf16.gmra.mrb[8].mxu1 %v2722_v3 }
  0x60   : > { %788 = vmatprep.mubr.bf16.mxu0 %v2776_v34  ;;  %901 = vmatprep.mubr.bf16.mxu1 %v2776_v34 }
  0x61   : > { %1026 = vmatpush1.bf16.msra.mxu0 %v3011_v51  ;;  %1139 = vmatpush1.bf16.msra.mxu1 %v3016_v52 }
  0x62   : > { %1027 = vmatprep.subr.bf16.mxu0 %v3023_v53  ;;  %1140 = vmatprep.subr.bf16.mxu1 %v3030_v54 }
  0x65   : > { %1028 = vmatpush1.bf16.msra.mxu0 %v3035_v55  ;;  %1141 = vmatpush1.bf16.msra.mxu1 %v3042_v56 }
  0x66   : > { %1029 = vmatprep.subr.bf16.mxu0 %v3047_v57  ;;  %1142 = vmatprep.subr.bf16.mxu1 %v3054_v58 }
  0x67   : > { %789 = vmatmul.mubr.bf16.gmra.mrb[12].mxu0 %v2723_v4  ;;  %902 = vmatmul.mubr.bf16.gmra.mrb[12].mxu1 %v2723_v4 }
  0x68   : > { %798 = vmatprep.mubr.bf16.mxu0 %v2776_v34  ;;  %911 = vmatprep.mubr.bf16.mxu1 %v2776_v34 }
  0x69   : > { %1030 = vmatpush1.bf16.msra.mxu0 %v3061_v59  ;;  %1143 = vmatpush1.bf16.msra.mxu1 %v3066_v60 }
  0x6a   : > { %1031 = vmatprep.subr.bf16.mxu0 %v3073_v61  ;;  %1144 = vmatprep.subr.bf16.mxu1 %v3080_v62 }
  0x6d   : > { %1032 = vmatpush1.bf16.msra.mxu0 %v3085_v63  ;;  %1145 = vmatpush1.bf16.msra.mxu1 %v3092_v0 }
  0x6e   : > { %1372 = vmatprep.subr.bf16.mxu0 %v2904_v32  ;;  %1485 = vmatprep.subr.bf16.mxu1 %v2909_v33 }
  0x6f   : > { %799 = vmatmul.mubr.bf16.gmra.mrb[16].mxu0 %v2724_v5  ;;  %912 = vmatmul.mubr.bf16.gmra.mrb[16].mxu1 %v2724_v5  ;;  %v2751_v5 = vld [vmem:[%s3056_s11 + $0xf8] sm:$0xff]  }
  0x70   : > { %808 = vmatprep.mubr.bf16.mxu0 %v2776_v34  ;;  %921 = vmatprep.mubr.bf16.mxu1 %v2776_v34 }
  0x77   : > { %809 = vmatmul.mubr.bf16.gmra.mrb[20].mxu0 %v2725_v6  ;;  %922 = vmatmul.mubr.bf16.gmra.mrb[20].mxu1 %v2725_v6 }
  0x78   : > { %818 = vmatprep.mubr.bf16.mxu0 %v2776_v34  ;;  %931 = vmatprep.mubr.bf16.mxu1 %v2776_v34 }
  0x7f   : > { %819 = vmatmul.mubr.bf16.gmra.mrb[24].mxu0 %v2726_v7  ;;  %932 = vmatmul.mubr.bf16.gmra.mrb[24].mxu1 %v2726_v7 }
  0x80   : > { %828 = vmatprep.mubr.bf16.mxu0 %v2776_v34  ;;  %941 = vmatprep.mubr.bf16.mxu1 %v2776_v34 }
  0x87   : > { %829 = vmatmul.mubr.bf16.gmra.mrb[28].mxu0 %v2727_v8  ;;  %942 = vmatmul.mubr.bf16.gmra.mrb[28].mxu1 %v2727_v8 }
  0x88   : > { %1049 = vmatprep.mubr.bf16.mxu0 %v2776_v34  ;;  %1162 = vmatprep.mubr.bf16.mxu1 %v2776_v34 }
  0x8f   : > { %1050 = vmatmul.mubr.bf16.vlgmr.msra.gmra.mrb[32].mxu0 %v2728_v9  ;;  %1163 = vmatmul.mubr.bf16.vlgmr.msra.gmra.mrb[32].mxu1 %v2728_v9 }
  0x90   : > { %1373 = vmatpush1.bf16.msra.mxu0 %v2917_v35  ;;  %1486 = vmatpush1.bf16.msra.mxu1 %v2922_v36 }
  0x91   : > { %1059 = vmatprep.mubr.bf16.mxu0 %v2776_v34  ;;  %1172 = vmatprep.mubr.bf16.mxu1 %v2776_v34 }
  0x92   : > { %1374 = vmatprep.subr.bf16.mxu0 %v2928_v37  ;;  %1487 = vmatprep.subr.bf16.mxu1 %v2935_v38 }
  0x94   : > { %1375 = vmatpush1.bf16.msra.mxu0 %v2940_v39  ;;  %1488 = vmatpush1.bf16.msra.mxu1 %v2946_v40 }
  0x95   : > { %1376 = vmatprep.subr.bf16.mxu0 %v2952_v41  ;;  %1489 = vmatprep.subr.bf16.mxu1 %v2957_v42 }
  0x97   : > { %1060 = vmatmul.mubr.bf16.gmra.mrb[36].mxu0 %v2729_v10  ;;  %1173 = vmatmul.mubr.bf16.gmra.mrb[36].mxu1 %v2729_v10 }
  0x98   : > { %1069 = vmatprep.mubr.bf16.mxu0 %v2776_v34  ;;  %1182 = vmatprep.mubr.bf16.mxu1 %v2776_v34 }
  0x99   : > { %1377 = vmatpush1.bf16.msra.mxu0 %v2962_v43  ;;  %1490 = vmatpush1.bf16.msra.mxu1 %v2967_v44 }
  0x9a   : > { %1378 = vmatprep.subr.bf16.mxu0 %v2974_v45  ;;  %1491 = vmatprep.subr.bf16.mxu1 %v2981_v46 }
  0x9d   : > { %1379 = vmatpush1.bf16.msra.mxu0 %v2986_v47  ;;  %1492 = vmatpush1.bf16.msra.mxu1 %v2993_v48 }
  0x9e   : > { %1380 = vmatprep.subr.bf16.mxu0 %v2998_v49  ;;  %1493 = vmatprep.subr.bf16.mxu1 %v3005_v50 }
  0x9f   : > { %1070 = vmatmul.mubr.bf16.gmra.mrb[40].mxu0 %v2730_v11  ;;  %1183 = vmatmul.mubr.bf16.gmra.mrb[40].mxu1 %v2730_v11 }
  0xa0   : > { %1079 = vmatprep.mubr.bf16.mxu0 %v2776_v34  ;;  %1192 = vmatprep.mubr.bf16.mxu1 %v2776_v34 }
  0xa1   : > { %1381 = vmatpush1.bf16.msra.mxu0 %v3011_v51  ;;  %1494 = vmatpush1.bf16.msra.mxu1 %v3016_v52 }
  0xa2   : > { %1382 = vmatprep.subr.bf16.mxu0 %v3023_v53  ;;  %1495 = vmatprep.subr.bf16.mxu1 %v3030_v54 }
  0xa5   : > { %1383 = vmatpush1.bf16.msra.mxu0 %v3035_v55  ;;  %1496 = vmatpush1.bf16.msra.mxu1 %v3042_v56 }
  0xa6   : > { %1384 = vmatprep.subr.bf16.mxu0 %v3047_v57  ;;  %1497 = vmatprep.subr.bf16.mxu1 %v3054_v58 }
  0xa7   : > { %1080 = vmatmul.mubr.bf16.gmra.mrb[44].mxu0 %v2731_v12  ;;  %1193 = vmatmul.mubr.bf16.gmra.mrb[44].mxu1 %v2731_v12 }
  0xa8   : > { %1089 = vmatprep.mubr.bf16.mxu0 %v2776_v34  ;;  %1202 = vmatprep.mubr.bf16.mxu1 %v2776_v34 }
  0xa9   : > { %1385 = vmatpush1.bf16.msra.mxu0 %v3061_v59  ;;  %1498 = vmatpush1.bf16.msra.mxu1 %v3066_v60 }
  0xaa   : > { %1386 = vmatprep.subr.bf16.mxu0 %v3073_v61  ;;  %1499 = vmatprep.subr.bf16.mxu1 %v3080_v62 }
  0xad   : > { %1387 = vmatpush1.bf16.msra.mxu0 %v3085_v63  ;;  %1500 = vmatpush1.bf16.msra.mxu1 %v3092_v0 }
  0xae   : > { %1727 = vmatprep.subr.bf16.mxu0 %v2904_v32  ;;  %1840 = vmatprep.subr.bf16.mxu1 %v2909_v33  ;;  %v2747_v32 = vld [vmem:[%s3056_s11 + $0xd8] sm:$0xff]  }
  0xaf   : > { %1090 = vmatmul.mubr.bf16.gmra.mrb[48].mxu0 %v2732_v13  ;;  %1203 = vmatmul.mubr.bf16.gmra.mrb[48].mxu1 %v2732_v13 }
  0xb0   : > { %1099 = vmatprep.mubr.bf16.mxu0 %v2776_v34  ;;  %1212 = vmatprep.mubr.bf16.mxu1 %v2776_v34 }
  0xb7   : > { %1100 = vmatmul.mubr.bf16.gmra.mrb[52].mxu0 %v2733_v14  ;;  %1213 = vmatmul.mubr.bf16.gmra.mrb[52].mxu1 %v2733_v14 }
  0xb8   : > { %1109 = vmatprep.mubr.bf16.mxu0 %v2776_v34  ;;  %1222 = vmatprep.mubr.bf16.mxu1 %v2776_v34 }
  0xbf   : > { %1110 = vmatmul.mubr.bf16.gmra.mrb[56].mxu0 %v2734_v15  ;;  %1223 = vmatmul.mubr.bf16.gmra.mrb[56].mxu1 %v2734_v15 }
  0xc0   : > { %1119 = vmatprep.mubr.bf16.mxu0 %v2776_v34  ;;  %1232 = vmatprep.mubr.bf16.mxu1 %v2776_v34 }
  0xc7   : > { %1120 = vmatmul.mubr.bf16.gmra.mrb[60].mxu0 %v2735_v16  ;;  %1233 = vmatmul.mubr.bf16.gmra.mrb[60].mxu1 %v2735_v16 }
  0xc8   : > { %1404 = vmatprep.mubr.bf16.mxu0 %v2776_v34  ;;  %1517 = vmatprep.mubr.bf16.mxu1 %v2776_v34 }
  0xcf   : > { %1405 = vmatmul.mubr.bf16.vlgmr.msra.gmra.mrb[64].mxu0 %v2736_v17  ;;  %1518 = vmatmul.mubr.bf16.vlgmr.msra.gmra.mrb[64].mxu1 %v2736_v17 }
  0xd0   : > { %1728 = vmatpush1.bf16.msra.mxu0 %v2917_v35  ;;  %1841 = vmatpush1.bf16.msra.mxu1 %v2922_v36 }
  0xd1   : > { %1414 = vmatprep.mubr.bf16.mxu0 %v2776_v34  ;;  %1527 = vmatprep.mubr.bf16.mxu1 %v2776_v34 }
  0xd2   : > { %1729 = vmatprep.subr.bf16.mxu0 %v2928_v37  ;;  %1842 = vmatprep.subr.bf16.mxu1 %v2935_v38 }
  0xd4   : > { %1730 = vmatpush1.bf16.msra.mxu0 %v2940_v39  ;;  %1843 = vmatpush1.bf16.msra.mxu1 %v2946_v40 }
  0xd5   : > { %1731 = vmatprep.subr.bf16.mxu0 %v2952_v41  ;;  %1844 = vmatprep.subr.bf16.mxu1 %v2957_v42  ;;  %v2748_v42 = vld [vmem:[%s3056_s11 + $0xe0] sm:$0xff]  }
  0xd7   : > { %1415 = vmatmul.mubr.bf16.gmra.mrb[68].mxu0 %v2737_v18  ;;  %1528 = vmatmul.mubr.bf16.gmra.mrb[68].mxu1 %v2737_v18 }
  0xd8   : > { %1424 = vmatprep.mubr.bf16.mxu0 %v2776_v34  ;;  %1537 = vmatprep.mubr.bf16.mxu1 %v2776_v34 }
  0xd9   : > { %1732 = vmatpush1.bf16.msra.mxu0 %v2962_v43  ;;  %1845 = vmatpush1.bf16.msra.mxu1 %v2967_v44 }
  0xda   : > { %1733 = vmatprep.subr.bf16.mxu0 %v2974_v45  ;;  %1846 = vmatprep.subr.bf16.mxu1 %v2981_v46 }
  0xdd   : > { %1734 = vmatpush1.bf16.msra.mxu0 %v2986_v47  ;;  %1847 = vmatpush1.bf16.msra.mxu1 %v2993_v48 }
  0xde   : > { %1735 = vmatprep.subr.bf16.mxu0 %v2998_v49  ;;  %1848 = vmatprep.subr.bf16.mxu1 %v3005_v50 }
  0xdf   : > { %1425 = vmatmul.mubr.bf16.gmra.mrb[72].mxu0 %v2738_v19  ;;  %1538 = vmatmul.mubr.bf16.gmra.mrb[72].mxu1 %v2738_v19 }
  0xe0   : > { %1434 = vmatprep.mubr.bf16.mxu0 %v2776_v34  ;;  %1547 = vmatprep.mubr.bf16.mxu1 %v2776_v34 }
  0xe1   : > { %1736 = vmatpush1.bf16.msra.mxu0 %v3011_v51  ;;  %1849 = vmatpush1.bf16.msra.mxu1 %v3016_v52  ;;  %v2749_v51 = vld [vmem:[%s3056_s11 + $0xe8] sm:$0xff]  }
  0xe2   : > { %1737 = vmatprep.subr.bf16.mxu0 %v3023_v53  ;;  %1850 = vmatprep.subr.bf16.mxu1 %v3030_v54 }
  0xe5   : > { %1738 = vmatpush1.bf16.msra.mxu0 %v3035_v55  ;;  %1851 = vmatpush1.bf16.msra.mxu1 %v3042_v56 }
  0xe6   : > { %1739 = vmatprep.subr.bf16.mxu0 %v3047_v57  ;;  %1852 = vmatprep.subr.bf16.mxu1 %v3054_v58 }
  0xe7   : > { %1435 = vmatmul.mubr.bf16.gmra.mrb[76].mxu0 %v2739_v20  ;;  %1548 = vmatmul.mubr.bf16.gmra.mrb[76].mxu1 %v2739_v20 }
  0xe8   : > { %1444 = vmatprep.mubr.bf16.mxu0 %v2776_v34  ;;  %1557 = vmatprep.mubr.bf16.mxu1 %v2776_v34 }
  0xe9   : > { %1740 = vmatpush1.bf16.msra.mxu0 %v3061_v59  ;;  %1853 = vmatpush1.bf16.msra.mxu1 %v3066_v60  ;;  %v2750_v60 = vld [vmem:[%s3056_s11 + $0xf0] sm:$0xff]  }
  0xea   : > { %1741 = vmatprep.subr.bf16.mxu0 %v3073_v61  ;;  %1854 = vmatprep.subr.bf16.mxu1 %v3080_v62 }
  0xed   : > { %1742 = vmatpush1.bf16.msra.mxu0 %v3085_v63  ;;  %1855 = vmatpush1.bf16.msra.mxu1 %v3092_v0 }
  0xef   : > { %1445 = vmatmul.mubr.bf16.gmra.mrb[80].mxu0 %v2740_v21  ;;  %1558 = vmatmul.mubr.bf16.gmra.mrb[80].mxu1 %v2740_v21 }
  0xf0   : > { %1454 = vmatprep.mubr.bf16.mxu0 %v2776_v34  ;;  %1567 = vmatprep.mubr.bf16.mxu1 %v2776_v34 }
  0xf7   : > { %1455 = vmatmul.mubr.bf16.gmra.mrb[84].mxu0 %v2741_v22  ;;  %1568 = vmatmul.mubr.bf16.gmra.mrb[84].mxu1 %v2741_v22 }
  0xf8   : > { %1464 = vmatprep.mubr.bf16.mxu0 %v2776_v34  ;;  %1577 = vmatprep.mubr.bf16.mxu1 %v2776_v34 }
  0xff   : > { %1465 = vmatmul.mubr.bf16.gmra.mrb[88].mxu0 %v2742_v23  ;;  %1578 = vmatmul.mubr.bf16.gmra.mrb[88].mxu1 %v2742_v23 }
 0x100   : > { %1474 = vmatprep.mubr.bf16.mxu0 %v2776_v34  ;;  %1587 = vmatprep.mubr.bf16.mxu1 %v2776_v34 }
 0x107   : > { %1475 = vmatmul.mubr.bf16.gmra.mrb[92].mxu0 %v2743_v24  ;;  %1588 = vmatmul.mubr.bf16.gmra.mrb[92].mxu1 %v2743_v24 }
 0x108   : > { %1759 = vmatprep.mubr.bf16.mxu0 %v2776_v34  ;;  %1872 = vmatprep.mubr.bf16.mxu1 %v2776_v34 }
 0x10f   : > { %1760 = vmatmul.mubr.bf16.vlgmr.msra.gmra.mrb[96].mxu0 %v2744_v25  ;;  %1873 = vmatmul.mubr.bf16.vlgmr.msra.gmra.mrb[96].mxu1 %v2744_v25 }
 0x110   : > { %1769 = vmatprep.mubr.bf16.mxu0 %v2776_v34  ;;  %1882 = vmatprep.mubr.bf16.mxu1 %v2776_v34 }
 0x117   : > { %1770 = vmatmul.mubr.bf16.gmra.mrb[100].mxu0 %v2745_v26  ;;  %1883 = vmatmul.mubr.bf16.gmra.mrb[100].mxu1 %v2745_v26 }
 0x118   : > { %1779 = vmatprep.mubr.bf16.mxu0 %v2776_v34  ;;  %1892 = vmatprep.mubr.bf16.mxu1 %v2776_v34 }
 0x11f   : > { %1780 = vmatmul.mubr.bf16.gmra.mrb[104].mxu0 %v2746_v27  ;;  %1893 = vmatmul.mubr.bf16.gmra.mrb[104].mxu1 %v2746_v27 }
 0x120   : > { %1789 = vmatprep.mubr.bf16.mxu0 %v2776_v34  ;;  %1902 = vmatprep.mubr.bf16.mxu1 %v2776_v34 }
 0x122   : > { %v3275_v28 = vpop.f32.mrb[0].mxu0  ;;  %v3277_v29 = vpop.f32.mrb[0].mxu1 }
 0x123   : > { %4267 = vst [vmem:[#allocation3_spill] sm:$0xff] %v3277_v29  ;;  %v3279_v30 = vpop.f32.mrb[1].mxu0  ;;  %v3281_v31 = vpop.f32.mrb[1].mxu1 }
 0x124   : > { %4268 = vst [vmem:[#allocation4_spill] sm:$0xff] %v3281_v31  ;;  %v3284_v33 = vpop.f32.mrb[2].mxu0  ;;  %v3286_v35 = vpop.f32.mrb[2].mxu1 }
 0x125   : > { %4269 = vst [vmem:[#allocation5_spill] sm:$0xff] %v3286_v35  ;;  %v3288_v36 = vpop.f32.mrb[3].mxu0  ;;  %v3290_v37 = vpop.f32.mrb[3].mxu1 }
 0x126   : > { %4270 = vst [vmem:[#allocation6_spill] sm:$0xff] %v3290_v37 }
 0x127   : > { %1790 = vmatmul.mubr.bf16.gmra.mrb[108].mxu0 %v2747_v32  ;;  %1903 = vmatmul.mubr.bf16.gmra.mrb[108].mxu1 %v2747_v32 }
 0x128   : > { %1799 = vmatprep.mubr.bf16.mxu0 %v2776_v34  ;;  %1912 = vmatprep.mubr.bf16.mxu1 %v2776_v34 }
 0x12a   : > { %v3294_v38 = vpop.f32.mrb[4].mxu0  ;;  %v3296_v39 = vpop.f32.mrb[4].mxu1 }
 0x12b   : > { %4271 = vst [vmem:[#allocation7_spill] sm:$0xff] %v3296_v39  ;;  %v3298_v40 = vpop.f32.mrb[5].mxu0  ;;  %v3300_v41 = vpop.f32.mrb[5].mxu1 }
 0x12c   : > { %4272 = vst [vmem:[#allocation8_spill] sm:$0xff] %v3300_v41  ;;  %v3303_v43 = vpop.f32.mrb[6].mxu0  ;;  %v3305_v44 = vpop.f32.mrb[6].mxu1 }
 0x12d   : > { %4273 = vst [vmem:[#allocation9_spill] sm:$0xff] %v3305_v44  ;;  %v3307_v45 = vpop.f32.mrb[7].mxu0  ;;  %v3309_v46 = vpop.f32.mrb[7].mxu1 }
 0x12e   : > { %4274 = vst [vmem:[#allocation10_spill] sm:$0xff] %v3309_v46 }
 0x12f   : > { %1800 = vmatmul.mubr.bf16.gmra.mrb[112].mxu0 %v2748_v42  ;;  %1913 = vmatmul.mubr.bf16.gmra.mrb[112].mxu1 %v2748_v42 }
 0x130   : > { %1809 = vmatprep.mubr.bf16.mxu0 %v2776_v34  ;;  %1922 = vmatprep.mubr.bf16.mxu1 %v2776_v34 }
 0x132   : > { %v3313_v47 = vpop.f32.mrb[8].mxu0  ;;  %v3315_v48 = vpop.f32.mrb[8].mxu1 }
 0x133   : > { %4275 = vst [vmem:[#allocation11_spill] sm:$0xff] %v3315_v48  ;;  %v3317_v49 = vpop.f32.mrb[9].mxu0  ;;  %v3319_v50 = vpop.f32.mrb[9].mxu1 }
 0x134   : > { %4276 = vst [vmem:[#allocation12_spill] sm:$0xff] %v3319_v50  ;;  %v3322_v52 = vpop.f32.mrb[10].mxu0  ;;  %v3324_v53 = vpop.f32.mrb[10].mxu1 }
 0x135   : > { %4277 = vst [vmem:[#allocation13_spill] sm:$0xff] %v3324_v53  ;;  %v3326_v54 = vpop.f32.mrb[11].mxu0  ;;  %v3328_v55 = vpop.f32.mrb[11].mxu1 }
 0x136   : > { %4278 = vst [vmem:[#allocation14_spill] sm:$0xff] %v3328_v55 }
 0x137   : > { %1810 = vmatmul.mubr.bf16.gmra.mrb[116].mxu0 %v2749_v51  ;;  %1923 = vmatmul.mubr.bf16.gmra.mrb[116].mxu1 %v2749_v51 }
 0x138   : > { %1819 = vmatprep.mubr.bf16.mxu0 %v2776_v34  ;;  %1932 = vmatprep.mubr.bf16.mxu1 %v2776_v34 }
 0x13a   : > { %v3332_v56 = vpop.f32.mrb[12].mxu0  ;;  %v3334_v57 = vpop.f32.mrb[12].mxu1 }
 0x13b   : > { %4279 = vst [vmem:[#allocation15_spill] sm:$0xff] %v3334_v57  ;;  %v3336_v58 = vpop.f32.mrb[13].mxu0  ;;  %v3338_v59 = vpop.f32.mrb[13].mxu1 }
 0x13c   : > { %4280 = vst [vmem:[#allocation16_spill] sm:$0xff] %v3338_v59  ;;  %v3341_v61 = vpop.f32.mrb[14].mxu0  ;;  %v3343_v62 = vpop.f32.mrb[14].mxu1 }
 0x13d   : > { %4281 = vst [vmem:[#allocation17_spill] sm:$0xff] %v3343_v62  ;;  %v3345_v63 = vpop.f32.mrb[15].mxu0  ;;  %v3347_v0 = vpop.f32.mrb[15].mxu1 }
 0x13e   : > { %4282 = vst [vmem:[#allocation18_spill] sm:$0xff] %v3347_v0 }
 0x13f   : > { %1820 = vmatmul.mubr.bf16.gmra.mrb[120].mxu0 %v2750_v60  ;;  %1933 = vmatmul.mubr.bf16.gmra.mrb[120].mxu1 %v2750_v60 }
 0x140   : > { %1829 = vmatprep.mubr.bf16.mxu0 %v2776_v34  ;;  %1942 = vmatprep.mubr.bf16.mxu1 %v2776_v34 }
 0x142   : > { %v3351_v1 = vpop.f32.mrb[16].mxu0  ;;  %v3353_v2 = vpop.f32.mrb[16].mxu1 }
 0x143   : > { %4283 = vst [vmem:[#allocation19_spill] sm:$0xff] %v3353_v2  ;;  %v3355_v3 = vpop.f32.mrb[17].mxu0  ;;  %v3357_v4 = vpop.f32.mrb[17].mxu1 }
 0x144   : > { %4284 = vst [vmem:[#allocation20_spill] sm:$0xff] %v3357_v4  ;;  %v3360_v6 = vpop.f32.mrb[18].mxu0  ;;  %v3362_v7 = vpop.f32.mrb[18].mxu1 }
 0x145   : > { %4285 = vst [vmem:[#allocation21_spill] sm:$0xff] %v3362_v7  ;;  %v3364_v8 = vpop.f32.mrb[19].mxu0  ;;  %v3366_v9 = vpop.f32.mrb[19].mxu1 }
 0x146   : > { %4286 = vst [vmem:[#allocation22_spill] sm:$0xff] %v3366_v9 }
 0x147   : > { %1830 = vmatmul.mubr.bf16.gmra.mrb[124].mxu0 %v2751_v5  ;;  %1943 = vmatmul.mubr.bf16.gmra.mrb[124].mxu1 %v2751_v5 }
 0x14a   : > { %v3368_v34 = vpop.f32.mrb[20].mxu0  ;;  %v3370_v10 = vpop.f32.mrb[20].mxu1 }
 0x14b   : > { %4287 = vst [vmem:[#allocation23_spill] sm:$0xff] %v3370_v10  ;;  %v3372_v11 = vpop.f32.mrb[21].mxu0  ;;  %v3374_v12 = vpop.f32.mrb[21].mxu1 }
 0x14c   : > { %4288 = vst [vmem:[#allocation24_spill] sm:$0xff] %v3374_v12  ;;  %v3376_v13 = vpop.f32.mrb[22].mxu0  ;;  %v3378_v14 = vpop.f32.mrb[22].mxu1 }
 0x14d   : > { %4289 = vst [vmem:[#allocation25_spill] sm:$0xff] %v3378_v14  ;;  %v3380_v15 = vpop.f32.mrb[23].mxu0  ;;  %v3382_v16 = vpop.f32.mrb[23].mxu1 }
 0x14e   : > { %4290 = vst [vmem:[#allocation26_spill] sm:$0xff] %v3382_v16 }
 0x152   : > { %v3384_v17 = vpop.f32.mrb[24].mxu0  ;;  %v3386_v18 = vpop.f32.mrb[24].mxu1 }
 0x153   : > { %4291 = vst [vmem:[#allocation27_spill] sm:$0xff] %v3384_v17  ;;  %4292 = vst [vmem:[#allocation28_spill] sm:$0xff] %v3386_v18  ;;  %v3388_v19 = vpop.f32.mrb[25].mxu0  ;;  %v3390_v20 = vpop.f32.mrb[25].mxu1 }
 0x154   : > { %4293 = vst [vmem:[#allocation29_spill] sm:$0xff] %v3388_v19  ;;  %4294 = vst [vmem:[#allocation30_spill] sm:$0xff] %v3390_v20  ;;  %v3392_v21 = vpop.f32.mrb[26].mxu0  ;;  %v3394_v22 = vpop.f32.mrb[26].mxu1 }
 0x155   : > { %4295 = vst [vmem:[#allocation31_spill] sm:$0xff] %v3392_v21  ;;  %4296 = vst [vmem:[#allocation32_spill] sm:$0xff] %v3394_v22  ;;  %v3396_v23 = vpop.f32.mrb[27].mxu0  ;;  %v3398_v24 = vpop.f32.mrb[27].mxu1 }
 0x156   : > { %4297 = vst [vmem:[#allocation33_spill] sm:$0xff] %v3396_v23  ;;  %4298 = vst [vmem:[#allocation34_spill] sm:$0xff] %v3398_v24 }
 0x15a   : > { %v3400_v25 = vpop.f32.mrb[28].mxu0  ;;  %v3402_v26 = vpop.f32.mrb[28].mxu1 }
 0x15b   : > { %4299 = vst [vmem:[#allocation35_spill] sm:$0xff] %v3400_v25  ;;  %4300 = vst [vmem:[#allocation36_spill] sm:$0xff] %v3402_v26  ;;  %v3404_v27 = vpop.f32.mrb[29].mxu0  ;;  %v3406_v32 = vpop.f32.mrb[29].mxu1  ;;  %v4358_v25 = vld [vmem:[#allocation3_spill] sm:$0xff] }
 0x15c   : > { %4301 = vst [vmem:[#allocation37_spill] sm:$0xff] %v3404_v27  ;;  %4302 = vst [vmem:[#allocation38_spill] sm:$0xff] %v3406_v32  ;;  %v3408_v42 = vpop.f32.mrb[30].mxu0  ;;  %v3410_v51 = vpop.f32.mrb[30].mxu1 }
 0x15d   : > { %4303 = vst [vmem:[#allocation39_spill] sm:$0xff] %v3408_v42  ;;  %4304 = vst [vmem:[#allocation40_spill] sm:$0xff] %v3410_v51  ;;  %v3412_v60 = vpop.f32.mrb[31].mxu0  ;;  %v3414_v5 = vpop.f32.mrb[31].mxu1 }
 0x15e   : > { %4305 = vst [vmem:[#allocation41_spill] sm:$0xff] %v3412_v60  ;;  %4306 = vst [vmem:[#allocation42_spill] sm:$0xff] %v3414_v5  ;;  %v4362_v5 = vld [vmem:[#allocation4_spill] sm:$0xff] }
 0x162   : > { %v3416_v22 = vpop.f32.mrb[32].mxu0  ;;  %v3418_v23 = vpop.f32.mrb[32].mxu1 }
 0x163   : > { %4307 = vst [vmem:[#allocation43_spill] sm:$0xff] %v3418_v23  ;;  %v3424_v26 = vpop.f32.mrb[33].mxu0  ;;  %v3426_v32 = vpop.f32.mrb[33].mxu1  ;;  %v4357_v21 = vmax.f32 %v3275_v28, %v3416_v22 }
 0x164   : > { %4308 = vst [vmem:[#allocation44_spill] sm:$0xff] %v3426_v32  ;;  %v3432_v60 = vpop.f32.mrb[34].mxu0  ;;  %v3434_v42 = vpop.f32.mrb[34].mxu1  ;;  %v4361_v51 = vmax.f32 %v3279_v30, %v3424_v26 }
 0x165   : > { %4309 = vst [vmem:[#allocation45_spill] sm:$0xff] %v3434_v42  ;;  %v3440_v23 = vpop.f32.mrb[35].mxu0  ;;  %v3442_v29 = vpop.f32.mrb[35].mxu1 }
 0x166   : > { %4310 = vst [vmem:[#allocation46_spill] sm:$0xff] %v3442_v29  ;;  %v4369_v26 = vmax.f32 %v3288_v36, %v3440_v23 }
 0x16a   : > { %v3448_v32 = vpop.f32.mrb[36].mxu0  ;;  %v3450_v31 = vpop.f32.mrb[36].mxu1 }
 0x16b   : > { %4311 = vst [vmem:[#allocation47_spill] sm:$0xff] %v3450_v31  ;;  %v3456_v42 = vpop.f32.mrb[37].mxu0  ;;  %v3458_v35 = vpop.f32.mrb[37].mxu1 }
 0x16c   : > { %4312 = vst [vmem:[#allocation48_spill] sm:$0xff] %v3458_v35  ;;  %v3464_v29 = vpop.f32.mrb[38].mxu0  ;;  %v3466_v37 = vpop.f32.mrb[38].mxu1  ;;  %v4367_v22 = vld [vmem:[#allocation45_spill] sm:$0xff] }
 0x16d   : > { %4313 = vst [vmem:[#allocation49_spill] sm:$0xff] %v3466_v37  ;;  %v3472_v31 = vpop.f32.mrb[39].mxu0  ;;  %v3474_v39 = vpop.f32.mrb[39].mxu1 }
 0x16e   : > { %4314 = vst [vmem:[#allocation50_spill] sm:$0xff] %v3474_v39 }
 0x172   : > { %v3480_v35 = vpop.f32.mrb[40].mxu0  ;;  %v3482_v41 = vpop.f32.mrb[40].mxu1 }
 0x173   : > { %4315 = vst [vmem:[#allocation51_spill] sm:$0xff] %v3482_v41  ;;  %v3488_v37 = vpop.f32.mrb[41].mxu0  ;;  %v3490_v44 = vpop.f32.mrb[41].mxu1 }
 0x174   : > { %4316 = vst [vmem:[#allocation52_spill] sm:$0xff] %v3490_v44  ;;  %v3496_v39 = vpop.f32.mrb[42].mxu0  ;;  %v3498_v46 = vpop.f32.mrb[42].mxu1 }
 0x175   : > { %4317 = vst [vmem:[#allocation53_spill] sm:$0xff] %v3498_v46  ;;  %v3504_v41 = vpop.f32.mrb[43].mxu0  ;;  %v3506_v48 = vpop.f32.mrb[43].mxu1 }
 0x176   : > { %4318 = vst [vmem:[#allocation54_spill] sm:$0xff] %v3506_v48 }
 0x17a   : > { %v3512_v44 = vpop.f32.mrb[44].mxu0  ;;  %v3514_v50 = vpop.f32.mrb[44].mxu1 }
 0x17b   : > { %4319 = vst [vmem:[#allocation55_spill] sm:$0xff] %v3514_v50  ;;  %v3520_v46 = vpop.f32.mrb[45].mxu0  ;;  %v3522_v53 = vpop.f32.mrb[45].mxu1 }
 0x17c   : > { %4320 = vst [vmem:[#allocation56_spill] sm:$0xff] %v3522_v53  ;;  %v3528_v48 = vpop.f32.mrb[46].mxu0  ;;  %v3530_v55 = vpop.f32.mrb[46].mxu1 }
 0x17d   : > { %4321 = vst [vmem:[#allocation57_spill] sm:$0xff] %v3530_v55  ;;  %v3536_v50 = vpop.f32.mrb[47].mxu0  ;;  %v3538_v57 = vpop.f32.mrb[47].mxu1 }
 0x17e   : > { %4322 = vst [vmem:[#allocation58_spill] sm:$0xff] %v3538_v57 }
 0x182   : > { %v3544_v53 = vpop.f32.mrb[48].mxu0  ;;  %v3546_v59 = vpop.f32.mrb[48].mxu1 }
 0x183   : > { %4323 = vst [vmem:[#allocation59_spill] sm:$0xff] %v3546_v59  ;;  %v3552_v55 = vpop.f32.mrb[49].mxu0  ;;  %v3554_v62 = vpop.f32.mrb[49].mxu1 }
 0x184   : > { %4324 = vst [vmem:[#allocation60_spill] sm:$0xff] %v3554_v62  ;;  %v3560_v57 = vpop.f32.mrb[50].mxu0  ;;  %v3562_v0 = vpop.f32.mrb[50].mxu1 }
 0x185   : > { %4325 = vst [vmem:[#allocation61_spill] sm:$0xff] %v3562_v0  ;;  %v3568_v59 = vpop.f32.mrb[51].mxu0  ;;  %v3570_v2 = vpop.f32.mrb[51].mxu1 }
 0x186   : > { %4326 = vst [vmem:[#allocation62_spill] sm:$0xff] %v3570_v2 }
 0x18a   : > { %v3576_v62 = vpop.f32.mrb[52].mxu0  ;;  %v3578_v4 = vpop.f32.mrb[52].mxu1 }
 0x18b   : > { %4327 = vst [vmem:[#allocation63_spill] sm:$0xff] %v3578_v4  ;;  %v3584_v0 = vpop.f32.mrb[53].mxu0  ;;  %v3586_v7 = vpop.f32.mrb[53].mxu1 }
 0x18c   : > { %4328 = vst [vmem:[#allocation64_spill] sm:$0xff] %v3586_v7  ;;  %v3592_v2 = vpop.f32.mrb[54].mxu0  ;;  %v3594_v9 = vpop.f32.mrb[54].mxu1 }
 0x18d   : > { %4329 = vst [vmem:[#allocation65_spill] sm:$0xff] %v3594_v9  ;;  %v3600_v4 = vpop.f32.mrb[55].mxu0  ;;  %v3602_v10 = vpop.f32.mrb[55].mxu1 }
 0x18e   : > { %4330 = vst [vmem:[#allocation66_spill] sm:$0xff] %v3602_v10 }
 0x192   : > { %v3608_v7 = vpop.f32.mrb[56].mxu0  ;;  %v3610_v12 = vpop.f32.mrb[56].mxu1 }
 0x193   : > { %4331 = vst [vmem:[#allocation67_spill] sm:$0xff] %v3608_v7  ;;  %4332 = vst [vmem:[#allocation68_spill] sm:$0xff] %v3610_v12  ;;  %v3616_v9 = vpop.f32.mrb[57].mxu0  ;;  %v3618_v14 = vpop.f32.mrb[57].mxu1 }
 0x194   : > { %4333 = vst [vmem:[#allocation69_spill] sm:$0xff] %v3616_v9  ;;  %4334 = vst [vmem:[#allocation70_spill] sm:$0xff] %v3618_v14  ;;  %v3624_v10 = vpop.f32.mrb[58].mxu0  ;;  %v3626_v16 = vpop.f32.mrb[58].mxu1 }
 0x195   : > { %4335 = vst [vmem:[#allocation71_spill] sm:$0xff] %v3624_v10  ;;  %4336 = vst [vmem:[#allocation72_spill] sm:$0xff] %v3626_v16  ;;  %v3632_v12 = vpop.f32.mrb[59].mxu0  ;;  %v3634_v18 = vpop.f32.mrb[59].mxu1 }
 0x196   : > { %4338 = vst [vmem:[#allocation73_spill] sm:$0xff] %v3632_v12  ;;  %4339 = vst [vmem:[#allocation74_spill] sm:$0xff] %v3634_v18 }
 0x19a   : > { %v3640_v14 = vpop.f32.mrb[60].mxu0  ;;  %v3642_v20 = vpop.f32.mrb[60].mxu1 }
 0x19b   : > { %4341 = vst [vmem:[#allocation75_spill] sm:$0xff] %v3640_v14  ;;  %4342 = vst [vmem:[#allocation76_spill] sm:$0xff] %v3642_v20  ;;  %v3648_v16 = vpop.f32.mrb[61].mxu0  ;;  %v3650_v7 = vpop.f32.mrb[61].mxu1 }
 0x19c   : > { %4345 = vst [vmem:[#allocation77_spill] sm:$0xff] %v3648_v16  ;;  %4346 = vst [vmem:[#allocation78_spill] sm:$0xff] %v3650_v7  ;;  %v3656_v18 = vpop.f32.mrb[62].mxu0  ;;  %v3658_v24 = vpop.f32.mrb[62].mxu1 }
 0x19d   : > { %4349 = vst [vmem:[#allocation79_spill] sm:$0xff] %v3656_v18  ;;  %4350 = vst [vmem:[#allocation80_spill] sm:$0xff] %v3658_v24  ;;  %v3664_v20 = vpop.f32.mrb[63].mxu0  ;;  %v3666_v10 = vpop.f32.mrb[63].mxu1  ;;  %v4359_v18 = vld [vmem:[#allocation43_spill] sm:$0xff] }
 0x19e   : > { %4353 = vst [vmem:[#allocation81_spill] sm:$0xff] %v3664_v20  ;;  %4354 = vst [vmem:[#allocation82_spill] sm:$0xff] %v3666_v10  ;;  %v4360_v27 = vmax.f32 %v4358_v25, %v4359_v18  ;;  %v4363_v10 = vld [vmem:[#allocation44_spill] sm:$0xff] }
 0x19f   : > { %v4364_v16 = vmax.f32 %v4362_v5, %v4363_v10 }
 0x1a2   : > { %v1406_v7 = vpop.f32.mrb[64].mxu0  ;;  %v1519_v12 = vpop.f32.mrb[64].mxu1 }
 0x1a3   : > { %v3675_v19 = vmax.f32 %v4357_v21, %v1406_v7  ;;  %v3680_v24 = vmax.f32 %v4360_v27, %v1519_v12  ;;  %v1408_v14 = vpop.f32.mrb[65].mxu0  ;;  %v1521_v17 = vpop.f32.mrb[65].mxu1  ;;  %v4365_v21 = vmax.f32 %v3284_v33, %v3432_v60  ;;  %v4366_v12 = vld [vmem:[#allocation5_spill] sm:$0xff] }
 0x1a4   : > { %v3685_v20 = vmax.f32 %v4361_v51, %v1408_v14  ;;  %v3690_v9 = vmax.f32 %v4364_v16, %v1521_v17  ;;  %v1410_v28 = vpop.f32.mrb[66].mxu0  ;;  %v1523_v7 = vpop.f32.mrb[66].mxu1  ;;  %v4368_v25 = vmax.f32 %v4366_v12, %v4367_v22  ;;  %v4370_v16 = vld [vmem:[#allocation6_spill] sm:$0xff]  ;;  %v4375_v12 = vld [vmem:[#allocation47_spill] sm:$0xff] }
 0x1a5   : > { %v3695_v18 = vmax.f32 %v4365_v21, %v1410_v28  ;;  %v1412_v30 = vpop.f32.mrb[67].mxu0  ;;  %v1525_v14 = vpop.f32.mrb[67].mxu1  ;;  %v4371_v17 = vld [vmem:[#allocation46_spill] sm:$0xff]  ;;  %v4373_v28 = vmax.f32 %v3294_v38, %v3448_v32 }
 0x1a6   : > { %v3700_v27 = vmax.f32 %v4368_v25, %v1523_v7  ;;  %v3705_v10 = vmax.f32 %v4369_v26, %v1412_v30  ;;  %v4372_v51 = vmax.f32 %v4370_v16, %v4371_v17  ;;  %v4374_v7 = vld [vmem:[#allocation7_spill] sm:$0xff]  ;;  %v4377_v30 = vmax.f32 %v3298_v40, %v3456_v42  ;;  %v4379_v16 = vld [vmem:[#allocation48_spill] sm:$0xff] }
 0x1a7   : > { %v4376_v22 = vmax.f32 %v4374_v7, %v4375_v12  ;;  %v4383_v7 = vld [vmem:[#allocation49_spill] sm:$0xff] }
 0x1a8   : > { %v3710_v5 = vmax.f32 %v4372_v51, %v1525_v14  ;;  %v4378_v14 = vld [vmem:[#allocation8_spill] sm:$0xff] }
 0x1a9   : > { %v4380_v17 = vmax.f32 %v4378_v14, %v4379_v16  ;;  %v4387_v14 = vld [vmem:[#allocation50_spill] sm:$0xff] }
 0x1aa   : > { %v1416_v33 = vpop.f32.mrb[68].mxu0  ;;  %v1529_v60 = vpop.f32.mrb[68].mxu1 }
 0x1ab   : > { %v3715_v21 = vmax.f32 %v4373_v28, %v1416_v33  ;;  %v3720_v25 = vmax.f32 %v4376_v22, %v1529_v60  ;;  %v1418_v36 = vpop.f32.mrb[69].mxu0  ;;  %v1531_v23 = vpop.f32.mrb[69].mxu1  ;;  %v4381_v33 = vmax.f32 %v3303_v43, %v3464_v29  ;;  %v4382_v60 = vld [vmem:[#allocation9_spill] sm:$0xff] }
 0x1ac   : > { %v3725_v26 = vmax.f32 %v4377_v30, %v1418_v36  ;;  %v3730_v51 = vmax.f32 %v4380_v17, %v1531_v23  ;;  %v1420_v38 = vpop.f32.mrb[70].mxu0  ;;  %v1533_v32 = vpop.f32.mrb[70].mxu1  ;;  %v4384_v12 = vmax.f32 %v4382_v60, %v4383_v7  ;;  %v4385_v36 = vmax.f32 %v3307_v45, %v3472_v31  ;;  %v4386_v23 = vld [vmem:[#allocation10_spill] sm:$0xff]  ;;  %v4391_v60 = vld [vmem:[#allocation51_spill] sm:$0xff] }
 0x1ad   : > { %v3735_v28 = vmax.f32 %v4381_v33, %v1420_v38  ;;  %v1422_v40 = vpop.f32.mrb[71].mxu0  ;;  %v1535_v42 = vpop.f32.mrb[71].mxu1  ;;  %v4388_v16 = vmax.f32 %v4386_v23, %v4387_v14  ;;  %v4389_v38 = vmax.f32 %v3313_v47, %v3480_v35  ;;  %v4395_v23 = vld [vmem:[#allocation52_spill] sm:$0xff] }
 0x1ae   : > { %v3740_v22 = vmax.f32 %v4384_v12, %v1533_v32  ;;  %v3745_v30 = vmax.f32 %v4385_v36, %v1422_v40  ;;  %v4390_v32 = vld [vmem:[#allocation11_spill] sm:$0xff]  ;;  %v4393_v40 = vmax.f32 %v3317_v49, %v3488_v37 }
 0x1af   : > { %v3750_v17 = vmax.f32 %v4388_v16, %v1535_v42  ;;  %v4392_v7 = vmax.f32 %v4390_v32, %v4391_v60  ;;  %v4394_v42 = vld [vmem:[#allocation12_spill] sm:$0xff]  ;;  %v4399_v32 = vld [vmem:[#allocation53_spill] sm:$0xff] }
 0x1b0   : > { %v4396_v14 = vmax.f32 %v4394_v42, %v4395_v23  ;;  %v4403_v42 = vld [vmem:[#allocation54_spill] sm:$0xff] }
 0x1b2   : > { %v1426_v29 = vpop.f32.mrb[72].mxu0  ;;  %v1539_v43 = vpop.f32.mrb[72].mxu1 }
 0x1b3   : > { %v3755_v33 = vmax.f32 %v4389_v38, %v1426_v29  ;;  %v3760_v12 = vmax.f32 %v4392_v7, %v1539_v43  ;;  %v1428_v31 = vpop.f32.mrb[73].mxu0  ;;  %v1541_v45 = vpop.f32.mrb[73].mxu1  ;;  %v4397_v29 = vmax.f32 %v3322_v52, %v3496_v39  ;;  %v4398_v43 = vld [vmem:[#allocation13_spill] sm:$0xff] }
 0x1b4   : > { %v3765_v36 = vmax.f32 %v4393_v40, %v1428_v31  ;;  %v3770_v16 = vmax.f32 %v4396_v14, %v1541_v45  ;;  %v1430_v35 = vpop.f32.mrb[74].mxu0  ;;  %v1543_v47 = vpop.f32.mrb[74].mxu1  ;;  %v4400_v60 = vmax.f32 %v4398_v43, %v4399_v32  ;;  %v4401_v31 = vmax.f32 %v3326_v54, %v3504_v41  ;;  %v4402_v45 = vld [vmem:[#allocation14_spill] sm:$0xff]  ;;  %v4407_v43 = vld [vmem:[#allocation55_spill] sm:$0xff] }
 0x1b5   : > { %v3775_v38 = vmax.f32 %v4397_v29, %v1430_v35  ;;  %v1432_v37 = vpop.f32.mrb[75].mxu0  ;;  %v1545_v49 = vpop.f32.mrb[75].mxu1  ;;  %v4404_v23 = vmax.f32 %v4402_v45, %v4403_v42  ;;  %v4405_v35 = vmax.f32 %v3332_v56, %v3512_v44  ;;  %v4411_v45 = vld [vmem:[#allocation56_spill] sm:$0xff] }
 0x1b6   : > { %v3780_v7 = vmax.f32 %v4400_v60, %v1543_v47  ;;  %v3785_v40 = vmax.f32 %v4401_v31, %v1432_v37  ;;  %v4406_v47 = vld [vmem:[#allocation15_spill] sm:$0xff]  ;;  %v4409_v37 = vmax.f32 %v3336_v58, %v3520_v46 }
 0x1b7   : > { %v3790_v14 = vmax.f32 %v4404_v23, %v1545_v49  ;;  %v4408_v32 = vmax.f32 %v4406_v47, %v4407_v43  ;;  %v4410_v49 = vld [vmem:[#allocation16_spill] sm:$0xff]  ;;  %v4415_v47 = vld [vmem:[#allocation57_spill] sm:$0xff] }
 0x1b8   : > { %v4412_v42 = vmax.f32 %v4410_v49, %v4411_v45  ;;  %v4419_v49 = vld [vmem:[#allocation58_spill] sm:$0xff] }
 0x1ba   : > { %v1436_v39 = vpop.f32.mrb[76].mxu0  ;;  %v1549_v52 = vpop.f32.mrb[76].mxu1 }
 0x1bb   : > { %v3795_v29 = vmax.f32 %v4405_v35, %v1436_v39  ;;  %v3800_v60 = vmax.f32 %v4408_v32, %v1549_v52  ;;  %v1438_v41 = vpop.f32.mrb[77].mxu0  ;;  %v1551_v54 = vpop.f32.mrb[77].mxu1  ;;  %v4413_v39 = vmax.f32 %v3341_v61, %v3528_v48  ;;  %v4414_v52 = vld [vmem:[#allocation17_spill] sm:$0xff] }
 0x1bc   : > { %v3805_v31 = vmax.f32 %v4409_v37, %v1438_v41  ;;  %v3810_v23 = vmax.f32 %v4412_v42, %v1551_v54  ;;  %v1440_v44 = vpop.f32.mrb[78].mxu0  ;;  %v1553_v56 = vpop.f32.mrb[78].mxu1  ;;  %v4416_v43 = vmax.f32 %v4414_v52, %v4415_v47  ;;  %v4417_v41 = vmax.f32 %v3345_v63, %v3536_v50  ;;  %v4418_v54 = vld [vmem:[#allocation18_spill] sm:$0xff]  ;;  %v4423_v52 = vld [vmem:[#allocation59_spill] sm:$0xff] }
 0x1bd   : > { %v3815_v35 = vmax.f32 %v4413_v39, %v1440_v44  ;;  %v1442_v46 = vpop.f32.mrb[79].mxu0  ;;  %v1555_v58 = vpop.f32.mrb[79].mxu1  ;;  %v4420_v45 = vmax.f32 %v4418_v54, %v4419_v49  ;;  %v4421_v44 = vmax.f32 %v3351_v1, %v3544_v53  ;;  %v4427_v54 = vld [vmem:[#allocation60_spill] sm:$0xff] }
 0x1be   : > { %v3820_v32 = vmax.f32 %v4416_v43, %v1553_v56  ;;  %v3825_v37 = vmax.f32 %v4417_v41, %v1442_v46  ;;  %v4422_v56 = vld [vmem:[#allocation19_spill] sm:$0xff]  ;;  %v4425_v46 = vmax.f32 %v3355_v3, %v3552_v55 }
 0x1bf   : > { %v3830_v42 = vmax.f32 %v4420_v45, %v1555_v58  ;;  %v4424_v47 = vmax.f32 %v4422_v56, %v4423_v52  ;;  %v4426_v58 = vld [vmem:[#allocation20_spill] sm:$0xff]  ;;  %v4431_v56 = vld [vmem:[#allocation61_spill] sm:$0xff] }
 0x1c0   : > { %v4428_v49 = vmax.f32 %v4426_v58, %v4427_v54  ;;  %v4435_v58 = vld [vmem:[#allocation62_spill] sm:$0xff] }
 0x1c2   : > { %v1446_v48 = vpop.f32.mrb[80].mxu0  ;;  %v1559_v61 = vpop.f32.mrb[80].mxu1 }
 0x1c3   : > { %v3835_v39 = vmax.f32 %v4421_v44, %v1446_v48  ;;  %v3840_v43 = vmax.f32 %v4424_v47, %v1559_v61  ;;  %v1448_v50 = vpop.f32.mrb[81].mxu0  ;;  %v1561_v63 = vpop.f32.mrb[81].mxu1  ;;  %v4429_v48 = vmax.f32 %v3360_v6, %v3560_v57  ;;  %v4430_v61 = vld [vmem:[#allocation21_spill] sm:$0xff] }
 0x1c4   : > { %v3845_v41 = vmax.f32 %v4425_v46, %v1448_v50  ;;  %v3850_v45 = vmax.f32 %v4428_v49, %v1561_v63  ;;  %v1450_v53 = vpop.f32.mrb[82].mxu0  ;;  %v1563_v1 = vpop.f32.mrb[82].mxu1  ;;  %v4432_v52 = vmax.f32 %v4430_v61, %v4431_v56  ;;  %v4433_v50 = vmax.f32 %v3364_v8, %v3568_v59  ;;  %v4434_v63 = vld [vmem:[#allocation22_spill] sm:$0xff]  ;;  %v4439_v61 = vld [vmem:[#allocation63_spill] sm:$0xff] }
 0x1c5   : > { %v3855_v44 = vmax.f32 %v4429_v48, %v1450_v53  ;;  %v1452_v55 = vpop.f32.mrb[83].mxu0  ;;  %v1565_v3 = vpop.f32.mrb[83].mxu1  ;;  %v4436_v54 = vmax.f32 %v4434_v63, %v4435_v58  ;;  %v4437_v53 = vmax.f32 %v3368_v34, %v3576_v62  ;;  %v4444_v63 = vld [vmem:[#allocation64_spill] sm:$0xff] }
 0x1c6   : > { %v3860_v47 = vmax.f32 %v4432_v52, %v1563_v1  ;;  %v3865_v46 = vmax.f32 %v4433_v50, %v1452_v55  ;;  %v4438_v1 = vld [vmem:[#allocation23_spill] sm:$0xff]  ;;  %v4441_v55 = vmax.f32 %v3372_v11, %v3584_v0 }
 0x1c7   : > { %v3870_v49 = vmax.f32 %v4436_v54, %v1565_v3  ;;  %v4440_v56 = vmax.f32 %v4438_v1, %v4439_v61  ;;  %v4443_v3 = vld [vmem:[#allocation24_spill] sm:$0xff]  ;;  %v4450_v1 = vld [vmem:[#allocation65_spill] sm:$0xff] }
 0x1c8   : > { %v4445_v58 = vmax.f32 %v4443_v3, %v4444_v63  ;;  %v4456_v3 = vld [vmem:[#allocation66_spill] sm:$0xff] }
 0x1ca   : > { %v1456_v57 = vpop.f32.mrb[84].mxu0  ;;  %v1569_v6 = vpop.f32.mrb[84].mxu1 }
 0x1cb   : > { %v3875_v48 = vmax.f32 %v4437_v53, %v1456_v57  ;;  %v3880_v52 = vmax.f32 %v4440_v56, %v1569_v6  ;;  %v1458_v59 = vpop.f32.mrb[85].mxu0  ;;  %v1571_v8 = vpop.f32.mrb[85].mxu1  ;;  %v4447_v57 = vmax.f32 %v3376_v13, %v3592_v2  ;;  %v4449_v6 = vld [vmem:[#allocation25_spill] sm:$0xff] }
 0x1cc   : > { %v3885_v50 = vmax.f32 %v4441_v55, %v1458_v59  ;;  %v3890_v54 = vmax.f32 %v4445_v58, %v1571_v8  ;;  %v1460_v62 = vpop.f32.mrb[86].mxu0  ;;  %v1573_v34 = vpop.f32.mrb[86].mxu1  ;;  %v4451_v61 = vmax.f32 %v4449_v6, %v4450_v1  ;;  %v4453_v59 = vmax.f32 %v3380_v15, %v3600_v4  ;;  %v4455_v8 = vld [vmem:[#allocation26_spill] sm:$0xff]  ;;  %v4464_v1 = vld [vmem:[#allocation68_spill] sm:$0xff] }
 0x1cd   : > { %v3895_v53 = vmax.f32 %v4447_v57, %v1460_v62  ;;  %v1462_v0 = vpop.f32.mrb[87].mxu0  ;;  %v1575_v11 = vpop.f32.mrb[87].mxu1  ;;  %v4457_v63 = vmax.f32 %v4455_v8, %v4456_v3  ;;  %v4459_v62 = vld [vmem:[#allocation27_spill] sm:$0xff]  ;;  %v4472_v3 = vld [vmem:[#allocation70_spill] sm:$0xff] }
 0x1ce   : > { %4442 = vst [vmem:[#allocation3_spill] sm:$0xff] %v3885_v50  ;;  %4446 = vst [vmem:[#allocation43_spill] sm:$0xff] %v3890_v54  ;;  %v3900_v56 = vmax.f32 %v4451_v61, %v1573_v34  ;;  %v3905_v55 = vmax.f32 %v4453_v59, %v1462_v0  ;;  %v4460_v57 = vld [vmem:[#allocation67_spill] sm:$0xff]  ;;  %v4463_v34 = vld [vmem:[#allocation28_spill] sm:$0xff] }
 0x1cf   : > { %4448 = vst [vmem:[#allocation4_spill] sm:$0xff] %v3895_v53  ;;  %v3910_v58 = vmax.f32 %v4457_v63, %v1575_v11  ;;  %v4461_v53 = vmax.f32 %v4459_v62, %v4460_v57  ;;  %v4465_v61 = vmax.f32 %v4463_v34, %v4464_v1  ;;  %v4467_v0 = vld [vmem:[#allocation29_spill] sm:$0xff]  ;;  %v4471_v11 = vld [vmem:[#allocation30_spill] sm:$0xff]  ;;  %v4476_v57 = vld [vmem:[#allocation71_spill] sm:$0xff] }
 0x1d0   : > { %4452 = vst [vmem:[#allocation44_spill] sm:$0xff] %v3900_v56  ;;  %4454 = vst [vmem:[#allocation5_spill] sm:$0xff] %v3905_v55  ;;  %v4468_v59 = vld [vmem:[#allocation69_spill] sm:$0xff]  ;;  %v4473_v63 = vmax.f32 %v4471_v11, %v4472_v3  ;;  %v4479_v1 = vld [vmem:[#allocation32_spill] sm:$0xff] }
 0x1d1   : > { %4458 = vst [vmem:[#allocation45_spill] sm:$0xff] %v3910_v58  ;;  %v4469_v55 = vmax.f32 %v4467_v0, %v4468_v59  ;;  %v2019_v0 = vlaneseq  ;;  %v4483_v59 = vld [vmem:[#allocation33_spill] sm:$0xff] }
 0x1d2   : > { %v1466_v2 = vpop.f32.mrb[88].mxu0  ;;  %v1579_v13 = vpop.f32.mrb[88].mxu1  ;;  %v4484_v11 = vld [vmem:[#allocation73_spill] sm:$0xff] }
 0x1d3   : > { %v3915_v6 = vmax.f32 %v4461_v53, %v1466_v2  ;;  %v3920_v56 = vmax.f32 %v4465_v61, %v1579_v13  ;;  %v1468_v4 = vpop.f32.mrb[89].mxu0  ;;  %v1581_v15 = vpop.f32.mrb[89].mxu1  ;;  %v4475_v2 = vld [vmem:[#allocation31_spill] sm:$0xff]  ;;  %v4480_v61 = vld [vmem:[#allocation72_spill] sm:$0xff] }
 0x1d4   : > { %v3925_v8 = vmax.f32 %v4469_v55, %v1468_v4  ;;  %v3930_v58 = vmax.f32 %v4473_v63, %v1581_v15  ;;  %v1470_v62 = vpop.f32.mrb[90].mxu0  ;;  %v1583_v53 = vpop.f32.mrb[90].mxu1  ;;  %v4477_v34 = vmax.f32 %v4475_v2, %v4476_v57  ;;  %v4485_v15 = vmax.f32 %v4483_v59, %v4484_v11  ;;  %v4487_v63 = vld [vmem:[#allocation34_spill] sm:$0xff] }
 0x1d5   : > { %4462 = vst [vmem:[#allocation6_spill] sm:$0xff] %v3915_v6  ;;  %4466 = vst [vmem:[#allocation46_spill] sm:$0xff] %v3920_v56  ;;  %v4481_v56 = vmax.f32 %v4479_v1, %v4480_v61  ;;  %v1472_v55 = vpop.f32.mrb[91].mxu0  ;;  %v1585_v4 = vpop.f32.mrb[91].mxu1  ;;  %v4492_v1 = vld [vmem:[#allocation75_spill] sm:$0xff]  ;;  %v4495_v61 = vld [vmem:[#allocation36_spill] sm:$0xff] }
 0x1d6   : > { %4470 = vst [vmem:[#allocation7_spill] sm:$0xff] %v3925_v8  ;;  %4474 = vst [vmem:[#allocation47_spill] sm:$0xff] %v3930_v58  ;;  %v3935_v13 = vmax.f32 %v4477_v34, %v1470_v62  ;;  %v3945_v3 = vmax.f32 %v4485_v15, %v1472_v55  ;;  %v4488_v58 = vld [vmem:[#allocation74_spill] sm:$0xff]  ;;  %v2020_v62 = vshrl.u32 %v2019_v0, 7  ;;  %v4491_v34 = vld [vmem:[#allocation35_spill] sm:$0xff] }
 0x1d7   : > { %v3940_v6 = vmax.f32 %v4481_v56, %v1583_v53  ;;  %v4489_v8 = vmax.f32 %v4487_v63, %v4488_v58  ;;  %v4493_v56 = vmax.f32 %v4491_v34, %v4492_v1  ;;  %v4499_v58 = vld [vmem:[#allocation37_spill] sm:$0xff]  ;;  %v4503_v11 = vld [vmem:[#allocation38_spill] sm:$0xff] }
 0x1d8   : > { %4478 = vst [vmem:[#allocation8_spill] sm:$0xff] %v3935_v13  ;;  %4486 = vst [vmem:[#allocation9_spill] sm:$0xff] %v3945_v3  ;;  %v4504_v15 = vld [vmem:[#allocation78_spill] sm:$0xff] }
 0x1d9   : > { %4482 = vst [vmem:[#allocation48_spill] sm:$0xff] %v3940_v6  ;;  %v3950_v54 = vmax.f32 %v4489_v8, %v1585_v4  ;;  %v4496_v6 = vld [vmem:[#allocation76_spill] sm:$0xff]  ;;  %v4500_v8 = vld [vmem:[#allocation77_spill] sm:$0xff]  ;;  %v4505_v63 = vmax.f32 %v4503_v11, %v4504_v15 }
 0x1da   : > { %v1476_v2 = vpop.f32.mrb[92].mxu0  ;;  %v1589_v57 = vpop.f32.mrb[92].mxu1  ;;  %v4497_v13 = vmax.f32 %v4495_v61, %v4496_v6  ;;  %v4501_v4 = vmax.f32 %v4499_v58, %v4500_v8  ;;  %v4508_v6 = vld [vmem:[#allocation79_spill] sm:$0xff]  ;;  %v4510_v61 = vld [vmem:[#allocation40_spill] sm:$0xff]  ;;  %v2021_v8 = vsub.s32 0, %v2020_v62  ;;  %v4514_v11 = vld [vmem:[#allocation81_spill] sm:$0xff] }
 0x1db   : > { %4490 = vst [vmem:[#allocation49_spill] sm:$0xff] %v3950_v54  ;;  %v3955_v53 = vmax.f32 %v4493_v56, %v1476_v2  ;;  %v1478_v55 = vpop.f32.mrb[93].mxu0  ;;  %v1591_v59 = vpop.f32.mrb[93].mxu1  ;;  %v4507_v56 = vld [vmem:[#allocation39_spill] sm:$0xff] }
 0x1dc   : > { %v3960_v50 = vmax.f32 %v4497_v13, %v1589_v57  ;;  %v3967_v0 = vmax.f32 %v4501_v4, %v1478_v55  ;;  %v3972_v34 = vmax.f32 %v4505_v63, %v1591_v59  ;;  %v1480_v2 = vpop.f32.mrb[94].mxu0  ;;  %v1593_v1 = vpop.f32.mrb[94].mxu1  ;;  %v4509_v13 = vmax.f32 %v4507_v56, %v4508_v6  ;;  %v4516_v63 = vld [vmem:[#allocation42_spill] sm:$0xff] }
 0x1dd   : > { %4494 = vst [vmem:[#allocation10_spill] sm:$0xff] %v3955_v53  ;;  %v1482_v58 = vpop.f32.mrb[95].mxu0  ;;  %v1595_v55 = vpop.f32.mrb[95].mxu1  ;;  %v2029_v4 = vsub.s32 2, %v2020_v62 }
 0x1de   : > { %4498 = vst [vmem:[#allocation50_spill] sm:$0xff] %v3960_v50  ;;  %4502 = vst [vmem:[#allocation11_spill] sm:$0xff] %v3967_v0  ;;  %v3977_v57 = vmax.f32 %v4509_v13, %v1480_v2  ;;  %v4511_v50 = vld [vmem:[#allocation80_spill] sm:$0xff]  ;;  %v4513_v0 = vld [vmem:[#allocation41_spill] sm:$0xff]  ;;  %v2033_v2 = vsub.s32 3, %v2020_v62 }
 0x1df   : > { %4506 = vst [vmem:[#allocation51_spill] sm:$0xff] %v3972_v34  ;;  %v4512_v53 = vmax.f32 %v4510_v61, %v4511_v50  ;;  %v4515_v59 = vmax.f32 %v4513_v0, %v4514_v11  ;;  %v4517_v34 = vld [vmem:[#allocation82_spill] sm:$0xff]  ;;  %v2017_v50 = vld [vmem:[%s4185_s2] sm:$0xf] }
 0x1e0   : > { %v4518_v3 = vmax.f32 %v4516_v63, %v4517_v34  ;;  %v3999_v6 = vrot.slane %v2017_v50, %v2029_v4 }
 0x1e1   : > { %v3982_v54 = vmax.f32 %v4512_v53, %v1593_v1  ;;  %v3987_v15 = vmax.f32 %v4515_v59, %v1482_v58  ;;  %v2025_v53 = vsub.s32 1, %v2020_v62  ;;  %v3997_v1 = vrot.slane %v2017_v50, %v2021_v8 }
 0x1e2   : > { %v3992_v56 = vmax.f32 %v4518_v3, %v1595_v55  ;;  %v1761_v13 = vpop.f32.mrb[96].mxu0  ;;  %v1874_v0 = vpop.f32.mrb[96].mxu1  ;;  %v4005_v3 = vrot.slane %v2017_v50, %v2033_v2 }
 0x1e3   : > { %v4003_v61 = vrot.slane %v2017_v50, %v2025_v53  ;;  %v1953_v34 = vmax.f32 %v3675_v19, %v1761_v13  ;;  %v1955_v58 = vmax.f32 %v3680_v24, %v1874_v0  ;;  %v1763_v55 = vpop.f32.mrb[97].mxu0  ;;  %v1876_v11 = vpop.f32.mrb[97].mxu1 }
 0x1e4   : > { %4519 = vst [vmem:[#allocation12_spill] sm:$0xff] %v3992_v56  ;;  %v1954_v62 = vmax.f32 %v3685_v20, %v1763_v55  ;;  %v1956_v8 = vmax.f32 %v3690_v9, %v1876_v11  ;;  %v1765_v4 = vpop.f32.mrb[98].mxu0  ;;  %v1878_v59 = vpop.f32.mrb[98].mxu1 }
 0x1e5   : > { %v2039_v63 = vadd.f32 %v3997_v1, %v1953_v34  ;;  %v2041_v53 = vadd.f32 %v3999_v6, %v1955_v58  ;;  %v1957_v56 = vmax.f32 %v3695_v18, %v1765_v4  ;;  %v1959_v50 = vmax.f32 %v3700_v27, %v1878_v59  ;;  %v1767_v2 = vpop.f32.mrb[99].mxu0  ;;  %v1880_v19 = vpop.f32.mrb[99].mxu1 }
 0x1e6   : > { %v2040_v24 = vadd.f32 %v4003_v61, %v1954_v62  ;;  %v2042_v13 = vadd.f32 %v4005_v3, %v1956_v8  ;;  %v1958_v20 = vmax.f32 %v3705_v10, %v1767_v2  ;;  %v1960_v9 = vmax.f32 %v3710_v5, %v1880_v19 }
 0x1e7   : > { %v2103_v0 = vmax.f32 %v2039_v63, 0.0  ;;  %v2105_v55 = vmax.f32 %v2041_v53, 0.0  ;;  %v2043_v34 = vadd.f32 %v3997_v1, %v1957_v56  ;;  %v2045_v58 = vadd.f32 %v3999_v6, %v1959_v50 }
 0x1e8   : > { %v2104_v18 = vmax.f32 %v2040_v24, 0.0  ;;  %v2106_v11 = vmax.f32 %v2042_v13, 0.0  ;;  %v2044_v27 = vadd.f32 %v4003_v61, %v1958_v20  ;;  %v2046_v4 = vadd.f32 %v4005_v3, %v1960_v9 }
 0x1e9   : > { %v2107_v10 = vmax.f32 %v2043_v34, 0.0  ;;  %v2109_v5 = vmax.f32 %v2045_v58, 0.0 }
 0x1ea   : > { %v2615_v62 = vpack.c.bf16 %v2104_v18, %v2103_v0  ;;  %v2616_v8 = vpack.c.bf16 %v2106_v11, %v2105_v55  ;;  %v2108_v56 = vmax.f32 %v2044_v27, 0.0  ;;  %v2110_v59 = vmax.f32 %v2046_v4, 0.0  ;;  %v1771_v63 = vpop.f32.mrb[100].mxu0  ;;  %v1884_v53 = vpop.f32.mrb[100].mxu1 }
 0x1eb   : > { %v1961_v50 = vmax.f32 %v3715_v21, %v1771_v63  ;;  %v1963_v2 = vmax.f32 %v3720_v25, %v1884_v53  ;;  %v1773_v19 = vpop.f32.mrb[101].mxu0  ;;  %v1886_v24 = vpop.f32.mrb[101].mxu1 }
 0x1ec   : > { %2359 = vst [vmem:[%s4027_s6] sm:$0xff] %v2615_v62  ;;  %2360 = vst [vmem:[%s4027_s6 + $0x8] sm:$0xff] %v2616_v8  ;;  %v2617_v13 = vpack.c.bf16 %v2108_v56, %v2107_v10  ;;  %v2618_v20 = vpack.c.bf16 %v2110_v59, %v2109_v5  ;;  %v1962_v9 = vmax.f32 %v3725_v26, %v1773_v19  ;;  %v1775_v55 = vpop.f32.mrb[102].mxu0  ;;  %v1888_v34 = vpop.f32.mrb[102].mxu1 }
 0x1ed   : > { %v1964_v0 = vmax.f32 %v3730_v51, %v1886_v24  ;;  %v2047_v58 = vadd.f32 %v3997_v1, %v1961_v50  ;;  %v2049_v21 = vadd.f32 %v3999_v6, %v1963_v2  ;;  %v1965_v25 = vmax.f32 %v3735_v28, %v1775_v55  ;;  %v1777_v11 = vpop.f32.mrb[103].mxu0  ;;  %v1890_v27 = vpop.f32.mrb[103].mxu1 }
 0x1ee   : > { %v1967_v18 = vmax.f32 %v3740_v22, %v1888_v34  ;;  %2361 = vst [vmem:[%s4027_s6 + $0x10] sm:$0xff] %v2617_v13  ;;  %2362 = vst [vmem:[%s4027_s6 + $0x18] sm:$0xff] %v2618_v20  ;;  %v2048_v4 = vadd.f32 %v4003_v61, %v1962_v9  ;;  %v1966_v51 = vmax.f32 %v3745_v30, %v1777_v11 }
 0x1ef   : > { %v2050_v26 = vadd.f32 %v4005_v3, %v1964_v0  ;;  %v1968_v10 = vmax.f32 %v3750_v17, %v1890_v27  ;;  %v2111_v5 = vmax.f32 %v2047_v58, 0.0  ;;  %v2113_v62 = vmax.f32 %v2049_v21, 0.0 }
 0x1f0   : > { %v2051_v8 = vadd.f32 %v3997_v1, %v1965_v25  ;;  %v2053_v28 = vadd.f32 %v3999_v6, %v1967_v18  ;;  %v2112_v56 = vmax.f32 %v2048_v4, 0.0  ;;  %v2052_v59 = vadd.f32 %v4003_v61, %v1966_v51 }
 0x1f1   : > { %v2114_v22 = vmax.f32 %v2050_v26, 0.0  ;;  %v2054_v63 = vadd.f32 %v4005_v3, %v1968_v10 }
 0x1f2   : > { %v2115_v53 = vmax.f32 %v2051_v8, 0.0  ;;  %v2117_v50 = vmax.f32 %v2053_v28, 0.0  ;;  %v2619_v2 = vpack.c.bf16 %v2112_v56, %v2111_v5  ;;  %v2116_v19 = vmax.f32 %v2052_v59, 0.0  ;;  %v1781_v24 = vpop.f32.mrb[104].mxu0  ;;  %v1894_v13 = vpop.f32.mrb[104].mxu1 }
 0x1f3   : > { %v2620_v30 = vpack.c.bf16 %v2114_v22, %v2113_v62  ;;  %v2118_v17 = vmax.f32 %v2054_v63, 0.0  ;;  %v1969_v20 = vmax.f32 %v3755_v33, %v1781_v24  ;;  %v1971_v9 = vmax.f32 %v3760_v12, %v1894_v13  ;;  %v1783_v0 = vpop.f32.mrb[105].mxu0  ;;  %v1896_v55 = vpop.f32.mrb[105].mxu1 }
 0x1f4   : > { %2363 = vst [vmem:[%s4027_s6 + $0x20] sm:$0xff] %v2619_v2  ;;  %v2621_v34 = vpack.c.bf16 %v2116_v19, %v2115_v53  ;;  %v1970_v21 = vmax.f32 %v3765_v36, %v1783_v0  ;;  %v1972_v25 = vmax.f32 %v3770_v16, %v1896_v55  ;;  %v1785_v18 = vpop.f32.mrb[106].mxu0  ;;  %v1898_v11 = vpop.f32.mrb[106].mxu1 }
 0x1f5   : > { %2364 = vst [vmem:[%s4027_s6 + $0x28] sm:$0xff] %v2620_v30  ;;  %v2622_v58 = vpack.c.bf16 %v2118_v17, %v2117_v50  ;;  %v2055_v27 = vadd.f32 %v3997_v1, %v1969_v20  ;;  %v2057_v33 = vadd.f32 %v3999_v6, %v1971_v9  ;;  %v1973_v12 = vmax.f32 %v3775_v38, %v1785_v18  ;;  %v1787_v26 = vpop.f32.mrb[107].mxu0  ;;  %v1900_v51 = vpop.f32.mrb[107].mxu1 }
 0x1f6   : > { %v1975_v4 = vmax.f32 %v3780_v7, %v1898_v11  ;;  %2365 = vst [vmem:[%s4027_s6 + $0x30] sm:$0xff] %v2621_v34  ;;  %v2056_v10 = vadd.f32 %v4003_v61, %v1970_v21  ;;  %v2058_v36 = vadd.f32 %v4005_v3, %v1972_v25  ;;  %v1974_v16 = vmax.f32 %v3785_v40, %v1787_v26 }
 0x1f7   : > { %2366 = vst [vmem:[%s4027_s6 + $0x38] sm:$0xff] %v2622_v58  ;;  %v1976_v5 = vmax.f32 %v3790_v14, %v1900_v51  ;;  %v2119_v62 = vmax.f32 %v2055_v27, 0.0  ;;  %v2121_v8 = vmax.f32 %v2057_v33, 0.0  ;;  %v2059_v28 = vadd.f32 %v3997_v1, %v1973_v12 }
 0x1f8   : > { %v2061_v38 = vadd.f32 %v3999_v6, %v1975_v4  ;;  %v2120_v56 = vmax.f32 %v2056_v10, 0.0  ;;  %v2122_v7 = vmax.f32 %v2058_v36, 0.0  ;;  %v2060_v22 = vadd.f32 %v4003_v61, %v1974_v16 }
 0x1f9   : > { %v2062_v59 = vadd.f32 %v4005_v3, %v1976_v5  ;;  %v2123_v63 = vmax.f32 %v2059_v28, 0.0 }
 0x1fa   : > { %v2125_v53 = vmax.f32 %v2061_v38, 0.0  ;;  %v2623_v50 = vpack.c.bf16 %v2120_v56, %v2119_v62  ;;  %v2624_v40 = vpack.c.bf16 %v2122_v7, %v2121_v8  ;;  %v2124_v2 = vmax.f32 %v2060_v22, 0.0  ;;  %v1791_v30 = vpop.f32.mrb[108].mxu0  ;;  %v1904_v19 = vpop.f32.mrb[108].mxu1 }
 0x1fb   : > { %v2126_v14 = vmax.f32 %v2062_v59, 0.0  ;;  %v1977_v17 = vmax.f32 %v3795_v29, %v1791_v30  ;;  %v1979_v24 = vmax.f32 %v3800_v60, %v1904_v19  ;;  %v1793_v13 = vpop.f32.mrb[109].mxu0  ;;  %v1906_v20 = vpop.f32.mrb[109].mxu1 }
 0x1fc   : > { %2367 = vst [vmem:[%s4027_s6 + $0x40] sm:$0xff] %v2623_v50  ;;  %2368 = vst [vmem:[%s4027_s6 + $0x48] sm:$0xff] %v2624_v40  ;;  %v2625_v9 = vpack.c.bf16 %v2124_v2, %v2123_v63  ;;  %v1978_v55 = vmax.f32 %v3805_v31, %v1793_v13  ;;  %v1980_v34 = vmax.f32 %v3810_v23, %v1906_v20  ;;  %v1795_v58 = vpop.f32.mrb[110].mxu0  ;;  %v1908_v21 = vpop.f32.mrb[110].mxu1 }
 0x1fd   : > { %v2626_v0 = vpack.c.bf16 %v2126_v14, %v2125_v53  ;;  %v2063_v25 = vadd.f32 %v3997_v1, %v1977_v17  ;;  %v2065_v29 = vadd.f32 %v3999_v6, %v1979_v24  ;;  %v1981_v60 = vmax.f32 %v3815_v35, %v1795_v58  ;;  %v1797_v11 = vpop.f32.mrb[111].mxu0  ;;  %v1910_v27 = vpop.f32.mrb[111].mxu1 }
 0x1fe   : > { %v1983_v18 = vmax.f32 %v3820_v32, %v1908_v21  ;;  %2369 = vst [vmem:[%s4027_s6 + $0x50] sm:$0xff] %v2625_v9  ;;  %v2064_v33 = vadd.f32 %v4003_v61, %v1978_v55  ;;  %v2066_v31 = vadd.f32 %v4005_v3, %v1980_v34  ;;  %v1982_v23 = vmax.f32 %v3825_v37, %v1797_v11 }
 0x1ff   : > { %2370 = vst [vmem:[%s4027_s6 + $0x58] sm:$0xff] %v2626_v0  ;;  %v1984_v12 = vmax.f32 %v3830_v42, %v1910_v27  ;;  %v2127_v4 = vmax.f32 %v2063_v25, 0.0  ;;  %v2129_v26 = vmax.f32 %v2065_v29, 0.0  ;;  %v2067_v51 = vadd.f32 %v3997_v1, %v1981_v60 }
 0x200   : > { %v2069_v35 = vadd.f32 %v3999_v6, %v1983_v18  ;;  %v2128_v10 = vmax.f32 %v2064_v33, 0.0  ;;  %v2130_v32 = vmax.f32 %v2066_v31, 0.0  ;;  %v2068_v36 = vadd.f32 %v4003_v61, %v1982_v23 }
 0x201   : > { %v2070_v16 = vadd.f32 %v4005_v3, %v1984_v12  ;;  %v2131_v5 = vmax.f32 %v2067_v51, 0.0 }
 0x202   : > { %v2133_v62 = vmax.f32 %v2069_v35, 0.0  ;;  %v2627_v8 = vpack.c.bf16 %v2128_v10, %v2127_v4  ;;  %v2628_v37 = vpack.c.bf16 %v2130_v32, %v2129_v26  ;;  %v2132_v28 = vmax.f32 %v2068_v36, 0.0  ;;  %v1801_v38 = vpop.f32.mrb[112].mxu0  ;;  %v1914_v56 = vpop.f32.mrb[112].mxu1  ;;  %v4520_v35 = vld [vmem:[#allocation3_spill] sm:$0xff] }
 0x203   : > { %v2134_v42 = vmax.f32 %v2070_v16, 0.0  ;;  %v1985_v7 = vmax.f32 %v3835_v39, %v1801_v38  ;;  %v1987_v22 = vmax.f32 %v3840_v43, %v1914_v56  ;;  %v1803_v59 = vpop.f32.mrb[113].mxu0  ;;  %v1916_v63 = vpop.f32.mrb[113].mxu1  ;;  %v4521_v32 = vld [vmem:[#allocation43_spill] sm:$0xff] }
 0x204   : > { %2371 = vst [vmem:[%s4027_s6 + $0x60] sm:$0xff] %v2627_v8  ;;  %2372 = vst [vmem:[%s4027_s6 + $0x68] sm:$0xff] %v2628_v37  ;;  %v2629_v53 = vpack.c.bf16 %v2132_v28, %v2131_v5  ;;  %v1986_v40 = vmax.f32 %v3845_v41, %v1803_v59  ;;  %v1988_v2 = vmax.f32 %v3850_v45, %v1916_v63  ;;  %v1805_v14 = vpop.f32.mrb[114].mxu0  ;;  %v1918_v30 = vpop.f32.mrb[114].mxu1  ;;  %v4522_v8 = vld [vmem:[#allocation4_spill] sm:$0xff]  ;;  %v4525_v63 = vld [vmem:[#allocation45_spill] sm:$0xff] }
 0x205   : > { %v2630_v50 = vpack.c.bf16 %v2134_v42, %v2133_v62  ;;  %v2071_v19 = vadd.f32 %v3997_v1, %v1985_v7  ;;  %v2073_v39 = vadd.f32 %v3999_v6, %v1987_v22  ;;  %v1989_v43 = vmax.f32 %v3855_v44, %v1805_v14  ;;  %v1807_v24 = vpop.f32.mrb[115].mxu0  ;;  %v1920_v13 = vpop.f32.mrb[115].mxu1  ;;  %v4523_v37 = vld [vmem:[#allocation44_spill] sm:$0xff]  ;;  %v4524_v22 = vld [vmem:[#allocation5_spill] sm:$0xff] }
 0x206   : > { %v1991_v17 = vmax.f32 %v3860_v47, %v1918_v30  ;;  %2373 = vst [vmem:[%s4027_s6 + $0x70] sm:$0xff] %v2629_v53  ;;  %v2072_v20 = vadd.f32 %v4003_v61, %v1986_v40  ;;  %v2074_v41 = vadd.f32 %v4005_v3, %v1988_v2  ;;  %v1990_v45 = vmax.f32 %v3865_v46, %v1807_v24 }
 0x207   : > { %2374 = vst [vmem:[%s4027_s6 + $0x78] sm:$0xff] %v2630_v50  ;;  %v1992_v9 = vmax.f32 %v3870_v49, %v1920_v13  ;;  %v2135_v0 = vmax.f32 %v2071_v19, 0.0  ;;  %v2137_v55 = vmax.f32 %v2073_v39, 0.0  ;;  %v2075_v34 = vadd.f32 %v3997_v1, %v1989_v43 }
 0x208   : > { %v2077_v44 = vadd.f32 %v3999_v6, %v1991_v17  ;;  %v2136_v58 = vmax.f32 %v2072_v20, 0.0  ;;  %v2138_v47 = vmax.f32 %v2074_v41, 0.0  ;;  %v2076_v21 = vadd.f32 %v4003_v61, %v1990_v45 }
 0x209   : > { %v2078_v25 = vadd.f32 %v4005_v3, %v1992_v9  ;;  %v2139_v29 = vmax.f32 %v2075_v34, 0.0 }
 0x20a   : > { %v2141_v60 = vmax.f32 %v2077_v44, 0.0  ;;  %v2631_v18 = vpack.c.bf16 %v2136_v58, %v2135_v0  ;;  %v2632_v46 = vpack.c.bf16 %v2138_v47, %v2137_v55  ;;  %v2140_v11 = vmax.f32 %v2076_v21, 0.0  ;;  %v1811_v27 = vpop.f32.mrb[116].mxu0  ;;  %v1924_v33 = vpop.f32.mrb[116].mxu1  ;;  %v4526_v55 = vld [vmem:[#allocation6_spill] sm:$0xff] }
 0x20b   : > { %v2142_v49 = vmax.f32 %v2078_v25, 0.0  ;;  %v1993_v31 = vmax.f32 %v3875_v48, %v1811_v27  ;;  %v1995_v23 = vmax.f32 %v3880_v52, %v1924_v33  ;;  %v1813_v12 = vpop.f32.mrb[117].mxu0  ;;  %v1926_v4 = vpop.f32.mrb[117].mxu1  ;;  %v4527_v44 = vld [vmem:[#allocation46_spill] sm:$0xff] }
 0x20c   : > { %2375 = vst [vmem:[%s4027_s6 + $0x80] sm:$0xff] %v2631_v18  ;;  %2376 = vst [vmem:[%s4027_s6 + $0x88] sm:$0xff] %v2632_v46  ;;  %v2633_v26 = vpack.c.bf16 %v2140_v11, %v2139_v29  ;;  %v1994_v10 = vmax.f32 %v4520_v35, %v1813_v12  ;;  %v1996_v36 = vmax.f32 %v4521_v32, %v1926_v4  ;;  %v1815_v16 = vpop.f32.mrb[118].mxu0  ;;  %v1928_v5 = vpop.f32.mrb[118].mxu1  ;;  %v4529_v46 = vld [vmem:[#allocation47_spill] sm:$0xff]  ;;  %v4531_v4 = vld [vmem:[#allocation48_spill] sm:$0xff] }
 0x20d   : > { %v2634_v51 = vpack.c.bf16 %v2142_v49, %v2141_v60  ;;  %v2079_v62 = vadd.f32 %v3997_v1, %v1993_v31  ;;  %v2081_v48 = vadd.f32 %v3999_v6, %v1995_v23  ;;  %v1997_v52 = vmax.f32 %v4522_v8, %v1815_v16  ;;  %v1817_v42 = vpop.f32.mrb[119].mxu0  ;;  %v1930_v38 = vpop.f32.mrb[119].mxu1  ;;  %v4528_v60 = vld [vmem:[#allocation7_spill] sm:$0xff]  ;;  %v4530_v23 = vld [vmem:[#allocation8_spill] sm:$0xff] }
 0x20e   : > { %v1999_v28 = vmax.f32 %v4523_v37, %v1928_v5  ;;  %2377 = vst [vmem:[%s4027_s6 + $0x90] sm:$0xff] %v2633_v26  ;;  %v2080_v56 = vadd.f32 %v4003_v61, %v1994_v10  ;;  %v2082_v7 = vadd.f32 %v4005_v3, %v1996_v36  ;;  %v1998_v59 = vmax.f32 %v4524_v22, %v1817_v42  ;;  %v4532_v36 = vld [vmem:[#allocation9_spill] sm:$0xff] }
 0x20f   : > { %2378 = vst [vmem:[%s4027_s6 + $0x98] sm:$0xff] %v2634_v51  ;;  %v2000_v53 = vmax.f32 %v4525_v63, %v1930_v38  ;;  %v2143_v50 = vmax.f32 %v2079_v62, 0.0  ;;  %v2145_v40 = vmax.f32 %v2081_v48, 0.0  ;;  %v2083_v2 = vadd.f32 %v3997_v1, %v1997_v52  ;;  %v4533_v5 = vld [vmem:[#allocation49_spill] sm:$0xff] }
 0x210   : > { %v2085_v14 = vadd.f32 %v3999_v6, %v1999_v28  ;;  %v2144_v30 = vmax.f32 %v2080_v56, 0.0  ;;  %v2146_v19 = vmax.f32 %v2082_v7, 0.0  ;;  %v2084_v39 = vadd.f32 %v4003_v61, %v1998_v59 }
 0x211   : > { %v2086_v43 = vadd.f32 %v4005_v3, %v2000_v53  ;;  %v2147_v17 = vmax.f32 %v2083_v2, 0.0 }
 0x212   : > { %v2149_v24 = vmax.f32 %v2085_v14, 0.0  ;;  %v2635_v13 = vpack.c.bf16 %v2144_v30, %v2143_v50  ;;  %v2636_v20 = vpack.c.bf16 %v2146_v19, %v2145_v40  ;;  %v2148_v41 = vmax.f32 %v2084_v39, 0.0  ;;  %v1821_v9 = vpop.f32.mrb[120].mxu0  ;;  %v1934_v0 = vpop.f32.mrb[120].mxu1  ;;  %v4534_v14 = vld [vmem:[#allocation10_spill] sm:$0xff] }
 0x213   : > { %v2150_v45 = vmax.f32 %v2086_v43, 0.0  ;;  %v2001_v34 = vmax.f32 %v4526_v55, %v1821_v9  ;;  %v2003_v58 = vmax.f32 %v4527_v44, %v1934_v0  ;;  %v1823_v47 = vpop.f32.mrb[121].mxu0  ;;  %v1936_v21 = vpop.f32.mrb[121].mxu1  ;;  %v4535_v19 = vld [vmem:[#allocation50_spill] sm:$0xff] }
 0x214   : > { %2379 = vst [vmem:[%s4027_s6 + $0xa0] sm:$0xff] %v2635_v13  ;;  %2380 = vst [vmem:[%s4027_s6 + $0xa8] sm:$0xff] %v2636_v20  ;;  %v2637_v25 = vpack.c.bf16 %v2148_v41, %v2147_v17  ;;  %v2002_v18 = vmax.f32 %v4528_v60, %v1823_v47  ;;  %v2004_v11 = vmax.f32 %v4529_v46, %v1936_v21  ;;  %v1825_v49 = vpop.f32.mrb[122].mxu0  ;;  %v1938_v27 = vpop.f32.mrb[122].mxu1  ;;  %v4536_v20 = vld [vmem:[#allocation11_spill] sm:$0xff]  ;;  %v4538_v46 = vld [vmem:[#allocation12_spill] sm:$0xff] }
 0x215   : > { %v2638_v29 = vpack.c.bf16 %v2150_v45, %v2149_v24  ;;  %v2087_v33 = vadd.f32 %v3997_v1, %v2001_v34  ;;  %v2089_v31 = vadd.f32 %v3999_v6, %v2003_v58  ;;  %v2005_v12 = vmax.f32 %v4530_v23, %v1825_v49  ;;  %v1827_v51 = vpop.f32.mrb[123].mxu0  ;;  %v1940_v35 = vpop.f32.mrb[123].mxu1  ;;  %v4537_v45 = vld [vmem:[#allocation51_spill] sm:$0xff] }
 0x216   : > { %v2007_v26 = vmax.f32 %v4531_v4, %v1938_v27  ;;  %2381 = vst [vmem:[%s4027_s6 + $0xb0] sm:$0xff] %v2637_v25  ;;  %v2088_v10 = vadd.f32 %v4003_v61, %v2002_v18  ;;  %v2090_v32 = vadd.f32 %v4005_v3, %v2004_v11  ;;  %v2006_v16 = vmax.f32 %v4532_v36, %v1827_v51 }
 0x217   : > { %2382 = vst [vmem:[%s4027_s6 + $0xb8] sm:$0xff] %v2638_v29  ;;  %v2008_v62 = vmax.f32 %v4533_v5, %v1940_v35  ;;  %v2151_v48 = vmax.f32 %v2087_v33, 0.0  ;;  %v2153_v8 = vmax.f32 %v2089_v31, 0.0  ;;  %v2091_v52 = vadd.f32 %v3997_v1, %v2005_v12 }
 0x218   : > { %v2093_v37 = vadd.f32 %v3999_v6, %v2007_v26  ;;  %v2152_v28 = vmax.f32 %v2088_v10, 0.0  ;;  %v2154_v42 = vmax.f32 %v2090_v32, 0.0  ;;  %v2092_v38 = vadd.f32 %v4003_v61, %v2006_v16 }
 0x219   : > { %v2094_v56 = vadd.f32 %v4005_v3, %v2008_v62  ;;  %v2155_v7 = vmax.f32 %v2091_v52, 0.0 }
 0x21a   : > { %v2157_v22 = vmax.f32 %v2093_v37, 0.0  ;;  %v2639_v59 = vpack.c.bf16 %v2152_v28, %v2151_v48  ;;  %v2640_v63 = vpack.c.bf16 %v2154_v42, %v2153_v8  ;;  %v2156_v53 = vmax.f32 %v2092_v38, 0.0  ;;  %v1831_v40 = vpop.f32.mrb[124].mxu0  ;;  %v1944_v2 = vpop.f32.mrb[124].mxu1 }
 0x21b   : > { %v2158_v50 = vmax.f32 %v2094_v56, 0.0  ;;  %v2009_v30 = vmax.f32 %v4534_v14, %v1831_v40  ;;  %v2011_v39 = vmax.f32 %v4535_v19, %v1944_v2  ;;  %v1833_v43 = vpop.f32.mrb[125].mxu0  ;;  %v1946_v17 = vpop.f32.mrb[125].mxu1 }
 0x21c   : > { %2383 = vst [vmem:[%s4027_s6 + $0xc0] sm:$0xff] %v2639_v59  ;;  %2384 = vst [vmem:[%s4027_s6 + $0xc8] sm:$0xff] %v2640_v63  ;;  %v2641_v24 = vpack.c.bf16 %v2156_v53, %v2155_v7  ;;  %v2010_v41 = vmax.f32 %v4536_v20, %v1833_v43  ;;  %v2012_v9 = vmax.f32 %v4537_v45, %v1946_v17  ;;  %v1835_v0 = vpop.f32.mrb[126].mxu0  ;;  %v1948_v55 = vpop.f32.mrb[126].mxu1 }
 0x21d   : > { %v2642_v13 = vpack.c.bf16 %v2158_v50, %v2157_v22  ;;  %v2095_v34 = vadd.f32 %v3997_v1, %v2009_v30  ;;  %v2097_v44 = vadd.f32 %v3999_v6, %v2011_v39  ;;  %v2013_v58 = vmax.f32 %v3977_v57, %v1835_v0  ;;  %v1837_v21 = vpop.f32.mrb[127].mxu0  ;;  %v1950_v25 = vpop.f32.mrb[127].mxu1 }
 0x21e   : > { %v2015_v47 = vmax.f32 %v3982_v54, %v1948_v55  ;;  %2385 = vst [vmem:[%s4027_s6 + $0xd0] sm:$0xff] %v2641_v24  ;;  %v2096_v29 = vadd.f32 %v4003_v61, %v2010_v41  ;;  %v2098_v60 = vadd.f32 %v4005_v3, %v2012_v9  ;;  %v2014_v18 = vmax.f32 %v3987_v15, %v1837_v21 }
 0x21f   : > { %2386 = vst [vmem:[%s4027_s6 + $0xd8] sm:$0xff] %v2642_v13  ;;  %v2016_v11 = vmax.f32 %v4538_v46, %v1950_v25  ;;  %v2159_v49 = vmax.f32 %v2095_v34, 0.0  ;;  %v2161_v27 = vmax.f32 %v2097_v44, 0.0  ;;  %v2099_v57 = vadd.f32 %v3997_v1, %v2013_v58 }
 0x220   : > { %v2101_v54 = vadd.f32 %v3999_v6, %v2015_v47  ;;  %v2160_v33 = vmax.f32 %v2096_v29, 0.0  ;;  %v2162_v31 = vmax.f32 %v2098_v60, 0.0  ;;  %v2100_v23 = vadd.f32 %v4003_v61, %v2014_v18 }
 0x221   : > { %v2102_v12 = vadd.f32 %v4005_v3, %v2016_v11  ;;  %v2163_v4 = vmax.f32 %v2099_v57, 0.0 }
 0x222   : > { %v2165_v15 = vmax.f32 %v2101_v54, 0.0  ;;  %v2643_v26 = vpack.c.bf16 %v2160_v33, %v2159_v49  ;;  %v2644_v51 = vpack.c.bf16 %v2162_v31, %v2161_v27  ;;  %v2164_v35 = vmax.f32 %v2100_v23, 0.0 }
 0x223   : > { %v2166_v10 = vmax.f32 %v2102_v12, 0.0 }
 0x224   : > { %2387 = vst [vmem:[%s4027_s6 + $0xe0] sm:$0xff] %v2643_v26  ;;  %2388 = vst [vmem:[%s4027_s6 + $0xe8] sm:$0xff] %v2644_v51  ;;  %v2645_v32 = vpack.c.bf16 %v2164_v35, %v2163_v4 }
 0x225   : > { %v2646_v1 = vpack.c.bf16 %v2166_v10, %v2165_v15 }
 0x226   : > { %2389 = vst [vmem:[%s4027_s6 + $0xf0] sm:$0xff] %v2645_v32 }
 0x227   : > { %2390 = vst [vmem:[%s4027_s6 + $0xf8] sm:$0xff] %v2646_v1 }
 0x228 PF: > { %p10_p9 = scmp.ge.s32.totalorder %s2814_s16, 4   ;;  %s4539_s12 = smov %s2770_s13 }
 0x229   : > { %s4540_s13 = smov %s2823_s19  ;;  %s4541_s14 = smov %s2814_s16 }
 0x22a   :  { %12 = sbr.rel (!%p10_p9) target bundleno = 2 (0x2), region = 111 }

// kernel: feature_extractor_forward.3
= control target key start
LH: loop header
LB: loop body
LE: loop exit
PB: predicated region body
PF: predicated region fallthrough
CT: control target
= control target key end

     0   :  { %v215_v36 = vlaneseq  ;;  %v3315_v37 = vmov 1966171168   ;;  %s4362_s1 = inlined_call_operand.vmem [shape: bf16[768,512], index: 1, kind: input, shape index: {}]   ;;  %s4363_s0 = inlined_call_operand.vmem [shape: bf16[2,768], index: 0, kind: input, shape index: {}]   ;;  %s4364_s3 = inlined_call_operand.vmem [shape: bf16[512,512], index: 3, kind: input, shape index: {}]   ;;  %s4365_s2 = inlined_call_operand.vmem [shape: f32[1,512], index: 2, kind: input, shape index: {}]   ;;  %s4366_s4 = inlined_call_operand.vmem [shape: f32[1,512], index: 4, kind: input, shape index: {}]   ;;  %s4367_s5 = inlined_call_operand.vmem [shape: f32[2,512], index: 5, kind: output, shape index: {}]  }
   0x1   :  { %v2834_v0 = vld [vmem:[%s4362_s1 + $0x4] ss:$16 sps:$4 sm:$0xff]   ;;  %v2836_v1 = vld [vmem:[%s4362_s1 + $0xc] ss:$16 sps:$4 sm:$0xff]   ;;  %v2838_v2 = vld [vmem:[%s4362_s1] ss:$16 sps:$4 sm:$0xff]   ;;  %v238_v38 = vunpack.c.l.s4 %v3315_v37 }
   0x2   :  { %1249 = vmatprep.subr.bf16.mxu0 %v2834_v0  ;;  %v2839_v3 = vld [vmem:[%s4362_s1 + $0x8] ss:$16 sps:$4 sm:$0xff]   ;;  %1372 = vmatprep.subr.bf16.mxu1 %v2836_v1  ;;  %v2840_v4 = vld [vmem:[%s4362_s1 + $0x24] ss:$16 sps:$4 sm:$0xff]   ;;  %v2842_v5 = vld [vmem:[%s4362_s1 + $0x2c] ss:$16 sps:$4 sm:$0xff]  }
   0x3   :  { %1250 = vmatpush1.bf16.msra.mxu0 %v2838_v2  ;;  %1373 = vmatpush1.bf16.msra.mxu1 %v2839_v3  ;;  %v2844_v6 = vld [vmem:[%s4362_s1 + $0x20] ss:$16 sps:$4 sm:$0xff]   ;;  %v2845_v7 = vld [vmem:[%s4362_s1 + $0x28] ss:$16 sps:$4 sm:$0xff]   ;;  %v2846_v8 = vld [vmem:[%s4362_s1 + $0x44] ss:$16 sps:$4 sm:$0xff]   ;;  %v239_v43 = vunpack.c.0.s8 %v238_v38 }
   0x4   :  { %1251 = vmatprep.subr.bf16.mxu0 %v2840_v4  ;;  %1374 = vmatprep.subr.bf16.mxu1 %v2842_v5  ;;  %v2848_v9 = vld [vmem:[%s4362_s1 + $0x4c] ss:$16 sps:$4 sm:$0xff]   ;;  %v2850_v10 = vld [vmem:[%s4362_s1 + $0x40] ss:$16 sps:$4 sm:$0xff]   ;;  %v2851_v11 = vld [vmem:[%s4362_s1 + $0x48] ss:$16 sps:$4 sm:$0xff]  }
   0x5   :  { %v2852_v12 = vld [vmem:[%s4362_s1 + $0x64] ss:$16 sps:$4 sm:$0xff]   ;;  %v2854_v13 = vld [vmem:[%s4362_s1 + $0x6c] ss:$16 sps:$4 sm:$0xff]   ;;  %v2856_v14 = vld [vmem:[%s4362_s1 + $0x60] ss:$16 sps:$4 sm:$0xff]  }
   0x6   :  { %v2857_v15 = vld [vmem:[%s4362_s1 + $0x68] ss:$16 sps:$4 sm:$0xff]   ;;  %v2858_v16 = vld [vmem:[%s4362_s1 + $0x84] ss:$16 sps:$4 sm:$0xff]   ;;  %v2860_v17 = vld [vmem:[%s4362_s1 + $0x8c] ss:$16 sps:$4 sm:$0xff]  }
   0x7   :  { %1252 = vmatpush1.bf16.msra.mxu0 %v2844_v6  ;;  %1375 = vmatpush1.bf16.msra.mxu1 %v2845_v7  ;;  %v2862_v18 = vld [vmem:[%s4362_s1 + $0x80] ss:$16 sps:$4 sm:$0xff]   ;;  %v2863_v19 = vld [vmem:[%s4362_s1 + $0x88] ss:$16 sps:$4 sm:$0xff]   ;;  %v2864_v20 = vld [vmem:[%s4362_s1 + $0xa4] ss:$16 sps:$4 sm:$0xff]  }
   0x8   :  { %1253 = vmatprep.subr.bf16.mxu0 %v2846_v8  ;;  %1376 = vmatprep.subr.bf16.mxu1 %v2848_v9  ;;  %v2866_v21 = vld [vmem:[%s4362_s1 + $0xac] ss:$16 sps:$4 sm:$0xff]   ;;  %v2868_v22 = vld [vmem:[%s4362_s1 + $0xa0] ss:$16 sps:$4 sm:$0xff]   ;;  %v2869_v23 = vld [vmem:[%s4362_s1 + $0xa8] ss:$16 sps:$4 sm:$0xff]  }
   0x9   :  { %v2870_v24 = vld [vmem:[%s4362_s1 + $0xc4] ss:$16 sps:$4 sm:$0xff]   ;;  %v2872_v25 = vld [vmem:[%s4362_s1 + $0xcc] ss:$16 sps:$4 sm:$0xff]   ;;  %v2874_v26 = vld [vmem:[%s4362_s1 + $0xc0] ss:$16 sps:$4 sm:$0xff]  }
   0xa   :  { %v2875_v27 = vld [vmem:[%s4362_s1 + $0xc8] ss:$16 sps:$4 sm:$0xff]   ;;  %v2876_v28 = vld [vmem:[%s4362_s1 + $0xe4] ss:$16 sps:$4 sm:$0xff]   ;;  %v2878_v29 = vld [vmem:[%s4362_s1 + $0xec] ss:$16 sps:$4 sm:$0xff]  }
   0xb   :  { %1254 = vmatpush1.bf16.msra.mxu0 %v2850_v10  ;;  %1377 = vmatpush1.bf16.msra.mxu1 %v2851_v11  ;;  %v2880_v30 = vld [vmem:[%s4362_s1 + $0xe0] ss:$16 sps:$4 sm:$0xff]   ;;  %v2881_v31 = vld [vmem:[%s4362_s1 + $0xe8] ss:$16 sps:$4 sm:$0xff]   ;;  %v2882_v32 = vld [vmem:[%s4362_s1 + $0x104] ss:$16 sps:$4 sm:$0xff]  }
   0xc   :  { %1255 = vmatprep.subr.bf16.mxu0 %v2852_v12  ;;  %1378 = vmatprep.subr.bf16.mxu1 %v2854_v13  ;;  %v2884_v33 = vld [vmem:[%s4362_s1 + $0x10c] ss:$16 sps:$4 sm:$0xff]   ;;  %v2886_v34 = vld [vmem:[%s4362_s1 + $0x100] ss:$16 sps:$4 sm:$0xff]   ;;  %v2887_v35 = vld [vmem:[%s4362_s1 + $0x108] ss:$16 sps:$4 sm:$0xff]  }
   0xd   :  { %v2888_v39 = vld [vmem:[%s4362_s1 + $0x124] ss:$16 sps:$4 sm:$0xff]   ;;  %v2890_v40 = vld [vmem:[%s4362_s1 + $0x12c] ss:$16 sps:$4 sm:$0xff]   ;;  %v2892_v41 = vld [vmem:[%s4362_s1 + $0x120] ss:$16 sps:$4 sm:$0xff]  }
   0xe   :  { %v3464_v42 = vshrl.u32 %v215_v36, 7  ;;  %v2893_v44 = vld [vmem:[%s4362_s1 + $0x128] ss:$16 sps:$4 sm:$0xff]   ;;  %v2894_v45 = vld [vmem:[%s4362_s1 + $0x144] ss:$16 sps:$4 sm:$0xff]  }
   0xf   :  { %1256 = vmatpush1.bf16.msra.mxu0 %v2856_v14  ;;  %1379 = vmatpush1.bf16.msra.mxu1 %v2857_v15  ;;  %v2896_v46 = vld [vmem:[%s4362_s1 + $0x14c] ss:$16 sps:$4 sm:$0xff]   ;;  %v2898_v47 = vld [vmem:[%s4362_s1 + $0x140] ss:$16 sps:$4 sm:$0xff]   ;;  %v2899_v48 = vld [vmem:[%s4362_s1 + $0x148] ss:$16 sps:$4 sm:$0xff]  }
  0x10   :  { %1257 = vmatprep.subr.bf16.mxu0 %v2858_v16  ;;  %1380 = vmatprep.subr.bf16.mxu1 %v2860_v17  ;;  %v242_v49 = vsub.s32 %v239_v43, %v3464_v42  ;;  %v2900_v50 = vld [vmem:[%s4362_s1 + $0x164] ss:$16 sps:$4 sm:$0xff]   ;;  %v2902_v51 = vld [vmem:[%s4362_s1 + $0x16c] ss:$16 sps:$4 sm:$0xff]   ;;  %v2904_v53 = vld [vmem:[%s4362_s1 + $0x160] ss:$16 sps:$4 sm:$0xff]  }
  0x11   :  { %v20_v52 = vld [vmem:[%s4363_s0] sm:$0x3f]  ;;  %v2905_v55 = vld [vmem:[%s4362_s1 + $0x168] ss:$16 sps:$4 sm:$0xff]   ;;  %v2908_v57 = vld [vmem:[%s4362_s1 + $0x18c] ss:$16 sps:$4 sm:$0xff]  }
  0x12   :  { %v243_v54 = vrot.slane %v20_v52, %v242_v49  ;;  %v2906_v56 = vld [vmem:[%s4362_s1 + $0x184] ss:$16 sps:$4 sm:$0xff]   ;;  %v2910_v59 = vld [vmem:[%s4362_s1 + $0x180] ss:$16 sps:$4 sm:$0xff]   ;;  %v2911_v61 = vld [vmem:[%s4362_s1 + $0x188] ss:$16 sps:$4 sm:$0xff]   ;;  %v236_v8 = vcombine.high %v20_v52, %v20_v52 }
  0x13   :  { %1258 = vmatpush1.bf16.msra.mxu0 %v2862_v18  ;;  %1381 = vmatpush1.bf16.msra.mxu1 %v2863_v19  ;;  %v2912_v62 = vld [vmem:[%s4362_s1 + $0x1a4] ss:$16 sps:$4 sm:$0xff]   ;;  %v2914_v63 = vld [vmem:[%s4362_s1 + $0x1ac] ss:$16 sps:$4 sm:$0xff]   ;;  %v2916_v0 = vld [vmem:[%s4362_s1 + $0x1a0] ss:$16 sps:$4 sm:$0xff]  }
  0x14   :  { %1259 = vmatprep.subr.bf16.mxu0 %v2864_v20  ;;  %1382 = vmatprep.subr.bf16.mxu1 %v2866_v21  ;;  %v251_v58 = vcombine.high %v243_v54, %v243_v54  ;;  %v2917_v1 = vld [vmem:[%s4362_s1 + $0x1a8] ss:$16 sps:$4 sm:$0xff]   ;;  %v2918_v2 = vld [vmem:[%s4362_s1 + $0x1c4] ss:$16 sps:$4 sm:$0xff]   ;;  %v2920_v3 = vld [vmem:[%s4362_s1 + $0x1cc] ss:$16 sps:$4 sm:$0xff]   ;;  %v250_v11 = vrot.slane %v236_v8, %v242_v49  ;;  %v3554_v16 = vrot.slane %v243_v54, %v242_v49 }
  0x15   :  { %v2922_v4 = vld [vmem:[%s4362_s1 + $0x1c0] ss:$16 sps:$4 sm:$0xff]   ;;  %v2923_v5 = vld [vmem:[%s4362_s1 + $0x1c8] ss:$16 sps:$4 sm:$0xff]   ;;  %v2924_v6 = vld [vmem:[%s4362_s1 + $0x1e4] ss:$16 sps:$4 sm:$0xff]  }
  0x16   :  { %v273_v60 = vrot.slane %v251_v58, %v242_v49  ;;  %v2926_v7 = vld [vmem:[%s4362_s1 + $0x1ec] ss:$16 sps:$4 sm:$0xff]   ;;  %v2928_v9 = vld [vmem:[%s4362_s1 + $0x1e0] ss:$16 sps:$4 sm:$0xff]   ;;  %v2929_v10 = vld [vmem:[%s4362_s1 + $0x1e8] ss:$16 sps:$4 sm:$0xff]   ;;  %v252_v14 = vcombine.high %v250_v11, %v250_v11  ;;  %v3561_v19 = vrot.slane %v250_v11, %v242_v49 }
  0x17   :  { %1260 = vmatpush1.bf16.msra.mxu0 %v2868_v22  ;;  %1383 = vmatpush1.bf16.msra.mxu1 %v2869_v23  ;;  %v2932_v12 = vld [vmem:[%s4362_s1 + $0x204] ss:$16 sps:$4 sm:$0xff]   ;;  %v2935_v13 = vld [vmem:[%s4362_s1 + $0x20c] ss:$16 sps:$4 sm:$0xff]   ;;  %v2930_v15 = vld [vmem:[%s4362_s1 + $0x200] ss:$16 sps:$4 sm:$0xff]  }
  0x18   :  { %1261 = vmatprep.subr.bf16.mxu0 %v2870_v24  ;;  %1384 = vmatprep.subr.bf16.mxu1 %v2872_v25  ;;  %v2933_v17 = vld [vmem:[%s4362_s1 + $0x208] ss:$16 sps:$4 sm:$0xff]   ;;  %v3559_v18 = vrot.slane %v252_v14, %v242_v49  ;;  %v2938_v20 = vld [vmem:[%s4362_s1 + $0x224] ss:$16 sps:$4 sm:$0xff]   ;;  %v2941_v21 = vld [vmem:[%s4362_s1 + $0x22c] ss:$16 sps:$4 sm:$0xff]   ;;  %v282_v22 = vcombine.high %v273_v60, %v273_v60 }
  0x19   :  { %1281 = vmatprep.mubr.bf16.mxu0 %v273_v60  ;;  %1404 = vmatprep.mubr.bf16.mxu1 %v273_v60  ;;  %v2936_v23 = vld [vmem:[%s4362_s1 + $0x220] ss:$16 sps:$4 sm:$0xff]   ;;  %v2939_v24 = vld [vmem:[%s4362_s1 + $0x228] ss:$16 sps:$4 sm:$0xff]   ;;  %v2944_v25 = vld [vmem:[%s4362_s1 + $0x244] ss:$16 sps:$4 sm:$0xff]  }
  0x1a   :  { %v2957_v36 = vld [vmem:[%s4362_s1 + $0x288] ss:$16 sps:$4 sm:$0xff]   ;;  %v2962_v37 = vld [vmem:[%s4362_s1 + $0x2a4] ss:$16 sps:$4 sm:$0xff]   ;;  %v2965_v38 = vld [vmem:[%s4362_s1 + $0x2ac] ss:$16 sps:$4 sm:$0xff]  }
  0x1b   :  { %1262 = vmatpush1.bf16.msra.mxu0 %v2874_v26  ;;  %1385 = vmatpush1.bf16.msra.mxu1 %v2875_v27  ;;  %v2947_v26 = vld [vmem:[%s4362_s1 + $0x24c] ss:$16 sps:$4 sm:$0xff]   ;;  %v2942_v27 = vld [vmem:[%s4362_s1 + $0x240] ss:$16 sps:$4 sm:$0xff]   ;;  %v2975_v49 = vld [vmem:[%s4362_s1 + $0x2e8] ss:$16 sps:$4 sm:$0xff]  }
  0x1c   :  { %1263 = vmatprep.subr.bf16.mxu0 %v2876_v28  ;;  %1386 = vmatprep.subr.bf16.mxu1 %v2878_v29  ;;  %v2945_v28 = vld [vmem:[%s4362_s1 + $0x248] ss:$16 sps:$4 sm:$0xff]   ;;  %v2950_v29 = vld [vmem:[%s4362_s1 + $0x264] ss:$16 sps:$4 sm:$0xff]   ;;  %v2971_v43 = vld [vmem:[%s4362_s1 + $0x2cc] ss:$16 sps:$4 sm:$0xff]  }
  0x1d   :  { %v2978_v52 = vld [vmem:[%s4362_s1 + $0x300] ss:$16 sps:$4 sm:$0xff]   ;;  %v2986_v54 = vld [vmem:[%s4362_s1 + $0x324] ss:$16 sps:$4 sm:$0xff]   ;;  %v3019_v11 = vld [vmem:[%s4362_s1 + $0x3cc] ss:$16 sps:$4 sm:$0xff]  }
  0x1e   :  { %v2992_v58 = vld [vmem:[%s4362_s1 + $0x344] ss:$16 sps:$4 sm:$0xff]   ;;  %v2990_v60 = vld [vmem:[%s4362_s1 + $0x340] ss:$16 sps:$4 sm:$0xff]  }
  0x1f   :  { %1264 = vmatpush1.bf16.msra.mxu0 %v2880_v30  ;;  %1387 = vmatpush1.bf16.msra.mxu1 %v2881_v31  ;;  %v2953_v30 = vld [vmem:[%s4362_s1 + $0x26c] ss:$16 sps:$4 sm:$0xff]   ;;  %v2948_v31 = vld [vmem:[%s4362_s1 + $0x260] ss:$16 sps:$4 sm:$0xff]   ;;  %v3022_v14 = vld [vmem:[%s4362_s1 + $0x3e4] ss:$16 sps:$4 sm:$0xff]  }
  0x20   :  { %1265 = vmatprep.subr.bf16.mxu0 %v2882_v32  ;;  %1388 = vmatprep.subr.bf16.mxu1 %v2884_v33  ;;  %v2951_v32 = vld [vmem:[%s4362_s1 + $0x268] ss:$16 sps:$4 sm:$0xff]   ;;  %v2956_v33 = vld [vmem:[%s4362_s1 + $0x284] ss:$16 sps:$4 sm:$0xff]   ;;  %v3008_v8 = vld [vmem:[%s4362_s1 + $0x3a0] ss:$16 sps:$4 sm:$0xff]  }
  0x23   :  { %1266 = vmatpush1.bf16.msra.mxu0 %v2886_v34  ;;  %1389 = vmatpush1.bf16.msra.mxu1 %v2887_v35  ;;  %v2959_v34 = vld [vmem:[%s4362_s1 + $0x28c] ss:$16 sps:$4 sm:$0xff]   ;;  %v2954_v35 = vld [vmem:[%s4362_s1 + $0x280] ss:$16 sps:$4 sm:$0xff]  }
  0x24   :  { %1267 = vmatprep.subr.bf16.mxu0 %v2888_v39  ;;  %1390 = vmatprep.subr.bf16.mxu1 %v2890_v40  ;;  %v2960_v39 = vld [vmem:[%s4362_s1 + $0x2a0] ss:$16 sps:$4 sm:$0xff]   ;;  %v2963_v40 = vld [vmem:[%s4362_s1 + $0x2a8] ss:$16 sps:$4 sm:$0xff]  }
  0x27   :  { %1268 = vmatpush1.bf16.msra.mxu0 %v2892_v41  ;;  %1391 = vmatpush1.bf16.msra.mxu1 %v2893_v44  ;;  %v2968_v41 = vld [vmem:[%s4362_s1 + $0x2c4] ss:$16 sps:$4 sm:$0xff]   ;;  %v2966_v44 = vld [vmem:[%s4362_s1 + $0x2c0] ss:$16 sps:$4 sm:$0xff]  }
  0x28   :  { %1269 = vmatprep.subr.bf16.mxu0 %v2894_v45  ;;  %1392 = vmatprep.subr.bf16.mxu1 %v2896_v46  ;;  %v2969_v45 = vld [vmem:[%s4362_s1 + $0x2c8] ss:$16 sps:$4 sm:$0xff]   ;;  %v2974_v46 = vld [vmem:[%s4362_s1 + $0x2e4] ss:$16 sps:$4 sm:$0xff]  }
  0x2b   :  { %1270 = vmatpush1.bf16.msra.mxu0 %v2898_v47  ;;  %1393 = vmatpush1.bf16.msra.mxu1 %v2899_v48  ;;  %v2977_v47 = vld [vmem:[%s4362_s1 + $0x2ec] ss:$16 sps:$4 sm:$0xff]   ;;  %v2972_v48 = vld [vmem:[%s4362_s1 + $0x2e0] ss:$16 sps:$4 sm:$0xff]  }
  0x2c   :  { %1271 = vmatprep.subr.bf16.mxu0 %v2900_v50  ;;  %1394 = vmatprep.subr.bf16.mxu1 %v2902_v51  ;;  %v2980_v50 = vld [vmem:[%s4362_s1 + $0x304] ss:$16 sps:$4 sm:$0xff]   ;;  %v2983_v51 = vld [vmem:[%s4362_s1 + $0x30c] ss:$16 sps:$4 sm:$0xff]  }
  0x2f   :  { %1272 = vmatpush1.bf16.msra.mxu0 %v2904_v53  ;;  %1395 = vmatpush1.bf16.msra.mxu1 %v2905_v55  ;;  %v2981_v53 = vld [vmem:[%s4362_s1 + $0x308] ss:$16 sps:$4 sm:$0xff]   ;;  %v2989_v55 = vld [vmem:[%s4362_s1 + $0x32c] ss:$16 sps:$4 sm:$0xff]  }
  0x30   :  { %1273 = vmatprep.subr.bf16.mxu0 %v2906_v56  ;;  %1396 = vmatprep.subr.bf16.mxu1 %v2908_v57  ;;  %v2984_v56 = vld [vmem:[%s4362_s1 + $0x320] ss:$16 sps:$4 sm:$0xff]   ;;  %v2987_v57 = vld [vmem:[%s4362_s1 + $0x328] ss:$16 sps:$4 sm:$0xff]  }
  0x33   :  { %1274 = vmatpush1.bf16.msra.mxu0 %v2910_v59  ;;  %1397 = vmatpush1.bf16.msra.mxu1 %v2911_v61  ;;  %v2995_v59 = vld [vmem:[%s4362_s1 + $0x34c] ss:$16 sps:$4 sm:$0xff]   ;;  %v2993_v61 = vld [vmem:[%s4362_s1 + $0x348] ss:$16 sps:$4 sm:$0xff]  }
  0x34   :  { %1275 = vmatprep.subr.bf16.mxu0 %v2912_v62  ;;  %1398 = vmatprep.subr.bf16.mxu1 %v2914_v63  ;;  %v2998_v62 = vld [vmem:[%s4362_s1 + $0x364] ss:$16 sps:$4 sm:$0xff]   ;;  %v3001_v63 = vld [vmem:[%s4362_s1 + $0x36c] ss:$16 sps:$4 sm:$0xff]  }
  0x37   :  { %1276 = vmatpush1.bf16.msra.mxu0 %v2916_v0  ;;  %1399 = vmatpush1.bf16.msra.mxu1 %v2917_v1  ;;  %v2996_v0 = vld [vmem:[%s4362_s1 + $0x360] ss:$16 sps:$4 sm:$0xff]   ;;  %v2999_v1 = vld [vmem:[%s4362_s1 + $0x368] ss:$16 sps:$4 sm:$0xff]  }
  0x38   :  { %1277 = vmatprep.subr.bf16.mxu0 %v2918_v2  ;;  %1400 = vmatprep.subr.bf16.mxu1 %v2920_v3  ;;  %v3004_v2 = vld [vmem:[%s4362_s1 + $0x384] ss:$16 sps:$4 sm:$0xff]   ;;  %v3007_v3 = vld [vmem:[%s4362_s1 + $0x38c] ss:$16 sps:$4 sm:$0xff]  }
  0x3b   :  { %1278 = vmatpush1.bf16.msra.mxu0 %v2922_v4  ;;  %1401 = vmatpush1.bf16.msra.mxu1 %v2923_v5  ;;  %v3002_v4 = vld [vmem:[%s4362_s1 + $0x380] ss:$16 sps:$4 sm:$0xff]   ;;  %v3005_v5 = vld [vmem:[%s4362_s1 + $0x388] ss:$16 sps:$4 sm:$0xff]  }
  0x3c   :  { %1279 = vmatprep.subr.bf16.mxu0 %v2924_v6  ;;  %1402 = vmatprep.subr.bf16.mxu1 %v2926_v7  ;;  %v3010_v6 = vld [vmem:[%s4362_s1 + $0x3a4] ss:$16 sps:$4 sm:$0xff]   ;;  %v3013_v7 = vld [vmem:[%s4362_s1 + $0x3ac] ss:$16 sps:$4 sm:$0xff]  }
  0x3f   :  { %1280 = vmatpush1.bf16.msra.mxu0 %v2928_v9  ;;  %1403 = vmatpush1.bf16.msra.mxu1 %v2929_v10  ;;  %v3011_v9 = vld [vmem:[%s4362_s1 + $0x3a8] ss:$16 sps:$4 sm:$0xff]   ;;  %v3016_v10 = vld [vmem:[%s4362_s1 + $0x3c4] ss:$16 sps:$4 sm:$0xff]  }
  0x40   :  { %1290 = vmatprep.subr.bf16.mxu0 %v2932_v12  ;;  %1413 = vmatprep.subr.bf16.mxu1 %v2935_v13  ;;  %v3014_v12 = vld [vmem:[%s4362_s1 + $0x3c0] ss:$16 sps:$4 sm:$0xff]   ;;  %v3017_v13 = vld [vmem:[%s4362_s1 + $0x3c8] ss:$16 sps:$4 sm:$0xff]  }
  0x42   :  { %1282 = vmatmul.mubr.bf16.vlgmr.msra.gmra.mrb[0].mxu0 %v3554_v16  ;;  %1405 = vmatmul.mubr.bf16.vlgmr.msra.gmra.mrb[0].mxu1 %v3554_v16 }
  0x43   :  { %1291 = vmatpush1.bf16.msra.mxu0 %v2930_v15  ;;  %1414 = vmatpush1.bf16.msra.mxu1 %v2933_v17  ;;  %v3025_v15 = vld [vmem:[%s4362_s1 + $0x3ec] ss:$16 sps:$4 sm:$0xff]   ;;  %v3020_v17 = vld [vmem:[%s4362_s1 + $0x3e0] ss:$16 sps:$4 sm:$0xff]  }
  0x44   :  { %1292 = vmatprep.subr.bf16.mxu0 %v2938_v20  ;;  %1415 = vmatprep.subr.bf16.mxu1 %v2941_v21  ;;  %v3023_v20 = vld [vmem:[%s4362_s1 + $0x3e8] ss:$16 sps:$4 sm:$0xff]   ;;  %v3028_v21 = vld [vmem:[%s4362_s1 + $0x404] ss:$16 sps:$4 sm:$0xff]  }
  0x45   :  { %1322 = vmatprep.mubr.bf16.mxu0 %v282_v22  ;;  %1445 = vmatprep.mubr.bf16.mxu1 %v282_v22  ;;  %v3031_v22 = vld [vmem:[%s4362_s1 + $0x40c] ss:$16 sps:$4 sm:$0xff]  }
  0x47   :  { %1293 = vmatpush1.bf16.msra.mxu0 %v2936_v23  ;;  %1416 = vmatpush1.bf16.msra.mxu1 %v2939_v24  ;;  %v3026_v23 = vld [vmem:[%s4362_s1 + $0x400] ss:$16 sps:$4 sm:$0xff]   ;;  %v281_v24 = vcombine.high %v3554_v16, %v3554_v16 }
  0x48   :  { %1294 = vmatprep.subr.bf16.mxu0 %v2944_v25  ;;  %1417 = vmatprep.subr.bf16.mxu1 %v2947_v26  ;;  %v3029_v25 = vld [vmem:[%s4362_s1 + $0x408] ss:$16 sps:$4 sm:$0xff]   ;;  %v3034_v26 = vld [vmem:[%s4362_s1 + $0x424] ss:$16 sps:$4 sm:$0xff]   ;;  %v3032_v16 = vld [vmem:[%s4362_s1 + $0x420] ss:$16 sps:$4 sm:$0xff]  }
  0x4b   :  { %1295 = vmatpush1.bf16.msra.mxu0 %v2942_v27  ;;  %1418 = vmatpush1.bf16.msra.mxu1 %v2945_v28  ;;  %v3037_v27 = vld [vmem:[%s4362_s1 + $0x42c] ss:$16 sps:$4 sm:$0xff]   ;;  %v3035_v28 = vld [vmem:[%s4362_s1 + $0x428] ss:$16 sps:$4 sm:$0xff]  }
  0x4c   :  { %1296 = vmatprep.subr.bf16.mxu0 %v2950_v29  ;;  %1419 = vmatprep.subr.bf16.mxu1 %v2953_v30  ;;  %v3040_v29 = vld [vmem:[%s4362_s1 + $0x444] ss:$16 sps:$4 sm:$0xff]   ;;  %v3043_v30 = vld [vmem:[%s4362_s1 + $0x44c] ss:$16 sps:$4 sm:$0xff]  }
  0x4f   :  { %1297 = vmatpush1.bf16.msra.mxu0 %v2948_v31  ;;  %1420 = vmatpush1.bf16.msra.mxu1 %v2951_v32  ;;  %v3038_v31 = vld [vmem:[%s4362_s1 + $0x440] ss:$16 sps:$4 sm:$0xff]   ;;  %v3041_v32 = vld [vmem:[%s4362_s1 + $0x448] ss:$16 sps:$4 sm:$0xff]  }
  0x50   :  { %1298 = vmatprep.subr.bf16.mxu0 %v2956_v33  ;;  %1421 = vmatprep.subr.bf16.mxu1 %v2959_v34  ;;  %v3046_v33 = vld [vmem:[%s4362_s1 + $0x464] ss:$16 sps:$4 sm:$0xff]   ;;  %v3044_v34 = vld [vmem:[%s4362_s1 + $0x460] ss:$16 sps:$4 sm:$0xff]  }
  0x53   :  { %1299 = vmatpush1.bf16.msra.mxu0 %v2954_v35  ;;  %1422 = vmatpush1.bf16.msra.mxu1 %v2957_v36  ;;  %v3047_v35 = vld [vmem:[%s4362_s1 + $0x468] ss:$16 sps:$4 sm:$0xff]   ;;  %v3052_v36 = vld [vmem:[%s4362_s1 + $0x484] ss:$16 sps:$4 sm:$0xff]  }
  0x54   :  { %1300 = vmatprep.subr.bf16.mxu0 %v2962_v37  ;;  %1423 = vmatprep.subr.bf16.mxu1 %v2965_v38  ;;  %v3055_v37 = vld [vmem:[%s4362_s1 + $0x48c] ss:$16 sps:$4 sm:$0xff]   ;;  %v3050_v38 = vld [vmem:[%s4362_s1 + $0x480] ss:$16 sps:$4 sm:$0xff]  }
  0x57   :  { %1301 = vmatpush1.bf16.msra.mxu0 %v2960_v39  ;;  %1424 = vmatpush1.bf16.msra.mxu1 %v2963_v40  ;;  %v3053_v39 = vld [vmem:[%s4362_s1 + $0x488] ss:$16 sps:$4 sm:$0xff]   ;;  %v3058_v40 = vld [vmem:[%s4362_s1 + $0x4a4] ss:$16 sps:$4 sm:$0xff]  }
  0x58   :  { %1302 = vmatprep.subr.bf16.mxu0 %v2968_v41  ;;  %1425 = vmatprep.subr.bf16.mxu1 %v2971_v43  ;;  %v3061_v41 = vld [vmem:[%s4362_s1 + $0x4ac] ss:$16 sps:$4 sm:$0xff]   ;;  %v3056_v43 = vld [vmem:[%s4362_s1 + $0x4a0] ss:$16 sps:$4 sm:$0xff]  }
  0x5b   :  { %1303 = vmatpush1.bf16.msra.mxu0 %v2966_v44  ;;  %1426 = vmatpush1.bf16.msra.mxu1 %v2969_v45  ;;  %v3059_v44 = vld [vmem:[%s4362_s1 + $0x4a8] ss:$16 sps:$4 sm:$0xff]   ;;  %v3064_v45 = vld [vmem:[%s4362_s1 + $0x4c4] ss:$16 sps:$4 sm:$0xff]  }
  0x5c   :  { %1304 = vmatprep.subr.bf16.mxu0 %v2974_v46  ;;  %1427 = vmatprep.subr.bf16.mxu1 %v2977_v47  ;;  %v3067_v46 = vld [vmem:[%s4362_s1 + $0x4cc] ss:$16 sps:$4 sm:$0xff]   ;;  %v3062_v47 = vld [vmem:[%s4362_s1 + $0x4c0] ss:$16 sps:$4 sm:$0xff]  }
  0x5f   :  { %1305 = vmatpush1.bf16.msra.mxu0 %v2972_v48  ;;  %1428 = vmatpush1.bf16.msra.mxu1 %v2975_v49  ;;  %v3065_v48 = vld [vmem:[%s4362_s1 + $0x4c8] ss:$16 sps:$4 sm:$0xff]   ;;  %v3070_v49 = vld [vmem:[%s4362_s1 + $0x4e4] ss:$16 sps:$4 sm:$0xff]  }
  0x60   :  { %1306 = vmatprep.subr.bf16.mxu0 %v2980_v50  ;;  %1429 = vmatprep.subr.bf16.mxu1 %v2983_v51  ;;  %v3073_v50 = vld [vmem:[%s4362_s1 + $0x4ec] ss:$16 sps:$4 sm:$0xff]   ;;  %v3068_v51 = vld [vmem:[%s4362_s1 + $0x4e0] ss:$16 sps:$4 sm:$0xff]  }
  0x63   :  { %1307 = vmatpush1.bf16.msra.mxu0 %v2978_v52  ;;  %1430 = vmatpush1.bf16.msra.mxu1 %v2981_v53  ;;  %v3071_v52 = vld [vmem:[%s4362_s1 + $0x4e8] ss:$16 sps:$4 sm:$0xff]   ;;  %v3076_v53 = vld [vmem:[%s4362_s1 + $0x504] ss:$16 sps:$4 sm:$0xff]  }
  0x64   :  { %1308 = vmatprep.subr.bf16.mxu0 %v2986_v54  ;;  %1431 = vmatprep.subr.bf16.mxu1 %v2989_v55  ;;  %v3079_v54 = vld [vmem:[%s4362_s1 + $0x50c] ss:$16 sps:$4 sm:$0xff]   ;;  %v3074_v55 = vld [vmem:[%s4362_s1 + $0x500] ss:$16 sps:$4 sm:$0xff]  }
  0x67   :  { %1309 = vmatpush1.bf16.msra.mxu0 %v2984_v56  ;;  %1432 = vmatpush1.bf16.msra.mxu1 %v2987_v57  ;;  %v3077_v56 = vld [vmem:[%s4362_s1 + $0x508] ss:$16 sps:$4 sm:$0xff]   ;;  %v3082_v57 = vld [vmem:[%s4362_s1 + $0x524] ss:$16 sps:$4 sm:$0xff]  }
  0x68   :  { %1310 = vmatprep.subr.bf16.mxu0 %v2992_v58  ;;  %1433 = vmatprep.subr.bf16.mxu1 %v2995_v59  ;;  %v3085_v58 = vld [vmem:[%s4362_s1 + $0x52c] ss:$16 sps:$4 sm:$0xff]   ;;  %v3080_v59 = vld [vmem:[%s4362_s1 + $0x520] ss:$16 sps:$4 sm:$0xff]  }
  0x6b   :  { %1311 = vmatpush1.bf16.msra.mxu0 %v2990_v60  ;;  %1434 = vmatpush1.bf16.msra.mxu1 %v2993_v61  ;;  %v3083_v60 = vld [vmem:[%s4362_s1 + $0x528] ss:$16 sps:$4 sm:$0xff]   ;;  %v3088_v61 = vld [vmem:[%s4362_s1 + $0x544] ss:$16 sps:$4 sm:$0xff]  }
  0x6c   :  { %1312 = vmatprep.subr.bf16.mxu0 %v2998_v62  ;;  %1435 = vmatprep.subr.bf16.mxu1 %v3001_v63  ;;  %v3091_v62 = vld [vmem:[%s4362_s1 + $0x54c] ss:$16 sps:$4 sm:$0xff]   ;;  %v3086_v63 = vld [vmem:[%s4362_s1 + $0x540] ss:$16 sps:$4 sm:$0xff]  }
  0x6f   :  { %1313 = vmatpush1.bf16.msra.mxu0 %v2996_v0  ;;  %1436 = vmatpush1.bf16.msra.mxu1 %v2999_v1  ;;  %v3089_v0 = vld [vmem:[%s4362_s1 + $0x548] ss:$16 sps:$4 sm:$0xff]   ;;  %v3094_v1 = vld [vmem:[%s4362_s1 + $0x564] ss:$16 sps:$4 sm:$0xff]  }
  0x70   :  { %1314 = vmatprep.subr.bf16.mxu0 %v3004_v2  ;;  %1437 = vmatprep.subr.bf16.mxu1 %v3007_v3  ;;  %v3097_v2 = vld [vmem:[%s4362_s1 + $0x56c] ss:$16 sps:$4 sm:$0xff]   ;;  %v3092_v3 = vld [vmem:[%s4362_s1 + $0x560] ss:$16 sps:$4 sm:$0xff]  }
  0x73   :  { %1315 = vmatpush1.bf16.msra.mxu0 %v3002_v4  ;;  %1438 = vmatpush1.bf16.msra.mxu1 %v3005_v5  ;;  %v3095_v4 = vld [vmem:[%s4362_s1 + $0x568] ss:$16 sps:$4 sm:$0xff]   ;;  %v3100_v5 = vld [vmem:[%s4362_s1 + $0x584] ss:$16 sps:$4 sm:$0xff]  }
  0x74   :  { %1316 = vmatprep.subr.bf16.mxu0 %v3010_v6  ;;  %1439 = vmatprep.subr.bf16.mxu1 %v3013_v7  ;;  %v3103_v6 = vld [vmem:[%s4362_s1 + $0x58c] ss:$16 sps:$4 sm:$0xff]   ;;  %v3098_v7 = vld [vmem:[%s4362_s1 + $0x580] ss:$16 sps:$4 sm:$0xff]  }
  0x77   :  { %1317 = vmatpush1.bf16.msra.mxu0 %v3008_v8  ;;  %1440 = vmatpush1.bf16.msra.mxu1 %v3011_v9  ;;  %v3101_v8 = vld [vmem:[%s4362_s1 + $0x588] ss:$16 sps:$4 sm:$0xff]   ;;  %v3106_v9 = vld [vmem:[%s4362_s1 + $0x5a4] ss:$16 sps:$4 sm:$0xff]  }
  0x78   :  { %1318 = vmatprep.subr.bf16.mxu0 %v3016_v10  ;;  %1441 = vmatprep.subr.bf16.mxu1 %v3019_v11  ;;  %v3109_v10 = vld [vmem:[%s4362_s1 + $0x5ac] ss:$16 sps:$4 sm:$0xff]   ;;  %v3104_v11 = vld [vmem:[%s4362_s1 + $0x5a0] ss:$16 sps:$4 sm:$0xff]  }
  0x7b   :  { %1319 = vmatpush1.bf16.msra.mxu0 %v3014_v12  ;;  %1442 = vmatpush1.bf16.msra.mxu1 %v3017_v13  ;;  %v3107_v12 = vld [vmem:[%s4362_s1 + $0x5a8] ss:$16 sps:$4 sm:$0xff]   ;;  %v3112_v13 = vld [vmem:[%s4362_s1 + $0x5c4] ss:$16 sps:$4 sm:$0xff]  }
  0x7c   :  { %1320 = vmatprep.subr.bf16.mxu0 %v3022_v14  ;;  %1443 = vmatprep.subr.bf16.mxu1 %v3025_v15  ;;  %v3115_v14 = vld [vmem:[%s4362_s1 + $0x5cc] ss:$16 sps:$4 sm:$0xff]   ;;  %v3110_v15 = vld [vmem:[%s4362_s1 + $0x5c0] ss:$16 sps:$4 sm:$0xff]  }
  0x7f   :  { %1321 = vmatpush1.bf16.msra.mxu0 %v3020_v17  ;;  %1444 = vmatpush1.bf16.msra.mxu1 %v3023_v20  ;;  %v3113_v17 = vld [vmem:[%s4362_s1 + $0x5c8] ss:$16 sps:$4 sm:$0xff]   ;;  %v3118_v20 = vld [vmem:[%s4362_s1 + $0x5e4] ss:$16 sps:$4 sm:$0xff]  }
  0x80   :  { %1331 = vmatprep.subr.bf16.mxu0 %v3028_v21  ;;  %1454 = vmatprep.subr.bf16.mxu1 %v3031_v22  ;;  %v3121_v21 = vld [vmem:[%s4362_s1 + $0x5ec] ss:$16 sps:$4 sm:$0xff]   ;;  %v3116_v22 = vld [vmem:[%s4362_s1 + $0x5e0] ss:$16 sps:$4 sm:$0xff]  }
  0x82   :  { %1323 = vmatmul.mubr.bf16.vlgmr.msra.gmra.mrb[0].mxu0 %v281_v24  ;;  %1446 = vmatmul.mubr.bf16.vlgmr.msra.gmra.mrb[0].mxu1 %v281_v24  ;;  %v3125_v24 = vld [vmem:[%s4364_s3 + $0x4] ss:$16 sps:$4 sm:$0xff]  }
  0x83   :  { %1332 = vmatpush1.bf16.msra.mxu0 %v3026_v23  ;;  %1455 = vmatpush1.bf16.msra.mxu1 %v3029_v25  ;;  %v3119_v23 = vld [vmem:[%s4362_s1 + $0x5e8] ss:$16 sps:$4 sm:$0xff]   ;;  %v3128_v25 = vld [vmem:[%s4364_s3 + $0xc] ss:$16 sps:$4 sm:$0xff]  }
  0x84   :  { %1333 = vmatprep.subr.bf16.mxu0 %v3034_v26  ;;  %1456 = vmatprep.subr.bf16.mxu1 %v3037_v27  ;;  %v3123_v26 = vld [vmem:[%s4364_s3] ss:$16 sps:$4 sm:$0xff]   ;;  %v3126_v27 = vld [vmem:[%s4364_s3 + $0x8] ss:$16 sps:$4 sm:$0xff]  }
  0x85   :  { %1363 = vmatprep.mubr.bf16.mxu0 %v3559_v18  ;;  %1486 = vmatprep.mubr.bf16.mxu1 %v3559_v18  ;;  %v3049_v18 = vld [vmem:[%s4362_s1 + $0x46c] ss:$16 sps:$4 sm:$0xff]  }
  0x87   :  { %1334 = vmatpush1.bf16.msra.mxu0 %v3032_v16  ;;  %1457 = vmatpush1.bf16.msra.mxu1 %v3035_v28  ;;  %v3131_v16 = vld [vmem:[%s4364_s3 + $0x24] ss:$16 sps:$4 sm:$0xff]   ;;  %v3134_v28 = vld [vmem:[%s4364_s3 + $0x2c] ss:$16 sps:$4 sm:$0xff]  }
  0x88   :  { %1335 = vmatprep.subr.bf16.mxu0 %v3040_v29  ;;  %1458 = vmatprep.subr.bf16.mxu1 %v3043_v30  ;;  %v3129_v29 = vld [vmem:[%s4364_s3 + $0x20] ss:$16 sps:$4 sm:$0xff]   ;;  %v3132_v30 = vld [vmem:[%s4364_s3 + $0x28] ss:$16 sps:$4 sm:$0xff]  }
  0x8b   :  { %1336 = vmatpush1.bf16.msra.mxu0 %v3038_v31  ;;  %1459 = vmatpush1.bf16.msra.mxu1 %v3041_v32  ;;  %v3137_v31 = vld [vmem:[%s4364_s3 + $0x44] ss:$16 sps:$4 sm:$0xff]   ;;  %v3135_v32 = vld [vmem:[%s4364_s3 + $0x40] ss:$16 sps:$4 sm:$0xff]  }
  0x8c   :  { %1337 = vmatprep.subr.bf16.mxu0 %v3046_v33  ;;  %1460 = vmatprep.subr.bf16.mxu1 %v3049_v18  ;;  %v3138_v33 = vld [vmem:[%s4364_s3 + $0x48] ss:$16 sps:$4 sm:$0xff]   ;;  %v3143_v18 = vld [vmem:[%s4364_s3 + $0x64] ss:$16 sps:$4 sm:$0xff]  }
  0x8f   :  { %1338 = vmatpush1.bf16.msra.mxu0 %v3044_v34  ;;  %1461 = vmatpush1.bf16.msra.mxu1 %v3047_v35  ;;  %v3146_v34 = vld [vmem:[%s4364_s3 + $0x6c] ss:$16 sps:$4 sm:$0xff]   ;;  %v3141_v35 = vld [vmem:[%s4364_s3 + $0x60] ss:$16 sps:$4 sm:$0xff]  }
  0x90   :  { %1339 = vmatprep.subr.bf16.mxu0 %v3052_v36  ;;  %1462 = vmatprep.subr.bf16.mxu1 %v3055_v37  ;;  %v3144_v36 = vld [vmem:[%s4364_s3 + $0x68] ss:$16 sps:$4 sm:$0xff]   ;;  %v3149_v37 = vld [vmem:[%s4364_s3 + $0x84] ss:$16 sps:$4 sm:$0xff]  }
  0x93   :  { %1340 = vmatpush1.bf16.msra.mxu0 %v3050_v38  ;;  %1463 = vmatpush1.bf16.msra.mxu1 %v3053_v39  ;;  %v3152_v38 = vld [vmem:[%s4364_s3 + $0x8c] ss:$16 sps:$4 sm:$0xff]   ;;  %v3147_v39 = vld [vmem:[%s4364_s3 + $0x80] ss:$16 sps:$4 sm:$0xff]  }
  0x94   :  { %1341 = vmatprep.subr.bf16.mxu0 %v3058_v40  ;;  %1464 = vmatprep.subr.bf16.mxu1 %v3061_v41  ;;  %v3150_v40 = vld [vmem:[%s4364_s3 + $0x88] ss:$16 sps:$4 sm:$0xff]   ;;  %v3155_v41 = vld [vmem:[%s4364_s3 + $0xa4] ss:$16 sps:$4 sm:$0xff]  }
  0x97   :  { %1342 = vmatpush1.bf16.msra.mxu0 %v3056_v43  ;;  %1465 = vmatpush1.bf16.msra.mxu1 %v3059_v44  ;;  %v3158_v43 = vld [vmem:[%s4364_s3 + $0xac] ss:$16 sps:$4 sm:$0xff]   ;;  %v3153_v44 = vld [vmem:[%s4364_s3 + $0xa0] ss:$16 sps:$4 sm:$0xff]  }
  0x98   :  { %1343 = vmatprep.subr.bf16.mxu0 %v3064_v45  ;;  %1466 = vmatprep.subr.bf16.mxu1 %v3067_v46  ;;  %v3156_v45 = vld [vmem:[%s4364_s3 + $0xa8] ss:$16 sps:$4 sm:$0xff]   ;;  %v3161_v46 = vld [vmem:[%s4364_s3 + $0xc4] ss:$16 sps:$4 sm:$0xff]  }
  0x9b   :  { %1344 = vmatpush1.bf16.msra.mxu0 %v3062_v47  ;;  %1467 = vmatpush1.bf16.msra.mxu1 %v3065_v48  ;;  %v3164_v47 = vld [vmem:[%s4364_s3 + $0xcc] ss:$16 sps:$4 sm:$0xff]   ;;  %v3159_v48 = vld [vmem:[%s4364_s3 + $0xc0] ss:$16 sps:$4 sm:$0xff]  }
  0x9c   :  { %1345 = vmatprep.subr.bf16.mxu0 %v3070_v49  ;;  %1468 = vmatprep.subr.bf16.mxu1 %v3073_v50  ;;  %v3162_v49 = vld [vmem:[%s4364_s3 + $0xc8] ss:$16 sps:$4 sm:$0xff]   ;;  %v3167_v50 = vld [vmem:[%s4364_s3 + $0xe4] ss:$16 sps:$4 sm:$0xff]  }
  0x9f   :  { %1346 = vmatpush1.bf16.msra.mxu0 %v3068_v51  ;;  %1469 = vmatpush1.bf16.msra.mxu1 %v3071_v52  ;;  %v3170_v51 = vld [vmem:[%s4364_s3 + $0xec] ss:$16 sps:$4 sm:$0xff]   ;;  %v3165_v52 = vld [vmem:[%s4364_s3 + $0xe0] ss:$16 sps:$4 sm:$0xff]  }
  0xa0   :  { %1347 = vmatprep.subr.bf16.mxu0 %v3076_v53  ;;  %1470 = vmatprep.subr.bf16.mxu1 %v3079_v54  ;;  %v3168_v53 = vld [vmem:[%s4364_s3 + $0xe8] ss:$16 sps:$4 sm:$0xff]   ;;  %v3173_v54 = vld [vmem:[%s4364_s3 + $0x104] ss:$16 sps:$4 sm:$0xff]  }
  0xa3   :  { %1348 = vmatpush1.bf16.msra.mxu0 %v3074_v55  ;;  %1471 = vmatpush1.bf16.msra.mxu1 %v3077_v56  ;;  %v3176_v55 = vld [vmem:[%s4364_s3 + $0x10c] ss:$16 sps:$4 sm:$0xff]   ;;  %v3171_v56 = vld [vmem:[%s4364_s3 + $0x100] ss:$16 sps:$4 sm:$0xff]  }
  0xa4   :  { %1349 = vmatprep.subr.bf16.mxu0 %v3082_v57  ;;  %1472 = vmatprep.subr.bf16.mxu1 %v3085_v58  ;;  %v3174_v57 = vld [vmem:[%s4364_s3 + $0x108] ss:$16 sps:$4 sm:$0xff]   ;;  %v3179_v58 = vld [vmem:[%s4364_s3 + $0x124] ss:$16 sps:$4 sm:$0xff]  }
  0xa7   :  { %1350 = vmatpush1.bf16.msra.mxu0 %v3080_v59  ;;  %1473 = vmatpush1.bf16.msra.mxu1 %v3083_v60  ;;  %v3182_v59 = vld [vmem:[%s4364_s3 + $0x12c] ss:$16 sps:$4 sm:$0xff]   ;;  %v3177_v60 = vld [vmem:[%s4364_s3 + $0x120] ss:$16 sps:$4 sm:$0xff]  }
  0xa8   :  { %1351 = vmatprep.subr.bf16.mxu0 %v3088_v61  ;;  %1474 = vmatprep.subr.bf16.mxu1 %v3091_v62  ;;  %v3180_v61 = vld [vmem:[%s4364_s3 + $0x128] ss:$16 sps:$4 sm:$0xff]   ;;  %v3185_v62 = vld [vmem:[%s4364_s3 + $0x144] ss:$16 sps:$4 sm:$0xff]  }
  0xab   :  { %1352 = vmatpush1.bf16.msra.mxu0 %v3086_v63  ;;  %1475 = vmatpush1.bf16.msra.mxu1 %v3089_v0  ;;  %v3188_v63 = vld [vmem:[%s4364_s3 + $0x14c] ss:$16 sps:$4 sm:$0xff]   ;;  %v3183_v0 = vld [vmem:[%s4364_s3 + $0x140] ss:$16 sps:$4 sm:$0xff]  }
  0xac   :  { %1353 = vmatprep.subr.bf16.mxu0 %v3094_v1  ;;  %1476 = vmatprep.subr.bf16.mxu1 %v3097_v2  ;;  %v3186_v1 = vld [vmem:[%s4364_s3 + $0x148] ss:$16 sps:$4 sm:$0xff]   ;;  %v3191_v2 = vld [vmem:[%s4364_s3 + $0x164] ss:$16 sps:$4 sm:$0xff]  }
  0xaf   :  { %1354 = vmatpush1.bf16.msra.mxu0 %v3092_v3  ;;  %1477 = vmatpush1.bf16.msra.mxu1 %v3095_v4  ;;  %v3194_v3 = vld [vmem:[%s4364_s3 + $0x16c] ss:$16 sps:$4 sm:$0xff]   ;;  %v3189_v4 = vld [vmem:[%s4364_s3 + $0x160] ss:$16 sps:$4 sm:$0xff]  }
  0xb0   :  { %1355 = vmatprep.subr.bf16.mxu0 %v3100_v5  ;;  %1478 = vmatprep.subr.bf16.mxu1 %v3103_v6  ;;  %v3192_v5 = vld [vmem:[%s4364_s3 + $0x168] ss:$16 sps:$4 sm:$0xff]   ;;  %v3197_v6 = vld [vmem:[%s4364_s3 + $0x184] ss:$16 sps:$4 sm:$0xff]  }
  0xb3   :  { %1356 = vmatpush1.bf16.msra.mxu0 %v3098_v7  ;;  %1479 = vmatpush1.bf16.msra.mxu1 %v3101_v8  ;;  %v3200_v7 = vld [vmem:[%s4364_s3 + $0x18c] ss:$16 sps:$4 sm:$0xff]   ;;  %v3195_v8 = vld [vmem:[%s4364_s3 + $0x180] ss:$16 sps:$4 sm:$0xff]  }
  0xb4   :  { %1357 = vmatprep.subr.bf16.mxu0 %v3106_v9  ;;  %1480 = vmatprep.subr.bf16.mxu1 %v3109_v10  ;;  %v3198_v9 = vld [vmem:[%s4364_s3 + $0x188] ss:$16 sps:$4 sm:$0xff]   ;;  %v3203_v10 = vld [vmem:[%s4364_s3 + $0x1a4] ss:$16 sps:$4 sm:$0xff]  }
  0xb7   :  { %1358 = vmatpush1.bf16.msra.mxu0 %v3104_v11  ;;  %1481 = vmatpush1.bf16.msra.mxu1 %v3107_v12  ;;  %v3206_v11 = vld [vmem:[%s4364_s3 + $0x1ac] ss:$16 sps:$4 sm:$0xff]   ;;  %v3201_v12 = vld [vmem:[%s4364_s3 + $0x1a0] ss:$16 sps:$4 sm:$0xff]  }
  0xb8   :  { %1359 = vmatprep.subr.bf16.mxu0 %v3112_v13  ;;  %1482 = vmatprep.subr.bf16.mxu1 %v3115_v14  ;;  %v3204_v13 = vld [vmem:[%s4364_s3 + $0x1a8] ss:$16 sps:$4 sm:$0xff]   ;;  %v3209_v14 = vld [vmem:[%s4364_s3 + $0x1c4] ss:$16 sps:$4 sm:$0xff]  }
  0xbb   :  { %1360 = vmatpush1.bf16.msra.mxu0 %v3110_v15  ;;  %1483 = vmatpush1.bf16.msra.mxu1 %v3113_v17  ;;  %v3212_v15 = vld [vmem:[%s4364_s3 + $0x1cc] ss:$16 sps:$4 sm:$0xff]   ;;  %v3207_v17 = vld [vmem:[%s4364_s3 + $0x1c0] ss:$16 sps:$4 sm:$0xff]  }
  0xbc   :  { %1361 = vmatprep.subr.bf16.mxu0 %v3118_v20  ;;  %1484 = vmatprep.subr.bf16.mxu1 %v3121_v21  ;;  %v3210_v20 = vld [vmem:[%s4364_s3 + $0x1c8] ss:$16 sps:$4 sm:$0xff]   ;;  %v3215_v21 = vld [vmem:[%s4364_s3 + $0x1e4] ss:$16 sps:$4 sm:$0xff]  }
  0xbf   :  { %1362 = vmatpush1.bf16.msra.mxu0 %v3116_v22  ;;  %1485 = vmatpush1.bf16.msra.mxu1 %v3119_v23  ;;  %v3218_v22 = vld [vmem:[%s4364_s3 + $0x1ec] ss:$16 sps:$4 sm:$0xff]   ;;  %v3213_v23 = vld [vmem:[%s4364_s3 + $0x1e0] ss:$16 sps:$4 sm:$0xff]  }
  0xc0   :  { %2289 = vmatprep.subr.bf16.mxu0 %v3125_v24  ;;  %2371 = vmatprep.subr.bf16.mxu1 %v3128_v25  ;;  %v3216_v24 = vld [vmem:[%s4364_s3 + $0x1e8] ss:$16 sps:$4 sm:$0xff]   ;;  %v3221_v25 = vld [vmem:[%s4364_s3 + $0x204] ss:$16 sps:$4 sm:$0xff]  }
  0xc2   :  { %1364 = vmatmul.mubr.bf16.vlgmr.msra.gmra.mrb[0].mxu0 %v3561_v19  ;;  %1487 = vmatmul.mubr.bf16.vlgmr.msra.gmra.mrb[0].mxu1 %v3561_v19  ;;  %v3140_v19 = vld [vmem:[%s4364_s3 + $0x4c] ss:$16 sps:$4 sm:$0xff]  }
  0xc3   :  { %2290 = vmatpush1.bf16.msra.mxu0 %v3123_v26  ;;  %2372 = vmatpush1.bf16.msra.mxu1 %v3126_v27  ;;  %v3224_v26 = vld [vmem:[%s4364_s3 + $0x20c] ss:$16 sps:$4 sm:$0xff]   ;;  %v217_v27 = vsub.s32 0, %v3464_v42 }
  0xc4   :  { %2291 = vmatprep.subr.bf16.mxu0 %v3131_v16  ;;  %2373 = vmatprep.subr.bf16.mxu1 %v3134_v28  ;;  %v4145_v16 = vld [vmem:[%s4365_s2] sm:$0xf]  ;;  %v221_v28 = vsub.s32 1, %v3464_v42 }
  0xc7   :  { %2292 = vmatpush1.bf16.msra.mxu0 %v3129_v29  ;;  %2374 = vmatpush1.bf16.msra.mxu1 %v3132_v30  ;;  %v229_v29 = vsub.s32 3, %v3464_v42  ;;  %v218_v30 = vrot.slane %v4145_v16, %v217_v27 }
  0xc8   :  { %2293 = vmatprep.subr.bf16.mxu0 %v3137_v31  ;;  %2375 = vmatprep.subr.bf16.mxu1 %v3140_v19  ;;  %v222_v31 = vrot.slane %v4145_v16, %v221_v28 }
  0xc9   :  { %v230_v19 = vrot.slane %v4145_v16, %v229_v29 }
  0xcb   :  { %2294 = vmatpush1.bf16.msra.mxu0 %v3135_v32  ;;  %2376 = vmatpush1.bf16.msra.mxu1 %v3138_v33 }
  0xcc   :  { %2295 = vmatprep.subr.bf16.mxu0 %v3143_v18  ;;  %2377 = vmatprep.subr.bf16.mxu1 %v3146_v34 }
  0xcf   :  { %2296 = vmatpush1.bf16.msra.mxu0 %v3141_v35  ;;  %2378 = vmatpush1.bf16.msra.mxu1 %v3144_v36 }
  0xd0   :  { %2297 = vmatprep.subr.bf16.mxu0 %v3149_v37  ;;  %2379 = vmatprep.subr.bf16.mxu1 %v3152_v38 }
  0xd3   :  { %2298 = vmatpush1.bf16.msra.mxu0 %v3147_v39  ;;  %2380 = vmatpush1.bf16.msra.mxu1 %v3150_v40 }
  0xd4   :  { %2299 = vmatprep.subr.bf16.mxu0 %v3155_v41  ;;  %2381 = vmatprep.subr.bf16.mxu1 %v3158_v43 }
  0xd7   :  { %2300 = vmatpush1.bf16.msra.mxu0 %v3153_v44  ;;  %2382 = vmatpush1.bf16.msra.mxu1 %v3156_v45  ;;  %v3219_v44 = vld [vmem:[%s4364_s3 + $0x200] ss:$16 sps:$4 sm:$0xff]   ;;  %v3222_v45 = vld [vmem:[%s4364_s3 + $0x208] ss:$16 sps:$4 sm:$0xff]  }
  0xd8   :  { %2301 = vmatprep.subr.bf16.mxu0 %v3161_v46  ;;  %2383 = vmatprep.subr.bf16.mxu1 %v3164_v47  ;;  %v3227_v47 = vld [vmem:[%s4364_s3 + $0x224] ss:$16 sps:$4 sm:$0xff]  }
  0xdb   :  { %2302 = vmatpush1.bf16.msra.mxu0 %v3159_v48  ;;  %2384 = vmatpush1.bf16.msra.mxu1 %v3162_v49  ;;  %v3230_v48 = vld [vmem:[%s4364_s3 + $0x22c] ss:$16 sps:$4 sm:$0xff]  }
  0xdc   :  { %2303 = vmatprep.subr.bf16.mxu0 %v3167_v50  ;;  %2385 = vmatprep.subr.bf16.mxu1 %v3170_v51  ;;  %v3225_v50 = vld [vmem:[%s4364_s3 + $0x220] ss:$16 sps:$4 sm:$0xff]   ;;  %v3228_v51 = vld [vmem:[%s4364_s3 + $0x228] ss:$16 sps:$4 sm:$0xff]  }
  0xdf   :  { %2304 = vmatpush1.bf16.msra.mxu0 %v3165_v52  ;;  %2386 = vmatpush1.bf16.msra.mxu1 %v3168_v53  ;;  %v3233_v52 = vld [vmem:[%s4364_s3 + $0x244] ss:$16 sps:$4 sm:$0xff]   ;;  %v3236_v53 = vld [vmem:[%s4364_s3 + $0x24c] ss:$16 sps:$4 sm:$0xff]  }
  0xe0   :  { %2305 = vmatprep.subr.bf16.mxu0 %v3173_v54  ;;  %2387 = vmatprep.subr.bf16.mxu1 %v3176_v55  ;;  %v3231_v54 = vld [vmem:[%s4364_s3 + $0x240] ss:$16 sps:$4 sm:$0xff]   ;;  %v3234_v55 = vld [vmem:[%s4364_s3 + $0x248] ss:$16 sps:$4 sm:$0xff]  }
  0xe3   :  { %2306 = vmatpush1.bf16.msra.mxu0 %v3171_v56  ;;  %2388 = vmatpush1.bf16.msra.mxu1 %v3174_v57  ;;  %v3239_v56 = vld [vmem:[%s4364_s3 + $0x264] ss:$16 sps:$4 sm:$0xff]   ;;  %v3242_v57 = vld [vmem:[%s4364_s3 + $0x26c] ss:$16 sps:$4 sm:$0xff]  }
  0xe4   :  { %2307 = vmatprep.subr.bf16.mxu0 %v3179_v58  ;;  %2389 = vmatprep.subr.bf16.mxu1 %v3182_v59  ;;  %v3237_v58 = vld [vmem:[%s4364_s3 + $0x260] ss:$16 sps:$4 sm:$0xff]   ;;  %v3240_v59 = vld [vmem:[%s4364_s3 + $0x268] ss:$16 sps:$4 sm:$0xff]  }
  0xe7   :  { %2308 = vmatpush1.bf16.msra.mxu0 %v3177_v60  ;;  %2390 = vmatpush1.bf16.msra.mxu1 %v3180_v61  ;;  %v3245_v60 = vld [vmem:[%s4364_s3 + $0x284] ss:$16 sps:$4 sm:$0xff]   ;;  %v3248_v61 = vld [vmem:[%s4364_s3 + $0x28c] ss:$16 sps:$4 sm:$0xff]  }
  0xe8   :  { %2309 = vmatprep.subr.bf16.mxu0 %v3185_v62  ;;  %2391 = vmatprep.subr.bf16.mxu1 %v3188_v63  ;;  %v3243_v62 = vld [vmem:[%s4364_s3 + $0x280] ss:$16 sps:$4 sm:$0xff]   ;;  %v3246_v63 = vld [vmem:[%s4364_s3 + $0x288] ss:$16 sps:$4 sm:$0xff]  }
  0xeb   :  { %2310 = vmatpush1.bf16.msra.mxu0 %v3183_v0  ;;  %2392 = vmatpush1.bf16.msra.mxu1 %v3186_v1  ;;  %v3251_v0 = vld [vmem:[%s4364_s3 + $0x2a4] ss:$16 sps:$4 sm:$0xff]   ;;  %v3254_v1 = vld [vmem:[%s4364_s3 + $0x2ac] ss:$16 sps:$4 sm:$0xff]  }
  0xec   :  { %2311 = vmatprep.subr.bf16.mxu0 %v3191_v2  ;;  %2393 = vmatprep.subr.bf16.mxu1 %v3194_v3  ;;  %v3249_v2 = vld [vmem:[%s4364_s3 + $0x2a0] ss:$16 sps:$4 sm:$0xff]   ;;  %v3252_v3 = vld [vmem:[%s4364_s3 + $0x2a8] ss:$16 sps:$4 sm:$0xff]  }
  0xef   :  { %2312 = vmatpush1.bf16.msra.mxu0 %v3189_v4  ;;  %2394 = vmatpush1.bf16.msra.mxu1 %v3192_v5  ;;  %v3257_v4 = vld [vmem:[%s4364_s3 + $0x2c4] ss:$16 sps:$4 sm:$0xff]   ;;  %v3260_v5 = vld [vmem:[%s4364_s3 + $0x2cc] ss:$16 sps:$4 sm:$0xff]  }
  0xf0   :  { %2313 = vmatprep.subr.bf16.mxu0 %v3197_v6  ;;  %2395 = vmatprep.subr.bf16.mxu1 %v3200_v7  ;;  %v3255_v6 = vld [vmem:[%s4364_s3 + $0x2c0] ss:$16 sps:$4 sm:$0xff]   ;;  %v3258_v7 = vld [vmem:[%s4364_s3 + $0x2c8] ss:$16 sps:$4 sm:$0xff]  }
  0xf3   :  { %2314 = vmatpush1.bf16.msra.mxu0 %v3195_v8  ;;  %2396 = vmatpush1.bf16.msra.mxu1 %v3198_v9  ;;  %v3263_v8 = vld [vmem:[%s4364_s3 + $0x2e4] ss:$16 sps:$4 sm:$0xff]   ;;  %v3266_v9 = vld [vmem:[%s4364_s3 + $0x2ec] ss:$16 sps:$4 sm:$0xff]  }
  0xf4   :  { %2315 = vmatprep.subr.bf16.mxu0 %v3203_v10  ;;  %2397 = vmatprep.subr.bf16.mxu1 %v3206_v11  ;;  %v3261_v10 = vld [vmem:[%s4364_s3 + $0x2e0] ss:$16 sps:$4 sm:$0xff]   ;;  %v3264_v11 = vld [vmem:[%s4364_s3 + $0x2e8] ss:$16 sps:$4 sm:$0xff]  }
  0xf7   :  { %2316 = vmatpush1.bf16.msra.mxu0 %v3201_v12  ;;  %2398 = vmatpush1.bf16.msra.mxu1 %v3204_v13  ;;  %v3269_v12 = vld [vmem:[%s4364_s3 + $0x304] ss:$16 sps:$4 sm:$0xff]   ;;  %v3272_v13 = vld [vmem:[%s4364_s3 + $0x30c] ss:$16 sps:$4 sm:$0xff]  }
  0xf8   :  { %2317 = vmatprep.subr.bf16.mxu0 %v3209_v14  ;;  %2399 = vmatprep.subr.bf16.mxu1 %v3212_v15  ;;  %v3267_v14 = vld [vmem:[%s4364_s3 + $0x300] ss:$16 sps:$4 sm:$0xff]   ;;  %v3270_v15 = vld [vmem:[%s4364_s3 + $0x308] ss:$16 sps:$4 sm:$0xff]  }
  0xfb   :  { %2318 = vmatpush1.bf16.msra.mxu0 %v3207_v17  ;;  %2400 = vmatpush1.bf16.msra.mxu1 %v3210_v20  ;;  %v3275_v17 = vld [vmem:[%s4364_s3 + $0x324] ss:$16 sps:$4 sm:$0xff]   ;;  %v3278_v20 = vld [vmem:[%s4364_s3 + $0x32c] ss:$16 sps:$4 sm:$0xff]  }
  0xfc   :  { %2319 = vmatprep.subr.bf16.mxu0 %v3215_v21  ;;  %2401 = vmatprep.subr.bf16.mxu1 %v3218_v22  ;;  %v3273_v21 = vld [vmem:[%s4364_s3 + $0x320] ss:$16 sps:$4 sm:$0xff]   ;;  %v3276_v22 = vld [vmem:[%s4364_s3 + $0x328] ss:$16 sps:$4 sm:$0xff]  }
  0xff   :  { %2320 = vmatpush1.bf16.msra.mxu0 %v3213_v23  ;;  %2402 = vmatpush1.bf16.msra.mxu1 %v3216_v24  ;;  %v3281_v23 = vld [vmem:[%s4364_s3 + $0x344] ss:$16 sps:$4 sm:$0xff]   ;;  %v3284_v24 = vld [vmem:[%s4364_s3 + $0x34c] ss:$16 sps:$4 sm:$0xff]  }
 0x100   :  { %2330 = vmatprep.subr.bf16.mxu0 %v3221_v25  ;;  %2412 = vmatprep.subr.bf16.mxu1 %v3224_v26  ;;  %v3279_v25 = vld [vmem:[%s4364_s3 + $0x340] ss:$16 sps:$4 sm:$0xff]   ;;  %v3282_v26 = vld [vmem:[%s4364_s3 + $0x348] ss:$16 sps:$4 sm:$0xff]  }
 0x195   :  { %v1365_v32 = vpop.f32.mrb[0].mxu0  ;;  %v4158_v33 = vpop.f32.mrb[0].mxu1 }
 0x196   :  { %v2800_v18 = vadd.f32 %v1365_v32, %v218_v30  ;;  %v1367_v34 = vpop.f32.mrb[1].mxu0  ;;  %v1490_v35 = vpop.f32.mrb[1].mxu1  ;;  %v3287_v30 = vld [vmem:[%s4364_s3 + $0x364] ss:$16 sps:$4 sm:$0xff]   ;;  %v3288_v32 = vld [vmem:[%s4364_s3 + $0x368] ss:$16 sps:$4 sm:$0xff]  }
 0x197   :  { %v2801_v36 = vadd.f32 %v1367_v34, %v222_v31  ;;  %v1369_v37 = vpop.f32.mrb[2].mxu0  ;;  %v1492_v38 = vpop.f32.mrb[2].mxu1  ;;  %v2803_v39 = vadd.f32 %v1490_v35, %v230_v19  ;;  %v3290_v31 = vld [vmem:[%s4364_s3 + $0x36c] ss:$16 sps:$4 sm:$0xff]   ;;  %v3285_v19 = vld [vmem:[%s4364_s3 + $0x360] ss:$16 sps:$4 sm:$0xff]  }
 0x198   :  { %v1370_v40 = vpop.f32.mrb[3].mxu0  ;;  %v1493_v41 = vpop.f32.mrb[3].mxu1  ;;  %v1495_v46 = vpack.c.bf16 %v2800_v18, %v2800_v18  ;;  %v3293_v18 = vld [vmem:[%s4364_s3 + $0x384] ss:$16 sps:$4 sm:$0xff]   ;;  %v3296_v34 = vld [vmem:[%s4364_s3 + $0x38c] ss:$16 sps:$4 sm:$0xff]  }
 0x199   :  { %v1496_v43 = vpack.c.bf16 %v2801_v36, %v2801_v36  ;;  %v1498_v49 = vpack.c.bf16 %v2803_v39, %v2803_v39  ;;  %v3291_v35 = vld [vmem:[%s4364_s3 + $0x380] ss:$16 sps:$4 sm:$0xff]   ;;  %v3294_v36 = vld [vmem:[%s4364_s3 + $0x388] ss:$16 sps:$4 sm:$0xff]   ;;  %v3299_v37 = vld [vmem:[%s4364_s3 + $0x3a4] ss:$16 sps:$4 sm:$0xff]  }
 0x19a   :  { %v3302_v38 = vld [vmem:[%s4364_s3 + $0x3ac] ss:$16 sps:$4 sm:$0xff]   ;;  %v3297_v39 = vld [vmem:[%s4364_s3 + $0x3a0] ss:$16 sps:$4 sm:$0xff]   ;;  %v3300_v40 = vld [vmem:[%s4364_s3 + $0x3a8] ss:$16 sps:$4 sm:$0xff]  }
 0x19b   :  { %2321 = vmatprep.mubr.bf16.mxu0 %v1496_v43  ;;  %2403 = vmatprep.mubr.bf16.mxu1 %v1496_v43  ;;  %v225_v41 = vsub.s32 2, %v3464_v42  ;;  %v3305_v43 = vld [vmem:[%s4364_s3 + $0x3c4] ss:$16 sps:$4 sm:$0xff]  }
 0x19c   :  { %2322 = vmatmul.mubr.bf16.vlgmr.msra.gmra.mrb[4].mxu0 %v1495_v46  ;;  %2404 = vmatmul.mubr.bf16.vlgmr.msra.gmra.mrb[4].mxu1 %v1495_v46  ;;  %v3306_v46 = vld [vmem:[%s4364_s3 + $0x3c8] ss:$16 sps:$4 sm:$0xff]  }
 0x19d   :  { %2331 = vmatpush1.bf16.msra.mxu0 %v3219_v44  ;;  %2413 = vmatpush1.bf16.msra.mxu1 %v3222_v45  ;;  %v3308_v44 = vld [vmem:[%s4364_s3 + $0x3cc] ss:$16 sps:$4 sm:$0xff]   ;;  %v3303_v45 = vld [vmem:[%s4364_s3 + $0x3c0] ss:$16 sps:$4 sm:$0xff]  }
 0x19e   :  { %2362 = vmatprep.mubr.bf16.mxu0 %v1498_v49  ;;  %2444 = vmatprep.mubr.bf16.mxu1 %v1498_v49  ;;  %v3314_v49 = vld [vmem:[%s4364_s3 + $0x3ec] ss:$16 sps:$4 sm:$0xff]  }
 0x19f   :  { %2332 = vmatprep.subr.bf16.mxu0 %v3227_v47  ;;  %2414 = vmatprep.subr.bf16.mxu1 %v3230_v48  ;;  %v226_v47 = vrot.slane %v4145_v16, %v225_v41  ;;  %v3311_v48 = vld [vmem:[%s4364_s3 + $0x3e4] ss:$16 sps:$4 sm:$0xff]   ;;  %v3312_v16 = vld [vmem:[%s4364_s3 + $0x3e8] ss:$16 sps:$4 sm:$0xff]  }
 0x1a1   :  { %2333 = vmatpush1.bf16.msra.mxu0 %v3225_v50  ;;  %2415 = vmatpush1.bf16.msra.mxu1 %v3228_v51  ;;  %v3309_v50 = vld [vmem:[%s4364_s3 + $0x3e0] ss:$16 sps:$4 sm:$0xff]   ;;  %v2802_v51 = vadd.f32 %v4158_v33, %v226_v47 }
 0x1a2   :  { %2334 = vmatprep.subr.bf16.mxu0 %v3233_v52  ;;  %2416 = vmatprep.subr.bf16.mxu1 %v3236_v53  ;;  %v1627_v53 = vld [vmem:[%s4366_s4] sm:$0xf] }
 0x1a3   :  { %v1497_v52 = vpack.c.bf16 %v2802_v51, %v2802_v51  ;;  %v1636_v33 = vrot.slane %v1627_v53, %v221_v28 }
 0x1a5   :  { %2335 = vmatpush1.bf16.msra.mxu0 %v3231_v54  ;;  %2417 = vmatpush1.bf16.msra.mxu1 %v3234_v55  ;;  %v3316_v54 = vmov 1983009808  }
 0x1a6   :  { %2336 = vmatprep.subr.bf16.mxu0 %v3239_v56  ;;  %2418 = vmatprep.subr.bf16.mxu1 %v3242_v57  ;;  %v2460_v55 = vunpack.c.l.s4 %v3316_v54  ;;  %v1632_v56 = vrot.slane %v1627_v53, %v217_v27  ;;  %v1640_v57 = vrot.slane %v1627_v53, %v225_v41 }
 0x1a9   :  { %2337 = vmatpush1.bf16.msra.mxu0 %v3237_v58  ;;  %2419 = vmatpush1.bf16.msra.mxu1 %v3240_v59  ;;  %v2461_v58 = vunpack.c.0.s8 %v2460_v55  ;;  %v1644_v59 = vrot.slane %v1627_v53, %v229_v29 }
 0x1aa   :  { %2338 = vmatprep.subr.bf16.mxu0 %v3245_v60  ;;  %2420 = vmatprep.subr.bf16.mxu1 %v3248_v61 }
 0x1ad   :  { %2339 = vmatpush1.bf16.msra.mxu0 %v3243_v62  ;;  %2421 = vmatpush1.bf16.msra.mxu1 %v3246_v63 }
 0x1ae   :  { %2340 = vmatprep.subr.bf16.mxu0 %v3251_v0  ;;  %2422 = vmatprep.subr.bf16.mxu1 %v3254_v1 }
 0x1b1   :  { %2341 = vmatpush1.bf16.msra.mxu0 %v3249_v2  ;;  %2423 = vmatpush1.bf16.msra.mxu1 %v3252_v3  ;;  %v2464_v3 = vsub.s32 %v2461_v58, %v3464_v42 }
 0x1b2   :  { %2342 = vmatprep.subr.bf16.mxu0 %v3257_v4  ;;  %2424 = vmatprep.subr.bf16.mxu1 %v3260_v5 }
 0x1b5   :  { %2343 = vmatpush1.bf16.msra.mxu0 %v3255_v6  ;;  %2425 = vmatpush1.bf16.msra.mxu1 %v3258_v7 }
 0x1b6   :  { %2344 = vmatprep.subr.bf16.mxu0 %v3263_v8  ;;  %2426 = vmatprep.subr.bf16.mxu1 %v3266_v9 }
 0x1b9   :  { %2345 = vmatpush1.bf16.msra.mxu0 %v3261_v10  ;;  %2427 = vmatpush1.bf16.msra.mxu1 %v3264_v11 }
 0x1ba   :  { %2346 = vmatprep.subr.bf16.mxu0 %v3269_v12  ;;  %2428 = vmatprep.subr.bf16.mxu1 %v3272_v13 }
 0x1bd   :  { %2347 = vmatpush1.bf16.msra.mxu0 %v3267_v14  ;;  %2429 = vmatpush1.bf16.msra.mxu1 %v3270_v15 }
 0x1be   :  { %2348 = vmatprep.subr.bf16.mxu0 %v3275_v17  ;;  %2430 = vmatprep.subr.bf16.mxu1 %v3278_v20 }
 0x1c1   :  { %2349 = vmatpush1.bf16.msra.mxu0 %v3273_v21  ;;  %2431 = vmatpush1.bf16.msra.mxu1 %v3276_v22 }
 0x1c2   :  { %2350 = vmatprep.subr.bf16.mxu0 %v3281_v23  ;;  %2432 = vmatprep.subr.bf16.mxu1 %v3284_v24 }
 0x1c5   :  { %2351 = vmatpush1.bf16.msra.mxu0 %v3279_v25  ;;  %2433 = vmatpush1.bf16.msra.mxu1 %v3282_v26 }
 0x1c6   :  { %2352 = vmatprep.subr.bf16.mxu0 %v3287_v30  ;;  %2434 = vmatprep.subr.bf16.mxu1 %v3290_v31 }
 0x1c9   :  { %2353 = vmatpush1.bf16.msra.mxu0 %v3285_v19  ;;  %2435 = vmatpush1.bf16.msra.mxu1 %v3288_v32 }
 0x1ca   :  { %2354 = vmatprep.subr.bf16.mxu0 %v3293_v18  ;;  %2436 = vmatprep.subr.bf16.mxu1 %v3296_v34 }
 0x1cd   :  { %2355 = vmatpush1.bf16.msra.mxu0 %v3291_v35  ;;  %2437 = vmatpush1.bf16.msra.mxu1 %v3294_v36 }
 0x1ce   :  { %2356 = vmatprep.subr.bf16.mxu0 %v3299_v37  ;;  %2438 = vmatprep.subr.bf16.mxu1 %v3302_v38 }
 0x1d1   :  { %2357 = vmatpush1.bf16.msra.mxu0 %v3297_v39  ;;  %2439 = vmatpush1.bf16.msra.mxu1 %v3300_v40 }
 0x1d2   :  { %2358 = vmatprep.subr.bf16.mxu0 %v3305_v43  ;;  %2440 = vmatprep.subr.bf16.mxu1 %v3308_v44 }
 0x1d5   :  { %2359 = vmatpush1.bf16.msra.mxu0 %v3303_v45  ;;  %2441 = vmatpush1.bf16.msra.mxu1 %v3306_v46 }
 0x1d6   :  { %2360 = vmatprep.subr.bf16.mxu0 %v3311_v48  ;;  %2442 = vmatprep.subr.bf16.mxu1 %v3314_v49 }
 0x1d9   :  { %2361 = vmatpush1.bf16.msra.mxu0 %v3309_v50  ;;  %2443 = vmatpush1.bf16.msra.mxu1 %v3312_v16 }
 0x1dc   :  { %2363 = vmatmul.mubr.bf16.vlgmr.msra.gmra.mrb[4].mxu0 %v1497_v52  ;;  %2445 = vmatmul.mubr.bf16.vlgmr.msra.gmra.mrb[4].mxu1 %v1497_v52 }
 0x2af   :  { %v2364_v60 = vpop.f32.mrb[4].mxu0  ;;  %v2446_v61 = vpop.f32.mrb[4].mxu1 }
 0x2b0   :  { %v2804_v62 = vadd.f32 %v2364_v60, %v1632_v56  ;;  %v2806_v63 = vadd.f32 %v2446_v61, %v1640_v57  ;;  %v2366_v0 = vpop.f32.mrb[5].mxu0  ;;  %v2448_v1 = vpop.f32.mrb[5].mxu1 }
 0x2b1   :  { %v2805_v2 = vadd.f32 %v2366_v0, %v1636_v33  ;;  %v2807_v4 = vadd.f32 %v2448_v1, %v1644_v59  ;;  %v2368_v5 = vpop.f32.mrb[6].mxu0  ;;  %v2450_v27 = vpop.f32.mrb[6].mxu1 }
 0x2b2   :  { %v2369_v6 = vpop.f32.mrb[7].mxu0  ;;  %v2451_v7 = vpop.f32.mrb[7].mxu1 }
 0x2b3   :  { %v2457_v8 = vcombine.low %v2804_v62, %v2805_v2  ;;  %v2458_v28 = vcombine.low %v2806_v63, %v2807_v4 }
 0x2b5   :  { %v2465_v9 = vrot.slane %v2457_v8, %v2464_v3  ;;  %v2472_v10 = vrot.slane %v2458_v28, %v2464_v3 }
 0x2b7   :  { %v2473_v11 = vcombine.low %v2465_v9, %v2472_v10 }
 0x2b9   :  { %2475 = vst [vmem:[%s4367_s5] sm:$0xff] %v2473_v11 }

// kernel: feature_extractor_forward.5
= control target key start
LH: loop header
LB: loop body
LE: loop exit
PB: predicated region body
PF: predicated region fallthrough
CT: control target
= control target key end

     0   :  { %8 = vsyncpa [#allocation4], 0  ;;  %s12392_s0 = inlined_call_operand.vmem [shape: bf16[2,65536], index: 0, kind: input, shape index: {}]   ;;  %s12393_s1 = inlined_call_operand.hbm [shape: bf16[32768,512], index: 1, kind: input, shape index: {}]   ;;  %s12394_s2 = inlined_call_operand.vmem [shape: f32[1,512], index: 2, kind: input, shape index: {}]   ;;  %s12395_s3 = inlined_call_operand.vmem [shape: f32[2,512], index: 3, kind: output, shape index: {}]  }
   0x1   :  { %10 = vsyncpa [#allocation4 + $0x1], 0  ;;  %s11026_s12 = smov 0   ;;  %s11028_s13 = smov 0  }
   0x2   :  { %s11030_s14 = smov 0   ;;  %s11032_s15 = smov 0  }
   0x3   :  { %s11034_s16 = smov 0   ;;  %s11036_s17 = smov 0  }
   0x4   :  { %s11038_s18 = smov 0   ;;  %s11040_s19 = smov 0  }
   0x5 LB: > { %s8122_s20 = sadd.s32 4294967295, %s10998_s19   ;;  %s28_s21 = sadd.s32 1, %s10990_s17  ;;  %s10998_s19 = sphi %s11040_s19, %s16_s19   ;;  %s10994_s18 = sphi %s11038_s18, %s12406_s18   ;;  %s10990_s17 = sphi %s11036_s17, %s12405_s17   ;;  %s10986_s16 = sphi %s11034_s16, %s12404_s16   ;;  %s10982_s15 = sphi %s11032_s15, %s12403_s15   ;;  %s10978_s14 = sphi %s11030_s14, %s12402_s14   ;;  %s10974_s13 = sphi %s11028_s13, %s12401_s13   ;;  %s10970_s12 = sphi %s11026_s12, %s12400_s12  }
   0x6   : > { %p29_p0 = scmp.ge.s32.totalorder %s28_s21, 2  ;;  %s31_s22 = sadd.s32 1, %s10994_s18 }
   0x7   : > { %s74_s23 = sadd.s32 1, %s10978_s14  ;;  %p81_p1 = scmp.ne.s32.totalorder %s10978_s14, %s10974_s13 }
   0x8   : > { %s12408_s21 = smov (%p29_p0, %s28_s21), 0  ;;  %s12410_s22 = smov (!%p29_p0, %s31_s22), %s10994_s18 }
   0x9   : > { %p82_p2 = scmp.eq.s32.totalorder %s10998_s19, 0  ;;  %p87_p3 = scmp.ne.s32.totalorder %s10974_s13, %s10970_s12 }
   0xa   : > { %p33_p4 = scmp.ge.s32.totalorder %s12410_s22, 8  ;;  %p88_p5 = scmp.eq.s32.totalorder %s8122_s20, 0 }
   0xb   : > { %p11075_p6 = por %p82_p2, %p81_p1  ;;  %p9290_p8 = scmp.lt.s32.totalorder %s10998_s19, 16 }
   0xc   : > { %s12412_s22 = smov (%p33_p4, %s12410_s22), 0  ;;  %p11081_p7 = por %p88_p5, %p87_p3 }
   0xd   : > { %s71_s26 = ssub.s32 %s10994_s18, %s12412_s22  ;;  %s177_s27 = sand.u32 1, %s10978_s14  }
   0xe   : > { %p72_p9 = scmp.eq.s32.totalorder %s71_s26, 0  ;;  %s8127_s28 = sshll.u32 %s177_s27, 13 }
   0xf   : > { %s9163_s29 = sshll.u32 %s10994_s18, 17  ;;  %s181_s7 = scalar_lea.vmem [#allocation3], %s8127_s28 }
  0x10   : > { %s11091_s30 = scalar_select %p72_p9, %s10978_s14, %s74_s23  }
  0x11   : > { %s11096_s6 = scalar_lea.hbm %s12393_s1, %s9163_s29  ;;  %s189_s8 = sshll.u32 %s181_s7, 4  ;;  %s11104_s8 = int_to_ptr.vmem [resolvable:$true] %s189_s8 }
  0x12   : > { %p11100_p10 = pnand %p9290_p8, %p11075_p6  ;;  %s11106_s10 = scalar_lea.sflag [#allocation4], %s177_s27 }
  0x13   : > { %s10902_s11 = scalar_lea.hbm %s11096_s6, 131072  ;;  %s10907_s23 = scalar_lea.hbm %s12393_s1, 1048576 }
  0x14   : > { %p10903_p11 = scmp.ne.s32.totalorder %s11096_s6, %s10902_s11  ;;  %p10904_p12 = pneg %p11100_p10 }
  0x15   : > { %p10908_p1 = scmp.lt.u32.totalorder %s11096_s6, %s12393_s1  ;;  %p10909_p2 = scmp.lt.u32.totalorder %s10907_s23, %s10902_s11 }
  0x16   : > { %p10905_p13 = pnand %p10904_p12, %p10903_p11  ;;  %p10911_p4 = scmp.lt.u32.totalorder %s10902_s11, %s11096_s6 }
  0x17   : > { %p10910_p3 = por %p10909_p2, %p10908_p1 }
  0x18   : > { %p10906_p0 = pneg %p10905_p13 }
  0x19   : > { %p10912_p5 = por %p10911_p4, %p10910_p3 }
  0x1b   : > { %p10913_p6 = pnand %p10912_p5, %p10906_p0 }
  0x1d   : > { %10916 = shalt.err (!%p10913_p6)
}
  0x1e   : > { %s10917_s27 = scalar_lea.vmem %s11104_s8, 131072  ;;  %s11000_s28 = smov [#allocation3]  }
  0x1f   : > { %p10918_p8 = scmp.ne.s32.totalorder %s11104_s8, %s10917_s27  ;;  %s10922_s29 = sshll.u32 %s11000_s28, 4  ;;  %s10923_s29 = int_to_ptr.vmem [resolvable:$false] %s10922_s29 }
  0x20   : > { %s10924_s4 = scalar_lea.vmem %s10923_s29, 262144  ;;  %p10925_p13 = scmp.lt.s32.totalorder %s11104_s8, %s10923_s29 }
  0x21   : > { %p10920_p9 = pnand %p10918_p8, %p10904_p12  ;;  %p10926_p1 = scmp.lt.s32.totalorder %s10924_s4, %s10917_s27 }
  0x23   : > { %p10921_p11 = pneg %p10920_p9  ;;  %p10927_p2 = por %p10926_p1, %p10925_p13 }
  0x25   : > { %p10928_p3 = pnand %p10927_p2, %p10921_p11 }
  0x27   : > { %10931 = shalt.err (!%p10928_p3)
}
  0x28   : > { %s11001_s5 = smov 256   ;;  %s11002_s7 = smov 16  }
  0x29   : > { %9289 = dma.hbm_to_vmem [thread:$0]  (!%p11100_p10), %s11096_s6, 131072, %s11104_s8, %s11106_s10, %s11001_s5, %s11001_s5, %s11002_s7  }
  0x2a   : > { %p8131_p12 = scmp.ge.s32.totalorder %s10998_s19, 1  ;;  %p197_p0 = scmp.lt.s32.totalorder %s10998_s19, 17 }
  0x2c   : > { %p198_p4 = pnand %p8131_p12, %p197_p0 }
  0x2d   : > { %s203_s11 = sand.u32 (!%p198_p4), 1, %s10974_s13  }
  0x2e   : > { %201 = sbr.rel (%p198_p4) target bundleno = 1325 (0x52d), region = 32  ;;  %s8132_s12 = sshll.u32 (!%p198_p4), %s203_s11, 13 }
  0x2f   : > { %s204_s20 = scalar_lea.sflag (!%p198_p4), [#allocation4], %s203_s11  ;;  %s11137_s23 = scalar_lea.vmem (!%p198_p4), [#allocation3], %s8132_s12 }
  0x35   : > { %10965 = dma.done.wait (%p11081_p7), %s204_s20, 131072  }
  0x36   : > { %10967 = vsyncadd (%p11081_p7), %s204_s20, 4294836224  ;;  %s8133_s6 = sshll.u32 %s10982_s15, 3  ;;  %p259_p10 = scmp.eq.s32.totalorder %s10986_s16, 0 }
  0x37   : > { %s241_s8 = sadd.s32 %s10986_s16, %s8133_s6  ;;  %p260_p5 = scmp.eq.s32.totalorder %s10982_s15, 0 }
  0x38   : > { %s8134_s9 = sshll.u32 %s241_s8, 5 }
  0x39   : > { %p245_p6 = scmp.lt.s32.totalorder %s8134_s9, 511  ;;  %p261_p8 = pnand %p260_p5, %p259_p10 }
  0x3a   : > { %v11003_v0 = vmov (!%p261_p8), 0.0  }
  0x3b   : > { %s12414_s9 = smov (!%p245_p6, %s8134_s9), 511  ;;  %264 = sbr.rel (%p261_p8) target bundleno = 66 (0x42), region = 40 }
  0x3c   : > { %s11150_s26 = scalar_lea.vmem %s12392_s0, %s12414_s9  ;;  %265 = vst [vmem:[#allocation2] sm:$0xff] (!%p261_p8), %v11003_v0 }
  0x42 PF: > { %v9360_v1 = vld [vmem:[%s11137_s23 + $0x4] ss:$16 sps:$4 sm:$0xff]   ;;  %v9362_v2 = vld [vmem:[%s11137_s23 + $0xc] ss:$16 sps:$4 sm:$0xff]   ;;  %v9364_v3 = vld [vmem:[%s11137_s23] ss:$16 sps:$4 sm:$0xff]   ;;  %v1303_v39 = vlaneseq }
  0x43   : > { %6647 = vmatprep.subr.bf16.mxu0 %v9360_v1  ;;  %v9365_v4 = vld [vmem:[%s11137_s23 + $0x8] ss:$16 sps:$4 sm:$0xff]   ;;  %7303 = vmatprep.subr.bf16.mxu1 %v9362_v2  ;;  %v9366_v5 = vld [vmem:[%s11137_s23 + $0x24] ss:$16 sps:$4 sm:$0xff]   ;;  %v9368_v6 = vld [vmem:[%s11137_s23 + $0x2c] ss:$16 sps:$4 sm:$0xff]  }
  0x44   : > { %6648 = vmatpush1.bf16.msra.mxu0 %v9364_v3  ;;  %7304 = vmatpush1.bf16.msra.mxu1 %v9365_v4  ;;  %v9370_v7 = vld [vmem:[%s11137_s23 + $0x20] ss:$16 sps:$4 sm:$0xff]   ;;  %v9371_v8 = vld [vmem:[%s11137_s23 + $0x28] ss:$16 sps:$4 sm:$0xff]   ;;  %v9372_v9 = vld [vmem:[%s11137_s23 + $0x44] ss:$16 sps:$4 sm:$0xff]  }
  0x45   : > { %6649 = vmatprep.subr.bf16.mxu0 %v9366_v5  ;;  %7305 = vmatprep.subr.bf16.mxu1 %v9368_v6  ;;  %v9374_v10 = vld [vmem:[%s11137_s23 + $0x4c] ss:$16 sps:$4 sm:$0xff]   ;;  %v9376_v11 = vld [vmem:[%s11137_s23 + $0x40] ss:$16 sps:$4 sm:$0xff]   ;;  %v9377_v12 = vld [vmem:[%s11137_s23 + $0x48] ss:$16 sps:$4 sm:$0xff]  }
  0x46   : > { %v9378_v13 = vld [vmem:[%s11137_s23 + $0x64] ss:$16 sps:$4 sm:$0xff]   ;;  %v9380_v14 = vld [vmem:[%s11137_s23 + $0x6c] ss:$16 sps:$4 sm:$0xff]   ;;  %v9382_v15 = vld [vmem:[%s11137_s23 + $0x60] ss:$16 sps:$4 sm:$0xff]  }
  0x47   : > { %v9383_v16 = vld [vmem:[%s11137_s23 + $0x68] ss:$16 sps:$4 sm:$0xff]   ;;  %v9384_v17 = vld [vmem:[%s11137_s23 + $0x84] ss:$16 sps:$4 sm:$0xff]   ;;  %v9386_v18 = vld [vmem:[%s11137_s23 + $0x8c] ss:$16 sps:$4 sm:$0xff]  }
  0x48   : > { %6650 = vmatpush1.bf16.msra.mxu0 %v9370_v7  ;;  %7306 = vmatpush1.bf16.msra.mxu1 %v9371_v8  ;;  %v9388_v19 = vld [vmem:[%s11137_s23 + $0x80] ss:$16 sps:$4 sm:$0xff]   ;;  %v9389_v20 = vld [vmem:[%s11137_s23 + $0x88] ss:$16 sps:$4 sm:$0xff]   ;;  %v9390_v21 = vld [vmem:[%s11137_s23 + $0xa4] ss:$16 sps:$4 sm:$0xff]  }
  0x49   : > { %6651 = vmatprep.subr.bf16.mxu0 %v9372_v9  ;;  %7307 = vmatprep.subr.bf16.mxu1 %v9374_v10  ;;  %v9392_v22 = vld [vmem:[%s11137_s23 + $0xac] ss:$16 sps:$4 sm:$0xff]   ;;  %v9394_v23 = vld [vmem:[%s11137_s23 + $0xa0] ss:$16 sps:$4 sm:$0xff]   ;;  %v9395_v24 = vld [vmem:[%s11137_s23 + $0xa8] ss:$16 sps:$4 sm:$0xff]  }
  0x4a   : > { %v9396_v25 = vld [vmem:[%s11137_s23 + $0xc4] ss:$16 sps:$4 sm:$0xff]   ;;  %v9398_v26 = vld [vmem:[%s11137_s23 + $0xcc] ss:$16 sps:$4 sm:$0xff]   ;;  %v9400_v27 = vld [vmem:[%s11137_s23 + $0xc0] ss:$16 sps:$4 sm:$0xff]  }
  0x4b   : > { %v9401_v28 = vld [vmem:[%s11137_s23 + $0xc8] ss:$16 sps:$4 sm:$0xff]   ;;  %v9402_v29 = vld [vmem:[%s11137_s23 + $0xe4] ss:$16 sps:$4 sm:$0xff]   ;;  %v9404_v30 = vld [vmem:[%s11137_s23 + $0xec] ss:$16 sps:$4 sm:$0xff]  }
  0x4c   : > { %6652 = vmatpush1.bf16.msra.mxu0 %v9376_v11  ;;  %7308 = vmatpush1.bf16.msra.mxu1 %v9377_v12  ;;  %v9406_v31 = vld [vmem:[%s11137_s23 + $0xe0] ss:$16 sps:$4 sm:$0xff]   ;;  %v9407_v32 = vld [vmem:[%s11137_s23 + $0xe8] ss:$16 sps:$4 sm:$0xff]   ;;  %v9408_v33 = vld [vmem:[%s11137_s23 + $0x104] ss:$16 sps:$4 sm:$0xff]  }
  0x4d   : > { %6653 = vmatprep.subr.bf16.mxu0 %v9378_v13  ;;  %7309 = vmatprep.subr.bf16.mxu1 %v9380_v14  ;;  %v9410_v34 = vld [vmem:[%s11137_s23 + $0x10c] ss:$16 sps:$4 sm:$0xff]   ;;  %v9412_v35 = vld [vmem:[%s11137_s23 + $0x100] ss:$16 sps:$4 sm:$0xff]   ;;  %v9413_v36 = vld [vmem:[%s11137_s23 + $0x108] ss:$16 sps:$4 sm:$0xff]  }
  0x4e   : > { %v11004_v37 = vmov 1966171168   ;;  %v9414_v40 = vld [vmem:[%s11137_s23 + $0x124] ss:$16 sps:$4 sm:$0xff]   ;;  %v9416_v41 = vld [vmem:[%s11137_s23 + $0x12c] ss:$16 sps:$4 sm:$0xff]  }
  0x4f   : > { %v1301_v38 = vunpack.c.l.s4 %v11004_v37  ;;  %v9418_v42 = vld [vmem:[%s11137_s23 + $0x120] ss:$16 sps:$4 sm:$0xff]   ;;  %v11191_v44 = vshrl.u32 %v1303_v39, 7  ;;  %v9419_v45 = vld [vmem:[%s11137_s23 + $0x128] ss:$16 sps:$4 sm:$0xff]   ;;  %p7983_p7 = scmp.eq.s32.totalorder %s10986_s16, 7 }
  0x50   : > { %6654 = vmatpush1.bf16.msra.mxu0 %v9382_v15  ;;  %7310 = vmatpush1.bf16.msra.mxu1 %v9383_v16  ;;  %v9420_v46 = vld [vmem:[%s11137_s23 + $0x144] ss:$16 sps:$4 sm:$0xff]   ;;  %v9422_v47 = vld [vmem:[%s11137_s23 + $0x14c] ss:$16 sps:$4 sm:$0xff]   ;;  %v9424_v48 = vld [vmem:[%s11137_s23 + $0x140] ss:$16 sps:$4 sm:$0xff]  }
  0x51   : > { %6655 = vmatprep.subr.bf16.mxu0 %v9384_v17  ;;  %7311 = vmatprep.subr.bf16.mxu1 %v9386_v18  ;;  %v1302_v43 = vunpack.c.0.s8 %v1301_v38  ;;  %v9425_v49 = vld [vmem:[%s11137_s23 + $0x148] ss:$16 sps:$4 sm:$0xff]   ;;  %v9426_v51 = vld [vmem:[%s11137_s23 + $0x164] ss:$16 sps:$4 sm:$0xff]   ;;  %v9428_v52 = vld [vmem:[%s11137_s23 + $0x16c] ss:$16 sps:$4 sm:$0xff]  }
  0x52   : > { %v11204_v53 = vld [vmem:[%s11150_s26] sm:$0xff]  ;;  %v9430_v54 = vld [vmem:[%s11137_s23 + $0x160] ss:$16 sps:$4 sm:$0xff]   ;;  %v9432_v57 = vld [vmem:[%s11137_s23 + $0x184] ss:$16 sps:$4 sm:$0xff]   ;;  %p7984_p9 = scmp.eq.s32.totalorder %s10982_s15, 1 }
  0x53   : > { %v11199_v50 = vsub.s32 %v1302_v43, %v11191_v44  ;;  %v9431_v56 = vld [vmem:[%s11137_s23 + $0x168] ss:$16 sps:$4 sm:$0xff]   ;;  %v9434_v58 = vld [vmem:[%s11137_s23 + $0x18c] ss:$16 sps:$4 sm:$0xff]   ;;  %v9436_v60 = vld [vmem:[%s11137_s23 + $0x180] ss:$16 sps:$4 sm:$0xff]  }
  0x54   : > { %6656 = vmatpush1.bf16.msra.mxu0 %v9388_v19  ;;  %7312 = vmatpush1.bf16.msra.mxu1 %v9389_v20  ;;  %v9437_v62 = vld [vmem:[%s11137_s23 + $0x188] ss:$16 sps:$4 sm:$0xff]   ;;  %v9438_v63 = vld [vmem:[%s11137_s23 + $0x1a4] ss:$16 sps:$4 sm:$0xff]   ;;  %v9440_v0 = vld [vmem:[%s11137_s23 + $0x1ac] ss:$16 sps:$4 sm:$0xff]   ;;  %p12351_p11 = pnand %p7984_p9, %p7983_p7 }
  0x55   : > { %6657 = vmatprep.subr.bf16.mxu0 %v9390_v21  ;;  %7313 = vmatprep.subr.bf16.mxu1 %v9392_v22  ;;  %v1306_v55 = vrot.slane %v11204_v53, %v11199_v50  ;;  %v9442_v1 = vld [vmem:[%s11137_s23 + $0x1a0] ss:$16 sps:$4 sm:$0xff]   ;;  %v9443_v2 = vld [vmem:[%s11137_s23 + $0x1a8] ss:$16 sps:$4 sm:$0xff]   ;;  %v9444_v3 = vld [vmem:[%s11137_s23 + $0x1c4] ss:$16 sps:$4 sm:$0xff]  }
  0x56   : > { %v9446_v4 = vld [vmem:[%s11137_s23 + $0x1cc] ss:$16 sps:$4 sm:$0xff]   ;;  %v9448_v5 = vld [vmem:[%s11137_s23 + $0x1c0] ss:$16 sps:$4 sm:$0xff]   ;;  %v9449_v6 = vld [vmem:[%s11137_s23 + $0x1c8] ss:$16 sps:$4 sm:$0xff]  }
  0x57   : > { %v1314_v59 = vcombine.high %v1306_v55, %v1306_v55  ;;  %v9450_v7 = vld [vmem:[%s11137_s23 + $0x1e4] ss:$16 sps:$4 sm:$0xff]   ;;  %v9452_v8 = vld [vmem:[%s11137_s23 + $0x1ec] ss:$16 sps:$4 sm:$0xff]   ;;  %v9454_v9 = vld [vmem:[%s11137_s23 + $0x1e0] ss:$16 sps:$4 sm:$0xff]   ;;  %v11231_v14 = vrot.slane %v1306_v55, %v11199_v50 }
  0x58   : > { %6658 = vmatpush1.bf16.msra.mxu0 %v9394_v23  ;;  %7314 = vmatpush1.bf16.msra.mxu1 %v9395_v24  ;;  %v9455_v10 = vld [vmem:[%s11137_s23 + $0x1e8] ss:$16 sps:$4 sm:$0xff]   ;;  %v9458_v11 = vld [vmem:[%s11137_s23 + $0x204] ss:$16 sps:$4 sm:$0xff]   ;;  %v9461_v12 = vld [vmem:[%s11137_s23 + $0x20c] ss:$16 sps:$4 sm:$0xff]  }
  0x59   : > { %6659 = vmatprep.subr.bf16.mxu0 %v9396_v25  ;;  %7315 = vmatprep.subr.bf16.mxu1 %v9398_v26  ;;  %v1336_v61 = vrot.slane %v1314_v59, %v11199_v50  ;;  %v9456_v13 = vld [vmem:[%s11137_s23 + $0x200] ss:$16 sps:$4 sm:$0xff]   ;;  %v9459_v15 = vld [vmem:[%s11137_s23 + $0x208] ss:$16 sps:$4 sm:$0xff]   ;;  %v9464_v16 = vld [vmem:[%s11137_s23 + $0x224] ss:$16 sps:$4 sm:$0xff]  }
  0x5a   : > { %v9467_v17 = vld [vmem:[%s11137_s23 + $0x22c] ss:$16 sps:$4 sm:$0xff]   ;;  %v9462_v19 = vld [vmem:[%s11137_s23 + $0x220] ss:$16 sps:$4 sm:$0xff]   ;;  %v9465_v20 = vld [vmem:[%s11137_s23 + $0x228] ss:$16 sps:$4 sm:$0xff]  }
  0x5b   : > { %6679 = vmatprep.mubr.bf16.mxu0 %v1336_v61  ;;  %7335 = vmatprep.mubr.bf16.mxu1 %v1336_v61  ;;  %v1346_v18 = vcombine.high %v1336_v61, %v1336_v61  ;;  %v9470_v21 = vld [vmem:[%s11137_s23 + $0x244] ss:$16 sps:$4 sm:$0xff]   ;;  %v9473_v22 = vld [vmem:[%s11137_s23 + $0x24c] ss:$16 sps:$4 sm:$0xff]   ;;  %v9468_v23 = vld [vmem:[%s11137_s23 + $0x240] ss:$16 sps:$4 sm:$0xff]  }
  0x5c   : > { %6660 = vmatpush1.bf16.msra.mxu0 %v9400_v27  ;;  %7316 = vmatpush1.bf16.msra.mxu1 %v9401_v28  ;;  %v9471_v24 = vld [vmem:[%s11137_s23 + $0x248] ss:$16 sps:$4 sm:$0xff]   ;;  %v9476_v25 = vld [vmem:[%s11137_s23 + $0x264] ss:$16 sps:$4 sm:$0xff]   ;;  %v9479_v26 = vld [vmem:[%s11137_s23 + $0x26c] ss:$16 sps:$4 sm:$0xff]  }
  0x5d   : > { %6661 = vmatprep.subr.bf16.mxu0 %v9402_v29  ;;  %7317 = vmatprep.subr.bf16.mxu1 %v9404_v30  ;;  %v9474_v27 = vld [vmem:[%s11137_s23 + $0x260] ss:$16 sps:$4 sm:$0xff]   ;;  %v9477_v28 = vld [vmem:[%s11137_s23 + $0x268] ss:$16 sps:$4 sm:$0xff]   ;;  %v9482_v29 = vld [vmem:[%s11137_s23 + $0x284] ss:$16 sps:$4 sm:$0xff]  }
  0x5e   : > { %v9485_v30 = vld [vmem:[%s11137_s23 + $0x28c] ss:$16 sps:$4 sm:$0xff]   ;;  %v9494_v37 = vld [vmem:[%s11137_s23 + $0x2c4] ss:$16 sps:$4 sm:$0xff]   ;;  %v9492_v39 = vld [vmem:[%s11137_s23 + $0x2c0] ss:$16 sps:$4 sm:$0xff]  }
  0x5f   : > { %v9497_v38 = vld [vmem:[%s11137_s23 + $0x2cc] ss:$16 sps:$4 sm:$0xff]   ;;  %v9498_v43 = vld [vmem:[%s11137_s23 + $0x2e0] ss:$16 sps:$4 sm:$0xff]   ;;  %v9513_v55 = vld [vmem:[%s11137_s23 + $0x328] ss:$16 sps:$4 sm:$0xff]  }
  0x60   : > { %6662 = vmatpush1.bf16.msra.mxu0 %v9406_v31  ;;  %7318 = vmatpush1.bf16.msra.mxu1 %v9407_v32  ;;  %v9480_v31 = vld [vmem:[%s11137_s23 + $0x280] ss:$16 sps:$4 sm:$0xff]   ;;  %v9483_v32 = vld [vmem:[%s11137_s23 + $0x288] ss:$16 sps:$4 sm:$0xff]   ;;  %v9527_v61 = vld [vmem:[%s11137_s23 + $0x36c] ss:$16 sps:$4 sm:$0xff]  }
  0x61   : > { %6663 = vmatprep.subr.bf16.mxu0 %v9408_v33  ;;  %7319 = vmatprep.subr.bf16.mxu1 %v9410_v34  ;;  %v9488_v33 = vld [vmem:[%s11137_s23 + $0x2a4] ss:$16 sps:$4 sm:$0xff]   ;;  %v9491_v34 = vld [vmem:[%s11137_s23 + $0x2ac] ss:$16 sps:$4 sm:$0xff]   ;;  %v9519_v59 = vld [vmem:[%s11137_s23 + $0x348] ss:$16 sps:$4 sm:$0xff]  }
  0x64   : > { %6664 = vmatpush1.bf16.msra.mxu0 %v9412_v35  ;;  %7320 = vmatpush1.bf16.msra.mxu1 %v9413_v36  ;;  %v9486_v35 = vld [vmem:[%s11137_s23 + $0x2a0] ss:$16 sps:$4 sm:$0xff]   ;;  %v9489_v36 = vld [vmem:[%s11137_s23 + $0x2a8] ss:$16 sps:$4 sm:$0xff]  }
  0x65   : > { %6665 = vmatprep.subr.bf16.mxu0 %v9414_v40  ;;  %7321 = vmatprep.subr.bf16.mxu1 %v9416_v41  ;;  %v9495_v40 = vld [vmem:[%s11137_s23 + $0x2c8] ss:$16 sps:$4 sm:$0xff]   ;;  %v9500_v41 = vld [vmem:[%s11137_s23 + $0x2e4] ss:$16 sps:$4 sm:$0xff]  }
  0x68   : > { %6666 = vmatpush1.bf16.msra.mxu0 %v9418_v42  ;;  %7322 = vmatpush1.bf16.msra.mxu1 %v9419_v45  ;;  %v9503_v42 = vld [vmem:[%s11137_s23 + $0x2ec] ss:$16 sps:$4 sm:$0xff]   ;;  %v9501_v45 = vld [vmem:[%s11137_s23 + $0x2e8] ss:$16 sps:$4 sm:$0xff]  }
  0x69   : > { %6667 = vmatprep.subr.bf16.mxu0 %v9420_v46  ;;  %7323 = vmatprep.subr.bf16.mxu1 %v9422_v47  ;;  %v9506_v46 = vld [vmem:[%s11137_s23 + $0x304] ss:$16 sps:$4 sm:$0xff]   ;;  %v9509_v47 = vld [vmem:[%s11137_s23 + $0x30c] ss:$16 sps:$4 sm:$0xff]  }
  0x6c   : > { %6668 = vmatpush1.bf16.msra.mxu0 %v9424_v48  ;;  %7324 = vmatpush1.bf16.msra.mxu1 %v9425_v49  ;;  %v9504_v48 = vld [vmem:[%s11137_s23 + $0x300] ss:$16 sps:$4 sm:$0xff]   ;;  %v9507_v49 = vld [vmem:[%s11137_s23 + $0x308] ss:$16 sps:$4 sm:$0xff]  }
  0x6d   : > { %6669 = vmatprep.subr.bf16.mxu0 %v9426_v51  ;;  %7325 = vmatprep.subr.bf16.mxu1 %v9428_v52  ;;  %v9512_v51 = vld [vmem:[%s11137_s23 + $0x324] ss:$16 sps:$4 sm:$0xff]   ;;  %v9515_v52 = vld [vmem:[%s11137_s23 + $0x32c] ss:$16 sps:$4 sm:$0xff]  }
  0x70   : > { %6670 = vmatpush1.bf16.msra.mxu0 %v9430_v54  ;;  %7326 = vmatpush1.bf16.msra.mxu1 %v9431_v56  ;;  %v9510_v54 = vld [vmem:[%s11137_s23 + $0x320] ss:$16 sps:$4 sm:$0xff]   ;;  %v9518_v56 = vld [vmem:[%s11137_s23 + $0x344] ss:$16 sps:$4 sm:$0xff]  }
  0x71   : > { %6671 = vmatprep.subr.bf16.mxu0 %v9432_v57  ;;  %7327 = vmatprep.subr.bf16.mxu1 %v9434_v58  ;;  %v9521_v57 = vld [vmem:[%s11137_s23 + $0x34c] ss:$16 sps:$4 sm:$0xff]   ;;  %v9516_v58 = vld [vmem:[%s11137_s23 + $0x340] ss:$16 sps:$4 sm:$0xff]  }
  0x74   : > { %6672 = vmatpush1.bf16.msra.mxu0 %v9436_v60  ;;  %7328 = vmatpush1.bf16.msra.mxu1 %v9437_v62  ;;  %v9524_v60 = vld [vmem:[%s11137_s23 + $0x364] ss:$16 sps:$4 sm:$0xff]   ;;  %v9522_v62 = vld [vmem:[%s11137_s23 + $0x360] ss:$16 sps:$4 sm:$0xff]  }
  0x75   : > { %6673 = vmatprep.subr.bf16.mxu0 %v9438_v63  ;;  %7329 = vmatprep.subr.bf16.mxu1 %v9440_v0  ;;  %v9525_v63 = vld [vmem:[%s11137_s23 + $0x368] ss:$16 sps:$4 sm:$0xff]   ;;  %v9530_v0 = vld [vmem:[%s11137_s23 + $0x384] ss:$16 sps:$4 sm:$0xff]  }
  0x78   : > { %6674 = vmatpush1.bf16.msra.mxu0 %v9442_v1  ;;  %7330 = vmatpush1.bf16.msra.mxu1 %v9443_v2  ;;  %v9533_v1 = vld [vmem:[%s11137_s23 + $0x38c] ss:$16 sps:$4 sm:$0xff]   ;;  %v9528_v2 = vld [vmem:[%s11137_s23 + $0x380] ss:$16 sps:$4 sm:$0xff]  }
  0x79   : > { %6675 = vmatprep.subr.bf16.mxu0 %v9444_v3  ;;  %7331 = vmatprep.subr.bf16.mxu1 %v9446_v4  ;;  %v9531_v3 = vld [vmem:[%s11137_s23 + $0x388] ss:$16 sps:$4 sm:$0xff]   ;;  %v9536_v4 = vld [vmem:[%s11137_s23 + $0x3a4] ss:$16 sps:$4 sm:$0xff]  }
  0x7c   : > { %6676 = vmatpush1.bf16.msra.mxu0 %v9448_v5  ;;  %7332 = vmatpush1.bf16.msra.mxu1 %v9449_v6  ;;  %v9539_v5 = vld [vmem:[%s11137_s23 + $0x3ac] ss:$16 sps:$4 sm:$0xff]   ;;  %v9534_v6 = vld [vmem:[%s11137_s23 + $0x3a0] ss:$16 sps:$4 sm:$0xff]  }
  0x7d   : > { %6677 = vmatprep.subr.bf16.mxu0 %v9450_v7  ;;  %7333 = vmatprep.subr.bf16.mxu1 %v9452_v8  ;;  %v9537_v7 = vld [vmem:[%s11137_s23 + $0x3a8] ss:$16 sps:$4 sm:$0xff]   ;;  %v9542_v8 = vld [vmem:[%s11137_s23 + $0x3c4] ss:$16 sps:$4 sm:$0xff]  }
  0x80   : > { %6678 = vmatpush1.bf16.msra.mxu0 %v9454_v9  ;;  %7334 = vmatpush1.bf16.msra.mxu1 %v9455_v10  ;;  %v9545_v9 = vld [vmem:[%s11137_s23 + $0x3cc] ss:$16 sps:$4 sm:$0xff]   ;;  %v1299_v10 = vcombine.high %v11204_v53, %v11204_v53  ;;  %v9549_v53 = vld [vmem:[%s11137_s23 + $0x3e8] ss:$16 sps:$4 sm:$0xff]  }
  0x81   : > { %6688 = vmatprep.subr.bf16.mxu0 %v9458_v11  ;;  %7344 = vmatprep.subr.bf16.mxu1 %v9461_v12  ;;  %v9540_v11 = vld [vmem:[%s11137_s23 + $0x3c0] ss:$16 sps:$4 sm:$0xff]   ;;  %v9543_v12 = vld [vmem:[%s11137_s23 + $0x3c8] ss:$16 sps:$4 sm:$0xff]  }
  0x83   : > { %6680 = vmatmul.mubr.bf16.vlgmr.msra.gmra.mrb[0].mxu0 %v11231_v14  ;;  %7336 = vmatmul.mubr.bf16.vlgmr.msra.gmra.mrb[0].mxu1 %v11231_v14 }
  0x84   : > { %6689 = vmatpush1.bf16.msra.mxu0 %v9456_v13  ;;  %7345 = vmatpush1.bf16.msra.mxu1 %v9459_v15  ;;  %v9548_v13 = vld [vmem:[%s11137_s23 + $0x3e4] ss:$16 sps:$4 sm:$0xff]   ;;  %v9551_v15 = vld [vmem:[%s11137_s23 + $0x3ec] ss:$16 sps:$4 sm:$0xff]  }
  0x85   : > { %6690 = vmatprep.subr.bf16.mxu0 %v9464_v16  ;;  %7346 = vmatprep.subr.bf16.mxu1 %v9467_v17  ;;  %v11297_v16 = vrot.slane %v1299_v10, %v11199_v50  ;;  %v9546_v17 = vld [vmem:[%s11137_s23 + $0x3e0] ss:$16 sps:$4 sm:$0xff]   ;;  %v9627_v10 = vld [vmem:[%s11137_s23 + $0x588] ss:$16 sps:$4 sm:$0xff]  }
  0x86   : > { %6720 = vmatprep.mubr.bf16.mxu0 %v1346_v18  ;;  %7376 = vmatprep.mubr.bf16.mxu1 %v1346_v18  ;;  %v9554_v18 = vld [vmem:[%s11137_s23 + $0x404] ss:$16 sps:$4 sm:$0xff]  }
  0x88   : > { %6691 = vmatpush1.bf16.msra.mxu0 %v9462_v19  ;;  %7347 = vmatpush1.bf16.msra.mxu1 %v9465_v20  ;;  %v9557_v19 = vld [vmem:[%s11137_s23 + $0x40c] ss:$16 sps:$4 sm:$0xff]   ;;  %v1315_v20 = vcombine.high %v11297_v16, %v11297_v16 }
  0x89   : > { %6692 = vmatprep.subr.bf16.mxu0 %v9470_v21  ;;  %7348 = vmatprep.subr.bf16.mxu1 %v9473_v22  ;;  %v9552_v21 = vld [vmem:[%s11137_s23 + $0x400] ss:$16 sps:$4 sm:$0xff]   ;;  %v1344_v22 = vcombine.high %v11231_v14, %v11231_v14  ;;  %v9561_v14 = vld [vmem:[%s11137_s23 + $0x428] ss:$16 sps:$4 sm:$0xff]  }
  0x8c   : > { %6693 = vmatpush1.bf16.msra.mxu0 %v9468_v23  ;;  %7349 = vmatpush1.bf16.msra.mxu1 %v9471_v24  ;;  %v9555_v23 = vld [vmem:[%s11137_s23 + $0x408] ss:$16 sps:$4 sm:$0xff]   ;;  %v9560_v24 = vld [vmem:[%s11137_s23 + $0x424] ss:$16 sps:$4 sm:$0xff]  }
  0x8d   : > { %6694 = vmatprep.subr.bf16.mxu0 %v9476_v25  ;;  %7350 = vmatprep.subr.bf16.mxu1 %v9479_v26  ;;  %v9563_v25 = vld [vmem:[%s11137_s23 + $0x42c] ss:$16 sps:$4 sm:$0xff]   ;;  %v11312_v26 = vrot.slane %v1315_v20, %v11199_v50  ;;  %v9644_v20 = vld [vmem:[%s11137_s23 + $0x5e4] ss:$16 sps:$4 sm:$0xff]  }
  0x90   : > { %6695 = vmatpush1.bf16.msra.mxu0 %v9474_v27  ;;  %7351 = vmatpush1.bf16.msra.mxu1 %v9477_v28  ;;  %v9558_v27 = vld [vmem:[%s11137_s23 + $0x420] ss:$16 sps:$4 sm:$0xff]   ;;  %v9566_v28 = vld [vmem:[%s11137_s23 + $0x444] ss:$16 sps:$4 sm:$0xff]  }
  0x91   : > { %6696 = vmatprep.subr.bf16.mxu0 %v9482_v29  ;;  %7352 = vmatprep.subr.bf16.mxu1 %v9485_v30  ;;  %v9569_v29 = vld [vmem:[%s11137_s23 + $0x44c] ss:$16 sps:$4 sm:$0xff]   ;;  %v9564_v30 = vld [vmem:[%s11137_s23 + $0x440] ss:$16 sps:$4 sm:$0xff]  }
  0x94   : > { %6697 = vmatpush1.bf16.msra.mxu0 %v9480_v31  ;;  %7353 = vmatpush1.bf16.msra.mxu1 %v9483_v32  ;;  %v9567_v31 = vld [vmem:[%s11137_s23 + $0x448] ss:$16 sps:$4 sm:$0xff]   ;;  %v9572_v32 = vld [vmem:[%s11137_s23 + $0x464] ss:$16 sps:$4 sm:$0xff]  }
  0x95   : > { %6698 = vmatprep.subr.bf16.mxu0 %v9488_v33  ;;  %7354 = vmatprep.subr.bf16.mxu1 %v9491_v34  ;;  %v9575_v33 = vld [vmem:[%s11137_s23 + $0x46c] ss:$16 sps:$4 sm:$0xff]   ;;  %v9570_v34 = vld [vmem:[%s11137_s23 + $0x460] ss:$16 sps:$4 sm:$0xff]  }
  0x98   : > { %6699 = vmatpush1.bf16.msra.mxu0 %v9486_v35  ;;  %7355 = vmatpush1.bf16.msra.mxu1 %v9489_v36  ;;  %v9573_v35 = vld [vmem:[%s11137_s23 + $0x468] ss:$16 sps:$4 sm:$0xff]   ;;  %v9578_v36 = vld [vmem:[%s11137_s23 + $0x484] ss:$16 sps:$4 sm:$0xff]  }
  0x99   : > { %6700 = vmatprep.subr.bf16.mxu0 %v9494_v37  ;;  %7356 = vmatprep.subr.bf16.mxu1 %v9497_v38  ;;  %v9581_v37 = vld [vmem:[%s11137_s23 + $0x48c] ss:$16 sps:$4 sm:$0xff]   ;;  %v9576_v38 = vld [vmem:[%s11137_s23 + $0x480] ss:$16 sps:$4 sm:$0xff]  }
  0x9c   : > { %6701 = vmatpush1.bf16.msra.mxu0 %v9492_v39  ;;  %7357 = vmatpush1.bf16.msra.mxu1 %v9495_v40  ;;  %v9579_v39 = vld [vmem:[%s11137_s23 + $0x488] ss:$16 sps:$4 sm:$0xff]   ;;  %v9584_v40 = vld [vmem:[%s11137_s23 + $0x4a4] ss:$16 sps:$4 sm:$0xff]  }
  0x9d   : > { %6702 = vmatprep.subr.bf16.mxu0 %v9500_v41  ;;  %7358 = vmatprep.subr.bf16.mxu1 %v9503_v42  ;;  %v9587_v41 = vld [vmem:[%s11137_s23 + $0x4ac] ss:$16 sps:$4 sm:$0xff]   ;;  %v9582_v42 = vld [vmem:[%s11137_s23 + $0x4a0] ss:$16 sps:$4 sm:$0xff]  }
  0xa0   : > { %6703 = vmatpush1.bf16.msra.mxu0 %v9498_v43  ;;  %7359 = vmatpush1.bf16.msra.mxu1 %v9501_v45  ;;  %v9585_v43 = vld [vmem:[%s11137_s23 + $0x4a8] ss:$16 sps:$4 sm:$0xff]   ;;  %v9590_v45 = vld [vmem:[%s11137_s23 + $0x4c4] ss:$16 sps:$4 sm:$0xff]  }
  0xa1   : > { %6704 = vmatprep.subr.bf16.mxu0 %v9506_v46  ;;  %7360 = vmatprep.subr.bf16.mxu1 %v9509_v47  ;;  %v9593_v46 = vld [vmem:[%s11137_s23 + $0x4cc] ss:$16 sps:$4 sm:$0xff]   ;;  %v9588_v47 = vld [vmem:[%s11137_s23 + $0x4c0] ss:$16 sps:$4 sm:$0xff]  }
  0xa4   : > { %6705 = vmatpush1.bf16.msra.mxu0 %v9504_v48  ;;  %7361 = vmatpush1.bf16.msra.mxu1 %v9507_v49  ;;  %v9591_v48 = vld [vmem:[%s11137_s23 + $0x4c8] ss:$16 sps:$4 sm:$0xff]   ;;  %v9596_v49 = vld [vmem:[%s11137_s23 + $0x4e4] ss:$16 sps:$4 sm:$0xff]  }
  0xa5   : > { %6706 = vmatprep.subr.bf16.mxu0 %v9512_v51  ;;  %7362 = vmatprep.subr.bf16.mxu1 %v9515_v52  ;;  %v9599_v51 = vld [vmem:[%s11137_s23 + $0x4ec] ss:$16 sps:$4 sm:$0xff]   ;;  %v9594_v52 = vld [vmem:[%s11137_s23 + $0x4e0] ss:$16 sps:$4 sm:$0xff]  }
  0xa8   : > { %6707 = vmatpush1.bf16.msra.mxu0 %v9510_v54  ;;  %7363 = vmatpush1.bf16.msra.mxu1 %v9513_v55  ;;  %v9597_v54 = vld [vmem:[%s11137_s23 + $0x4e8] ss:$16 sps:$4 sm:$0xff]   ;;  %v9602_v55 = vld [vmem:[%s11137_s23 + $0x504] ss:$16 sps:$4 sm:$0xff]  }
  0xa9   : > { %6708 = vmatprep.subr.bf16.mxu0 %v9518_v56  ;;  %7364 = vmatprep.subr.bf16.mxu1 %v9521_v57  ;;  %v9605_v56 = vld [vmem:[%s11137_s23 + $0x50c] ss:$16 sps:$4 sm:$0xff]   ;;  %v9600_v57 = vld [vmem:[%s11137_s23 + $0x500] ss:$16 sps:$4 sm:$0xff]  }
  0xac   : > { %6709 = vmatpush1.bf16.msra.mxu0 %v9516_v58  ;;  %7365 = vmatpush1.bf16.msra.mxu1 %v9519_v59  ;;  %v9603_v58 = vld [vmem:[%s11137_s23 + $0x508] ss:$16 sps:$4 sm:$0xff]   ;;  %v9608_v59 = vld [vmem:[%s11137_s23 + $0x524] ss:$16 sps:$4 sm:$0xff]  }
  0xad   : > { %6710 = vmatprep.subr.bf16.mxu0 %v9524_v60  ;;  %7366 = vmatprep.subr.bf16.mxu1 %v9527_v61  ;;  %v9611_v60 = vld [vmem:[%s11137_s23 + $0x52c] ss:$16 sps:$4 sm:$0xff]   ;;  %v9606_v61 = vld [vmem:[%s11137_s23 + $0x520] ss:$16 sps:$4 sm:$0xff]  }
  0xb0   : > { %6711 = vmatpush1.bf16.msra.mxu0 %v9522_v62  ;;  %7367 = vmatpush1.bf16.msra.mxu1 %v9525_v63  ;;  %v9609_v62 = vld [vmem:[%s11137_s23 + $0x528] ss:$16 sps:$4 sm:$0xff]   ;;  %v9614_v63 = vld [vmem:[%s11137_s23 + $0x544] ss:$16 sps:$4 sm:$0xff]  }
  0xb1   : > { %6712 = vmatprep.subr.bf16.mxu0 %v9530_v0  ;;  %7368 = vmatprep.subr.bf16.mxu1 %v9533_v1  ;;  %v9617_v0 = vld [vmem:[%s11137_s23 + $0x54c] ss:$16 sps:$4 sm:$0xff]   ;;  %v9612_v1 = vld [vmem:[%s11137_s23 + $0x540] ss:$16 sps:$4 sm:$0xff]  }
  0xb4   : > { %6713 = vmatpush1.bf16.msra.mxu0 %v9528_v2  ;;  %7369 = vmatpush1.bf16.msra.mxu1 %v9531_v3  ;;  %v9615_v2 = vld [vmem:[%s11137_s23 + $0x548] ss:$16 sps:$4 sm:$0xff]   ;;  %v9620_v3 = vld [vmem:[%s11137_s23 + $0x564] ss:$16 sps:$4 sm:$0xff]  }
  0xb5   : > { %6714 = vmatprep.subr.bf16.mxu0 %v9536_v4  ;;  %7370 = vmatprep.subr.bf16.mxu1 %v9539_v5  ;;  %v9623_v4 = vld [vmem:[%s11137_s23 + $0x56c] ss:$16 sps:$4 sm:$0xff]   ;;  %v9618_v5 = vld [vmem:[%s11137_s23 + $0x560] ss:$16 sps:$4 sm:$0xff]  }
  0xb8   : > { %6715 = vmatpush1.bf16.msra.mxu0 %v9534_v6  ;;  %7371 = vmatpush1.bf16.msra.mxu1 %v9537_v7  ;;  %v9621_v6 = vld [vmem:[%s11137_s23 + $0x568] ss:$16 sps:$4 sm:$0xff]   ;;  %v9626_v7 = vld [vmem:[%s11137_s23 + $0x584] ss:$16 sps:$4 sm:$0xff]  }
  0xb9   : > { %6716 = vmatprep.subr.bf16.mxu0 %v9542_v8  ;;  %7372 = vmatprep.subr.bf16.mxu1 %v9545_v9  ;;  %v9629_v8 = vld [vmem:[%s11137_s23 + $0x58c] ss:$16 sps:$4 sm:$0xff]   ;;  %v9624_v9 = vld [vmem:[%s11137_s23 + $0x580] ss:$16 sps:$4 sm:$0xff]  }
  0xbc   : > { %6717 = vmatpush1.bf16.msra.mxu0 %v9540_v11  ;;  %7373 = vmatpush1.bf16.msra.mxu1 %v9543_v12  ;;  %v9632_v11 = vld [vmem:[%s11137_s23 + $0x5a4] ss:$16 sps:$4 sm:$0xff]   ;;  %v9635_v12 = vld [vmem:[%s11137_s23 + $0x5ac] ss:$16 sps:$4 sm:$0xff]  }
  0xbd   : > { %6718 = vmatprep.subr.bf16.mxu0 %v9548_v13  ;;  %7374 = vmatprep.subr.bf16.mxu1 %v9551_v15  ;;  %v9630_v13 = vld [vmem:[%s11137_s23 + $0x5a0] ss:$16 sps:$4 sm:$0xff]   ;;  %v9633_v15 = vld [vmem:[%s11137_s23 + $0x5a8] ss:$16 sps:$4 sm:$0xff]  }
  0xc0   : > { %6719 = vmatpush1.bf16.msra.mxu0 %v9546_v17  ;;  %7375 = vmatpush1.bf16.msra.mxu1 %v9549_v53  ;;  %v9638_v17 = vld [vmem:[%s11137_s23 + $0x5c4] ss:$16 sps:$4 sm:$0xff]   ;;  %v9641_v53 = vld [vmem:[%s11137_s23 + $0x5cc] ss:$16 sps:$4 sm:$0xff]  }
  0xc1   : > { %6729 = vmatprep.subr.bf16.mxu0 %v9554_v18  ;;  %7385 = vmatprep.subr.bf16.mxu1 %v9557_v19  ;;  %v9636_v18 = vld [vmem:[%s11137_s23 + $0x5c0] ss:$16 sps:$4 sm:$0xff]   ;;  %v9639_v19 = vld [vmem:[%s11137_s23 + $0x5c8] ss:$16 sps:$4 sm:$0xff]  }
  0xc3   : > { %6721 = vmatmul.mubr.bf16.vlgmr.msra.gmra.mrb[0].mxu0 %v1344_v22  ;;  %7377 = vmatmul.mubr.bf16.vlgmr.msra.gmra.mrb[0].mxu1 %v1344_v22  ;;  %v9642_v22 = vld [vmem:[%s11137_s23 + $0x5e0] ss:$16 sps:$4 sm:$0xff]  }
  0xc4   : > { %6730 = vmatpush1.bf16.msra.mxu0 %v9552_v21  ;;  %7386 = vmatpush1.bf16.msra.mxu1 %v9555_v23  ;;  %v9647_v21 = vld [vmem:[%s11137_s23 + $0x5ec] ss:$16 sps:$4 sm:$0xff]   ;;  %v9645_v23 = vld [vmem:[%s11137_s23 + $0x5e8] ss:$16 sps:$4 sm:$0xff]  }
  0xc5   : > { %6731 = vmatprep.subr.bf16.mxu0 %v9560_v24  ;;  %7387 = vmatprep.subr.bf16.mxu1 %v9563_v25  ;;  %v9651_v24 = vld [vmem:[%s11137_s23 + $0x604] ss:$16 sps:$4 sm:$0xff]   ;;  %v9654_v25 = vld [vmem:[%s11137_s23 + $0x60c] ss:$16 sps:$4 sm:$0xff]  }
  0xc6   : > { %6761 = vmatprep.mubr.bf16.mxu0 %v11312_v26  ;;  %7417 = vmatprep.mubr.bf16.mxu1 %v11312_v26 }
  0xc8   : > { %6732 = vmatpush1.bf16.msra.mxu0 %v9558_v27  ;;  %7388 = vmatpush1.bf16.msra.mxu1 %v9561_v14  ;;  %v9649_v27 = vld [vmem:[%s11137_s23 + $0x600] ss:$16 sps:$4 sm:$0xff]   ;;  %v11379_v14 = vrot.slane %v11297_v16, %v11199_v50 }
  0xc9   : > { %6733 = vmatprep.subr.bf16.mxu0 %v9566_v28  ;;  %7389 = vmatprep.subr.bf16.mxu1 %v9569_v29  ;;  %v9652_v28 = vld [vmem:[%s11137_s23 + $0x608] ss:$16 sps:$4 sm:$0xff]   ;;  %v9657_v29 = vld [vmem:[%s11137_s23 + $0x624] ss:$16 sps:$4 sm:$0xff]   ;;  %v9655_v16 = vld [vmem:[%s11137_s23 + $0x620] ss:$16 sps:$4 sm:$0xff]  }
  0xcc   : > { %6734 = vmatpush1.bf16.msra.mxu0 %v9564_v30  ;;  %7390 = vmatpush1.bf16.msra.mxu1 %v9567_v31  ;;  %v9660_v30 = vld [vmem:[%s11137_s23 + $0x62c] ss:$16 sps:$4 sm:$0xff]   ;;  %v1347_v31 = vcombine.high %v11312_v26, %v11312_v26  ;;  %v9661_v26 = vld [vmem:[%s11137_s23 + $0x640] ss:$16 sps:$4 sm:$0xff]  }
  0xcd   : > { %6735 = vmatprep.subr.bf16.mxu0 %v9572_v32  ;;  %7391 = vmatprep.subr.bf16.mxu1 %v9575_v33  ;;  %v9658_v32 = vld [vmem:[%s11137_s23 + $0x628] ss:$16 sps:$4 sm:$0xff]   ;;  %v9663_v33 = vld [vmem:[%s11137_s23 + $0x644] ss:$16 sps:$4 sm:$0xff]  }
  0xd0   : > { %6736 = vmatpush1.bf16.msra.mxu0 %v9570_v34  ;;  %7392 = vmatpush1.bf16.msra.mxu1 %v9573_v35  ;;  %v9666_v34 = vld [vmem:[%s11137_s23 + $0x64c] ss:$16 sps:$4 sm:$0xff]   ;;  %v9664_v35 = vld [vmem:[%s11137_s23 + $0x648] ss:$16 sps:$4 sm:$0xff]  }
  0xd1   : > { %6737 = vmatprep.subr.bf16.mxu0 %v9578_v36  ;;  %7393 = vmatprep.subr.bf16.mxu1 %v9581_v37  ;;  %v9669_v36 = vld [vmem:[%s11137_s23 + $0x664] ss:$16 sps:$4 sm:$0xff]   ;;  %v9672_v37 = vld [vmem:[%s11137_s23 + $0x66c] ss:$16 sps:$4 sm:$0xff]  }
  0xd4   : > { %6738 = vmatpush1.bf16.msra.mxu0 %v9576_v38  ;;  %7394 = vmatpush1.bf16.msra.mxu1 %v9579_v39  ;;  %v9667_v38 = vld [vmem:[%s11137_s23 + $0x660] ss:$16 sps:$4 sm:$0xff]   ;;  %v9670_v39 = vld [vmem:[%s11137_s23 + $0x668] ss:$16 sps:$4 sm:$0xff]  }
  0xd5   : > { %6739 = vmatprep.subr.bf16.mxu0 %v9584_v40  ;;  %7395 = vmatprep.subr.bf16.mxu1 %v9587_v41  ;;  %v9675_v40 = vld [vmem:[%s11137_s23 + $0x684] ss:$16 sps:$4 sm:$0xff]   ;;  %v9678_v41 = vld [vmem:[%s11137_s23 + $0x68c] ss:$16 sps:$4 sm:$0xff]  }
  0xd8   : > { %6740 = vmatpush1.bf16.msra.mxu0 %v9582_v42  ;;  %7396 = vmatpush1.bf16.msra.mxu1 %v9585_v43  ;;  %v9673_v42 = vld [vmem:[%s11137_s23 + $0x680] ss:$16 sps:$4 sm:$0xff]   ;;  %v9676_v43 = vld [vmem:[%s11137_s23 + $0x688] ss:$16 sps:$4 sm:$0xff]  }
  0xd9   : > { %6741 = vmatprep.subr.bf16.mxu0 %v9590_v45  ;;  %7397 = vmatprep.subr.bf16.mxu1 %v9593_v46  ;;  %v9681_v45 = vld [vmem:[%s11137_s23 + $0x6a4] ss:$16 sps:$4 sm:$0xff]   ;;  %v9684_v46 = vld [vmem:[%s11137_s23 + $0x6ac] ss:$16 sps:$4 sm:$0xff]  }
  0xdc   : > { %6742 = vmatpush1.bf16.msra.mxu0 %v9588_v47  ;;  %7398 = vmatpush1.bf16.msra.mxu1 %v9591_v48  ;;  %v9679_v47 = vld [vmem:[%s11137_s23 + $0x6a0] ss:$16 sps:$4 sm:$0xff]   ;;  %v9682_v48 = vld [vmem:[%s11137_s23 + $0x6a8] ss:$16 sps:$4 sm:$0xff]  }
  0xdd   : > { %6743 = vmatprep.subr.bf16.mxu0 %v9596_v49  ;;  %7399 = vmatprep.subr.bf16.mxu1 %v9599_v51  ;;  %v9687_v49 = vld [vmem:[%s11137_s23 + $0x6c4] ss:$16 sps:$4 sm:$0xff]   ;;  %v9690_v51 = vld [vmem:[%s11137_s23 + $0x6cc] ss:$16 sps:$4 sm:$0xff]  }
  0xe0   : > { %6744 = vmatpush1.bf16.msra.mxu0 %v9594_v52  ;;  %7400 = vmatpush1.bf16.msra.mxu1 %v9597_v54  ;;  %v9685_v52 = vld [vmem:[%s11137_s23 + $0x6c0] ss:$16 sps:$4 sm:$0xff]   ;;  %v9688_v54 = vld [vmem:[%s11137_s23 + $0x6c8] ss:$16 sps:$4 sm:$0xff]  }
  0xe1   : > { %6745 = vmatprep.subr.bf16.mxu0 %v9602_v55  ;;  %7401 = vmatprep.subr.bf16.mxu1 %v9605_v56  ;;  %v9693_v55 = vld [vmem:[%s11137_s23 + $0x6e4] ss:$16 sps:$4 sm:$0xff]   ;;  %v9696_v56 = vld [vmem:[%s11137_s23 + $0x6ec] ss:$16 sps:$4 sm:$0xff]  }
  0xe4   : > { %6746 = vmatpush1.bf16.msra.mxu0 %v9600_v57  ;;  %7402 = vmatpush1.bf16.msra.mxu1 %v9603_v58  ;;  %v9691_v57 = vld [vmem:[%s11137_s23 + $0x6e0] ss:$16 sps:$4 sm:$0xff]   ;;  %v9694_v58 = vld [vmem:[%s11137_s23 + $0x6e8] ss:$16 sps:$4 sm:$0xff]  }
  0xe5   : > { %6747 = vmatprep.subr.bf16.mxu0 %v9608_v59  ;;  %7403 = vmatprep.subr.bf16.mxu1 %v9611_v60  ;;  %v9699_v59 = vld [vmem:[%s11137_s23 + $0x704] ss:$16 sps:$4 sm:$0xff]   ;;  %v9702_v60 = vld [vmem:[%s11137_s23 + $0x70c] ss:$16 sps:$4 sm:$0xff]  }
  0xe8   : > { %6748 = vmatpush1.bf16.msra.mxu0 %v9606_v61  ;;  %7404 = vmatpush1.bf16.msra.mxu1 %v9609_v62  ;;  %v9697_v61 = vld [vmem:[%s11137_s23 + $0x700] ss:$16 sps:$4 sm:$0xff]   ;;  %v9700_v62 = vld [vmem:[%s11137_s23 + $0x708] ss:$16 sps:$4 sm:$0xff]  }
  0xe9   : > { %6749 = vmatprep.subr.bf16.mxu0 %v9614_v63  ;;  %7405 = vmatprep.subr.bf16.mxu1 %v9617_v0  ;;  %v9705_v63 = vld [vmem:[%s11137_s23 + $0x724] ss:$16 sps:$4 sm:$0xff]   ;;  %v9708_v0 = vld [vmem:[%s11137_s23 + $0x72c] ss:$16 sps:$4 sm:$0xff]  }
  0xec   : > { %6750 = vmatpush1.bf16.msra.mxu0 %v9612_v1  ;;  %7406 = vmatpush1.bf16.msra.mxu1 %v9615_v2  ;;  %v9703_v1 = vld [vmem:[%s11137_s23 + $0x720] ss:$16 sps:$4 sm:$0xff]   ;;  %v9706_v2 = vld [vmem:[%s11137_s23 + $0x728] ss:$16 sps:$4 sm:$0xff]  }
  0xed   : > { %6751 = vmatprep.subr.bf16.mxu0 %v9620_v3  ;;  %7407 = vmatprep.subr.bf16.mxu1 %v9623_v4  ;;  %v9711_v3 = vld [vmem:[%s11137_s23 + $0x744] ss:$16 sps:$4 sm:$0xff]   ;;  %v9714_v4 = vld [vmem:[%s11137_s23 + $0x74c] ss:$16 sps:$4 sm:$0xff]  }
  0xf0   : > { %6752 = vmatpush1.bf16.msra.mxu0 %v9618_v5  ;;  %7408 = vmatpush1.bf16.msra.mxu1 %v9621_v6  ;;  %v9709_v5 = vld [vmem:[%s11137_s23 + $0x740] ss:$16 sps:$4 sm:$0xff]   ;;  %v9712_v6 = vld [vmem:[%s11137_s23 + $0x748] ss:$16 sps:$4 sm:$0xff]  }
  0xf1   : > { %6753 = vmatprep.subr.bf16.mxu0 %v9626_v7  ;;  %7409 = vmatprep.subr.bf16.mxu1 %v9629_v8  ;;  %v9717_v7 = vld [vmem:[%s11137_s23 + $0x764] ss:$16 sps:$4 sm:$0xff]   ;;  %v9720_v8 = vld [vmem:[%s11137_s23 + $0x76c] ss:$16 sps:$4 sm:$0xff]  }
  0xf4   : > { %6754 = vmatpush1.bf16.msra.mxu0 %v9624_v9  ;;  %7410 = vmatpush1.bf16.msra.mxu1 %v9627_v10  ;;  %v9715_v9 = vld [vmem:[%s11137_s23 + $0x760] ss:$16 sps:$4 sm:$0xff]   ;;  %v9718_v10 = vld [vmem:[%s11137_s23 + $0x768] ss:$16 sps:$4 sm:$0xff]  }
  0xf5   : > { %6755 = vmatprep.subr.bf16.mxu0 %v9632_v11  ;;  %7411 = vmatprep.subr.bf16.mxu1 %v9635_v12  ;;  %v9723_v11 = vld [vmem:[%s11137_s23 + $0x784] ss:$16 sps:$4 sm:$0xff]   ;;  %v9726_v12 = vld [vmem:[%s11137_s23 + $0x78c] ss:$16 sps:$4 sm:$0xff]  }
  0xf8   : > { %6756 = vmatpush1.bf16.msra.mxu0 %v9630_v13  ;;  %7412 = vmatpush1.bf16.msra.mxu1 %v9633_v15  ;;  %v9721_v13 = vld [vmem:[%s11137_s23 + $0x780] ss:$16 sps:$4 sm:$0xff]   ;;  %v9724_v15 = vld [vmem:[%s11137_s23 + $0x788] ss:$16 sps:$4 sm:$0xff]  }
  0xf9   : > { %6757 = vmatprep.subr.bf16.mxu0 %v9638_v17  ;;  %7413 = vmatprep.subr.bf16.mxu1 %v9641_v53  ;;  %v9729_v17 = vld [vmem:[%s11137_s23 + $0x7a4] ss:$16 sps:$4 sm:$0xff]   ;;  %v9732_v53 = vld [vmem:[%s11137_s23 + $0x7ac] ss:$16 sps:$4 sm:$0xff]  }
  0xfc   : > { %6758 = vmatpush1.bf16.msra.mxu0 %v9636_v18  ;;  %7414 = vmatpush1.bf16.msra.mxu1 %v9639_v19  ;;  %v9727_v18 = vld [vmem:[%s11137_s23 + $0x7a0] ss:$16 sps:$4 sm:$0xff]   ;;  %v9730_v19 = vld [vmem:[%s11137_s23 + $0x7a8] ss:$16 sps:$4 sm:$0xff]  }
  0xfd   : > { %6759 = vmatprep.subr.bf16.mxu0 %v9644_v20  ;;  %7415 = vmatprep.subr.bf16.mxu1 %v9647_v21  ;;  %v9735_v20 = vld [vmem:[%s11137_s23 + $0x7c4] ss:$16 sps:$4 sm:$0xff]   ;;  %v9738_v21 = vld [vmem:[%s11137_s23 + $0x7cc] ss:$16 sps:$4 sm:$0xff]  }
 0x100   : > { %6760 = vmatpush1.bf16.msra.mxu0 %v9642_v22  ;;  %7416 = vmatpush1.bf16.msra.mxu1 %v9645_v23  ;;  %v11441_v22 = vld.sshfl [vmem:[%s11150_s26 + $0x8] sm:$0xff pattern:$0x75316420] }
 0x101   : > { %6770 = vmatprep.subr.bf16.mxu0 %v9651_v24  ;;  %7426 = vmatprep.subr.bf16.mxu1 %v9654_v25  ;;  %v9733_v23 = vld [vmem:[%s11137_s23 + $0x7c0] ss:$16 sps:$4 sm:$0xff]   ;;  %v9736_v24 = vld [vmem:[%s11137_s23 + $0x7c8] ss:$16 sps:$4 sm:$0xff]   ;;  %v9741_v25 = vld [vmem:[%s11137_s23 + $0x7e4] ss:$16 sps:$4 sm:$0xff]  }
 0x103   : > { %6762 = vmatmul.mubr.bf16.vlgmr.msra.gmra.mrb[0].mxu0 %v11379_v14  ;;  %7418 = vmatmul.mubr.bf16.vlgmr.msra.gmra.mrb[0].mxu1 %v11379_v14 }
 0x104   : > { %6771 = vmatpush1.bf16.msra.mxu0 %v9649_v27  ;;  %7427 = vmatpush1.bf16.msra.mxu1 %v9652_v28  ;;  %v9744_v27 = vld [vmem:[%s11137_s23 + $0x7ec] ss:$16 sps:$4 sm:$0xff]   ;;  %v9739_v28 = vld [vmem:[%s11137_s23 + $0x7e0] ss:$16 sps:$4 sm:$0xff]  }
 0x105   : > { %6772 = vmatprep.subr.bf16.mxu0 %v9657_v29  ;;  %7428 = vmatprep.subr.bf16.mxu1 %v9660_v30  ;;  %v9742_v29 = vld [vmem:[%s11137_s23 + $0x7e8] ss:$16 sps:$4 sm:$0xff]   ;;  %v9747_v30 = vld [vmem:[%s11137_s23 + $0x804] ss:$16 sps:$4 sm:$0xff]  }
 0x106   : > { %6802 = vmatprep.mubr.bf16.mxu0 %v1347_v31  ;;  %7458 = vmatprep.mubr.bf16.mxu1 %v1347_v31  ;;  %v9750_v31 = vld [vmem:[%s11137_s23 + $0x80c] ss:$16 sps:$4 sm:$0xff]  }
 0x108   : > { %6773 = vmatpush1.bf16.msra.mxu0 %v9655_v16  ;;  %7429 = vmatpush1.bf16.msra.mxu1 %v9658_v32  ;;  %v1363_v16 = vcombine.high %v11441_v22, %v11441_v22  ;;  %v1345_v32 = vcombine.high %v11379_v14, %v11379_v14  ;;  %v9751_v14 = vld [vmem:[%s11137_s23 + $0x820] ss:$16 sps:$4 sm:$0xff]  }
 0x109   : > { %6774 = vmatprep.subr.bf16.mxu0 %v9663_v33  ;;  %7430 = vmatprep.subr.bf16.mxu1 %v9666_v34  ;;  %v9745_v33 = vld [vmem:[%s11137_s23 + $0x800] ss:$16 sps:$4 sm:$0xff]   ;;  %v9748_v34 = vld [vmem:[%s11137_s23 + $0x808] ss:$16 sps:$4 sm:$0xff]  }
 0x10c   : > { %6775 = vmatpush1.bf16.msra.mxu0 %v9661_v26  ;;  %7431 = vmatpush1.bf16.msra.mxu1 %v9664_v35  ;;  %v9753_v26 = vld [vmem:[%s11137_s23 + $0x824] ss:$16 sps:$4 sm:$0xff]   ;;  %v9756_v35 = vld [vmem:[%s11137_s23 + $0x82c] ss:$16 sps:$4 sm:$0xff]  }
 0x10d   : > { %6776 = vmatprep.subr.bf16.mxu0 %v9669_v36  ;;  %7432 = vmatprep.subr.bf16.mxu1 %v9672_v37  ;;  %v11460_v36 = vrot.slane %v1363_v16, %v11199_v50  ;;  %v9754_v37 = vld [vmem:[%s11137_s23 + $0x828] ss:$16 sps:$4 sm:$0xff]   ;;  %v9837_v16 = vld [vmem:[%s11137_s23 + $0x9e4] ss:$16 sps:$4 sm:$0xff]  }
 0x110   : > { %6777 = vmatpush1.bf16.msra.mxu0 %v9667_v38  ;;  %7433 = vmatpush1.bf16.msra.mxu1 %v9670_v39  ;;  %v9759_v38 = vld [vmem:[%s11137_s23 + $0x844] ss:$16 sps:$4 sm:$0xff]   ;;  %v9762_v39 = vld [vmem:[%s11137_s23 + $0x84c] ss:$16 sps:$4 sm:$0xff]  }
 0x111   : > { %6778 = vmatprep.subr.bf16.mxu0 %v9675_v40  ;;  %7434 = vmatprep.subr.bf16.mxu1 %v9678_v41  ;;  %v9757_v40 = vld [vmem:[%s11137_s23 + $0x840] ss:$16 sps:$4 sm:$0xff]   ;;  %v9760_v41 = vld [vmem:[%s11137_s23 + $0x848] ss:$16 sps:$4 sm:$0xff]  }
 0x114   : > { %6779 = vmatpush1.bf16.msra.mxu0 %v9673_v42  ;;  %7435 = vmatpush1.bf16.msra.mxu1 %v9676_v43  ;;  %v9765_v42 = vld [vmem:[%s11137_s23 + $0x864] ss:$16 sps:$4 sm:$0xff]   ;;  %v9768_v43 = vld [vmem:[%s11137_s23 + $0x86c] ss:$16 sps:$4 sm:$0xff]  }
 0x115   : > { %6780 = vmatprep.subr.bf16.mxu0 %v9681_v45  ;;  %7436 = vmatprep.subr.bf16.mxu1 %v9684_v46  ;;  %v9763_v45 = vld [vmem:[%s11137_s23 + $0x860] ss:$16 sps:$4 sm:$0xff]   ;;  %v9766_v46 = vld [vmem:[%s11137_s23 + $0x868] ss:$16 sps:$4 sm:$0xff]  }
 0x118   : > { %6781 = vmatpush1.bf16.msra.mxu0 %v9679_v47  ;;  %7437 = vmatpush1.bf16.msra.mxu1 %v9682_v48  ;;  %v9771_v47 = vld [vmem:[%s11137_s23 + $0x884] ss:$16 sps:$4 sm:$0xff]   ;;  %v9774_v48 = vld [vmem:[%s11137_s23 + $0x88c] ss:$16 sps:$4 sm:$0xff]  }
 0x119   : > { %6782 = vmatprep.subr.bf16.mxu0 %v9687_v49  ;;  %7438 = vmatprep.subr.bf16.mxu1 %v9690_v51  ;;  %v9769_v49 = vld [vmem:[%s11137_s23 + $0x880] ss:$16 sps:$4 sm:$0xff]   ;;  %v9772_v51 = vld [vmem:[%s11137_s23 + $0x888] ss:$16 sps:$4 sm:$0xff]  }
 0x11c   : > { %6783 = vmatpush1.bf16.msra.mxu0 %v9685_v52  ;;  %7439 = vmatpush1.bf16.msra.mxu1 %v9688_v54  ;;  %v9777_v52 = vld [vmem:[%s11137_s23 + $0x8a4] ss:$16 sps:$4 sm:$0xff]   ;;  %v9780_v54 = vld [vmem:[%s11137_s23 + $0x8ac] ss:$16 sps:$4 sm:$0xff]  }
 0x11d   : > { %6784 = vmatprep.subr.bf16.mxu0 %v9693_v55  ;;  %7440 = vmatprep.subr.bf16.mxu1 %v9696_v56  ;;  %v9775_v55 = vld [vmem:[%s11137_s23 + $0x8a0] ss:$16 sps:$4 sm:$0xff]   ;;  %v9778_v56 = vld [vmem:[%s11137_s23 + $0x8a8] ss:$16 sps:$4 sm:$0xff]  }
 0x120   : > { %6785 = vmatpush1.bf16.msra.mxu0 %v9691_v57  ;;  %7441 = vmatpush1.bf16.msra.mxu1 %v9694_v58  ;;  %v9783_v57 = vld [vmem:[%s11137_s23 + $0x8c4] ss:$16 sps:$4 sm:$0xff]   ;;  %v9786_v58 = vld [vmem:[%s11137_s23 + $0x8cc] ss:$16 sps:$4 sm:$0xff]  }
 0x121   : > { %6786 = vmatprep.subr.bf16.mxu0 %v9699_v59  ;;  %7442 = vmatprep.subr.bf16.mxu1 %v9702_v60  ;;  %v9781_v59 = vld [vmem:[%s11137_s23 + $0x8c0] ss:$16 sps:$4 sm:$0xff]   ;;  %v9784_v60 = vld [vmem:[%s11137_s23 + $0x8c8] ss:$16 sps:$4 sm:$0xff]  }
 0x124   : > { %6787 = vmatpush1.bf16.msra.mxu0 %v9697_v61  ;;  %7443 = vmatpush1.bf16.msra.mxu1 %v9700_v62  ;;  %v9789_v61 = vld [vmem:[%s11137_s23 + $0x8e4] ss:$16 sps:$4 sm:$0xff]   ;;  %v9792_v62 = vld [vmem:[%s11137_s23 + $0x8ec] ss:$16 sps:$4 sm:$0xff]  }
 0x125   : > { %6788 = vmatprep.subr.bf16.mxu0 %v9705_v63  ;;  %7444 = vmatprep.subr.bf16.mxu1 %v9708_v0  ;;  %v9787_v63 = vld [vmem:[%s11137_s23 + $0x8e0] ss:$16 sps:$4 sm:$0xff]   ;;  %v9790_v0 = vld [vmem:[%s11137_s23 + $0x8e8] ss:$16 sps:$4 sm:$0xff]  }
 0x128   : > { %6789 = vmatpush1.bf16.msra.mxu0 %v9703_v1  ;;  %7445 = vmatpush1.bf16.msra.mxu1 %v9706_v2  ;;  %v9795_v1 = vld [vmem:[%s11137_s23 + $0x904] ss:$16 sps:$4 sm:$0xff]   ;;  %v9798_v2 = vld [vmem:[%s11137_s23 + $0x90c] ss:$16 sps:$4 sm:$0xff]  }
 0x129   : > { %6790 = vmatprep.subr.bf16.mxu0 %v9711_v3  ;;  %7446 = vmatprep.subr.bf16.mxu1 %v9714_v4  ;;  %v9793_v3 = vld [vmem:[%s11137_s23 + $0x900] ss:$16 sps:$4 sm:$0xff]   ;;  %v9796_v4 = vld [vmem:[%s11137_s23 + $0x908] ss:$16 sps:$4 sm:$0xff]  }
 0x12c   : > { %6791 = vmatpush1.bf16.msra.mxu0 %v9709_v5  ;;  %7447 = vmatpush1.bf16.msra.mxu1 %v9712_v6  ;;  %v9801_v5 = vld [vmem:[%s11137_s23 + $0x924] ss:$16 sps:$4 sm:$0xff]   ;;  %v9804_v6 = vld [vmem:[%s11137_s23 + $0x92c] ss:$16 sps:$4 sm:$0xff]  }
 0x12d   : > { %6792 = vmatprep.subr.bf16.mxu0 %v9717_v7  ;;  %7448 = vmatprep.subr.bf16.mxu1 %v9720_v8  ;;  %v9799_v7 = vld [vmem:[%s11137_s23 + $0x920] ss:$16 sps:$4 sm:$0xff]   ;;  %v9802_v8 = vld [vmem:[%s11137_s23 + $0x928] ss:$16 sps:$4 sm:$0xff]  }
 0x130   : > { %6793 = vmatpush1.bf16.msra.mxu0 %v9715_v9  ;;  %7449 = vmatpush1.bf16.msra.mxu1 %v9718_v10  ;;  %v9807_v9 = vld [vmem:[%s11137_s23 + $0x944] ss:$16 sps:$4 sm:$0xff]   ;;  %v9810_v10 = vld [vmem:[%s11137_s23 + $0x94c] ss:$16 sps:$4 sm:$0xff]  }
 0x131   : > { %6794 = vmatprep.subr.bf16.mxu0 %v9723_v11  ;;  %7450 = vmatprep.subr.bf16.mxu1 %v9726_v12  ;;  %v9805_v11 = vld [vmem:[%s11137_s23 + $0x940] ss:$16 sps:$4 sm:$0xff]   ;;  %v9808_v12 = vld [vmem:[%s11137_s23 + $0x948] ss:$16 sps:$4 sm:$0xff]  }
 0x134   : > { %6795 = vmatpush1.bf16.msra.mxu0 %v9721_v13  ;;  %7451 = vmatpush1.bf16.msra.mxu1 %v9724_v15  ;;  %v9813_v13 = vld [vmem:[%s11137_s23 + $0x964] ss:$16 sps:$4 sm:$0xff]   ;;  %v9816_v15 = vld [vmem:[%s11137_s23 + $0x96c] ss:$16 sps:$4 sm:$0xff]  }
 0x135   : > { %6796 = vmatprep.subr.bf16.mxu0 %v9729_v17  ;;  %7452 = vmatprep.subr.bf16.mxu1 %v9732_v53  ;;  %v9811_v17 = vld [vmem:[%s11137_s23 + $0x960] ss:$16 sps:$4 sm:$0xff]   ;;  %v9814_v53 = vld [vmem:[%s11137_s23 + $0x968] ss:$16 sps:$4 sm:$0xff]  }
 0x138   : > { %6797 = vmatpush1.bf16.msra.mxu0 %v9727_v18  ;;  %7453 = vmatpush1.bf16.msra.mxu1 %v9730_v19  ;;  %v9819_v18 = vld [vmem:[%s11137_s23 + $0x984] ss:$16 sps:$4 sm:$0xff]   ;;  %v9822_v19 = vld [vmem:[%s11137_s23 + $0x98c] ss:$16 sps:$4 sm:$0xff]  }
 0x139   : > { %6798 = vmatprep.subr.bf16.mxu0 %v9735_v20  ;;  %7454 = vmatprep.subr.bf16.mxu1 %v9738_v21  ;;  %v9817_v20 = vld [vmem:[%s11137_s23 + $0x980] ss:$16 sps:$4 sm:$0xff]   ;;  %v9820_v21 = vld [vmem:[%s11137_s23 + $0x988] ss:$16 sps:$4 sm:$0xff]  }
 0x13c   : > { %6799 = vmatpush1.bf16.msra.mxu0 %v9733_v23  ;;  %7455 = vmatpush1.bf16.msra.mxu1 %v9736_v24  ;;  %v9825_v23 = vld [vmem:[%s11137_s23 + $0x9a4] ss:$16 sps:$4 sm:$0xff]   ;;  %v9828_v24 = vld [vmem:[%s11137_s23 + $0x9ac] ss:$16 sps:$4 sm:$0xff]  }
 0x13d   : > { %6800 = vmatprep.subr.bf16.mxu0 %v9741_v25  ;;  %7456 = vmatprep.subr.bf16.mxu1 %v9744_v27  ;;  %v9823_v25 = vld [vmem:[%s11137_s23 + $0x9a0] ss:$16 sps:$4 sm:$0xff]   ;;  %v9826_v27 = vld [vmem:[%s11137_s23 + $0x9a8] ss:$16 sps:$4 sm:$0xff]  }
 0x140   : > { %6801 = vmatpush1.bf16.msra.mxu0 %v9739_v28  ;;  %7457 = vmatpush1.bf16.msra.mxu1 %v9742_v29  ;;  %v9831_v28 = vld [vmem:[%s11137_s23 + $0x9c4] ss:$16 sps:$4 sm:$0xff]   ;;  %v9834_v29 = vld [vmem:[%s11137_s23 + $0x9cc] ss:$16 sps:$4 sm:$0xff]  }
 0x141   : > { %6811 = vmatprep.subr.bf16.mxu0 %v9747_v30  ;;  %7467 = vmatprep.subr.bf16.mxu1 %v9750_v31  ;;  %v9829_v30 = vld [vmem:[%s11137_s23 + $0x9c0] ss:$16 sps:$4 sm:$0xff]   ;;  %v9832_v31 = vld [vmem:[%s11137_s23 + $0x9c8] ss:$16 sps:$4 sm:$0xff]  }
 0x143   : > { %6803 = vmatmul.mubr.bf16.vlgmr.msra.gmra.mrb[0].mxu0 %v1345_v32  ;;  %7459 = vmatmul.mubr.bf16.vlgmr.msra.gmra.mrb[0].mxu1 %v1345_v32  ;;  %v9840_v32 = vld [vmem:[%s11137_s23 + $0x9ec] ss:$16 sps:$4 sm:$0xff]  }
 0x144   : > { %6812 = vmatpush1.bf16.msra.mxu0 %v9745_v33  ;;  %7468 = vmatpush1.bf16.msra.mxu1 %v9748_v34  ;;  %v9835_v33 = vld [vmem:[%s11137_s23 + $0x9e0] ss:$16 sps:$4 sm:$0xff]   ;;  %v9838_v34 = vld [vmem:[%s11137_s23 + $0x9e8] ss:$16 sps:$4 sm:$0xff]  }
 0x145   : > { %6813 = vmatprep.subr.bf16.mxu0 %v9753_v26  ;;  %7469 = vmatprep.subr.bf16.mxu1 %v9756_v35  ;;  %v9843_v26 = vld [vmem:[%s11137_s23 + $0xa04] ss:$16 sps:$4 sm:$0xff]   ;;  %v9846_v35 = vld [vmem:[%s11137_s23 + $0xa0c] ss:$16 sps:$4 sm:$0xff]  }
 0x146   : > { %6843 = vmatprep.mubr.bf16.mxu0 %v11460_v36  ;;  %7499 = vmatprep.mubr.bf16.mxu1 %v11460_v36 }
 0x148   : > { %6814 = vmatpush1.bf16.msra.mxu0 %v9751_v14  ;;  %7470 = vmatpush1.bf16.msra.mxu1 %v9754_v37  ;;  %v11526_v14 = vrot.slane %v11441_v22, %v11199_v50  ;;  %v9841_v37 = vld [vmem:[%s11137_s23 + $0xa00] ss:$16 sps:$4 sm:$0xff]  }
 0x149   : > { %6815 = vmatprep.subr.bf16.mxu0 %v9759_v38  ;;  %7471 = vmatprep.subr.bf16.mxu1 %v9762_v39  ;;  %v9844_v38 = vld [vmem:[%s11137_s23 + $0xa08] ss:$16 sps:$4 sm:$0xff]   ;;  %v9849_v39 = vld [vmem:[%s11137_s23 + $0xa24] ss:$16 sps:$4 sm:$0xff]   ;;  %v9847_v22 = vld [vmem:[%s11137_s23 + $0xa20] ss:$16 sps:$4 sm:$0xff]  }
 0x14c   : > { %6816 = vmatpush1.bf16.msra.mxu0 %v9757_v40  ;;  %7472 = vmatpush1.bf16.msra.mxu1 %v9760_v41  ;;  %v9852_v40 = vld [vmem:[%s11137_s23 + $0xa2c] ss:$16 sps:$4 sm:$0xff]   ;;  %v1395_v41 = vcombine.high %v11460_v36, %v11460_v36  ;;  %v9853_v36 = vld [vmem:[%s11137_s23 + $0xa40] ss:$16 sps:$4 sm:$0xff]  }
 0x14d   : > { %6817 = vmatprep.subr.bf16.mxu0 %v9765_v42  ;;  %7473 = vmatprep.subr.bf16.mxu1 %v9768_v43  ;;  %v9850_v42 = vld [vmem:[%s11137_s23 + $0xa28] ss:$16 sps:$4 sm:$0xff]   ;;  %v9855_v43 = vld [vmem:[%s11137_s23 + $0xa44] ss:$16 sps:$4 sm:$0xff]  }
 0x150   : > { %6818 = vmatpush1.bf16.msra.mxu0 %v9763_v45  ;;  %7474 = vmatpush1.bf16.msra.mxu1 %v9766_v46  ;;  %v9858_v45 = vld [vmem:[%s11137_s23 + $0xa4c] ss:$16 sps:$4 sm:$0xff]   ;;  %v9856_v46 = vld [vmem:[%s11137_s23 + $0xa48] ss:$16 sps:$4 sm:$0xff]  }
 0x151   : > { %6819 = vmatprep.subr.bf16.mxu0 %v9771_v47  ;;  %7475 = vmatprep.subr.bf16.mxu1 %v9774_v48  ;;  %v9861_v47 = vld [vmem:[%s11137_s23 + $0xa64] ss:$16 sps:$4 sm:$0xff]   ;;  %v9864_v48 = vld [vmem:[%s11137_s23 + $0xa6c] ss:$16 sps:$4 sm:$0xff]  }
 0x154   : > { %6820 = vmatpush1.bf16.msra.mxu0 %v9769_v49  ;;  %7476 = vmatpush1.bf16.msra.mxu1 %v9772_v51  ;;  %v9859_v49 = vld [vmem:[%s11137_s23 + $0xa60] ss:$16 sps:$4 sm:$0xff]   ;;  %v9862_v51 = vld [vmem:[%s11137_s23 + $0xa68] ss:$16 sps:$4 sm:$0xff]  }
 0x155   : > { %6821 = vmatprep.subr.bf16.mxu0 %v9777_v52  ;;  %7477 = vmatprep.subr.bf16.mxu1 %v9780_v54  ;;  %v9867_v52 = vld [vmem:[%s11137_s23 + $0xa84] ss:$16 sps:$4 sm:$0xff]   ;;  %v9870_v54 = vld [vmem:[%s11137_s23 + $0xa8c] ss:$16 sps:$4 sm:$0xff]  }
 0x158   : > { %6822 = vmatpush1.bf16.msra.mxu0 %v9775_v55  ;;  %7478 = vmatpush1.bf16.msra.mxu1 %v9778_v56  ;;  %v9865_v55 = vld [vmem:[%s11137_s23 + $0xa80] ss:$16 sps:$4 sm:$0xff]   ;;  %v9868_v56 = vld [vmem:[%s11137_s23 + $0xa88] ss:$16 sps:$4 sm:$0xff]  }
 0x159   : > { %6823 = vmatprep.subr.bf16.mxu0 %v9783_v57  ;;  %7479 = vmatprep.subr.bf16.mxu1 %v9786_v58  ;;  %v9873_v57 = vld [vmem:[%s11137_s23 + $0xaa4] ss:$16 sps:$4 sm:$0xff]   ;;  %v9876_v58 = vld [vmem:[%s11137_s23 + $0xaac] ss:$16 sps:$4 sm:$0xff]  }
 0x15c   : > { %6824 = vmatpush1.bf16.msra.mxu0 %v9781_v59  ;;  %7480 = vmatpush1.bf16.msra.mxu1 %v9784_v60  ;;  %v9871_v59 = vld [vmem:[%s11137_s23 + $0xaa0] ss:$16 sps:$4 sm:$0xff]   ;;  %v9874_v60 = vld [vmem:[%s11137_s23 + $0xaa8] ss:$16 sps:$4 sm:$0xff]  }
 0x15d   : > { %6825 = vmatprep.subr.bf16.mxu0 %v9789_v61  ;;  %7481 = vmatprep.subr.bf16.mxu1 %v9792_v62  ;;  %v9879_v61 = vld [vmem:[%s11137_s23 + $0xac4] ss:$16 sps:$4 sm:$0xff]   ;;  %v9882_v62 = vld [vmem:[%s11137_s23 + $0xacc] ss:$16 sps:$4 sm:$0xff]  }
 0x160   : > { %6826 = vmatpush1.bf16.msra.mxu0 %v9787_v63  ;;  %7482 = vmatpush1.bf16.msra.mxu1 %v9790_v0  ;;  %v9877_v63 = vld [vmem:[%s11137_s23 + $0xac0] ss:$16 sps:$4 sm:$0xff]   ;;  %v9880_v0 = vld [vmem:[%s11137_s23 + $0xac8] ss:$16 sps:$4 sm:$0xff]  }
 0x161   : > { %6827 = vmatprep.subr.bf16.mxu0 %v9795_v1  ;;  %7483 = vmatprep.subr.bf16.mxu1 %v9798_v2  ;;  %v9885_v1 = vld [vmem:[%s11137_s23 + $0xae4] ss:$16 sps:$4 sm:$0xff]   ;;  %v9888_v2 = vld [vmem:[%s11137_s23 + $0xaec] ss:$16 sps:$4 sm:$0xff]  }
 0x164   : > { %6828 = vmatpush1.bf16.msra.mxu0 %v9793_v3  ;;  %7484 = vmatpush1.bf16.msra.mxu1 %v9796_v4  ;;  %v9883_v3 = vld [vmem:[%s11137_s23 + $0xae0] ss:$16 sps:$4 sm:$0xff]   ;;  %v9886_v4 = vld [vmem:[%s11137_s23 + $0xae8] ss:$16 sps:$4 sm:$0xff]  }
 0x165   : > { %6829 = vmatprep.subr.bf16.mxu0 %v9801_v5  ;;  %7485 = vmatprep.subr.bf16.mxu1 %v9804_v6  ;;  %v9891_v5 = vld [vmem:[%s11137_s23 + $0xb04] ss:$16 sps:$4 sm:$0xff]   ;;  %v9894_v6 = vld [vmem:[%s11137_s23 + $0xb0c] ss:$16 sps:$4 sm:$0xff]  }
 0x168   : > { %6830 = vmatpush1.bf16.msra.mxu0 %v9799_v7  ;;  %7486 = vmatpush1.bf16.msra.mxu1 %v9802_v8  ;;  %v9889_v7 = vld [vmem:[%s11137_s23 + $0xb00] ss:$16 sps:$4 sm:$0xff]   ;;  %v9892_v8 = vld [vmem:[%s11137_s23 + $0xb08] ss:$16 sps:$4 sm:$0xff]  }
 0x169   : > { %6831 = vmatprep.subr.bf16.mxu0 %v9807_v9  ;;  %7487 = vmatprep.subr.bf16.mxu1 %v9810_v10  ;;  %v9897_v9 = vld [vmem:[%s11137_s23 + $0xb24] ss:$16 sps:$4 sm:$0xff]   ;;  %v9900_v10 = vld [vmem:[%s11137_s23 + $0xb2c] ss:$16 sps:$4 sm:$0xff]  }
 0x16c   : > { %6832 = vmatpush1.bf16.msra.mxu0 %v9805_v11  ;;  %7488 = vmatpush1.bf16.msra.mxu1 %v9808_v12  ;;  %v9895_v11 = vld [vmem:[%s11137_s23 + $0xb20] ss:$16 sps:$4 sm:$0xff]   ;;  %v9898_v12 = vld [vmem:[%s11137_s23 + $0xb28] ss:$16 sps:$4 sm:$0xff]  }
 0x16d   : > { %6833 = vmatprep.subr.bf16.mxu0 %v9813_v13  ;;  %7489 = vmatprep.subr.bf16.mxu1 %v9816_v15  ;;  %v9903_v13 = vld [vmem:[%s11137_s23 + $0xb44] ss:$16 sps:$4 sm:$0xff]   ;;  %v9906_v15 = vld [vmem:[%s11137_s23 + $0xb4c] ss:$16 sps:$4 sm:$0xff]  }
 0x170   : > { %6834 = vmatpush1.bf16.msra.mxu0 %v9811_v17  ;;  %7490 = vmatpush1.bf16.msra.mxu1 %v9814_v53  ;;  %v9901_v17 = vld [vmem:[%s11137_s23 + $0xb40] ss:$16 sps:$4 sm:$0xff]   ;;  %v9904_v53 = vld [vmem:[%s11137_s23 + $0xb48] ss:$16 sps:$4 sm:$0xff]  }
 0x171   : > { %6835 = vmatprep.subr.bf16.mxu0 %v9819_v18  ;;  %7491 = vmatprep.subr.bf16.mxu1 %v9822_v19  ;;  %v9909_v18 = vld [vmem:[%s11137_s23 + $0xb64] ss:$16 sps:$4 sm:$0xff]   ;;  %v9912_v19 = vld [vmem:[%s11137_s23 + $0xb6c] ss:$16 sps:$4 sm:$0xff]  }
 0x174   : > { %6836 = vmatpush1.bf16.msra.mxu0 %v9817_v20  ;;  %7492 = vmatpush1.bf16.msra.mxu1 %v9820_v21  ;;  %v9907_v20 = vld [vmem:[%s11137_s23 + $0xb60] ss:$16 sps:$4 sm:$0xff]   ;;  %v9910_v21 = vld [vmem:[%s11137_s23 + $0xb68] ss:$16 sps:$4 sm:$0xff]  }
 0x175   : > { %6837 = vmatprep.subr.bf16.mxu0 %v9825_v23  ;;  %7493 = vmatprep.subr.bf16.mxu1 %v9828_v24  ;;  %v9915_v23 = vld [vmem:[%s11137_s23 + $0xb84] ss:$16 sps:$4 sm:$0xff]   ;;  %v9918_v24 = vld [vmem:[%s11137_s23 + $0xb8c] ss:$16 sps:$4 sm:$0xff]  }
 0x178   : > { %6838 = vmatpush1.bf16.msra.mxu0 %v9823_v25  ;;  %7494 = vmatpush1.bf16.msra.mxu1 %v9826_v27  ;;  %v9913_v25 = vld [vmem:[%s11137_s23 + $0xb80] ss:$16 sps:$4 sm:$0xff]   ;;  %v9916_v27 = vld [vmem:[%s11137_s23 + $0xb88] ss:$16 sps:$4 sm:$0xff]  }
 0x179   : > { %6839 = vmatprep.subr.bf16.mxu0 %v9831_v28  ;;  %7495 = vmatprep.subr.bf16.mxu1 %v9834_v29  ;;  %v9921_v28 = vld [vmem:[%s11137_s23 + $0xba4] ss:$16 sps:$4 sm:$0xff]   ;;  %v9924_v29 = vld [vmem:[%s11137_s23 + $0xbac] ss:$16 sps:$4 sm:$0xff]  }
 0x17c   : > { %6840 = vmatpush1.bf16.msra.mxu0 %v9829_v30  ;;  %7496 = vmatpush1.bf16.msra.mxu1 %v9832_v31  ;;  %v9919_v30 = vld [vmem:[%s11137_s23 + $0xba0] ss:$16 sps:$4 sm:$0xff]   ;;  %v9922_v31 = vld [vmem:[%s11137_s23 + $0xba8] ss:$16 sps:$4 sm:$0xff]  }
 0x17d   : > { %6841 = vmatprep.subr.bf16.mxu0 %v9837_v16  ;;  %7497 = vmatprep.subr.bf16.mxu1 %v9840_v32  ;;  %v9927_v16 = vld [vmem:[%s11137_s23 + $0xbc4] ss:$16 sps:$4 sm:$0xff]   ;;  %v9930_v32 = vld [vmem:[%s11137_s23 + $0xbcc] ss:$16 sps:$4 sm:$0xff]  }
 0x180   : > { %6842 = vmatpush1.bf16.msra.mxu0 %v9835_v33  ;;  %7498 = vmatpush1.bf16.msra.mxu1 %v9838_v34  ;;  %v10900_v33 = vld [vmem:[%s11150_s26 + $0x8] sm:$0xff] }
 0x181   : > { %6852 = vmatprep.subr.bf16.mxu0 %v9843_v26  ;;  %7508 = vmatprep.subr.bf16.mxu1 %v9846_v35  ;;  %v1348_v34 = vcombine.high %v10900_v33, %v10900_v33  ;;  %v9925_v26 = vld [vmem:[%s11137_s23 + $0xbc0] ss:$16 sps:$4 sm:$0xff]   ;;  %v9928_v35 = vld [vmem:[%s11137_s23 + $0xbc8] ss:$16 sps:$4 sm:$0xff]  }
 0x182   : > { %v10009_v33 = vld [vmem:[%s11137_s23 + $0xd80] ss:$16 sps:$4 sm:$0xff]  }
 0x183   : > { %6844 = vmatmul.mubr.bf16.vlgmr.msra.gmra.mrb[0].mxu0 %v11526_v14  ;;  %7500 = vmatmul.mubr.bf16.vlgmr.msra.gmra.mrb[0].mxu1 %v11526_v14 }
 0x184   : > { %6853 = vmatpush1.bf16.msra.mxu0 %v9841_v37  ;;  %7509 = vmatpush1.bf16.msra.mxu1 %v9844_v38  ;;  %v9933_v37 = vld [vmem:[%s11137_s23 + $0xbe4] ss:$16 sps:$4 sm:$0xff]   ;;  %v9936_v38 = vld [vmem:[%s11137_s23 + $0xbec] ss:$16 sps:$4 sm:$0xff]  }
 0x185   : > { %6854 = vmatprep.subr.bf16.mxu0 %v9849_v39  ;;  %7510 = vmatprep.subr.bf16.mxu1 %v9852_v40  ;;  %v11594_v39 = vrot.slane %v1348_v34, %v11199_v50  ;;  %v9931_v40 = vld [vmem:[%s11137_s23 + $0xbe0] ss:$16 sps:$4 sm:$0xff]   ;;  %v10012_v34 = vld [vmem:[%s11137_s23 + $0xd88] ss:$16 sps:$4 sm:$0xff]  }
 0x186   : > { %6884 = vmatprep.mubr.bf16.mxu0 %v1395_v41  ;;  %7540 = vmatprep.mubr.bf16.mxu1 %v1395_v41  ;;  %v9934_v41 = vld [vmem:[%s11137_s23 + $0xbe8] ss:$16 sps:$4 sm:$0xff]  }
 0x188   : > { %6855 = vmatpush1.bf16.msra.mxu0 %v9847_v22  ;;  %7511 = vmatpush1.bf16.msra.mxu1 %v9850_v42  ;;  %v9939_v22 = vld [vmem:[%s11137_s23 + $0xc04] ss:$16 sps:$4 sm:$0xff]   ;;  %v9942_v42 = vld [vmem:[%s11137_s23 + $0xc0c] ss:$16 sps:$4 sm:$0xff]  }
 0x189   : > { %6856 = vmatprep.subr.bf16.mxu0 %v9855_v43  ;;  %7512 = vmatprep.subr.bf16.mxu1 %v9858_v45  ;;  %v1364_v43 = vcombine.high %v11594_v39, %v11594_v39  ;;  %v1393_v45 = vcombine.high %v11526_v14, %v11526_v14  ;;  %v9943_v14 = vld [vmem:[%s11137_s23 + $0xc20] ss:$16 sps:$4 sm:$0xff]  }
 0x18c   : > { %6857 = vmatpush1.bf16.msra.mxu0 %v9853_v36  ;;  %7513 = vmatpush1.bf16.msra.mxu1 %v9856_v46  ;;  %v9937_v36 = vld [vmem:[%s11137_s23 + $0xc00] ss:$16 sps:$4 sm:$0xff]   ;;  %v9940_v46 = vld [vmem:[%s11137_s23 + $0xc08] ss:$16 sps:$4 sm:$0xff]  }
 0x18d   : > { %6858 = vmatprep.subr.bf16.mxu0 %v9861_v47  ;;  %7514 = vmatprep.subr.bf16.mxu1 %v9864_v48  ;;  %v9945_v47 = vld [vmem:[%s11137_s23 + $0xc24] ss:$16 sps:$4 sm:$0xff]   ;;  %v9948_v48 = vld [vmem:[%s11137_s23 + $0xc2c] ss:$16 sps:$4 sm:$0xff]  }
 0x190   : > { %6859 = vmatpush1.bf16.msra.mxu0 %v9859_v49  ;;  %7515 = vmatpush1.bf16.msra.mxu1 %v9862_v51  ;;  %v11609_v49 = vrot.slane %v1364_v43, %v11199_v50  ;;  %v9946_v51 = vld [vmem:[%s11137_s23 + $0xc28] ss:$16 sps:$4 sm:$0xff]   ;;  %v10029_v43 = vld [vmem:[%s11137_s23 + $0xde4] ss:$16 sps:$4 sm:$0xff]  }
 0x191   : > { %6860 = vmatprep.subr.bf16.mxu0 %v9867_v52  ;;  %7516 = vmatprep.subr.bf16.mxu1 %v9870_v54  ;;  %v9951_v52 = vld [vmem:[%s11137_s23 + $0xc44] ss:$16 sps:$4 sm:$0xff]   ;;  %v9954_v54 = vld [vmem:[%s11137_s23 + $0xc4c] ss:$16 sps:$4 sm:$0xff]  }
 0x194   : > { %6861 = vmatpush1.bf16.msra.mxu0 %v9865_v55  ;;  %7517 = vmatpush1.bf16.msra.mxu1 %v9868_v56  ;;  %v9949_v55 = vld [vmem:[%s11137_s23 + $0xc40] ss:$16 sps:$4 sm:$0xff]   ;;  %v9952_v56 = vld [vmem:[%s11137_s23 + $0xc48] ss:$16 sps:$4 sm:$0xff]  }
 0x195   : > { %6862 = vmatprep.subr.bf16.mxu0 %v9873_v57  ;;  %7518 = vmatprep.subr.bf16.mxu1 %v9876_v58  ;;  %v9957_v57 = vld [vmem:[%s11137_s23 + $0xc64] ss:$16 sps:$4 sm:$0xff]   ;;  %v9960_v58 = vld [vmem:[%s11137_s23 + $0xc6c] ss:$16 sps:$4 sm:$0xff]  }
 0x198   : > { %6863 = vmatpush1.bf16.msra.mxu0 %v9871_v59  ;;  %7519 = vmatpush1.bf16.msra.mxu1 %v9874_v60  ;;  %v9955_v59 = vld [vmem:[%s11137_s23 + $0xc60] ss:$16 sps:$4 sm:$0xff]   ;;  %v9958_v60 = vld [vmem:[%s11137_s23 + $0xc68] ss:$16 sps:$4 sm:$0xff]  }
 0x199   : > { %6864 = vmatprep.subr.bf16.mxu0 %v9879_v61  ;;  %7520 = vmatprep.subr.bf16.mxu1 %v9882_v62  ;;  %v9963_v61 = vld [vmem:[%s11137_s23 + $0xc84] ss:$16 sps:$4 sm:$0xff]   ;;  %v9966_v62 = vld [vmem:[%s11137_s23 + $0xc8c] ss:$16 sps:$4 sm:$0xff]  }
 0x19c   : > { %6865 = vmatpush1.bf16.msra.mxu0 %v9877_v63  ;;  %7521 = vmatpush1.bf16.msra.mxu1 %v9880_v0  ;;  %v9961_v63 = vld [vmem:[%s11137_s23 + $0xc80] ss:$16 sps:$4 sm:$0xff]   ;;  %v9964_v0 = vld [vmem:[%s11137_s23 + $0xc88] ss:$16 sps:$4 sm:$0xff]  }
 0x19d   : > { %6866 = vmatprep.subr.bf16.mxu0 %v9885_v1  ;;  %7522 = vmatprep.subr.bf16.mxu1 %v9888_v2  ;;  %v9969_v1 = vld [vmem:[%s11137_s23 + $0xca4] ss:$16 sps:$4 sm:$0xff]   ;;  %v9972_v2 = vld [vmem:[%s11137_s23 + $0xcac] ss:$16 sps:$4 sm:$0xff]  }
 0x1a0   : > { %6867 = vmatpush1.bf16.msra.mxu0 %v9883_v3  ;;  %7523 = vmatpush1.bf16.msra.mxu1 %v9886_v4  ;;  %v9967_v3 = vld [vmem:[%s11137_s23 + $0xca0] ss:$16 sps:$4 sm:$0xff]   ;;  %v9970_v4 = vld [vmem:[%s11137_s23 + $0xca8] ss:$16 sps:$4 sm:$0xff]  }
 0x1a1   : > { %6868 = vmatprep.subr.bf16.mxu0 %v9891_v5  ;;  %7524 = vmatprep.subr.bf16.mxu1 %v9894_v6  ;;  %v9975_v5 = vld [vmem:[%s11137_s23 + $0xcc4] ss:$16 sps:$4 sm:$0xff]   ;;  %v9978_v6 = vld [vmem:[%s11137_s23 + $0xccc] ss:$16 sps:$4 sm:$0xff]  }
 0x1a4   : > { %6869 = vmatpush1.bf16.msra.mxu0 %v9889_v7  ;;  %7525 = vmatpush1.bf16.msra.mxu1 %v9892_v8  ;;  %v9973_v7 = vld [vmem:[%s11137_s23 + $0xcc0] ss:$16 sps:$4 sm:$0xff]   ;;  %v9976_v8 = vld [vmem:[%s11137_s23 + $0xcc8] ss:$16 sps:$4 sm:$0xff]  }
 0x1a5   : > { %6870 = vmatprep.subr.bf16.mxu0 %v9897_v9  ;;  %7526 = vmatprep.subr.bf16.mxu1 %v9900_v10  ;;  %v9981_v9 = vld [vmem:[%s11137_s23 + $0xce4] ss:$16 sps:$4 sm:$0xff]   ;;  %v9984_v10 = vld [vmem:[%s11137_s23 + $0xcec] ss:$16 sps:$4 sm:$0xff]  }
 0x1a8   : > { %6871 = vmatpush1.bf16.msra.mxu0 %v9895_v11  ;;  %7527 = vmatpush1.bf16.msra.mxu1 %v9898_v12  ;;  %v9979_v11 = vld [vmem:[%s11137_s23 + $0xce0] ss:$16 sps:$4 sm:$0xff]   ;;  %v9982_v12 = vld [vmem:[%s11137_s23 + $0xce8] ss:$16 sps:$4 sm:$0xff]  }
 0x1a9   : > { %6872 = vmatprep.subr.bf16.mxu0 %v9903_v13  ;;  %7528 = vmatprep.subr.bf16.mxu1 %v9906_v15  ;;  %v9987_v13 = vld [vmem:[%s11137_s23 + $0xd04] ss:$16 sps:$4 sm:$0xff]   ;;  %v9990_v15 = vld [vmem:[%s11137_s23 + $0xd0c] ss:$16 sps:$4 sm:$0xff]  }
 0x1ac   : > { %6873 = vmatpush1.bf16.msra.mxu0 %v9901_v17  ;;  %7529 = vmatpush1.bf16.msra.mxu1 %v9904_v53  ;;  %v9985_v17 = vld [vmem:[%s11137_s23 + $0xd00] ss:$16 sps:$4 sm:$0xff]   ;;  %v9988_v53 = vld [vmem:[%s11137_s23 + $0xd08] ss:$16 sps:$4 sm:$0xff]  }
 0x1ad   : > { %6874 = vmatprep.subr.bf16.mxu0 %v9909_v18  ;;  %7530 = vmatprep.subr.bf16.mxu1 %v9912_v19  ;;  %v9993_v18 = vld [vmem:[%s11137_s23 + $0xd24] ss:$16 sps:$4 sm:$0xff]   ;;  %v9996_v19 = vld [vmem:[%s11137_s23 + $0xd2c] ss:$16 sps:$4 sm:$0xff]  }
 0x1b0   : > { %6875 = vmatpush1.bf16.msra.mxu0 %v9907_v20  ;;  %7531 = vmatpush1.bf16.msra.mxu1 %v9910_v21  ;;  %v9991_v20 = vld [vmem:[%s11137_s23 + $0xd20] ss:$16 sps:$4 sm:$0xff]   ;;  %v9994_v21 = vld [vmem:[%s11137_s23 + $0xd28] ss:$16 sps:$4 sm:$0xff]  }
 0x1b1   : > { %6876 = vmatprep.subr.bf16.mxu0 %v9915_v23  ;;  %7532 = vmatprep.subr.bf16.mxu1 %v9918_v24  ;;  %v9999_v23 = vld [vmem:[%s11137_s23 + $0xd44] ss:$16 sps:$4 sm:$0xff]   ;;  %v10002_v24 = vld [vmem:[%s11137_s23 + $0xd4c] ss:$16 sps:$4 sm:$0xff]  }
 0x1b4   : > { %6877 = vmatpush1.bf16.msra.mxu0 %v9913_v25  ;;  %7533 = vmatpush1.bf16.msra.mxu1 %v9916_v27  ;;  %v9997_v25 = vld [vmem:[%s11137_s23 + $0xd40] ss:$16 sps:$4 sm:$0xff]   ;;  %v10000_v27 = vld [vmem:[%s11137_s23 + $0xd48] ss:$16 sps:$4 sm:$0xff]  }
 0x1b5   : > { %6878 = vmatprep.subr.bf16.mxu0 %v9921_v28  ;;  %7534 = vmatprep.subr.bf16.mxu1 %v9924_v29  ;;  %v10005_v28 = vld [vmem:[%s11137_s23 + $0xd64] ss:$16 sps:$4 sm:$0xff]   ;;  %v10008_v29 = vld [vmem:[%s11137_s23 + $0xd6c] ss:$16 sps:$4 sm:$0xff]  }
 0x1b8   : > { %6879 = vmatpush1.bf16.msra.mxu0 %v9919_v30  ;;  %7535 = vmatpush1.bf16.msra.mxu1 %v9922_v31  ;;  %v10003_v30 = vld [vmem:[%s11137_s23 + $0xd60] ss:$16 sps:$4 sm:$0xff]   ;;  %v10006_v31 = vld [vmem:[%s11137_s23 + $0xd68] ss:$16 sps:$4 sm:$0xff]  }
 0x1b9   : > { %6880 = vmatprep.subr.bf16.mxu0 %v9927_v16  ;;  %7536 = vmatprep.subr.bf16.mxu1 %v9930_v32  ;;  %v10011_v16 = vld [vmem:[%s11137_s23 + $0xd84] ss:$16 sps:$4 sm:$0xff]   ;;  %v10014_v32 = vld [vmem:[%s11137_s23 + $0xd8c] ss:$16 sps:$4 sm:$0xff]  }
 0x1bc   : > { %6881 = vmatpush1.bf16.msra.mxu0 %v9925_v26  ;;  %7537 = vmatpush1.bf16.msra.mxu1 %v9928_v35  ;;  %v10017_v26 = vld [vmem:[%s11137_s23 + $0xda4] ss:$16 sps:$4 sm:$0xff]   ;;  %v10020_v35 = vld [vmem:[%s11137_s23 + $0xdac] ss:$16 sps:$4 sm:$0xff]  }
 0x1bd   : > { %6882 = vmatprep.subr.bf16.mxu0 %v9933_v37  ;;  %7538 = vmatprep.subr.bf16.mxu1 %v9936_v38  ;;  %v10015_v37 = vld [vmem:[%s11137_s23 + $0xda0] ss:$16 sps:$4 sm:$0xff]   ;;  %v10018_v38 = vld [vmem:[%s11137_s23 + $0xda8] ss:$16 sps:$4 sm:$0xff]  }
 0x1c0   : > { %6883 = vmatpush1.bf16.msra.mxu0 %v9931_v40  ;;  %7539 = vmatpush1.bf16.msra.mxu1 %v9934_v41  ;;  %v10023_v40 = vld [vmem:[%s11137_s23 + $0xdc4] ss:$16 sps:$4 sm:$0xff]   ;;  %v10026_v41 = vld [vmem:[%s11137_s23 + $0xdcc] ss:$16 sps:$4 sm:$0xff]  }
 0x1c1   : > { %6893 = vmatprep.subr.bf16.mxu0 %v9939_v22  ;;  %7549 = vmatprep.subr.bf16.mxu1 %v9942_v42  ;;  %v10021_v22 = vld [vmem:[%s11137_s23 + $0xdc0] ss:$16 sps:$4 sm:$0xff]   ;;  %v10024_v42 = vld [vmem:[%s11137_s23 + $0xdc8] ss:$16 sps:$4 sm:$0xff]  }
 0x1c3   : > { %6885 = vmatmul.mubr.bf16.vlgmr.msra.gmra.mrb[0].mxu0 %v1393_v45  ;;  %7541 = vmatmul.mubr.bf16.vlgmr.msra.gmra.mrb[0].mxu1 %v1393_v45  ;;  %v10032_v45 = vld [vmem:[%s11137_s23 + $0xdec] ss:$16 sps:$4 sm:$0xff]  }
 0x1c4   : > { %6894 = vmatpush1.bf16.msra.mxu0 %v9937_v36  ;;  %7550 = vmatpush1.bf16.msra.mxu1 %v9940_v46  ;;  %v10027_v36 = vld [vmem:[%s11137_s23 + $0xde0] ss:$16 sps:$4 sm:$0xff]   ;;  %v10030_v46 = vld [vmem:[%s11137_s23 + $0xde8] ss:$16 sps:$4 sm:$0xff]  }
 0x1c5   : > { %6895 = vmatprep.subr.bf16.mxu0 %v9945_v47  ;;  %7551 = vmatprep.subr.bf16.mxu1 %v9948_v48  ;;  %v10036_v47 = vld [vmem:[%s11137_s23 + $0xe04] ss:$16 sps:$4 sm:$0xff]   ;;  %v10039_v48 = vld [vmem:[%s11137_s23 + $0xe0c] ss:$16 sps:$4 sm:$0xff]  }
 0x1c6   : > { %6925 = vmatprep.mubr.bf16.mxu0 %v11609_v49  ;;  %7581 = vmatprep.mubr.bf16.mxu1 %v11609_v49 }
 0x1c8   : > { %6896 = vmatpush1.bf16.msra.mxu0 %v9943_v14  ;;  %7552 = vmatpush1.bf16.msra.mxu1 %v9946_v51  ;;  %v11675_v14 = vrot.slane %v11594_v39, %v11199_v50  ;;  %v10034_v51 = vld [vmem:[%s11137_s23 + $0xe00] ss:$16 sps:$4 sm:$0xff]  }
 0x1c9   : > { %6897 = vmatprep.subr.bf16.mxu0 %v9951_v52  ;;  %7553 = vmatprep.subr.bf16.mxu1 %v9954_v54  ;;  %v10037_v52 = vld [vmem:[%s11137_s23 + $0xe08] ss:$16 sps:$4 sm:$0xff]   ;;  %v10042_v54 = vld [vmem:[%s11137_s23 + $0xe24] ss:$16 sps:$4 sm:$0xff]   ;;  %v10040_v39 = vld [vmem:[%s11137_s23 + $0xe20] ss:$16 sps:$4 sm:$0xff]  }
 0x1cc   : > { %6898 = vmatpush1.bf16.msra.mxu0 %v9949_v55  ;;  %7554 = vmatpush1.bf16.msra.mxu1 %v9952_v56  ;;  %v10045_v55 = vld [vmem:[%s11137_s23 + $0xe2c] ss:$16 sps:$4 sm:$0xff]   ;;  %v1396_v56 = vcombine.high %v11609_v49, %v11609_v49  ;;  %v10046_v49 = vld [vmem:[%s11137_s23 + $0xe40] ss:$16 sps:$4 sm:$0xff]  }
 0x1cd   : > { %6899 = vmatprep.subr.bf16.mxu0 %v9957_v57  ;;  %7555 = vmatprep.subr.bf16.mxu1 %v9960_v58  ;;  %v10043_v57 = vld [vmem:[%s11137_s23 + $0xe28] ss:$16 sps:$4 sm:$0xff]   ;;  %v10048_v58 = vld [vmem:[%s11137_s23 + $0xe44] ss:$16 sps:$4 sm:$0xff]  }
 0x1d0   : > { %6900 = vmatpush1.bf16.msra.mxu0 %v9955_v59  ;;  %7556 = vmatpush1.bf16.msra.mxu1 %v9958_v60  ;;  %v10051_v59 = vld [vmem:[%s11137_s23 + $0xe4c] ss:$16 sps:$4 sm:$0xff]   ;;  %v10049_v60 = vld [vmem:[%s11137_s23 + $0xe48] ss:$16 sps:$4 sm:$0xff]  }
 0x1d1   : > { %6901 = vmatprep.subr.bf16.mxu0 %v9963_v61  ;;  %7557 = vmatprep.subr.bf16.mxu1 %v9966_v62  ;;  %v10054_v61 = vld [vmem:[%s11137_s23 + $0xe64] ss:$16 sps:$4 sm:$0xff]   ;;  %v10057_v62 = vld [vmem:[%s11137_s23 + $0xe6c] ss:$16 sps:$4 sm:$0xff]  }
 0x1d4   : > { %6902 = vmatpush1.bf16.msra.mxu0 %v9961_v63  ;;  %7558 = vmatpush1.bf16.msra.mxu1 %v9964_v0  ;;  %v10052_v63 = vld [vmem:[%s11137_s23 + $0xe60] ss:$16 sps:$4 sm:$0xff]   ;;  %v10055_v0 = vld [vmem:[%s11137_s23 + $0xe68] ss:$16 sps:$4 sm:$0xff]  }
 0x1d5   : > { %6903 = vmatprep.subr.bf16.mxu0 %v9969_v1  ;;  %7559 = vmatprep.subr.bf16.mxu1 %v9972_v2  ;;  %v10060_v1 = vld [vmem:[%s11137_s23 + $0xe84] ss:$16 sps:$4 sm:$0xff]   ;;  %v10063_v2 = vld [vmem:[%s11137_s23 + $0xe8c] ss:$16 sps:$4 sm:$0xff]  }
 0x1d8   : > { %6904 = vmatpush1.bf16.msra.mxu0 %v9967_v3  ;;  %7560 = vmatpush1.bf16.msra.mxu1 %v9970_v4  ;;  %v10058_v3 = vld [vmem:[%s11137_s23 + $0xe80] ss:$16 sps:$4 sm:$0xff]   ;;  %v10061_v4 = vld [vmem:[%s11137_s23 + $0xe88] ss:$16 sps:$4 sm:$0xff]  }
 0x1d9   : > { %6905 = vmatprep.subr.bf16.mxu0 %v9975_v5  ;;  %7561 = vmatprep.subr.bf16.mxu1 %v9978_v6  ;;  %v10066_v5 = vld [vmem:[%s11137_s23 + $0xea4] ss:$16 sps:$4 sm:$0xff]   ;;  %v10069_v6 = vld [vmem:[%s11137_s23 + $0xeac] ss:$16 sps:$4 sm:$0xff]  }
 0x1dc   : > { %6906 = vmatpush1.bf16.msra.mxu0 %v9973_v7  ;;  %7562 = vmatpush1.bf16.msra.mxu1 %v9976_v8  ;;  %v10064_v7 = vld [vmem:[%s11137_s23 + $0xea0] ss:$16 sps:$4 sm:$0xff]   ;;  %v10067_v8 = vld [vmem:[%s11137_s23 + $0xea8] ss:$16 sps:$4 sm:$0xff]  }
 0x1dd   : > { %6907 = vmatprep.subr.bf16.mxu0 %v9981_v9  ;;  %7563 = vmatprep.subr.bf16.mxu1 %v9984_v10  ;;  %v10072_v9 = vld [vmem:[%s11137_s23 + $0xec4] ss:$16 sps:$4 sm:$0xff]   ;;  %v10075_v10 = vld [vmem:[%s11137_s23 + $0xecc] ss:$16 sps:$4 sm:$0xff]  }
 0x1e0   : > { %6908 = vmatpush1.bf16.msra.mxu0 %v9979_v11  ;;  %7564 = vmatpush1.bf16.msra.mxu1 %v9982_v12  ;;  %v10070_v11 = vld [vmem:[%s11137_s23 + $0xec0] ss:$16 sps:$4 sm:$0xff]   ;;  %v10073_v12 = vld [vmem:[%s11137_s23 + $0xec8] ss:$16 sps:$4 sm:$0xff]  }
 0x1e1   : > { %6909 = vmatprep.subr.bf16.mxu0 %v9987_v13  ;;  %7565 = vmatprep.subr.bf16.mxu1 %v9990_v15  ;;  %v10078_v13 = vld [vmem:[%s11137_s23 + $0xee4] ss:$16 sps:$4 sm:$0xff]   ;;  %v10081_v15 = vld [vmem:[%s11137_s23 + $0xeec] ss:$16 sps:$4 sm:$0xff]  }
 0x1e4   : > { %6910 = vmatpush1.bf16.msra.mxu0 %v9985_v17  ;;  %7566 = vmatpush1.bf16.msra.mxu1 %v9988_v53  ;;  %v10076_v17 = vld [vmem:[%s11137_s23 + $0xee0] ss:$16 sps:$4 sm:$0xff]   ;;  %v10079_v53 = vld [vmem:[%s11137_s23 + $0xee8] ss:$16 sps:$4 sm:$0xff]  }
 0x1e5   : > { %6911 = vmatprep.subr.bf16.mxu0 %v9993_v18  ;;  %7567 = vmatprep.subr.bf16.mxu1 %v9996_v19  ;;  %v10084_v18 = vld [vmem:[%s11137_s23 + $0xf04] ss:$16 sps:$4 sm:$0xff]   ;;  %v10087_v19 = vld [vmem:[%s11137_s23 + $0xf0c] ss:$16 sps:$4 sm:$0xff]  }
 0x1e8   : > { %6912 = vmatpush1.bf16.msra.mxu0 %v9991_v20  ;;  %7568 = vmatpush1.bf16.msra.mxu1 %v9994_v21  ;;  %v10082_v20 = vld [vmem:[%s11137_s23 + $0xf00] ss:$16 sps:$4 sm:$0xff]   ;;  %v10085_v21 = vld [vmem:[%s11137_s23 + $0xf08] ss:$16 sps:$4 sm:$0xff]  }
 0x1e9   : > { %6913 = vmatprep.subr.bf16.mxu0 %v9999_v23  ;;  %7569 = vmatprep.subr.bf16.mxu1 %v10002_v24  ;;  %v10090_v23 = vld [vmem:[%s11137_s23 + $0xf24] ss:$16 sps:$4 sm:$0xff]   ;;  %v10093_v24 = vld [vmem:[%s11137_s23 + $0xf2c] ss:$16 sps:$4 sm:$0xff]  }
 0x1ec   : > { %6914 = vmatpush1.bf16.msra.mxu0 %v9997_v25  ;;  %7570 = vmatpush1.bf16.msra.mxu1 %v10000_v27  ;;  %v10088_v25 = vld [vmem:[%s11137_s23 + $0xf20] ss:$16 sps:$4 sm:$0xff]   ;;  %v10091_v27 = vld [vmem:[%s11137_s23 + $0xf28] ss:$16 sps:$4 sm:$0xff]  }
 0x1ed   : > { %6915 = vmatprep.subr.bf16.mxu0 %v10005_v28  ;;  %7571 = vmatprep.subr.bf16.mxu1 %v10008_v29  ;;  %v10096_v28 = vld [vmem:[%s11137_s23 + $0xf44] ss:$16 sps:$4 sm:$0xff]   ;;  %v10099_v29 = vld [vmem:[%s11137_s23 + $0xf4c] ss:$16 sps:$4 sm:$0xff]  }
 0x1f0   : > { %6916 = vmatpush1.bf16.msra.mxu0 %v10003_v30  ;;  %7572 = vmatpush1.bf16.msra.mxu1 %v10006_v31  ;;  %v10094_v30 = vld [vmem:[%s11137_s23 + $0xf40] ss:$16 sps:$4 sm:$0xff]   ;;  %v10097_v31 = vld [vmem:[%s11137_s23 + $0xf48] ss:$16 sps:$4 sm:$0xff]  }
 0x1f1   : > { %6917 = vmatprep.subr.bf16.mxu0 %v10011_v16  ;;  %7573 = vmatprep.subr.bf16.mxu1 %v10014_v32  ;;  %v10102_v16 = vld [vmem:[%s11137_s23 + $0xf64] ss:$16 sps:$4 sm:$0xff]   ;;  %v10105_v32 = vld [vmem:[%s11137_s23 + $0xf6c] ss:$16 sps:$4 sm:$0xff]  }
 0x1f4   : > { %6918 = vmatpush1.bf16.msra.mxu0 %v10009_v33  ;;  %7574 = vmatpush1.bf16.msra.mxu1 %v10012_v34  ;;  %v10100_v33 = vld [vmem:[%s11137_s23 + $0xf60] ss:$16 sps:$4 sm:$0xff]   ;;  %v10103_v34 = vld [vmem:[%s11137_s23 + $0xf68] ss:$16 sps:$4 sm:$0xff]  }
 0x1f5   : > { %6919 = vmatprep.subr.bf16.mxu0 %v10017_v26  ;;  %7575 = vmatprep.subr.bf16.mxu1 %v10020_v35  ;;  %v10108_v26 = vld [vmem:[%s11137_s23 + $0xf84] ss:$16 sps:$4 sm:$0xff]   ;;  %v10111_v35 = vld [vmem:[%s11137_s23 + $0xf8c] ss:$16 sps:$4 sm:$0xff]  }
 0x1f8   : > { %6920 = vmatpush1.bf16.msra.mxu0 %v10015_v37  ;;  %7576 = vmatpush1.bf16.msra.mxu1 %v10018_v38  ;;  %v10106_v37 = vld [vmem:[%s11137_s23 + $0xf80] ss:$16 sps:$4 sm:$0xff]   ;;  %v10109_v38 = vld [vmem:[%s11137_s23 + $0xf88] ss:$16 sps:$4 sm:$0xff]  }
 0x1f9   : > { %6921 = vmatprep.subr.bf16.mxu0 %v10023_v40  ;;  %7577 = vmatprep.subr.bf16.mxu1 %v10026_v41  ;;  %v10114_v40 = vld [vmem:[%s11137_s23 + $0xfa4] ss:$16 sps:$4 sm:$0xff]   ;;  %v10117_v41 = vld [vmem:[%s11137_s23 + $0xfac] ss:$16 sps:$4 sm:$0xff]  }
 0x1fc   : > { %6922 = vmatpush1.bf16.msra.mxu0 %v10021_v22  ;;  %7578 = vmatpush1.bf16.msra.mxu1 %v10024_v42  ;;  %v10112_v22 = vld [vmem:[%s11137_s23 + $0xfa0] ss:$16 sps:$4 sm:$0xff]   ;;  %v10115_v42 = vld [vmem:[%s11137_s23 + $0xfa8] ss:$16 sps:$4 sm:$0xff]  }
 0x1fd   : > { %6923 = vmatprep.subr.bf16.mxu0 %v10029_v43  ;;  %7579 = vmatprep.subr.bf16.mxu1 %v10032_v45  ;;  %v10120_v43 = vld [vmem:[%s11137_s23 + $0xfc4] ss:$16 sps:$4 sm:$0xff]   ;;  %v10123_v45 = vld [vmem:[%s11137_s23 + $0xfcc] ss:$16 sps:$4 sm:$0xff]  }
 0x200   : > { %6924 = vmatpush1.bf16.msra.mxu0 %v10027_v36  ;;  %7580 = vmatpush1.bf16.msra.mxu1 %v10030_v46  ;;  %v11738_v36 = vld [vmem:[%s11150_s26 + $0x10] sm:$0xff]  ;;  %v10118_v46 = vld [vmem:[%s11137_s23 + $0xfc0] ss:$16 sps:$4 sm:$0xff]  }
 0x201   : > { %6934 = vmatprep.subr.bf16.mxu0 %v10036_v47  ;;  %7590 = vmatprep.subr.bf16.mxu1 %v10039_v48  ;;  %v10121_v47 = vld [vmem:[%s11137_s23 + $0xfc8] ss:$16 sps:$4 sm:$0xff]   ;;  %v10126_v48 = vld [vmem:[%s11137_s23 + $0xfe4] ss:$16 sps:$4 sm:$0xff]  }
 0x203   : > { %6926 = vmatmul.mubr.bf16.vlgmr.msra.gmra.mrb[0].mxu0 %v11675_v14  ;;  %7582 = vmatmul.mubr.bf16.vlgmr.msra.gmra.mrb[0].mxu1 %v11675_v14 }
 0x204   : > { %6935 = vmatpush1.bf16.msra.mxu0 %v10034_v51  ;;  %7591 = vmatpush1.bf16.msra.mxu1 %v10037_v52  ;;  %v10129_v51 = vld [vmem:[%s11137_s23 + $0xfec] ss:$16 sps:$4 sm:$0xff]   ;;  %v11746_v52 = vrot.slane %v11738_v36, %v11199_v50 }
 0x205   : > { %6936 = vmatprep.subr.bf16.mxu0 %v10042_v54  ;;  %7592 = vmatprep.subr.bf16.mxu1 %v10045_v55  ;;  %v10124_v54 = vld [vmem:[%s11137_s23 + $0xfe0] ss:$16 sps:$4 sm:$0xff]   ;;  %v10127_v55 = vld [vmem:[%s11137_s23 + $0xfe8] ss:$16 sps:$4 sm:$0xff]  }
 0x206   : > { %6966 = vmatprep.mubr.bf16.mxu0 %v1396_v56  ;;  %7622 = vmatprep.mubr.bf16.mxu1 %v1396_v56  ;;  %v10132_v56 = vld [vmem:[%s11137_s23 + $0x1004] ss:$16 sps:$4 sm:$0xff]  }
 0x208   : > { %6937 = vmatpush1.bf16.msra.mxu0 %v10040_v39  ;;  %7593 = vmatpush1.bf16.msra.mxu1 %v10043_v57  ;;  %v10135_v39 = vld [vmem:[%s11137_s23 + $0x100c] ss:$16 sps:$4 sm:$0xff]   ;;  %v1412_v57 = vcombine.high %v11746_v52, %v11746_v52 }
 0x209   : > { %6938 = vmatprep.subr.bf16.mxu0 %v10048_v58  ;;  %7594 = vmatprep.subr.bf16.mxu1 %v10051_v59  ;;  %v1394_v58 = vcombine.high %v11675_v14, %v11675_v14  ;;  %v10130_v59 = vld [vmem:[%s11137_s23 + $0x1000] ss:$16 sps:$4 sm:$0xff]  }
 0x20a   : > { %v10136_v14 = vld [vmem:[%s11137_s23 + $0x1020] ss:$16 sps:$4 sm:$0xff]  }
 0x20c   : > { %6939 = vmatpush1.bf16.msra.mxu0 %v10046_v49  ;;  %7595 = vmatpush1.bf16.msra.mxu1 %v10049_v60  ;;  %v10133_v49 = vld [vmem:[%s11137_s23 + $0x1008] ss:$16 sps:$4 sm:$0xff]   ;;  %v10138_v60 = vld [vmem:[%s11137_s23 + $0x1024] ss:$16 sps:$4 sm:$0xff]  }
 0x20d   : > { %6940 = vmatprep.subr.bf16.mxu0 %v10054_v61  ;;  %7596 = vmatprep.subr.bf16.mxu1 %v10057_v62  ;;  %v10141_v61 = vld [vmem:[%s11137_s23 + $0x102c] ss:$16 sps:$4 sm:$0xff]   ;;  %v11761_v62 = vrot.slane %v1412_v57, %v11199_v50  ;;  %v10217_v57 = vld [vmem:[%s11137_s23 + $0x11c8] ss:$16 sps:$4 sm:$0xff]  }
 0x210   : > { %6941 = vmatpush1.bf16.msra.mxu0 %v10052_v63  ;;  %7597 = vmatpush1.bf16.msra.mxu1 %v10055_v0  ;;  %v10139_v63 = vld [vmem:[%s11137_s23 + $0x1028] ss:$16 sps:$4 sm:$0xff]   ;;  %v10144_v0 = vld [vmem:[%s11137_s23 + $0x1044] ss:$16 sps:$4 sm:$0xff]  }
 0x211   : > { %6942 = vmatprep.subr.bf16.mxu0 %v10060_v1  ;;  %7598 = vmatprep.subr.bf16.mxu1 %v10063_v2  ;;  %v10147_v1 = vld [vmem:[%s11137_s23 + $0x104c] ss:$16 sps:$4 sm:$0xff]   ;;  %v10142_v2 = vld [vmem:[%s11137_s23 + $0x1040] ss:$16 sps:$4 sm:$0xff]  }
 0x214   : > { %6943 = vmatpush1.bf16.msra.mxu0 %v10058_v3  ;;  %7599 = vmatpush1.bf16.msra.mxu1 %v10061_v4  ;;  %v10145_v3 = vld [vmem:[%s11137_s23 + $0x1048] ss:$16 sps:$4 sm:$0xff]   ;;  %v10150_v4 = vld [vmem:[%s11137_s23 + $0x1064] ss:$16 sps:$4 sm:$0xff]  }
 0x215   : > { %6944 = vmatprep.subr.bf16.mxu0 %v10066_v5  ;;  %7600 = vmatprep.subr.bf16.mxu1 %v10069_v6  ;;  %v10153_v5 = vld [vmem:[%s11137_s23 + $0x106c] ss:$16 sps:$4 sm:$0xff]   ;;  %v10148_v6 = vld [vmem:[%s11137_s23 + $0x1060] ss:$16 sps:$4 sm:$0xff]  }
 0x218   : > { %6945 = vmatpush1.bf16.msra.mxu0 %v10064_v7  ;;  %7601 = vmatpush1.bf16.msra.mxu1 %v10067_v8  ;;  %v10151_v7 = vld [vmem:[%s11137_s23 + $0x1068] ss:$16 sps:$4 sm:$0xff]   ;;  %v10156_v8 = vld [vmem:[%s11137_s23 + $0x1084] ss:$16 sps:$4 sm:$0xff]  }
 0x219   : > { %6946 = vmatprep.subr.bf16.mxu0 %v10072_v9  ;;  %7602 = vmatprep.subr.bf16.mxu1 %v10075_v10  ;;  %v10159_v9 = vld [vmem:[%s11137_s23 + $0x108c] ss:$16 sps:$4 sm:$0xff]   ;;  %v10154_v10 = vld [vmem:[%s11137_s23 + $0x1080] ss:$16 sps:$4 sm:$0xff]  }
 0x21c   : > { %6947 = vmatpush1.bf16.msra.mxu0 %v10070_v11  ;;  %7603 = vmatpush1.bf16.msra.mxu1 %v10073_v12  ;;  %v10157_v11 = vld [vmem:[%s11137_s23 + $0x1088] ss:$16 sps:$4 sm:$0xff]   ;;  %v10162_v12 = vld [vmem:[%s11137_s23 + $0x10a4] ss:$16 sps:$4 sm:$0xff]  }
 0x21d   : > { %6948 = vmatprep.subr.bf16.mxu0 %v10078_v13  ;;  %7604 = vmatprep.subr.bf16.mxu1 %v10081_v15  ;;  %v10165_v13 = vld [vmem:[%s11137_s23 + $0x10ac] ss:$16 sps:$4 sm:$0xff]   ;;  %v10160_v15 = vld [vmem:[%s11137_s23 + $0x10a0] ss:$16 sps:$4 sm:$0xff]  }
 0x220   : > { %6949 = vmatpush1.bf16.msra.mxu0 %v10076_v17  ;;  %7605 = vmatpush1.bf16.msra.mxu1 %v10079_v53  ;;  %v10163_v17 = vld [vmem:[%s11137_s23 + $0x10a8] ss:$16 sps:$4 sm:$0xff]   ;;  %v10168_v53 = vld [vmem:[%s11137_s23 + $0x10c4] ss:$16 sps:$4 sm:$0xff]  }
 0x221   : > { %6950 = vmatprep.subr.bf16.mxu0 %v10084_v18  ;;  %7606 = vmatprep.subr.bf16.mxu1 %v10087_v19  ;;  %v10171_v18 = vld [vmem:[%s11137_s23 + $0x10cc] ss:$16 sps:$4 sm:$0xff]   ;;  %v10166_v19 = vld [vmem:[%s11137_s23 + $0x10c0] ss:$16 sps:$4 sm:$0xff]  }
 0x224   : > { %6951 = vmatpush1.bf16.msra.mxu0 %v10082_v20  ;;  %7607 = vmatpush1.bf16.msra.mxu1 %v10085_v21  ;;  %v10169_v20 = vld [vmem:[%s11137_s23 + $0x10c8] ss:$16 sps:$4 sm:$0xff]   ;;  %v10174_v21 = vld [vmem:[%s11137_s23 + $0x10e4] ss:$16 sps:$4 sm:$0xff]  }
 0x225   : > { %6952 = vmatprep.subr.bf16.mxu0 %v10090_v23  ;;  %7608 = vmatprep.subr.bf16.mxu1 %v10093_v24  ;;  %v10177_v23 = vld [vmem:[%s11137_s23 + $0x10ec] ss:$16 sps:$4 sm:$0xff]   ;;  %v10172_v24 = vld [vmem:[%s11137_s23 + $0x10e0] ss:$16 sps:$4 sm:$0xff]  }
 0x228   : > { %6953 = vmatpush1.bf16.msra.mxu0 %v10088_v25  ;;  %7609 = vmatpush1.bf16.msra.mxu1 %v10091_v27  ;;  %v10175_v25 = vld [vmem:[%s11137_s23 + $0x10e8] ss:$16 sps:$4 sm:$0xff]   ;;  %v10180_v27 = vld [vmem:[%s11137_s23 + $0x1104] ss:$16 sps:$4 sm:$0xff]  }
 0x229   : > { %6954 = vmatprep.subr.bf16.mxu0 %v10096_v28  ;;  %7610 = vmatprep.subr.bf16.mxu1 %v10099_v29  ;;  %v10183_v28 = vld [vmem:[%s11137_s23 + $0x110c] ss:$16 sps:$4 sm:$0xff]   ;;  %v10178_v29 = vld [vmem:[%s11137_s23 + $0x1100] ss:$16 sps:$4 sm:$0xff]  }
 0x22c   : > { %6955 = vmatpush1.bf16.msra.mxu0 %v10094_v30  ;;  %7611 = vmatpush1.bf16.msra.mxu1 %v10097_v31  ;;  %v10181_v30 = vld [vmem:[%s11137_s23 + $0x1108] ss:$16 sps:$4 sm:$0xff]   ;;  %v10186_v31 = vld [vmem:[%s11137_s23 + $0x1124] ss:$16 sps:$4 sm:$0xff]  }
 0x22d   : > { %6956 = vmatprep.subr.bf16.mxu0 %v10102_v16  ;;  %7612 = vmatprep.subr.bf16.mxu1 %v10105_v32  ;;  %v10189_v16 = vld [vmem:[%s11137_s23 + $0x112c] ss:$16 sps:$4 sm:$0xff]   ;;  %v10184_v32 = vld [vmem:[%s11137_s23 + $0x1120] ss:$16 sps:$4 sm:$0xff]  }
 0x230   : > { %6957 = vmatpush1.bf16.msra.mxu0 %v10100_v33  ;;  %7613 = vmatpush1.bf16.msra.mxu1 %v10103_v34  ;;  %v10187_v33 = vld [vmem:[%s11137_s23 + $0x1128] ss:$16 sps:$4 sm:$0xff]   ;;  %v10192_v34 = vld [vmem:[%s11137_s23 + $0x1144] ss:$16 sps:$4 sm:$0xff]  }
 0x231   : > { %6958 = vmatprep.subr.bf16.mxu0 %v10108_v26  ;;  %7614 = vmatprep.subr.bf16.mxu1 %v10111_v35  ;;  %v10195_v26 = vld [vmem:[%s11137_s23 + $0x114c] ss:$16 sps:$4 sm:$0xff]   ;;  %v10190_v35 = vld [vmem:[%s11137_s23 + $0x1140] ss:$16 sps:$4 sm:$0xff]  }
 0x234   : > { %6959 = vmatpush1.bf16.msra.mxu0 %v10106_v37  ;;  %7615 = vmatpush1.bf16.msra.mxu1 %v10109_v38  ;;  %v10193_v37 = vld [vmem:[%s11137_s23 + $0x1148] ss:$16 sps:$4 sm:$0xff]   ;;  %v10198_v38 = vld [vmem:[%s11137_s23 + $0x1164] ss:$16 sps:$4 sm:$0xff]  }
 0x235   : > { %6960 = vmatprep.subr.bf16.mxu0 %v10114_v40  ;;  %7616 = vmatprep.subr.bf16.mxu1 %v10117_v41  ;;  %v10201_v40 = vld [vmem:[%s11137_s23 + $0x116c] ss:$16 sps:$4 sm:$0xff]   ;;  %v10196_v41 = vld [vmem:[%s11137_s23 + $0x1160] ss:$16 sps:$4 sm:$0xff]  }
 0x238   : > { %6961 = vmatpush1.bf16.msra.mxu0 %v10112_v22  ;;  %7617 = vmatpush1.bf16.msra.mxu1 %v10115_v42  ;;  %v10199_v22 = vld [vmem:[%s11137_s23 + $0x1168] ss:$16 sps:$4 sm:$0xff]   ;;  %v10204_v42 = vld [vmem:[%s11137_s23 + $0x1184] ss:$16 sps:$4 sm:$0xff]  }
 0x239   : > { %6962 = vmatprep.subr.bf16.mxu0 %v10120_v43  ;;  %7618 = vmatprep.subr.bf16.mxu1 %v10123_v45  ;;  %v10207_v43 = vld [vmem:[%s11137_s23 + $0x118c] ss:$16 sps:$4 sm:$0xff]   ;;  %v10202_v45 = vld [vmem:[%s11137_s23 + $0x1180] ss:$16 sps:$4 sm:$0xff]  }
 0x23c   : > { %6963 = vmatpush1.bf16.msra.mxu0 %v10118_v46  ;;  %7619 = vmatpush1.bf16.msra.mxu1 %v10121_v47  ;;  %v10205_v46 = vld [vmem:[%s11137_s23 + $0x1188] ss:$16 sps:$4 sm:$0xff]   ;;  %v10210_v47 = vld [vmem:[%s11137_s23 + $0x11a4] ss:$16 sps:$4 sm:$0xff]  }
 0x23d   : > { %6964 = vmatprep.subr.bf16.mxu0 %v10126_v48  ;;  %7620 = vmatprep.subr.bf16.mxu1 %v10129_v51  ;;  %v10213_v48 = vld [vmem:[%s11137_s23 + $0x11ac] ss:$16 sps:$4 sm:$0xff]   ;;  %v10208_v51 = vld [vmem:[%s11137_s23 + $0x11a0] ss:$16 sps:$4 sm:$0xff]  }
 0x240   : > { %6965 = vmatpush1.bf16.msra.mxu0 %v10124_v54  ;;  %7621 = vmatpush1.bf16.msra.mxu1 %v10127_v55  ;;  %v10211_v54 = vld [vmem:[%s11137_s23 + $0x11a8] ss:$16 sps:$4 sm:$0xff]   ;;  %v10216_v55 = vld [vmem:[%s11137_s23 + $0x11c4] ss:$16 sps:$4 sm:$0xff]  }
 0x241   : > { %6975 = vmatprep.subr.bf16.mxu0 %v10132_v56  ;;  %7631 = vmatprep.subr.bf16.mxu1 %v10135_v39  ;;  %v10219_v56 = vld [vmem:[%s11137_s23 + $0x11cc] ss:$16 sps:$4 sm:$0xff]   ;;  %v10214_v39 = vld [vmem:[%s11137_s23 + $0x11c0] ss:$16 sps:$4 sm:$0xff]  }
 0x243   : > { %6967 = vmatmul.mubr.bf16.vlgmr.msra.gmra.mrb[0].mxu0 %v1394_v58  ;;  %7623 = vmatmul.mubr.bf16.vlgmr.msra.gmra.mrb[0].mxu1 %v1394_v58  ;;  %v10222_v58 = vld [vmem:[%s11137_s23 + $0x11e4] ss:$16 sps:$4 sm:$0xff]  }
 0x244   : > { %6976 = vmatpush1.bf16.msra.mxu0 %v10130_v59  ;;  %7632 = vmatpush1.bf16.msra.mxu1 %v10133_v49  ;;  %v10225_v59 = vld [vmem:[%s11137_s23 + $0x11ec] ss:$16 sps:$4 sm:$0xff]   ;;  %v10220_v49 = vld [vmem:[%s11137_s23 + $0x11e0] ss:$16 sps:$4 sm:$0xff]  }
 0x245   : > { %6977 = vmatprep.subr.bf16.mxu0 %v10138_v60  ;;  %7633 = vmatprep.subr.bf16.mxu1 %v10141_v61  ;;  %v10223_v60 = vld [vmem:[%s11137_s23 + $0x11e8] ss:$16 sps:$4 sm:$0xff]   ;;  %v10228_v61 = vld [vmem:[%s11137_s23 + $0x1204] ss:$16 sps:$4 sm:$0xff]  }
 0x246   : > { %7007 = vmatprep.mubr.bf16.mxu0 %v11761_v62  ;;  %7663 = vmatprep.mubr.bf16.mxu1 %v11761_v62 }
 0x248   : > { %6978 = vmatpush1.bf16.msra.mxu0 %v10136_v14  ;;  %7634 = vmatpush1.bf16.msra.mxu1 %v10139_v63  ;;  %v10231_v14 = vld [vmem:[%s11137_s23 + $0x120c] ss:$16 sps:$4 sm:$0xff]   ;;  %v11827_v63 = vrot.slane %v11746_v52, %v11199_v50  ;;  %v10232_v52 = vld [vmem:[%s11137_s23 + $0x1220] ss:$16 sps:$4 sm:$0xff]  }
 0x249   : > { %6979 = vmatprep.subr.bf16.mxu0 %v10144_v0  ;;  %7635 = vmatprep.subr.bf16.mxu1 %v10147_v1  ;;  %v10226_v0 = vld [vmem:[%s11137_s23 + $0x1200] ss:$16 sps:$4 sm:$0xff]   ;;  %v10229_v1 = vld [vmem:[%s11137_s23 + $0x1208] ss:$16 sps:$4 sm:$0xff]  }
 0x24c   : > { %6980 = vmatpush1.bf16.msra.mxu0 %v10142_v2  ;;  %7636 = vmatpush1.bf16.msra.mxu1 %v10145_v3  ;;  %v10234_v2 = vld [vmem:[%s11137_s23 + $0x1224] ss:$16 sps:$4 sm:$0xff]   ;;  %v10237_v3 = vld [vmem:[%s11137_s23 + $0x122c] ss:$16 sps:$4 sm:$0xff]  }
 0x24d   : > { %6981 = vmatprep.subr.bf16.mxu0 %v10150_v4  ;;  %7637 = vmatprep.subr.bf16.mxu1 %v10153_v5  ;;  %v1444_v4 = vcombine.high %v11761_v62, %v11761_v62  ;;  %v10235_v5 = vld [vmem:[%s11137_s23 + $0x1228] ss:$16 sps:$4 sm:$0xff]   ;;  %v10238_v62 = vld [vmem:[%s11137_s23 + $0x1240] ss:$16 sps:$4 sm:$0xff]  }
 0x250   : > { %6982 = vmatpush1.bf16.msra.mxu0 %v10148_v6  ;;  %7638 = vmatpush1.bf16.msra.mxu1 %v10151_v7  ;;  %v10240_v6 = vld [vmem:[%s11137_s23 + $0x1244] ss:$16 sps:$4 sm:$0xff]   ;;  %v10243_v7 = vld [vmem:[%s11137_s23 + $0x124c] ss:$16 sps:$4 sm:$0xff]  }
 0x251   : > { %6983 = vmatprep.subr.bf16.mxu0 %v10156_v8  ;;  %7639 = vmatprep.subr.bf16.mxu1 %v10159_v9  ;;  %v10241_v8 = vld [vmem:[%s11137_s23 + $0x1248] ss:$16 sps:$4 sm:$0xff]   ;;  %v10246_v9 = vld [vmem:[%s11137_s23 + $0x1264] ss:$16 sps:$4 sm:$0xff]  }
 0x254   : > { %6984 = vmatpush1.bf16.msra.mxu0 %v10154_v10  ;;  %7640 = vmatpush1.bf16.msra.mxu1 %v10157_v11  ;;  %v10249_v10 = vld [vmem:[%s11137_s23 + $0x126c] ss:$16 sps:$4 sm:$0xff]   ;;  %v10244_v11 = vld [vmem:[%s11137_s23 + $0x1260] ss:$16 sps:$4 sm:$0xff]  }
 0x255   : > { %6985 = vmatprep.subr.bf16.mxu0 %v10162_v12  ;;  %7641 = vmatprep.subr.bf16.mxu1 %v10165_v13  ;;  %v10247_v12 = vld [vmem:[%s11137_s23 + $0x1268] ss:$16 sps:$4 sm:$0xff]   ;;  %v10252_v13 = vld [vmem:[%s11137_s23 + $0x1284] ss:$16 sps:$4 sm:$0xff]  }
 0x258   : > { %6986 = vmatpush1.bf16.msra.mxu0 %v10160_v15  ;;  %7642 = vmatpush1.bf16.msra.mxu1 %v10163_v17  ;;  %v10255_v15 = vld [vmem:[%s11137_s23 + $0x128c] ss:$16 sps:$4 sm:$0xff]   ;;  %v10250_v17 = vld [vmem:[%s11137_s23 + $0x1280] ss:$16 sps:$4 sm:$0xff]  }
 0x259   : > { %6987 = vmatprep.subr.bf16.mxu0 %v10168_v53  ;;  %7643 = vmatprep.subr.bf16.mxu1 %v10171_v18  ;;  %v10253_v53 = vld [vmem:[%s11137_s23 + $0x1288] ss:$16 sps:$4 sm:$0xff]   ;;  %v10258_v18 = vld [vmem:[%s11137_s23 + $0x12a4] ss:$16 sps:$4 sm:$0xff]  }
 0x25c   : > { %6988 = vmatpush1.bf16.msra.mxu0 %v10166_v19  ;;  %7644 = vmatpush1.bf16.msra.mxu1 %v10169_v20  ;;  %v10261_v19 = vld [vmem:[%s11137_s23 + $0x12ac] ss:$16 sps:$4 sm:$0xff]   ;;  %v10256_v20 = vld [vmem:[%s11137_s23 + $0x12a0] ss:$16 sps:$4 sm:$0xff]  }
 0x25d   : > { %6989 = vmatprep.subr.bf16.mxu0 %v10174_v21  ;;  %7645 = vmatprep.subr.bf16.mxu1 %v10177_v23  ;;  %v10259_v21 = vld [vmem:[%s11137_s23 + $0x12a8] ss:$16 sps:$4 sm:$0xff]   ;;  %v10264_v23 = vld [vmem:[%s11137_s23 + $0x12c4] ss:$16 sps:$4 sm:$0xff]  }
 0x260   : > { %6990 = vmatpush1.bf16.msra.mxu0 %v10172_v24  ;;  %7646 = vmatpush1.bf16.msra.mxu1 %v10175_v25  ;;  %v10267_v24 = vld [vmem:[%s11137_s23 + $0x12cc] ss:$16 sps:$4 sm:$0xff]   ;;  %v10262_v25 = vld [vmem:[%s11137_s23 + $0x12c0] ss:$16 sps:$4 sm:$0xff]  }
 0x261   : > { %6991 = vmatprep.subr.bf16.mxu0 %v10180_v27  ;;  %7647 = vmatprep.subr.bf16.mxu1 %v10183_v28  ;;  %v10265_v27 = vld [vmem:[%s11137_s23 + $0x12c8] ss:$16 sps:$4 sm:$0xff]   ;;  %v10270_v28 = vld [vmem:[%s11137_s23 + $0x12e4] ss:$16 sps:$4 sm:$0xff]  }
 0x264   : > { %6992 = vmatpush1.bf16.msra.mxu0 %v10178_v29  ;;  %7648 = vmatpush1.bf16.msra.mxu1 %v10181_v30  ;;  %v10273_v29 = vld [vmem:[%s11137_s23 + $0x12ec] ss:$16 sps:$4 sm:$0xff]   ;;  %v10268_v30 = vld [vmem:[%s11137_s23 + $0x12e0] ss:$16 sps:$4 sm:$0xff]  }
 0x265   : > { %6993 = vmatprep.subr.bf16.mxu0 %v10186_v31  ;;  %7649 = vmatprep.subr.bf16.mxu1 %v10189_v16  ;;  %v10271_v31 = vld [vmem:[%s11137_s23 + $0x12e8] ss:$16 sps:$4 sm:$0xff]   ;;  %v10276_v16 = vld [vmem:[%s11137_s23 + $0x1304] ss:$16 sps:$4 sm:$0xff]  }
 0x268   : > { %6994 = vmatpush1.bf16.msra.mxu0 %v10184_v32  ;;  %7650 = vmatpush1.bf16.msra.mxu1 %v10187_v33  ;;  %v10279_v32 = vld [vmem:[%s11137_s23 + $0x130c] ss:$16 sps:$4 sm:$0xff]   ;;  %v10274_v33 = vld [vmem:[%s11137_s23 + $0x1300] ss:$16 sps:$4 sm:$0xff]  }
 0x269   : > { %6995 = vmatprep.subr.bf16.mxu0 %v10192_v34  ;;  %7651 = vmatprep.subr.bf16.mxu1 %v10195_v26  ;;  %v10277_v34 = vld [vmem:[%s11137_s23 + $0x1308] ss:$16 sps:$4 sm:$0xff]   ;;  %v10282_v26 = vld [vmem:[%s11137_s23 + $0x1324] ss:$16 sps:$4 sm:$0xff]  }
 0x26c   : > { %6996 = vmatpush1.bf16.msra.mxu0 %v10190_v35  ;;  %7652 = vmatpush1.bf16.msra.mxu1 %v10193_v37  ;;  %v10285_v35 = vld [vmem:[%s11137_s23 + $0x132c] ss:$16 sps:$4 sm:$0xff]   ;;  %v10280_v37 = vld [vmem:[%s11137_s23 + $0x1320] ss:$16 sps:$4 sm:$0xff]  }
 0x26d   : > { %6997 = vmatprep.subr.bf16.mxu0 %v10198_v38  ;;  %7653 = vmatprep.subr.bf16.mxu1 %v10201_v40  ;;  %v10283_v38 = vld [vmem:[%s11137_s23 + $0x1328] ss:$16 sps:$4 sm:$0xff]   ;;  %v10288_v40 = vld [vmem:[%s11137_s23 + $0x1344] ss:$16 sps:$4 sm:$0xff]  }
 0x270   : > { %6998 = vmatpush1.bf16.msra.mxu0 %v10196_v41  ;;  %7654 = vmatpush1.bf16.msra.mxu1 %v10199_v22  ;;  %v10291_v41 = vld [vmem:[%s11137_s23 + $0x134c] ss:$16 sps:$4 sm:$0xff]   ;;  %v10286_v22 = vld [vmem:[%s11137_s23 + $0x1340] ss:$16 sps:$4 sm:$0xff]  }
 0x271   : > { %6999 = vmatprep.subr.bf16.mxu0 %v10204_v42  ;;  %7655 = vmatprep.subr.bf16.mxu1 %v10207_v43  ;;  %v10289_v42 = vld [vmem:[%s11137_s23 + $0x1348] ss:$16 sps:$4 sm:$0xff]   ;;  %v10294_v43 = vld [vmem:[%s11137_s23 + $0x1364] ss:$16 sps:$4 sm:$0xff]  }
 0x274   : > { %7000 = vmatpush1.bf16.msra.mxu0 %v10202_v45  ;;  %7656 = vmatpush1.bf16.msra.mxu1 %v10205_v46  ;;  %v10297_v45 = vld [vmem:[%s11137_s23 + $0x136c] ss:$16 sps:$4 sm:$0xff]   ;;  %v10292_v46 = vld [vmem:[%s11137_s23 + $0x1360] ss:$16 sps:$4 sm:$0xff]  }
 0x275   : > { %7001 = vmatprep.subr.bf16.mxu0 %v10210_v47  ;;  %7657 = vmatprep.subr.bf16.mxu1 %v10213_v48  ;;  %v10295_v47 = vld [vmem:[%s11137_s23 + $0x1368] ss:$16 sps:$4 sm:$0xff]   ;;  %v10300_v48 = vld [vmem:[%s11137_s23 + $0x1384] ss:$16 sps:$4 sm:$0xff]  }
 0x278   : > { %7002 = vmatpush1.bf16.msra.mxu0 %v10208_v51  ;;  %7658 = vmatpush1.bf16.msra.mxu1 %v10211_v54  ;;  %v10303_v51 = vld [vmem:[%s11137_s23 + $0x138c] ss:$16 sps:$4 sm:$0xff]   ;;  %v10298_v54 = vld [vmem:[%s11137_s23 + $0x1380] ss:$16 sps:$4 sm:$0xff]  }
 0x279   : > { %7003 = vmatprep.subr.bf16.mxu0 %v10216_v55  ;;  %7659 = vmatprep.subr.bf16.mxu1 %v10219_v56  ;;  %v10301_v55 = vld [vmem:[%s11137_s23 + $0x1388] ss:$16 sps:$4 sm:$0xff]   ;;  %v10306_v56 = vld [vmem:[%s11137_s23 + $0x13a4] ss:$16 sps:$4 sm:$0xff]  }
 0x27c   : > { %7004 = vmatpush1.bf16.msra.mxu0 %v10214_v39  ;;  %7660 = vmatpush1.bf16.msra.mxu1 %v10217_v57  ;;  %v10309_v39 = vld [vmem:[%s11137_s23 + $0x13ac] ss:$16 sps:$4 sm:$0xff]   ;;  %v10304_v57 = vld [vmem:[%s11137_s23 + $0x13a0] ss:$16 sps:$4 sm:$0xff]  }
 0x27d   : > { %7005 = vmatprep.subr.bf16.mxu0 %v10222_v58  ;;  %7661 = vmatprep.subr.bf16.mxu1 %v10225_v59  ;;  %v10307_v58 = vld [vmem:[%s11137_s23 + $0x13a8] ss:$16 sps:$4 sm:$0xff]   ;;  %v10312_v59 = vld [vmem:[%s11137_s23 + $0x13c4] ss:$16 sps:$4 sm:$0xff]  }
 0x280   : > { %7006 = vmatpush1.bf16.msra.mxu0 %v10220_v49  ;;  %7662 = vmatpush1.bf16.msra.mxu1 %v10223_v60  ;;  %v10315_v49 = vld [vmem:[%s11137_s23 + $0x13cc] ss:$16 sps:$4 sm:$0xff]   ;;  %v1397_v60 = vcombine.high %v11738_v36, %v11738_v36  ;;  %v10316_v36 = vld [vmem:[%s11137_s23 + $0x13e0] ss:$16 sps:$4 sm:$0xff]  }
 0x281   : > { %7016 = vmatprep.subr.bf16.mxu0 %v10228_v61  ;;  %7672 = vmatprep.subr.bf16.mxu1 %v10231_v14  ;;  %v10310_v61 = vld [vmem:[%s11137_s23 + $0x13c0] ss:$16 sps:$4 sm:$0xff]   ;;  %v10313_v14 = vld [vmem:[%s11137_s23 + $0x13c8] ss:$16 sps:$4 sm:$0xff]  }
 0x283   : > { %7008 = vmatmul.mubr.bf16.vlgmr.msra.gmra.mrb[0].mxu0 %v11827_v63  ;;  %7664 = vmatmul.mubr.bf16.vlgmr.msra.gmra.mrb[0].mxu1 %v11827_v63 }
 0x284   : > { %7017 = vmatpush1.bf16.msra.mxu0 %v10226_v0  ;;  %7673 = vmatpush1.bf16.msra.mxu1 %v10229_v1  ;;  %v10318_v0 = vld [vmem:[%s11137_s23 + $0x13e4] ss:$16 sps:$4 sm:$0xff]   ;;  %v10321_v1 = vld [vmem:[%s11137_s23 + $0x13ec] ss:$16 sps:$4 sm:$0xff]  }
 0x285   : > { %7018 = vmatprep.subr.bf16.mxu0 %v10234_v2  ;;  %7674 = vmatprep.subr.bf16.mxu1 %v10237_v3  ;;  %v11896_v2 = vrot.slane %v1397_v60, %v11199_v50  ;;  %v10319_v3 = vld [vmem:[%s11137_s23 + $0x13e8] ss:$16 sps:$4 sm:$0xff]  }
 0x286   : > { %7048 = vmatprep.mubr.bf16.mxu0 %v1444_v4  ;;  %7704 = vmatprep.mubr.bf16.mxu1 %v1444_v4  ;;  %v10324_v4 = vld [vmem:[%s11137_s23 + $0x1404] ss:$16 sps:$4 sm:$0xff]   ;;  %v10397_v60 = vld [vmem:[%s11137_s23 + $0x1588] ss:$16 sps:$4 sm:$0xff]  }
 0x288   : > { %7019 = vmatpush1.bf16.msra.mxu0 %v10232_v52  ;;  %7675 = vmatpush1.bf16.msra.mxu1 %v10235_v5  ;;  %v10327_v52 = vld [vmem:[%s11137_s23 + $0x140c] ss:$16 sps:$4 sm:$0xff]   ;;  %v1413_v5 = vcombine.high %v11896_v2, %v11896_v2 }
 0x289   : > { %7020 = vmatprep.subr.bf16.mxu0 %v10240_v6  ;;  %7676 = vmatprep.subr.bf16.mxu1 %v10243_v7  ;;  %v1442_v6 = vcombine.high %v11827_v63, %v11827_v63  ;;  %v10322_v7 = vld [vmem:[%s11137_s23 + $0x1400] ss:$16 sps:$4 sm:$0xff]  }
 0x28a   : > { %v10328_v63 = vld [vmem:[%s11137_s23 + $0x1420] ss:$16 sps:$4 sm:$0xff]  }
 0x28c   : > { %7021 = vmatpush1.bf16.msra.mxu0 %v10238_v62  ;;  %7677 = vmatpush1.bf16.msra.mxu1 %v10241_v8  ;;  %v10325_v62 = vld [vmem:[%s11137_s23 + $0x1408] ss:$16 sps:$4 sm:$0xff]   ;;  %v10330_v8 = vld [vmem:[%s11137_s23 + $0x1424] ss:$16 sps:$4 sm:$0xff]  }
 0x28d   : > { %7022 = vmatprep.subr.bf16.mxu0 %v10246_v9  ;;  %7678 = vmatprep.subr.bf16.mxu1 %v10249_v10  ;;  %v10333_v9 = vld [vmem:[%s11137_s23 + $0x142c] ss:$16 sps:$4 sm:$0xff]   ;;  %v11911_v10 = vrot.slane %v1413_v5, %v11199_v50  ;;  %v10414_v5 = vld [vmem:[%s11137_s23 + $0x15e4] ss:$16 sps:$4 sm:$0xff]  }
 0x290   : > { %7023 = vmatpush1.bf16.msra.mxu0 %v10244_v11  ;;  %7679 = vmatpush1.bf16.msra.mxu1 %v10247_v12  ;;  %v10331_v11 = vld [vmem:[%s11137_s23 + $0x1428] ss:$16 sps:$4 sm:$0xff]   ;;  %v10336_v12 = vld [vmem:[%s11137_s23 + $0x1444] ss:$16 sps:$4 sm:$0xff]  }
 0x291   : > { %7024 = vmatprep.subr.bf16.mxu0 %v10252_v13  ;;  %7680 = vmatprep.subr.bf16.mxu1 %v10255_v15  ;;  %v10339_v13 = vld [vmem:[%s11137_s23 + $0x144c] ss:$16 sps:$4 sm:$0xff]   ;;  %v10334_v15 = vld [vmem:[%s11137_s23 + $0x1440] ss:$16 sps:$4 sm:$0xff]  }
 0x294   : > { %7025 = vmatpush1.bf16.msra.mxu0 %v10250_v17  ;;  %7681 = vmatpush1.bf16.msra.mxu1 %v10253_v53  ;;  %v10337_v17 = vld [vmem:[%s11137_s23 + $0x1448] ss:$16 sps:$4 sm:$0xff]   ;;  %v10342_v53 = vld [vmem:[%s11137_s23 + $0x1464] ss:$16 sps:$4 sm:$0xff]  }
 0x295   : > { %7026 = vmatprep.subr.bf16.mxu0 %v10258_v18  ;;  %7682 = vmatprep.subr.bf16.mxu1 %v10261_v19  ;;  %v10345_v18 = vld [vmem:[%s11137_s23 + $0x146c] ss:$16 sps:$4 sm:$0xff]   ;;  %v10340_v19 = vld [vmem:[%s11137_s23 + $0x1460] ss:$16 sps:$4 sm:$0xff]  }
 0x298   : > { %7027 = vmatpush1.bf16.msra.mxu0 %v10256_v20  ;;  %7683 = vmatpush1.bf16.msra.mxu1 %v10259_v21  ;;  %v10343_v20 = vld [vmem:[%s11137_s23 + $0x1468] ss:$16 sps:$4 sm:$0xff]   ;;  %v10348_v21 = vld [vmem:[%s11137_s23 + $0x1484] ss:$16 sps:$4 sm:$0xff]  }
 0x299   : > { %7028 = vmatprep.subr.bf16.mxu0 %v10264_v23  ;;  %7684 = vmatprep.subr.bf16.mxu1 %v10267_v24  ;;  %v10351_v23 = vld [vmem:[%s11137_s23 + $0x148c] ss:$16 sps:$4 sm:$0xff]   ;;  %v10346_v24 = vld [vmem:[%s11137_s23 + $0x1480] ss:$16 sps:$4 sm:$0xff]  }
 0x29c   : > { %7029 = vmatpush1.bf16.msra.mxu0 %v10262_v25  ;;  %7685 = vmatpush1.bf16.msra.mxu1 %v10265_v27  ;;  %v10349_v25 = vld [vmem:[%s11137_s23 + $0x1488] ss:$16 sps:$4 sm:$0xff]   ;;  %v10354_v27 = vld [vmem:[%s11137_s23 + $0x14a4] ss:$16 sps:$4 sm:$0xff]  }
 0x29d   : > { %7030 = vmatprep.subr.bf16.mxu0 %v10270_v28  ;;  %7686 = vmatprep.subr.bf16.mxu1 %v10273_v29  ;;  %v10357_v28 = vld [vmem:[%s11137_s23 + $0x14ac] ss:$16 sps:$4 sm:$0xff]   ;;  %v10352_v29 = vld [vmem:[%s11137_s23 + $0x14a0] ss:$16 sps:$4 sm:$0xff]  }
 0x2a0   : > { %7031 = vmatpush1.bf16.msra.mxu0 %v10268_v30  ;;  %7687 = vmatpush1.bf16.msra.mxu1 %v10271_v31  ;;  %v10355_v30 = vld [vmem:[%s11137_s23 + $0x14a8] ss:$16 sps:$4 sm:$0xff]   ;;  %v10360_v31 = vld [vmem:[%s11137_s23 + $0x14c4] ss:$16 sps:$4 sm:$0xff]  }
 0x2a1   : > { %7032 = vmatprep.subr.bf16.mxu0 %v10276_v16  ;;  %7688 = vmatprep.subr.bf16.mxu1 %v10279_v32  ;;  %v10363_v16 = vld [vmem:[%s11137_s23 + $0x14cc] ss:$16 sps:$4 sm:$0xff]   ;;  %v10358_v32 = vld [vmem:[%s11137_s23 + $0x14c0] ss:$16 sps:$4 sm:$0xff]  }
 0x2a4   : > { %7033 = vmatpush1.bf16.msra.mxu0 %v10274_v33  ;;  %7689 = vmatpush1.bf16.msra.mxu1 %v10277_v34  ;;  %v10361_v33 = vld [vmem:[%s11137_s23 + $0x14c8] ss:$16 sps:$4 sm:$0xff]   ;;  %v10366_v34 = vld [vmem:[%s11137_s23 + $0x14e4] ss:$16 sps:$4 sm:$0xff]  }
 0x2a5   : > { %7034 = vmatprep.subr.bf16.mxu0 %v10282_v26  ;;  %7690 = vmatprep.subr.bf16.mxu1 %v10285_v35  ;;  %v10369_v26 = vld [vmem:[%s11137_s23 + $0x14ec] ss:$16 sps:$4 sm:$0xff]   ;;  %v10364_v35 = vld [vmem:[%s11137_s23 + $0x14e0] ss:$16 sps:$4 sm:$0xff]  }
 0x2a8   : > { %7035 = vmatpush1.bf16.msra.mxu0 %v10280_v37  ;;  %7691 = vmatpush1.bf16.msra.mxu1 %v10283_v38  ;;  %v10367_v37 = vld [vmem:[%s11137_s23 + $0x14e8] ss:$16 sps:$4 sm:$0xff]   ;;  %v10372_v38 = vld [vmem:[%s11137_s23 + $0x1504] ss:$16 sps:$4 sm:$0xff]  }
 0x2a9   : > { %7036 = vmatprep.subr.bf16.mxu0 %v10288_v40  ;;  %7692 = vmatprep.subr.bf16.mxu1 %v10291_v41  ;;  %v10375_v40 = vld [vmem:[%s11137_s23 + $0x150c] ss:$16 sps:$4 sm:$0xff]   ;;  %v10370_v41 = vld [vmem:[%s11137_s23 + $0x1500] ss:$16 sps:$4 sm:$0xff]  }
 0x2ac   : > { %7037 = vmatpush1.bf16.msra.mxu0 %v10286_v22  ;;  %7693 = vmatpush1.bf16.msra.mxu1 %v10289_v42  ;;  %v10373_v22 = vld [vmem:[%s11137_s23 + $0x1508] ss:$16 sps:$4 sm:$0xff]   ;;  %v10378_v42 = vld [vmem:[%s11137_s23 + $0x1524] ss:$16 sps:$4 sm:$0xff]  }
 0x2ad   : > { %7038 = vmatprep.subr.bf16.mxu0 %v10294_v43  ;;  %7694 = vmatprep.subr.bf16.mxu1 %v10297_v45  ;;  %v10381_v43 = vld [vmem:[%s11137_s23 + $0x152c] ss:$16 sps:$4 sm:$0xff]   ;;  %v10376_v45 = vld [vmem:[%s11137_s23 + $0x1520] ss:$16 sps:$4 sm:$0xff]  }
 0x2b0   : > { %7039 = vmatpush1.bf16.msra.mxu0 %v10292_v46  ;;  %7695 = vmatpush1.bf16.msra.mxu1 %v10295_v47  ;;  %v10379_v46 = vld [vmem:[%s11137_s23 + $0x1528] ss:$16 sps:$4 sm:$0xff]   ;;  %v10384_v47 = vld [vmem:[%s11137_s23 + $0x1544] ss:$16 sps:$4 sm:$0xff]  }
 0x2b1   : > { %7040 = vmatprep.subr.bf16.mxu0 %v10300_v48  ;;  %7696 = vmatprep.subr.bf16.mxu1 %v10303_v51  ;;  %v10387_v48 = vld [vmem:[%s11137_s23 + $0x154c] ss:$16 sps:$4 sm:$0xff]   ;;  %v10382_v51 = vld [vmem:[%s11137_s23 + $0x1540] ss:$16 sps:$4 sm:$0xff]  }
 0x2b4   : > { %7041 = vmatpush1.bf16.msra.mxu0 %v10298_v54  ;;  %7697 = vmatpush1.bf16.msra.mxu1 %v10301_v55  ;;  %v10385_v54 = vld [vmem:[%s11137_s23 + $0x1548] ss:$16 sps:$4 sm:$0xff]   ;;  %v10390_v55 = vld [vmem:[%s11137_s23 + $0x1564] ss:$16 sps:$4 sm:$0xff]  }
 0x2b5   : > { %7042 = vmatprep.subr.bf16.mxu0 %v10306_v56  ;;  %7698 = vmatprep.subr.bf16.mxu1 %v10309_v39  ;;  %v10393_v56 = vld [vmem:[%s11137_s23 + $0x156c] ss:$16 sps:$4 sm:$0xff]   ;;  %v10388_v39 = vld [vmem:[%s11137_s23 + $0x1560] ss:$16 sps:$4 sm:$0xff]  }
 0x2b8   : > { %7043 = vmatpush1.bf16.msra.mxu0 %v10304_v57  ;;  %7699 = vmatpush1.bf16.msra.mxu1 %v10307_v58  ;;  %v10391_v57 = vld [vmem:[%s11137_s23 + $0x1568] ss:$16 sps:$4 sm:$0xff]   ;;  %v10396_v58 = vld [vmem:[%s11137_s23 + $0x1584] ss:$16 sps:$4 sm:$0xff]  }
 0x2b9   : > { %7044 = vmatprep.subr.bf16.mxu0 %v10312_v59  ;;  %7700 = vmatprep.subr.bf16.mxu1 %v10315_v49  ;;  %v10399_v59 = vld [vmem:[%s11137_s23 + $0x158c] ss:$16 sps:$4 sm:$0xff]   ;;  %v10394_v49 = vld [vmem:[%s11137_s23 + $0x1580] ss:$16 sps:$4 sm:$0xff]  }
 0x2bc   : > { %7045 = vmatpush1.bf16.msra.mxu0 %v10310_v61  ;;  %7701 = vmatpush1.bf16.msra.mxu1 %v10313_v14  ;;  %v10402_v61 = vld [vmem:[%s11137_s23 + $0x15a4] ss:$16 sps:$4 sm:$0xff]   ;;  %v10405_v14 = vld [vmem:[%s11137_s23 + $0x15ac] ss:$16 sps:$4 sm:$0xff]  }
 0x2bd   : > { %7046 = vmatprep.subr.bf16.mxu0 %v10318_v0  ;;  %7702 = vmatprep.subr.bf16.mxu1 %v10321_v1  ;;  %v10400_v0 = vld [vmem:[%s11137_s23 + $0x15a0] ss:$16 sps:$4 sm:$0xff]   ;;  %v10403_v1 = vld [vmem:[%s11137_s23 + $0x15a8] ss:$16 sps:$4 sm:$0xff]  }
 0x2c0   : > { %7047 = vmatpush1.bf16.msra.mxu0 %v10316_v36  ;;  %7703 = vmatpush1.bf16.msra.mxu1 %v10319_v3  ;;  %v10408_v36 = vld [vmem:[%s11137_s23 + $0x15c4] ss:$16 sps:$4 sm:$0xff]   ;;  %v10411_v3 = vld [vmem:[%s11137_s23 + $0x15cc] ss:$16 sps:$4 sm:$0xff]  }
 0x2c1   : > { %7057 = vmatprep.subr.bf16.mxu0 %v10324_v4  ;;  %7713 = vmatprep.subr.bf16.mxu1 %v10327_v52  ;;  %v10406_v4 = vld [vmem:[%s11137_s23 + $0x15c0] ss:$16 sps:$4 sm:$0xff]   ;;  %v10409_v52 = vld [vmem:[%s11137_s23 + $0x15c8] ss:$16 sps:$4 sm:$0xff]  }
 0x2c3   : > { %7049 = vmatmul.mubr.bf16.vlgmr.msra.gmra.mrb[0].mxu0 %v1442_v6  ;;  %7705 = vmatmul.mubr.bf16.vlgmr.msra.gmra.mrb[0].mxu1 %v1442_v6  ;;  %v10417_v6 = vld [vmem:[%s11137_s23 + $0x15ec] ss:$16 sps:$4 sm:$0xff]  }
 0x2c4   : > { %7058 = vmatpush1.bf16.msra.mxu0 %v10322_v7  ;;  %7714 = vmatpush1.bf16.msra.mxu1 %v10325_v62  ;;  %v10412_v7 = vld [vmem:[%s11137_s23 + $0x15e0] ss:$16 sps:$4 sm:$0xff]   ;;  %v10415_v62 = vld [vmem:[%s11137_s23 + $0x15e8] ss:$16 sps:$4 sm:$0xff]  }
 0x2c5   : > { %7059 = vmatprep.subr.bf16.mxu0 %v10330_v8  ;;  %7715 = vmatprep.subr.bf16.mxu1 %v10333_v9  ;;  %v10421_v8 = vld [vmem:[%s11137_s23 + $0x1604] ss:$16 sps:$4 sm:$0xff]   ;;  %v10424_v9 = vld [vmem:[%s11137_s23 + $0x160c] ss:$16 sps:$4 sm:$0xff]  }
 0x2c6   : > { %7089 = vmatprep.mubr.bf16.mxu0 %v11911_v10  ;;  %7745 = vmatprep.mubr.bf16.mxu1 %v11911_v10 }
 0x2c8   : > { %7060 = vmatpush1.bf16.msra.mxu0 %v10328_v63  ;;  %7716 = vmatpush1.bf16.msra.mxu1 %v10331_v11  ;;  %v11977_v63 = vrot.slane %v11896_v2, %v11199_v50  ;;  %v10419_v11 = vld [vmem:[%s11137_s23 + $0x1600] ss:$16 sps:$4 sm:$0xff]  }
 0x2c9   : > { %7061 = vmatprep.subr.bf16.mxu0 %v10336_v12  ;;  %7717 = vmatprep.subr.bf16.mxu1 %v10339_v13  ;;  %v10422_v12 = vld [vmem:[%s11137_s23 + $0x1608] ss:$16 sps:$4 sm:$0xff]   ;;  %v10427_v13 = vld [vmem:[%s11137_s23 + $0x1624] ss:$16 sps:$4 sm:$0xff]   ;;  %v10425_v2 = vld [vmem:[%s11137_s23 + $0x1620] ss:$16 sps:$4 sm:$0xff]  }
 0x2cc   : > { %7062 = vmatpush1.bf16.msra.mxu0 %v10334_v15  ;;  %7718 = vmatpush1.bf16.msra.mxu1 %v10337_v17  ;;  %v10430_v15 = vld [vmem:[%s11137_s23 + $0x162c] ss:$16 sps:$4 sm:$0xff]   ;;  %v1445_v17 = vcombine.high %v11911_v10, %v11911_v10  ;;  %v10431_v10 = vld [vmem:[%s11137_s23 + $0x1640] ss:$16 sps:$4 sm:$0xff]  }
 0x2cd   : > { %7063 = vmatprep.subr.bf16.mxu0 %v10342_v53  ;;  %7719 = vmatprep.subr.bf16.mxu1 %v10345_v18  ;;  %v10428_v53 = vld [vmem:[%s11137_s23 + $0x1628] ss:$16 sps:$4 sm:$0xff]   ;;  %v10433_v18 = vld [vmem:[%s11137_s23 + $0x1644] ss:$16 sps:$4 sm:$0xff]  }
 0x2d0   : > { %7064 = vmatpush1.bf16.msra.mxu0 %v10340_v19  ;;  %7720 = vmatpush1.bf16.msra.mxu1 %v10343_v20  ;;  %v10436_v19 = vld [vmem:[%s11137_s23 + $0x164c] ss:$16 sps:$4 sm:$0xff]   ;;  %v10434_v20 = vld [vmem:[%s11137_s23 + $0x1648] ss:$16 sps:$4 sm:$0xff]  }
 0x2d1   : > { %7065 = vmatprep.subr.bf16.mxu0 %v10348_v21  ;;  %7721 = vmatprep.subr.bf16.mxu1 %v10351_v23  ;;  %v10439_v21 = vld [vmem:[%s11137_s23 + $0x1664] ss:$16 sps:$4 sm:$0xff]   ;;  %v10442_v23 = vld [vmem:[%s11137_s23 + $0x166c] ss:$16 sps:$4 sm:$0xff]  }
 0x2d4   : > { %7066 = vmatpush1.bf16.msra.mxu0 %v10346_v24  ;;  %7722 = vmatpush1.bf16.msra.mxu1 %v10349_v25  ;;  %v10437_v24 = vld [vmem:[%s11137_s23 + $0x1660] ss:$16 sps:$4 sm:$0xff]   ;;  %v10440_v25 = vld [vmem:[%s11137_s23 + $0x1668] ss:$16 sps:$4 sm:$0xff]  }
 0x2d5   : > { %7067 = vmatprep.subr.bf16.mxu0 %v10354_v27  ;;  %7723 = vmatprep.subr.bf16.mxu1 %v10357_v28  ;;  %v10445_v27 = vld [vmem:[%s11137_s23 + $0x1684] ss:$16 sps:$4 sm:$0xff]   ;;  %v10448_v28 = vld [vmem:[%s11137_s23 + $0x168c] ss:$16 sps:$4 sm:$0xff]  }
 0x2d8   : > { %7068 = vmatpush1.bf16.msra.mxu0 %v10352_v29  ;;  %7724 = vmatpush1.bf16.msra.mxu1 %v10355_v30  ;;  %v10443_v29 = vld [vmem:[%s11137_s23 + $0x1680] ss:$16 sps:$4 sm:$0xff]   ;;  %v10446_v30 = vld [vmem:[%s11137_s23 + $0x1688] ss:$16 sps:$4 sm:$0xff]  }
 0x2d9   : > { %7069 = vmatprep.subr.bf16.mxu0 %v10360_v31  ;;  %7725 = vmatprep.subr.bf16.mxu1 %v10363_v16  ;;  %v10451_v31 = vld [vmem:[%s11137_s23 + $0x16a4] ss:$16 sps:$4 sm:$0xff]   ;;  %v10454_v16 = vld [vmem:[%s11137_s23 + $0x16ac] ss:$16 sps:$4 sm:$0xff]  }
 0x2dc   : > { %7070 = vmatpush1.bf16.msra.mxu0 %v10358_v32  ;;  %7726 = vmatpush1.bf16.msra.mxu1 %v10361_v33  ;;  %v10449_v32 = vld [vmem:[%s11137_s23 + $0x16a0] ss:$16 sps:$4 sm:$0xff]   ;;  %v10452_v33 = vld [vmem:[%s11137_s23 + $0x16a8] ss:$16 sps:$4 sm:$0xff]  }
 0x2dd   : > { %7071 = vmatprep.subr.bf16.mxu0 %v10366_v34  ;;  %7727 = vmatprep.subr.bf16.mxu1 %v10369_v26  ;;  %v10457_v34 = vld [vmem:[%s11137_s23 + $0x16c4] ss:$16 sps:$4 sm:$0xff]   ;;  %v10460_v26 = vld [vmem:[%s11137_s23 + $0x16cc] ss:$16 sps:$4 sm:$0xff]  }
 0x2e0   : > { %7072 = vmatpush1.bf16.msra.mxu0 %v10364_v35  ;;  %7728 = vmatpush1.bf16.msra.mxu1 %v10367_v37  ;;  %v10455_v35 = vld [vmem:[%s11137_s23 + $0x16c0] ss:$16 sps:$4 sm:$0xff]   ;;  %v10458_v37 = vld [vmem:[%s11137_s23 + $0x16c8] ss:$16 sps:$4 sm:$0xff]  }
 0x2e1   : > { %7073 = vmatprep.subr.bf16.mxu0 %v10372_v38  ;;  %7729 = vmatprep.subr.bf16.mxu1 %v10375_v40  ;;  %v10463_v38 = vld [vmem:[%s11137_s23 + $0x16e4] ss:$16 sps:$4 sm:$0xff]   ;;  %v10466_v40 = vld [vmem:[%s11137_s23 + $0x16ec] ss:$16 sps:$4 sm:$0xff]  }
 0x2e4   : > { %7074 = vmatpush1.bf16.msra.mxu0 %v10370_v41  ;;  %7730 = vmatpush1.bf16.msra.mxu1 %v10373_v22  ;;  %v10461_v41 = vld [vmem:[%s11137_s23 + $0x16e0] ss:$16 sps:$4 sm:$0xff]   ;;  %v10464_v22 = vld [vmem:[%s11137_s23 + $0x16e8] ss:$16 sps:$4 sm:$0xff]  }
 0x2e5   : > { %7075 = vmatprep.subr.bf16.mxu0 %v10378_v42  ;;  %7731 = vmatprep.subr.bf16.mxu1 %v10381_v43  ;;  %v10469_v42 = vld [vmem:[%s11137_s23 + $0x1704] ss:$16 sps:$4 sm:$0xff]   ;;  %v10472_v43 = vld [vmem:[%s11137_s23 + $0x170c] ss:$16 sps:$4 sm:$0xff]  }
 0x2e8   : > { %7076 = vmatpush1.bf16.msra.mxu0 %v10376_v45  ;;  %7732 = vmatpush1.bf16.msra.mxu1 %v10379_v46  ;;  %v10467_v45 = vld [vmem:[%s11137_s23 + $0x1700] ss:$16 sps:$4 sm:$0xff]   ;;  %v10470_v46 = vld [vmem:[%s11137_s23 + $0x1708] ss:$16 sps:$4 sm:$0xff]  }
 0x2e9   : > { %7077 = vmatprep.subr.bf16.mxu0 %v10384_v47  ;;  %7733 = vmatprep.subr.bf16.mxu1 %v10387_v48  ;;  %v10475_v47 = vld [vmem:[%s11137_s23 + $0x1724] ss:$16 sps:$4 sm:$0xff]   ;;  %v10478_v48 = vld [vmem:[%s11137_s23 + $0x172c] ss:$16 sps:$4 sm:$0xff]  }
 0x2ec   : > { %7078 = vmatpush1.bf16.msra.mxu0 %v10382_v51  ;;  %7734 = vmatpush1.bf16.msra.mxu1 %v10385_v54  ;;  %v10473_v51 = vld [vmem:[%s11137_s23 + $0x1720] ss:$16 sps:$4 sm:$0xff]   ;;  %v10476_v54 = vld [vmem:[%s11137_s23 + $0x1728] ss:$16 sps:$4 sm:$0xff]  }
 0x2ed   : > { %7079 = vmatprep.subr.bf16.mxu0 %v10390_v55  ;;  %7735 = vmatprep.subr.bf16.mxu1 %v10393_v56  ;;  %v10481_v55 = vld [vmem:[%s11137_s23 + $0x1744] ss:$16 sps:$4 sm:$0xff]   ;;  %v10484_v56 = vld [vmem:[%s11137_s23 + $0x174c] ss:$16 sps:$4 sm:$0xff]  }
 0x2f0   : > { %7080 = vmatpush1.bf16.msra.mxu0 %v10388_v39  ;;  %7736 = vmatpush1.bf16.msra.mxu1 %v10391_v57  ;;  %v10479_v39 = vld [vmem:[%s11137_s23 + $0x1740] ss:$16 sps:$4 sm:$0xff]   ;;  %v10482_v57 = vld [vmem:[%s11137_s23 + $0x1748] ss:$16 sps:$4 sm:$0xff]  }
 0x2f1   : > { %7081 = vmatprep.subr.bf16.mxu0 %v10396_v58  ;;  %7737 = vmatprep.subr.bf16.mxu1 %v10399_v59  ;;  %v10487_v58 = vld [vmem:[%s11137_s23 + $0x1764] ss:$16 sps:$4 sm:$0xff]   ;;  %v10490_v59 = vld [vmem:[%s11137_s23 + $0x176c] ss:$16 sps:$4 sm:$0xff]  }
 0x2f4   : > { %7082 = vmatpush1.bf16.msra.mxu0 %v10394_v49  ;;  %7738 = vmatpush1.bf16.msra.mxu1 %v10397_v60  ;;  %v10485_v49 = vld [vmem:[%s11137_s23 + $0x1760] ss:$16 sps:$4 sm:$0xff]   ;;  %v10488_v60 = vld [vmem:[%s11137_s23 + $0x1768] ss:$16 sps:$4 sm:$0xff]  }
 0x2f5   : > { %7083 = vmatprep.subr.bf16.mxu0 %v10402_v61  ;;  %7739 = vmatprep.subr.bf16.mxu1 %v10405_v14  ;;  %v10493_v61 = vld [vmem:[%s11137_s23 + $0x1784] ss:$16 sps:$4 sm:$0xff]   ;;  %v10496_v14 = vld [vmem:[%s11137_s23 + $0x178c] ss:$16 sps:$4 sm:$0xff]  }
 0x2f8   : > { %7084 = vmatpush1.bf16.msra.mxu0 %v10400_v0  ;;  %7740 = vmatpush1.bf16.msra.mxu1 %v10403_v1  ;;  %v10491_v0 = vld [vmem:[%s11137_s23 + $0x1780] ss:$16 sps:$4 sm:$0xff]   ;;  %v10494_v1 = vld [vmem:[%s11137_s23 + $0x1788] ss:$16 sps:$4 sm:$0xff]  }
 0x2f9   : > { %7085 = vmatprep.subr.bf16.mxu0 %v10408_v36  ;;  %7741 = vmatprep.subr.bf16.mxu1 %v10411_v3  ;;  %v10499_v36 = vld [vmem:[%s11137_s23 + $0x17a4] ss:$16 sps:$4 sm:$0xff]   ;;  %v10502_v3 = vld [vmem:[%s11137_s23 + $0x17ac] ss:$16 sps:$4 sm:$0xff]  }
 0x2fc   : > { %7086 = vmatpush1.bf16.msra.mxu0 %v10406_v4  ;;  %7742 = vmatpush1.bf16.msra.mxu1 %v10409_v52  ;;  %v10497_v4 = vld [vmem:[%s11137_s23 + $0x17a0] ss:$16 sps:$4 sm:$0xff]   ;;  %v10500_v52 = vld [vmem:[%s11137_s23 + $0x17a8] ss:$16 sps:$4 sm:$0xff]  }
 0x2fd   : > { %7087 = vmatprep.subr.bf16.mxu0 %v10414_v5  ;;  %7743 = vmatprep.subr.bf16.mxu1 %v10417_v6  ;;  %v10505_v5 = vld [vmem:[%s11137_s23 + $0x17c4] ss:$16 sps:$4 sm:$0xff]   ;;  %v10508_v6 = vld [vmem:[%s11137_s23 + $0x17cc] ss:$16 sps:$4 sm:$0xff]  }
 0x300   : > { %7088 = vmatpush1.bf16.msra.mxu0 %v10412_v7  ;;  %7744 = vmatpush1.bf16.msra.mxu1 %v10415_v62  ;;  %v12040_v7 = vld [vmem:[%s11150_s26 + $0x18] sm:$0xff] }
 0x301   : > { %7098 = vmatprep.subr.bf16.mxu0 %v10421_v8  ;;  %7754 = vmatprep.subr.bf16.mxu1 %v10424_v9  ;;  %v10503_v62 = vld [vmem:[%s11137_s23 + $0x17c0] ss:$16 sps:$4 sm:$0xff]   ;;  %v10506_v8 = vld [vmem:[%s11137_s23 + $0x17c8] ss:$16 sps:$4 sm:$0xff]   ;;  %v10511_v9 = vld [vmem:[%s11137_s23 + $0x17e4] ss:$16 sps:$4 sm:$0xff]  }
 0x303   : > { %7090 = vmatmul.mubr.bf16.vlgmr.msra.gmra.mrb[0].mxu0 %v11977_v63  ;;  %7746 = vmatmul.mubr.bf16.vlgmr.msra.gmra.mrb[0].mxu1 %v11977_v63 }
 0x304   : > { %7099 = vmatpush1.bf16.msra.mxu0 %v10419_v11  ;;  %7755 = vmatpush1.bf16.msra.mxu1 %v10422_v12  ;;  %v10514_v11 = vld [vmem:[%s11137_s23 + $0x17ec] ss:$16 sps:$4 sm:$0xff]   ;;  %v12048_v12 = vrot.slane %v12040_v7, %v11199_v50 }
 0x305   : > { %7100 = vmatprep.subr.bf16.mxu0 %v10427_v13  ;;  %7756 = vmatprep.subr.bf16.mxu1 %v10430_v15  ;;  %v10509_v13 = vld [vmem:[%s11137_s23 + $0x17e0] ss:$16 sps:$4 sm:$0xff]   ;;  %v10512_v15 = vld [vmem:[%s11137_s23 + $0x17e8] ss:$16 sps:$4 sm:$0xff]  }
 0x306   : > { %7130 = vmatprep.mubr.bf16.mxu0 %v1445_v17  ;;  %7786 = vmatprep.mubr.bf16.mxu1 %v1445_v17  ;;  %v10517_v17 = vld [vmem:[%s11137_s23 + $0x1804] ss:$16 sps:$4 sm:$0xff]  }
 0x308   : > { %7101 = vmatpush1.bf16.msra.mxu0 %v10425_v2  ;;  %7757 = vmatpush1.bf16.msra.mxu1 %v10428_v53  ;;  %v10520_v2 = vld [vmem:[%s11137_s23 + $0x180c] ss:$16 sps:$4 sm:$0xff]   ;;  %v1461_v53 = vcombine.high %v12048_v12, %v12048_v12 }
 0x309   : > { %7102 = vmatprep.subr.bf16.mxu0 %v10433_v18  ;;  %7758 = vmatprep.subr.bf16.mxu1 %v10436_v19  ;;  %v1443_v18 = vcombine.high %v11977_v63, %v11977_v63  ;;  %v10515_v19 = vld [vmem:[%s11137_s23 + $0x1800] ss:$16 sps:$4 sm:$0xff]  }
 0x30a   : > { %v10521_v63 = vld [vmem:[%s11137_s23 + $0x1820] ss:$16 sps:$4 sm:$0xff]  }
 0x30c   : > { %7103 = vmatpush1.bf16.msra.mxu0 %v10431_v10  ;;  %7759 = vmatpush1.bf16.msra.mxu1 %v10434_v20  ;;  %v10518_v10 = vld [vmem:[%s11137_s23 + $0x1808] ss:$16 sps:$4 sm:$0xff]   ;;  %v10523_v20 = vld [vmem:[%s11137_s23 + $0x1824] ss:$16 sps:$4 sm:$0xff]  }
 0x30d   : > { %7104 = vmatprep.subr.bf16.mxu0 %v10439_v21  ;;  %7760 = vmatprep.subr.bf16.mxu1 %v10442_v23  ;;  %v10526_v21 = vld [vmem:[%s11137_s23 + $0x182c] ss:$16 sps:$4 sm:$0xff]   ;;  %v12063_v23 = vrot.slane %v1461_v53, %v11199_v50  ;;  %v10602_v53 = vld [vmem:[%s11137_s23 + $0x19c8] ss:$16 sps:$4 sm:$0xff]  }
 0x310   : > { %7105 = vmatpush1.bf16.msra.mxu0 %v10437_v24  ;;  %7761 = vmatpush1.bf16.msra.mxu1 %v10440_v25  ;;  %v10524_v24 = vld [vmem:[%s11137_s23 + $0x1828] ss:$16 sps:$4 sm:$0xff]   ;;  %v10529_v25 = vld [vmem:[%s11137_s23 + $0x1844] ss:$16 sps:$4 sm:$0xff]  }
 0x311   : > { %7106 = vmatprep.subr.bf16.mxu0 %v10445_v27  ;;  %7762 = vmatprep.subr.bf16.mxu1 %v10448_v28  ;;  %v10532_v27 = vld [vmem:[%s11137_s23 + $0x184c] ss:$16 sps:$4 sm:$0xff]   ;;  %v10527_v28 = vld [vmem:[%s11137_s23 + $0x1840] ss:$16 sps:$4 sm:$0xff]  }
 0x314   : > { %7107 = vmatpush1.bf16.msra.mxu0 %v10443_v29  ;;  %7763 = vmatpush1.bf16.msra.mxu1 %v10446_v30  ;;  %v10530_v29 = vld [vmem:[%s11137_s23 + $0x1848] ss:$16 sps:$4 sm:$0xff]   ;;  %v10535_v30 = vld [vmem:[%s11137_s23 + $0x1864] ss:$16 sps:$4 sm:$0xff]  }
 0x315   : > { %7108 = vmatprep.subr.bf16.mxu0 %v10451_v31  ;;  %7764 = vmatprep.subr.bf16.mxu1 %v10454_v16  ;;  %v10538_v31 = vld [vmem:[%s11137_s23 + $0x186c] ss:$16 sps:$4 sm:$0xff]   ;;  %v10533_v16 = vld [vmem:[%s11137_s23 + $0x1860] ss:$16 sps:$4 sm:$0xff]  }
 0x318   : > { %7109 = vmatpush1.bf16.msra.mxu0 %v10449_v32  ;;  %7765 = vmatpush1.bf16.msra.mxu1 %v10452_v33  ;;  %v10536_v32 = vld [vmem:[%s11137_s23 + $0x1868] ss:$16 sps:$4 sm:$0xff]   ;;  %v10541_v33 = vld [vmem:[%s11137_s23 + $0x1884] ss:$16 sps:$4 sm:$0xff]  }
 0x319   : > { %7110 = vmatprep.subr.bf16.mxu0 %v10457_v34  ;;  %7766 = vmatprep.subr.bf16.mxu1 %v10460_v26  ;;  %v10544_v34 = vld [vmem:[%s11137_s23 + $0x188c] ss:$16 sps:$4 sm:$0xff]   ;;  %v10539_v26 = vld [vmem:[%s11137_s23 + $0x1880] ss:$16 sps:$4 sm:$0xff]  }
 0x31c   : > { %7111 = vmatpush1.bf16.msra.mxu0 %v10455_v35  ;;  %7767 = vmatpush1.bf16.msra.mxu1 %v10458_v37  ;;  %v10542_v35 = vld [vmem:[%s11137_s23 + $0x1888] ss:$16 sps:$4 sm:$0xff]   ;;  %v10547_v37 = vld [vmem:[%s11137_s23 + $0x18a4] ss:$16 sps:$4 sm:$0xff]  }
 0x31d   : > { %7112 = vmatprep.subr.bf16.mxu0 %v10463_v38  ;;  %7768 = vmatprep.subr.bf16.mxu1 %v10466_v40  ;;  %v10550_v38 = vld [vmem:[%s11137_s23 + $0x18ac] ss:$16 sps:$4 sm:$0xff]   ;;  %v10545_v40 = vld [vmem:[%s11137_s23 + $0x18a0] ss:$16 sps:$4 sm:$0xff]  }
 0x320   : > { %7113 = vmatpush1.bf16.msra.mxu0 %v10461_v41  ;;  %7769 = vmatpush1.bf16.msra.mxu1 %v10464_v22  ;;  %v10548_v41 = vld [vmem:[%s11137_s23 + $0x18a8] ss:$16 sps:$4 sm:$0xff]   ;;  %v10553_v22 = vld [vmem:[%s11137_s23 + $0x18c4] ss:$16 sps:$4 sm:$0xff]  }
 0x321   : > { %7114 = vmatprep.subr.bf16.mxu0 %v10469_v42  ;;  %7770 = vmatprep.subr.bf16.mxu1 %v10472_v43  ;;  %v10556_v42 = vld [vmem:[%s11137_s23 + $0x18cc] ss:$16 sps:$4 sm:$0xff]   ;;  %v10551_v43 = vld [vmem:[%s11137_s23 + $0x18c0] ss:$16 sps:$4 sm:$0xff]  }
 0x324   : > { %7115 = vmatpush1.bf16.msra.mxu0 %v10467_v45  ;;  %7771 = vmatpush1.bf16.msra.mxu1 %v10470_v46  ;;  %v10554_v45 = vld [vmem:[%s11137_s23 + $0x18c8] ss:$16 sps:$4 sm:$0xff]   ;;  %v10559_v46 = vld [vmem:[%s11137_s23 + $0x18e4] ss:$16 sps:$4 sm:$0xff]  }
 0x325   : > { %7116 = vmatprep.subr.bf16.mxu0 %v10475_v47  ;;  %7772 = vmatprep.subr.bf16.mxu1 %v10478_v48  ;;  %v10562_v47 = vld [vmem:[%s11137_s23 + $0x18ec] ss:$16 sps:$4 sm:$0xff]   ;;  %v10557_v48 = vld [vmem:[%s11137_s23 + $0x18e0] ss:$16 sps:$4 sm:$0xff]  }
 0x328   : > { %7117 = vmatpush1.bf16.msra.mxu0 %v10473_v51  ;;  %7773 = vmatpush1.bf16.msra.mxu1 %v10476_v54  ;;  %v10560_v51 = vld [vmem:[%s11137_s23 + $0x18e8] ss:$16 sps:$4 sm:$0xff]   ;;  %v10565_v54 = vld [vmem:[%s11137_s23 + $0x1904] ss:$16 sps:$4 sm:$0xff]  }
 0x329   : > { %7118 = vmatprep.subr.bf16.mxu0 %v10481_v55  ;;  %7774 = vmatprep.subr.bf16.mxu1 %v10484_v56  ;;  %v10568_v55 = vld [vmem:[%s11137_s23 + $0x190c] ss:$16 sps:$4 sm:$0xff]   ;;  %v10563_v56 = vld [vmem:[%s11137_s23 + $0x1900] ss:$16 sps:$4 sm:$0xff]  }
 0x32c   : > { %7119 = vmatpush1.bf16.msra.mxu0 %v10479_v39  ;;  %7775 = vmatpush1.bf16.msra.mxu1 %v10482_v57  ;;  %v10566_v39 = vld [vmem:[%s11137_s23 + $0x1908] ss:$16 sps:$4 sm:$0xff]   ;;  %v10571_v57 = vld [vmem:[%s11137_s23 + $0x1924] ss:$16 sps:$4 sm:$0xff]  }
 0x32d   : > { %7120 = vmatprep.subr.bf16.mxu0 %v10487_v58  ;;  %7776 = vmatprep.subr.bf16.mxu1 %v10490_v59  ;;  %v10574_v58 = vld [vmem:[%s11137_s23 + $0x192c] ss:$16 sps:$4 sm:$0xff]   ;;  %v10569_v59 = vld [vmem:[%s11137_s23 + $0x1920] ss:$16 sps:$4 sm:$0xff]  }
 0x330   : > { %7121 = vmatpush1.bf16.msra.mxu0 %v10485_v49  ;;  %7777 = vmatpush1.bf16.msra.mxu1 %v10488_v60  ;;  %v10572_v49 = vld [vmem:[%s11137_s23 + $0x1928] ss:$16 sps:$4 sm:$0xff]   ;;  %v10577_v60 = vld [vmem:[%s11137_s23 + $0x1944] ss:$16 sps:$4 sm:$0xff]  }
 0x331   : > { %7122 = vmatprep.subr.bf16.mxu0 %v10493_v61  ;;  %7778 = vmatprep.subr.bf16.mxu1 %v10496_v14  ;;  %v10580_v61 = vld [vmem:[%s11137_s23 + $0x194c] ss:$16 sps:$4 sm:$0xff]   ;;  %v10575_v14 = vld [vmem:[%s11137_s23 + $0x1940] ss:$16 sps:$4 sm:$0xff]  }
 0x334   : > { %7123 = vmatpush1.bf16.msra.mxu0 %v10491_v0  ;;  %7779 = vmatpush1.bf16.msra.mxu1 %v10494_v1  ;;  %v10578_v0 = vld [vmem:[%s11137_s23 + $0x1948] ss:$16 sps:$4 sm:$0xff]   ;;  %v10583_v1 = vld [vmem:[%s11137_s23 + $0x1964] ss:$16 sps:$4 sm:$0xff]  }
 0x335   : > { %7124 = vmatprep.subr.bf16.mxu0 %v10499_v36  ;;  %7780 = vmatprep.subr.bf16.mxu1 %v10502_v3  ;;  %v10586_v36 = vld [vmem:[%s11137_s23 + $0x196c] ss:$16 sps:$4 sm:$0xff]   ;;  %v10581_v3 = vld [vmem:[%s11137_s23 + $0x1960] ss:$16 sps:$4 sm:$0xff]  }
 0x338   : > { %7125 = vmatpush1.bf16.msra.mxu0 %v10497_v4  ;;  %7781 = vmatpush1.bf16.msra.mxu1 %v10500_v52  ;;  %v10584_v4 = vld [vmem:[%s11137_s23 + $0x1968] ss:$16 sps:$4 sm:$0xff]   ;;  %v10589_v52 = vld [vmem:[%s11137_s23 + $0x1984] ss:$16 sps:$4 sm:$0xff]  }
 0x339   : > { %7126 = vmatprep.subr.bf16.mxu0 %v10505_v5  ;;  %7782 = vmatprep.subr.bf16.mxu1 %v10508_v6  ;;  %v10592_v5 = vld [vmem:[%s11137_s23 + $0x198c] ss:$16 sps:$4 sm:$0xff]   ;;  %v10587_v6 = vld [vmem:[%s11137_s23 + $0x1980] ss:$16 sps:$4 sm:$0xff]  }
 0x33c   : > { %7127 = vmatpush1.bf16.msra.mxu0 %v10503_v62  ;;  %7783 = vmatpush1.bf16.msra.mxu1 %v10506_v8  ;;  %v10590_v62 = vld [vmem:[%s11137_s23 + $0x1988] ss:$16 sps:$4 sm:$0xff]   ;;  %v10595_v8 = vld [vmem:[%s11137_s23 + $0x19a4] ss:$16 sps:$4 sm:$0xff]  }
 0x33d   : > { %7128 = vmatprep.subr.bf16.mxu0 %v10511_v9  ;;  %7784 = vmatprep.subr.bf16.mxu1 %v10514_v11  ;;  %v10598_v9 = vld [vmem:[%s11137_s23 + $0x19ac] ss:$16 sps:$4 sm:$0xff]   ;;  %v10593_v11 = vld [vmem:[%s11137_s23 + $0x19a0] ss:$16 sps:$4 sm:$0xff]  }
 0x340   : > { %7129 = vmatpush1.bf16.msra.mxu0 %v10509_v13  ;;  %7785 = vmatpush1.bf16.msra.mxu1 %v10512_v15  ;;  %v10596_v13 = vld [vmem:[%s11137_s23 + $0x19a8] ss:$16 sps:$4 sm:$0xff]   ;;  %v10601_v15 = vld [vmem:[%s11137_s23 + $0x19c4] ss:$16 sps:$4 sm:$0xff]  }
 0x341   : > { %7139 = vmatprep.subr.bf16.mxu0 %v10517_v17  ;;  %7795 = vmatprep.subr.bf16.mxu1 %v10520_v2  ;;  %v10604_v17 = vld [vmem:[%s11137_s23 + $0x19cc] ss:$16 sps:$4 sm:$0xff]   ;;  %v10599_v2 = vld [vmem:[%s11137_s23 + $0x19c0] ss:$16 sps:$4 sm:$0xff]  }
 0x343   : > { %7131 = vmatmul.mubr.bf16.vlgmr.msra.gmra.mrb[0].mxu0 %v1443_v18  ;;  %7787 = vmatmul.mubr.bf16.vlgmr.msra.gmra.mrb[0].mxu1 %v1443_v18  ;;  %v10607_v18 = vld [vmem:[%s11137_s23 + $0x19e4] ss:$16 sps:$4 sm:$0xff]  }
 0x344   : > { %7140 = vmatpush1.bf16.msra.mxu0 %v10515_v19  ;;  %7796 = vmatpush1.bf16.msra.mxu1 %v10518_v10  ;;  %v10610_v19 = vld [vmem:[%s11137_s23 + $0x19ec] ss:$16 sps:$4 sm:$0xff]   ;;  %v10605_v10 = vld [vmem:[%s11137_s23 + $0x19e0] ss:$16 sps:$4 sm:$0xff]  }
 0x345   : > { %7141 = vmatprep.subr.bf16.mxu0 %v10523_v20  ;;  %7797 = vmatprep.subr.bf16.mxu1 %v10526_v21  ;;  %v10608_v20 = vld [vmem:[%s11137_s23 + $0x19e8] ss:$16 sps:$4 sm:$0xff]   ;;  %v10613_v21 = vld [vmem:[%s11137_s23 + $0x1a04] ss:$16 sps:$4 sm:$0xff]  }
 0x346   : > { %7171 = vmatprep.mubr.bf16.mxu0 %v12063_v23  ;;  %7827 = vmatprep.mubr.bf16.mxu1 %v12063_v23 }
 0x348   : > { %7142 = vmatpush1.bf16.msra.mxu0 %v10521_v63  ;;  %7798 = vmatpush1.bf16.msra.mxu1 %v10524_v24  ;;  %v10616_v63 = vld [vmem:[%s11137_s23 + $0x1a0c] ss:$16 sps:$4 sm:$0xff]   ;;  %v12129_v24 = vrot.slane %v12048_v12, %v11199_v50  ;;  %v10617_v12 = vld [vmem:[%s11137_s23 + $0x1a20] ss:$16 sps:$4 sm:$0xff]  }
 0x349   : > { %7143 = vmatprep.subr.bf16.mxu0 %v10529_v25  ;;  %7799 = vmatprep.subr.bf16.mxu1 %v10532_v27  ;;  %v10611_v25 = vld [vmem:[%s11137_s23 + $0x1a00] ss:$16 sps:$4 sm:$0xff]   ;;  %v10614_v27 = vld [vmem:[%s11137_s23 + $0x1a08] ss:$16 sps:$4 sm:$0xff]  }
 0x34c   : > { %7144 = vmatpush1.bf16.msra.mxu0 %v10527_v28  ;;  %7800 = vmatpush1.bf16.msra.mxu1 %v10530_v29  ;;  %v10619_v28 = vld [vmem:[%s11137_s23 + $0x1a24] ss:$16 sps:$4 sm:$0xff]   ;;  %v10622_v29 = vld [vmem:[%s11137_s23 + $0x1a2c] ss:$16 sps:$4 sm:$0xff]  }
 0x34d   : > { %7145 = vmatprep.subr.bf16.mxu0 %v10535_v30  ;;  %7801 = vmatprep.subr.bf16.mxu1 %v10538_v31  ;;  %v1493_v30 = vcombine.high %v12063_v23, %v12063_v23  ;;  %v10620_v31 = vld [vmem:[%s11137_s23 + $0x1a28] ss:$16 sps:$4 sm:$0xff]   ;;  %v10623_v23 = vld [vmem:[%s11137_s23 + $0x1a40] ss:$16 sps:$4 sm:$0xff]  }
 0x350   : > { %7146 = vmatpush1.bf16.msra.mxu0 %v10533_v16  ;;  %7802 = vmatpush1.bf16.msra.mxu1 %v10536_v32  ;;  %v10625_v16 = vld [vmem:[%s11137_s23 + $0x1a44] ss:$16 sps:$4 sm:$0xff]   ;;  %v10628_v32 = vld [vmem:[%s11137_s23 + $0x1a4c] ss:$16 sps:$4 sm:$0xff]  }
 0x351   : > { %7147 = vmatprep.subr.bf16.mxu0 %v10541_v33  ;;  %7803 = vmatprep.subr.bf16.mxu1 %v10544_v34  ;;  %v10626_v33 = vld [vmem:[%s11137_s23 + $0x1a48] ss:$16 sps:$4 sm:$0xff]   ;;  %v10631_v34 = vld [vmem:[%s11137_s23 + $0x1a64] ss:$16 sps:$4 sm:$0xff]  }
 0x354   : > { %7148 = vmatpush1.bf16.msra.mxu0 %v10539_v26  ;;  %7804 = vmatpush1.bf16.msra.mxu1 %v10542_v35  ;;  %v10634_v26 = vld [vmem:[%s11137_s23 + $0x1a6c] ss:$16 sps:$4 sm:$0xff]   ;;  %v10629_v35 = vld [vmem:[%s11137_s23 + $0x1a60] ss:$16 sps:$4 sm:$0xff]  }
 0x355   : > { %7149 = vmatprep.subr.bf16.mxu0 %v10547_v37  ;;  %7805 = vmatprep.subr.bf16.mxu1 %v10550_v38  ;;  %v10632_v37 = vld [vmem:[%s11137_s23 + $0x1a68] ss:$16 sps:$4 sm:$0xff]   ;;  %v10637_v38 = vld [vmem:[%s11137_s23 + $0x1a84] ss:$16 sps:$4 sm:$0xff]  }
 0x358   : > { %7150 = vmatpush1.bf16.msra.mxu0 %v10545_v40  ;;  %7806 = vmatpush1.bf16.msra.mxu1 %v10548_v41  ;;  %v10640_v40 = vld [vmem:[%s11137_s23 + $0x1a8c] ss:$16 sps:$4 sm:$0xff]   ;;  %v10635_v41 = vld [vmem:[%s11137_s23 + $0x1a80] ss:$16 sps:$4 sm:$0xff]  }
 0x359   : > { %7151 = vmatprep.subr.bf16.mxu0 %v10553_v22  ;;  %7807 = vmatprep.subr.bf16.mxu1 %v10556_v42  ;;  %v10638_v22 = vld [vmem:[%s11137_s23 + $0x1a88] ss:$16 sps:$4 sm:$0xff]   ;;  %v10643_v42 = vld [vmem:[%s11137_s23 + $0x1aa4] ss:$16 sps:$4 sm:$0xff]  }
 0x35c   : > { %7152 = vmatpush1.bf16.msra.mxu0 %v10551_v43  ;;  %7808 = vmatpush1.bf16.msra.mxu1 %v10554_v45  ;;  %v10646_v43 = vld [vmem:[%s11137_s23 + $0x1aac] ss:$16 sps:$4 sm:$0xff]   ;;  %v10641_v45 = vld [vmem:[%s11137_s23 + $0x1aa0] ss:$16 sps:$4 sm:$0xff]  }
 0x35d   : > { %7153 = vmatprep.subr.bf16.mxu0 %v10559_v46  ;;  %7809 = vmatprep.subr.bf16.mxu1 %v10562_v47  ;;  %v10644_v46 = vld [vmem:[%s11137_s23 + $0x1aa8] ss:$16 sps:$4 sm:$0xff]   ;;  %v10649_v47 = vld [vmem:[%s11137_s23 + $0x1ac4] ss:$16 sps:$4 sm:$0xff]  }
 0x360   : > { %7154 = vmatpush1.bf16.msra.mxu0 %v10557_v48  ;;  %7810 = vmatpush1.bf16.msra.mxu1 %v10560_v51  ;;  %v10652_v48 = vld [vmem:[%s11137_s23 + $0x1acc] ss:$16 sps:$4 sm:$0xff]   ;;  %v10647_v51 = vld [vmem:[%s11137_s23 + $0x1ac0] ss:$16 sps:$4 sm:$0xff]  }
 0x361   : > { %7155 = vmatprep.subr.bf16.mxu0 %v10565_v54  ;;  %7811 = vmatprep.subr.bf16.mxu1 %v10568_v55  ;;  %v10650_v54 = vld [vmem:[%s11137_s23 + $0x1ac8] ss:$16 sps:$4 sm:$0xff]   ;;  %v10655_v55 = vld [vmem:[%s11137_s23 + $0x1ae4] ss:$16 sps:$4 sm:$0xff]  }
 0x364   : > { %7156 = vmatpush1.bf16.msra.mxu0 %v10563_v56  ;;  %7812 = vmatpush1.bf16.msra.mxu1 %v10566_v39  ;;  %v10658_v56 = vld [vmem:[%s11137_s23 + $0x1aec] ss:$16 sps:$4 sm:$0xff]   ;;  %v10653_v39 = vld [vmem:[%s11137_s23 + $0x1ae0] ss:$16 sps:$4 sm:$0xff]  }
 0x365   : > { %7157 = vmatprep.subr.bf16.mxu0 %v10571_v57  ;;  %7813 = vmatprep.subr.bf16.mxu1 %v10574_v58  ;;  %v10656_v57 = vld [vmem:[%s11137_s23 + $0x1ae8] ss:$16 sps:$4 sm:$0xff]   ;;  %v10661_v58 = vld [vmem:[%s11137_s23 + $0x1b04] ss:$16 sps:$4 sm:$0xff]  }
 0x368   : > { %7158 = vmatpush1.bf16.msra.mxu0 %v10569_v59  ;;  %7814 = vmatpush1.bf16.msra.mxu1 %v10572_v49  ;;  %v10664_v59 = vld [vmem:[%s11137_s23 + $0x1b0c] ss:$16 sps:$4 sm:$0xff]   ;;  %v10659_v49 = vld [vmem:[%s11137_s23 + $0x1b00] ss:$16 sps:$4 sm:$0xff]  }
 0x369   : > { %7159 = vmatprep.subr.bf16.mxu0 %v10577_v60  ;;  %7815 = vmatprep.subr.bf16.mxu1 %v10580_v61  ;;  %v10662_v60 = vld [vmem:[%s11137_s23 + $0x1b08] ss:$16 sps:$4 sm:$0xff]   ;;  %v10667_v61 = vld [vmem:[%s11137_s23 + $0x1b24] ss:$16 sps:$4 sm:$0xff]  }
 0x36c   : > { %7160 = vmatpush1.bf16.msra.mxu0 %v10575_v14  ;;  %7816 = vmatpush1.bf16.msra.mxu1 %v10578_v0  ;;  %v10670_v14 = vld [vmem:[%s11137_s23 + $0x1b2c] ss:$16 sps:$4 sm:$0xff]   ;;  %v10665_v0 = vld [vmem:[%s11137_s23 + $0x1b20] ss:$16 sps:$4 sm:$0xff]  }
 0x36d   : > { %7161 = vmatprep.subr.bf16.mxu0 %v10583_v1  ;;  %7817 = vmatprep.subr.bf16.mxu1 %v10586_v36  ;;  %v10668_v1 = vld [vmem:[%s11137_s23 + $0x1b28] ss:$16 sps:$4 sm:$0xff]   ;;  %v10673_v36 = vld [vmem:[%s11137_s23 + $0x1b44] ss:$16 sps:$4 sm:$0xff]  }
 0x370   : > { %7162 = vmatpush1.bf16.msra.mxu0 %v10581_v3  ;;  %7818 = vmatpush1.bf16.msra.mxu1 %v10584_v4  ;;  %v10676_v3 = vld [vmem:[%s11137_s23 + $0x1b4c] ss:$16 sps:$4 sm:$0xff]   ;;  %v10671_v4 = vld [vmem:[%s11137_s23 + $0x1b40] ss:$16 sps:$4 sm:$0xff]  }
 0x371   : > { %7163 = vmatprep.subr.bf16.mxu0 %v10589_v52  ;;  %7819 = vmatprep.subr.bf16.mxu1 %v10592_v5  ;;  %v10674_v52 = vld [vmem:[%s11137_s23 + $0x1b48] ss:$16 sps:$4 sm:$0xff]   ;;  %v10679_v5 = vld [vmem:[%s11137_s23 + $0x1b64] ss:$16 sps:$4 sm:$0xff]  }
 0x374   : > { %7164 = vmatpush1.bf16.msra.mxu0 %v10587_v6  ;;  %7820 = vmatpush1.bf16.msra.mxu1 %v10590_v62  ;;  %v10682_v6 = vld [vmem:[%s11137_s23 + $0x1b6c] ss:$16 sps:$4 sm:$0xff]   ;;  %v10677_v62 = vld [vmem:[%s11137_s23 + $0x1b60] ss:$16 sps:$4 sm:$0xff]  }
 0x375   : > { %7165 = vmatprep.subr.bf16.mxu0 %v10595_v8  ;;  %7821 = vmatprep.subr.bf16.mxu1 %v10598_v9  ;;  %v10680_v8 = vld [vmem:[%s11137_s23 + $0x1b68] ss:$16 sps:$4 sm:$0xff]   ;;  %v10685_v9 = vld [vmem:[%s11137_s23 + $0x1b84] ss:$16 sps:$4 sm:$0xff]  }
 0x378   : > { %7166 = vmatpush1.bf16.msra.mxu0 %v10593_v11  ;;  %7822 = vmatpush1.bf16.msra.mxu1 %v10596_v13  ;;  %v10688_v11 = vld [vmem:[%s11137_s23 + $0x1b8c] ss:$16 sps:$4 sm:$0xff]   ;;  %v10683_v13 = vld [vmem:[%s11137_s23 + $0x1b80] ss:$16 sps:$4 sm:$0xff]  }
 0x379   : > { %7167 = vmatprep.subr.bf16.mxu0 %v10601_v15  ;;  %7823 = vmatprep.subr.bf16.mxu1 %v10604_v17  ;;  %v10686_v15 = vld [vmem:[%s11137_s23 + $0x1b88] ss:$16 sps:$4 sm:$0xff]   ;;  %v10691_v17 = vld [vmem:[%s11137_s23 + $0x1ba4] ss:$16 sps:$4 sm:$0xff]  }
 0x37c   : > { %7168 = vmatpush1.bf16.msra.mxu0 %v10599_v2  ;;  %7824 = vmatpush1.bf16.msra.mxu1 %v10602_v53  ;;  %v10694_v2 = vld [vmem:[%s11137_s23 + $0x1bac] ss:$16 sps:$4 sm:$0xff]   ;;  %v10689_v53 = vld [vmem:[%s11137_s23 + $0x1ba0] ss:$16 sps:$4 sm:$0xff]  }
 0x37d   : > { %7169 = vmatprep.subr.bf16.mxu0 %v10607_v18  ;;  %7825 = vmatprep.subr.bf16.mxu1 %v10610_v19  ;;  %v10692_v18 = vld [vmem:[%s11137_s23 + $0x1ba8] ss:$16 sps:$4 sm:$0xff]   ;;  %v10697_v19 = vld [vmem:[%s11137_s23 + $0x1bc4] ss:$16 sps:$4 sm:$0xff]  }
 0x380   : > { %7170 = vmatpush1.bf16.msra.mxu0 %v10605_v10  ;;  %7826 = vmatpush1.bf16.msra.mxu1 %v10608_v20  ;;  %v10700_v10 = vld [vmem:[%s11137_s23 + $0x1bcc] ss:$16 sps:$4 sm:$0xff]   ;;  %v1446_v20 = vcombine.high %v12040_v7, %v12040_v7  ;;  %v10701_v7 = vld [vmem:[%s11137_s23 + $0x1be0] ss:$16 sps:$4 sm:$0xff]  }
 0x381   : > { %7180 = vmatprep.subr.bf16.mxu0 %v10613_v21  ;;  %7836 = vmatprep.subr.bf16.mxu1 %v10616_v63  ;;  %v10695_v21 = vld [vmem:[%s11137_s23 + $0x1bc0] ss:$16 sps:$4 sm:$0xff]   ;;  %v10698_v63 = vld [vmem:[%s11137_s23 + $0x1bc8] ss:$16 sps:$4 sm:$0xff]  }
 0x383   : > { %7172 = vmatmul.mubr.bf16.vlgmr.msra.gmra.mrb[0].mxu0 %v12129_v24  ;;  %7828 = vmatmul.mubr.bf16.vlgmr.msra.gmra.mrb[0].mxu1 %v12129_v24 }
 0x384   : > { %7181 = vmatpush1.bf16.msra.mxu0 %v10611_v25  ;;  %7837 = vmatpush1.bf16.msra.mxu1 %v10614_v27  ;;  %v10703_v25 = vld [vmem:[%s11137_s23 + $0x1be4] ss:$16 sps:$4 sm:$0xff]   ;;  %v10706_v27 = vld [vmem:[%s11137_s23 + $0x1bec] ss:$16 sps:$4 sm:$0xff]  }
 0x385   : > { %7182 = vmatprep.subr.bf16.mxu0 %v10619_v28  ;;  %7838 = vmatprep.subr.bf16.mxu1 %v10622_v29  ;;  %v12198_v28 = vrot.slane %v1446_v20, %v11199_v50  ;;  %v10704_v29 = vld [vmem:[%s11137_s23 + $0x1be8] ss:$16 sps:$4 sm:$0xff]  }
 0x386   : > { %7212 = vmatprep.mubr.bf16.mxu0 %v1493_v30  ;;  %7868 = vmatprep.mubr.bf16.mxu1 %v1493_v30  ;;  %v10709_v30 = vld [vmem:[%s11137_s23 + $0x1c04] ss:$16 sps:$4 sm:$0xff]   ;;  %v10782_v20 = vld [vmem:[%s11137_s23 + $0x1d88] ss:$16 sps:$4 sm:$0xff]  }
 0x388   : > { %7183 = vmatpush1.bf16.msra.mxu0 %v10617_v12  ;;  %7839 = vmatpush1.bf16.msra.mxu1 %v10620_v31  ;;  %v10712_v12 = vld [vmem:[%s11137_s23 + $0x1c0c] ss:$16 sps:$4 sm:$0xff]   ;;  %v1462_v31 = vcombine.high %v12198_v28, %v12198_v28 }
 0x389   : > { %7184 = vmatprep.subr.bf16.mxu0 %v10625_v16  ;;  %7840 = vmatprep.subr.bf16.mxu1 %v10628_v32  ;;  %v1491_v16 = vcombine.high %v12129_v24, %v12129_v24  ;;  %v10707_v32 = vld [vmem:[%s11137_s23 + $0x1c00] ss:$16 sps:$4 sm:$0xff]  }
 0x38a   : > { %v10713_v24 = vld [vmem:[%s11137_s23 + $0x1c20] ss:$16 sps:$4 sm:$0xff]  }
 0x38c   : > { %7185 = vmatpush1.bf16.msra.mxu0 %v10623_v23  ;;  %7841 = vmatpush1.bf16.msra.mxu1 %v10626_v33  ;;  %v10710_v23 = vld [vmem:[%s11137_s23 + $0x1c08] ss:$16 sps:$4 sm:$0xff]   ;;  %v10715_v33 = vld [vmem:[%s11137_s23 + $0x1c24] ss:$16 sps:$4 sm:$0xff]  }
 0x38d   : > { %7186 = vmatprep.subr.bf16.mxu0 %v10631_v34  ;;  %7842 = vmatprep.subr.bf16.mxu1 %v10634_v26  ;;  %v10718_v34 = vld [vmem:[%s11137_s23 + $0x1c2c] ss:$16 sps:$4 sm:$0xff]   ;;  %v12213_v26 = vrot.slane %v1462_v31, %v11199_v50  ;;  %v10799_v31 = vld [vmem:[%s11137_s23 + $0x1de4] ss:$16 sps:$4 sm:$0xff]  }
 0x390   : > { %7187 = vmatpush1.bf16.msra.mxu0 %v10629_v35  ;;  %7843 = vmatpush1.bf16.msra.mxu1 %v10632_v37  ;;  %v10716_v35 = vld [vmem:[%s11137_s23 + $0x1c28] ss:$16 sps:$4 sm:$0xff]   ;;  %v10721_v37 = vld [vmem:[%s11137_s23 + $0x1c44] ss:$16 sps:$4 sm:$0xff]  }
 0x391   : > { %7188 = vmatprep.subr.bf16.mxu0 %v10637_v38  ;;  %7844 = vmatprep.subr.bf16.mxu1 %v10640_v40  ;;  %v10724_v38 = vld [vmem:[%s11137_s23 + $0x1c4c] ss:$16 sps:$4 sm:$0xff]   ;;  %v10719_v40 = vld [vmem:[%s11137_s23 + $0x1c40] ss:$16 sps:$4 sm:$0xff]  }
 0x394   : > { %7189 = vmatpush1.bf16.msra.mxu0 %v10635_v41  ;;  %7845 = vmatpush1.bf16.msra.mxu1 %v10638_v22  ;;  %v10722_v41 = vld [vmem:[%s11137_s23 + $0x1c48] ss:$16 sps:$4 sm:$0xff]   ;;  %v10727_v22 = vld [vmem:[%s11137_s23 + $0x1c64] ss:$16 sps:$4 sm:$0xff]  }
 0x395   : > { %7190 = vmatprep.subr.bf16.mxu0 %v10643_v42  ;;  %7846 = vmatprep.subr.bf16.mxu1 %v10646_v43  ;;  %v10730_v42 = vld [vmem:[%s11137_s23 + $0x1c6c] ss:$16 sps:$4 sm:$0xff]   ;;  %v10725_v43 = vld [vmem:[%s11137_s23 + $0x1c60] ss:$16 sps:$4 sm:$0xff]  }
 0x398   : > { %7191 = vmatpush1.bf16.msra.mxu0 %v10641_v45  ;;  %7847 = vmatpush1.bf16.msra.mxu1 %v10644_v46  ;;  %v10728_v45 = vld [vmem:[%s11137_s23 + $0x1c68] ss:$16 sps:$4 sm:$0xff]   ;;  %v10733_v46 = vld [vmem:[%s11137_s23 + $0x1c84] ss:$16 sps:$4 sm:$0xff]  }
 0x399   : > { %7192 = vmatprep.subr.bf16.mxu0 %v10649_v47  ;;  %7848 = vmatprep.subr.bf16.mxu1 %v10652_v48  ;;  %v10736_v47 = vld [vmem:[%s11137_s23 + $0x1c8c] ss:$16 sps:$4 sm:$0xff]   ;;  %v10731_v48 = vld [vmem:[%s11137_s23 + $0x1c80] ss:$16 sps:$4 sm:$0xff]  }
 0x39c   : > { %7193 = vmatpush1.bf16.msra.mxu0 %v10647_v51  ;;  %7849 = vmatpush1.bf16.msra.mxu1 %v10650_v54  ;;  %v10734_v51 = vld [vmem:[%s11137_s23 + $0x1c88] ss:$16 sps:$4 sm:$0xff]   ;;  %v10739_v54 = vld [vmem:[%s11137_s23 + $0x1ca4] ss:$16 sps:$4 sm:$0xff]  }
 0x39d   : > { %7194 = vmatprep.subr.bf16.mxu0 %v10655_v55  ;;  %7850 = vmatprep.subr.bf16.mxu1 %v10658_v56  ;;  %v10742_v55 = vld [vmem:[%s11137_s23 + $0x1cac] ss:$16 sps:$4 sm:$0xff]   ;;  %v10737_v56 = vld [vmem:[%s11137_s23 + $0x1ca0] ss:$16 sps:$4 sm:$0xff]  }
 0x3a0   : > { %7195 = vmatpush1.bf16.msra.mxu0 %v10653_v39  ;;  %7851 = vmatpush1.bf16.msra.mxu1 %v10656_v57  ;;  %v10740_v39 = vld [vmem:[%s11137_s23 + $0x1ca8] ss:$16 sps:$4 sm:$0xff]   ;;  %v10745_v57 = vld [vmem:[%s11137_s23 + $0x1cc4] ss:$16 sps:$4 sm:$0xff]  }
 0x3a1   : > { %7196 = vmatprep.subr.bf16.mxu0 %v10661_v58  ;;  %7852 = vmatprep.subr.bf16.mxu1 %v10664_v59  ;;  %v10748_v58 = vld [vmem:[%s11137_s23 + $0x1ccc] ss:$16 sps:$4 sm:$0xff]   ;;  %v10743_v59 = vld [vmem:[%s11137_s23 + $0x1cc0] ss:$16 sps:$4 sm:$0xff]  }
 0x3a4   : > { %7197 = vmatpush1.bf16.msra.mxu0 %v10659_v49  ;;  %7853 = vmatpush1.bf16.msra.mxu1 %v10662_v60  ;;  %v10746_v49 = vld [vmem:[%s11137_s23 + $0x1cc8] ss:$16 sps:$4 sm:$0xff]   ;;  %v10751_v60 = vld [vmem:[%s11137_s23 + $0x1ce4] ss:$16 sps:$4 sm:$0xff]  }
 0x3a5   : > { %7198 = vmatprep.subr.bf16.mxu0 %v10667_v61  ;;  %7854 = vmatprep.subr.bf16.mxu1 %v10670_v14  ;;  %v10754_v61 = vld [vmem:[%s11137_s23 + $0x1cec] ss:$16 sps:$4 sm:$0xff]   ;;  %v10749_v14 = vld [vmem:[%s11137_s23 + $0x1ce0] ss:$16 sps:$4 sm:$0xff]  }
 0x3a8   : > { %7199 = vmatpush1.bf16.msra.mxu0 %v10665_v0  ;;  %7855 = vmatpush1.bf16.msra.mxu1 %v10668_v1  ;;  %v10752_v0 = vld [vmem:[%s11137_s23 + $0x1ce8] ss:$16 sps:$4 sm:$0xff]   ;;  %v10757_v1 = vld [vmem:[%s11137_s23 + $0x1d04] ss:$16 sps:$4 sm:$0xff]  }
 0x3a9   : > { %7200 = vmatprep.subr.bf16.mxu0 %v10673_v36  ;;  %7856 = vmatprep.subr.bf16.mxu1 %v10676_v3  ;;  %v10760_v36 = vld [vmem:[%s11137_s23 + $0x1d0c] ss:$16 sps:$4 sm:$0xff]   ;;  %v10755_v3 = vld [vmem:[%s11137_s23 + $0x1d00] ss:$16 sps:$4 sm:$0xff]  }
 0x3ac   : > { %7201 = vmatpush1.bf16.msra.mxu0 %v10671_v4  ;;  %7857 = vmatpush1.bf16.msra.mxu1 %v10674_v52  ;;  %v10758_v4 = vld [vmem:[%s11137_s23 + $0x1d08] ss:$16 sps:$4 sm:$0xff]   ;;  %v10763_v52 = vld [vmem:[%s11137_s23 + $0x1d24] ss:$16 sps:$4 sm:$0xff]  }
 0x3ad   : > { %7202 = vmatprep.subr.bf16.mxu0 %v10679_v5  ;;  %7858 = vmatprep.subr.bf16.mxu1 %v10682_v6  ;;  %v10766_v5 = vld [vmem:[%s11137_s23 + $0x1d2c] ss:$16 sps:$4 sm:$0xff]   ;;  %v10761_v6 = vld [vmem:[%s11137_s23 + $0x1d20] ss:$16 sps:$4 sm:$0xff]  }
 0x3b0   : > { %7203 = vmatpush1.bf16.msra.mxu0 %v10677_v62  ;;  %7859 = vmatpush1.bf16.msra.mxu1 %v10680_v8  ;;  %v10764_v62 = vld [vmem:[%s11137_s23 + $0x1d28] ss:$16 sps:$4 sm:$0xff]   ;;  %v10769_v8 = vld [vmem:[%s11137_s23 + $0x1d44] ss:$16 sps:$4 sm:$0xff]  }
 0x3b1   : > { %7204 = vmatprep.subr.bf16.mxu0 %v10685_v9  ;;  %7860 = vmatprep.subr.bf16.mxu1 %v10688_v11  ;;  %v10772_v9 = vld [vmem:[%s11137_s23 + $0x1d4c] ss:$16 sps:$4 sm:$0xff]   ;;  %v10767_v11 = vld [vmem:[%s11137_s23 + $0x1d40] ss:$16 sps:$4 sm:$0xff]  }
 0x3b4   : > { %7205 = vmatpush1.bf16.msra.mxu0 %v10683_v13  ;;  %7861 = vmatpush1.bf16.msra.mxu1 %v10686_v15  ;;  %v10770_v13 = vld [vmem:[%s11137_s23 + $0x1d48] ss:$16 sps:$4 sm:$0xff]   ;;  %v10775_v15 = vld [vmem:[%s11137_s23 + $0x1d64] ss:$16 sps:$4 sm:$0xff]  }
 0x3b5   : > { %7206 = vmatprep.subr.bf16.mxu0 %v10691_v17  ;;  %7862 = vmatprep.subr.bf16.mxu1 %v10694_v2  ;;  %v10778_v17 = vld [vmem:[%s11137_s23 + $0x1d6c] ss:$16 sps:$4 sm:$0xff]   ;;  %v10773_v2 = vld [vmem:[%s11137_s23 + $0x1d60] ss:$16 sps:$4 sm:$0xff]  }
 0x3b8   : > { %7207 = vmatpush1.bf16.msra.mxu0 %v10689_v53  ;;  %7863 = vmatpush1.bf16.msra.mxu1 %v10692_v18  ;;  %v10776_v53 = vld [vmem:[%s11137_s23 + $0x1d68] ss:$16 sps:$4 sm:$0xff]   ;;  %v10781_v18 = vld [vmem:[%s11137_s23 + $0x1d84] ss:$16 sps:$4 sm:$0xff]  }
 0x3b9   : > { %7208 = vmatprep.subr.bf16.mxu0 %v10697_v19  ;;  %7864 = vmatprep.subr.bf16.mxu1 %v10700_v10  ;;  %v10784_v19 = vld [vmem:[%s11137_s23 + $0x1d8c] ss:$16 sps:$4 sm:$0xff]   ;;  %v10779_v10 = vld [vmem:[%s11137_s23 + $0x1d80] ss:$16 sps:$4 sm:$0xff]  }
 0x3bc   : > { %7209 = vmatpush1.bf16.msra.mxu0 %v10695_v21  ;;  %7865 = vmatpush1.bf16.msra.mxu1 %v10698_v63  ;;  %v10787_v21 = vld [vmem:[%s11137_s23 + $0x1da4] ss:$16 sps:$4 sm:$0xff]   ;;  %v10790_v63 = vld [vmem:[%s11137_s23 + $0x1dac] ss:$16 sps:$4 sm:$0xff]  }
 0x3bd   : > { %7210 = vmatprep.subr.bf16.mxu0 %v10703_v25  ;;  %7866 = vmatprep.subr.bf16.mxu1 %v10706_v27  ;;  %v10785_v25 = vld [vmem:[%s11137_s23 + $0x1da0] ss:$16 sps:$4 sm:$0xff]   ;;  %v10788_v27 = vld [vmem:[%s11137_s23 + $0x1da8] ss:$16 sps:$4 sm:$0xff]  }
 0x3c0   : > { %7211 = vmatpush1.bf16.msra.mxu0 %v10701_v7  ;;  %7867 = vmatpush1.bf16.msra.mxu1 %v10704_v29  ;;  %v10793_v7 = vld [vmem:[%s11137_s23 + $0x1dc4] ss:$16 sps:$4 sm:$0xff]   ;;  %v10796_v29 = vld [vmem:[%s11137_s23 + $0x1dcc] ss:$16 sps:$4 sm:$0xff]  }
 0x3c1   : > { %7221 = vmatprep.subr.bf16.mxu0 %v10709_v30  ;;  %7877 = vmatprep.subr.bf16.mxu1 %v10712_v12  ;;  %v10791_v30 = vld [vmem:[%s11137_s23 + $0x1dc0] ss:$16 sps:$4 sm:$0xff]   ;;  %v10794_v12 = vld [vmem:[%s11137_s23 + $0x1dc8] ss:$16 sps:$4 sm:$0xff]  }
 0x3c3   : > { %7213 = vmatmul.mubr.bf16.vlgmr.msra.gmra.mrb[0].mxu0 %v1491_v16  ;;  %7869 = vmatmul.mubr.bf16.vlgmr.msra.gmra.mrb[0].mxu1 %v1491_v16  ;;  %v10802_v16 = vld [vmem:[%s11137_s23 + $0x1dec] ss:$16 sps:$4 sm:$0xff]  }
 0x3c4   : > { %7222 = vmatpush1.bf16.msra.mxu0 %v10707_v32  ;;  %7878 = vmatpush1.bf16.msra.mxu1 %v10710_v23  ;;  %v10797_v32 = vld [vmem:[%s11137_s23 + $0x1de0] ss:$16 sps:$4 sm:$0xff]   ;;  %v10800_v23 = vld [vmem:[%s11137_s23 + $0x1de8] ss:$16 sps:$4 sm:$0xff]  }
 0x3c5   : > { %7223 = vmatprep.subr.bf16.mxu0 %v10715_v33  ;;  %7879 = vmatprep.subr.bf16.mxu1 %v10718_v34  ;;  %v10806_v33 = vld [vmem:[%s11137_s23 + $0x1e04] ss:$16 sps:$4 sm:$0xff]   ;;  %v10809_v34 = vld [vmem:[%s11137_s23 + $0x1e0c] ss:$16 sps:$4 sm:$0xff]  }
 0x3c6   : > { %7253 = vmatprep.mubr.bf16.mxu0 %v12213_v26  ;;  %7909 = vmatprep.mubr.bf16.mxu1 %v12213_v26 }
 0x3c8   : > { %7224 = vmatpush1.bf16.msra.mxu0 %v10713_v24  ;;  %7880 = vmatpush1.bf16.msra.mxu1 %v10716_v35  ;;  %v12279_v24 = vrot.slane %v12198_v28, %v11199_v50  ;;  %v10804_v35 = vld [vmem:[%s11137_s23 + $0x1e00] ss:$16 sps:$4 sm:$0xff]   ;;  %v10813_v28 = vld [vmem:[%s11137_s23 + $0x1e28] ss:$16 sps:$4 sm:$0xff]  }
 0x3c9   : > { %7225 = vmatprep.subr.bf16.mxu0 %v10721_v37  ;;  %7881 = vmatprep.subr.bf16.mxu1 %v10724_v38  ;;  %v10807_v37 = vld [vmem:[%s11137_s23 + $0x1e08] ss:$16 sps:$4 sm:$0xff]   ;;  %v10812_v38 = vld [vmem:[%s11137_s23 + $0x1e24] ss:$16 sps:$4 sm:$0xff]   ;;  %v10810_v50 = vld [vmem:[%s11137_s23 + $0x1e20] ss:$16 sps:$4 sm:$0xff]  }
 0x3cc   : > { %7226 = vmatpush1.bf16.msra.mxu0 %v10719_v40  ;;  %7882 = vmatpush1.bf16.msra.mxu1 %v10722_v41  ;;  %v10815_v40 = vld [vmem:[%s11137_s23 + $0x1e2c] ss:$16 sps:$4 sm:$0xff]   ;;  %v1494_v41 = vcombine.high %v12213_v26, %v12213_v26  ;;  %v10816_v26 = vld [vmem:[%s11137_s23 + $0x1e40] ss:$16 sps:$4 sm:$0xff]  }
 0x3cd   : > { %7227 = vmatprep.subr.bf16.mxu0 %v10727_v22  ;;  %7883 = vmatprep.subr.bf16.mxu1 %v10730_v42  ;;  %v10818_v22 = vld [vmem:[%s11137_s23 + $0x1e44] ss:$16 sps:$4 sm:$0xff]   ;;  %v10821_v42 = vld [vmem:[%s11137_s23 + $0x1e4c] ss:$16 sps:$4 sm:$0xff]  }
 0x3d0   : > { %7228 = vmatpush1.bf16.msra.mxu0 %v10725_v43  ;;  %7884 = vmatpush1.bf16.msra.mxu1 %v10728_v45  ;;  %v10819_v43 = vld [vmem:[%s11137_s23 + $0x1e48] ss:$16 sps:$4 sm:$0xff]   ;;  %v10824_v45 = vld [vmem:[%s11137_s23 + $0x1e64] ss:$16 sps:$4 sm:$0xff]  }
 0x3d1   : > { %7229 = vmatprep.subr.bf16.mxu0 %v10733_v46  ;;  %7885 = vmatprep.subr.bf16.mxu1 %v10736_v47  ;;  %v10827_v46 = vld [vmem:[%s11137_s23 + $0x1e6c] ss:$16 sps:$4 sm:$0xff]   ;;  %v10822_v47 = vld [vmem:[%s11137_s23 + $0x1e60] ss:$16 sps:$4 sm:$0xff]  }
 0x3d4   : > { %7230 = vmatpush1.bf16.msra.mxu0 %v10731_v48  ;;  %7886 = vmatpush1.bf16.msra.mxu1 %v10734_v51  ;;  %v10825_v48 = vld [vmem:[%s11137_s23 + $0x1e68] ss:$16 sps:$4 sm:$0xff]   ;;  %v10830_v51 = vld [vmem:[%s11137_s23 + $0x1e84] ss:$16 sps:$4 sm:$0xff]  }
 0x3d5   : > { %7231 = vmatprep.subr.bf16.mxu0 %v10739_v54  ;;  %7887 = vmatprep.subr.bf16.mxu1 %v10742_v55  ;;  %v10833_v54 = vld [vmem:[%s11137_s23 + $0x1e8c] ss:$16 sps:$4 sm:$0xff]   ;;  %v10828_v55 = vld [vmem:[%s11137_s23 + $0x1e80] ss:$16 sps:$4 sm:$0xff]  }
 0x3d8   : > { %7232 = vmatpush1.bf16.msra.mxu0 %v10737_v56  ;;  %7888 = vmatpush1.bf16.msra.mxu1 %v10740_v39  ;;  %v10831_v56 = vld [vmem:[%s11137_s23 + $0x1e88] ss:$16 sps:$4 sm:$0xff]   ;;  %v10836_v39 = vld [vmem:[%s11137_s23 + $0x1ea4] ss:$16 sps:$4 sm:$0xff]  }
 0x3d9   : > { %7233 = vmatprep.subr.bf16.mxu0 %v10745_v57  ;;  %7889 = vmatprep.subr.bf16.mxu1 %v10748_v58  ;;  %v10839_v57 = vld [vmem:[%s11137_s23 + $0x1eac] ss:$16 sps:$4 sm:$0xff]   ;;  %v10834_v58 = vld [vmem:[%s11137_s23 + $0x1ea0] ss:$16 sps:$4 sm:$0xff]  }
 0x3dc   : > { %7234 = vmatpush1.bf16.msra.mxu0 %v10743_v59  ;;  %7890 = vmatpush1.bf16.msra.mxu1 %v10746_v49  ;;  %v10837_v59 = vld [vmem:[%s11137_s23 + $0x1ea8] ss:$16 sps:$4 sm:$0xff]   ;;  %v10842_v49 = vld [vmem:[%s11137_s23 + $0x1ec4] ss:$16 sps:$4 sm:$0xff]  }
 0x3dd   : > { %7235 = vmatprep.subr.bf16.mxu0 %v10751_v60  ;;  %7891 = vmatprep.subr.bf16.mxu1 %v10754_v61  ;;  %v10845_v60 = vld [vmem:[%s11137_s23 + $0x1ecc] ss:$16 sps:$4 sm:$0xff]   ;;  %v10840_v61 = vld [vmem:[%s11137_s23 + $0x1ec0] ss:$16 sps:$4 sm:$0xff]  }
 0x3e0   : > { %7236 = vmatpush1.bf16.msra.mxu0 %v10749_v14  ;;  %7892 = vmatpush1.bf16.msra.mxu1 %v10752_v0  ;;  %v10843_v14 = vld [vmem:[%s11137_s23 + $0x1ec8] ss:$16 sps:$4 sm:$0xff]   ;;  %v10848_v0 = vld [vmem:[%s11137_s23 + $0x1ee4] ss:$16 sps:$4 sm:$0xff]  }
 0x3e1   : > { %7237 = vmatprep.subr.bf16.mxu0 %v10757_v1  ;;  %7893 = vmatprep.subr.bf16.mxu1 %v10760_v36  ;;  %v10851_v1 = vld [vmem:[%s11137_s23 + $0x1eec] ss:$16 sps:$4 sm:$0xff]   ;;  %v10846_v36 = vld [vmem:[%s11137_s23 + $0x1ee0] ss:$16 sps:$4 sm:$0xff]  }
 0x3e4   : > { %7238 = vmatpush1.bf16.msra.mxu0 %v10755_v3  ;;  %7894 = vmatpush1.bf16.msra.mxu1 %v10758_v4  ;;  %v10849_v3 = vld [vmem:[%s11137_s23 + $0x1ee8] ss:$16 sps:$4 sm:$0xff]   ;;  %v10854_v4 = vld [vmem:[%s11137_s23 + $0x1f04] ss:$16 sps:$4 sm:$0xff]  }
 0x3e5   : > { %7239 = vmatprep.subr.bf16.mxu0 %v10763_v52  ;;  %7895 = vmatprep.subr.bf16.mxu1 %v10766_v5  ;;  %v10857_v52 = vld [vmem:[%s11137_s23 + $0x1f0c] ss:$16 sps:$4 sm:$0xff]   ;;  %v10852_v5 = vld [vmem:[%s11137_s23 + $0x1f00] ss:$16 sps:$4 sm:$0xff]  }
 0x3e8   : > { %7240 = vmatpush1.bf16.msra.mxu0 %v10761_v6  ;;  %7896 = vmatpush1.bf16.msra.mxu1 %v10764_v62  ;;  %v10855_v6 = vld [vmem:[%s11137_s23 + $0x1f08] ss:$16 sps:$4 sm:$0xff]   ;;  %v10860_v62 = vld [vmem:[%s11137_s23 + $0x1f24] ss:$16 sps:$4 sm:$0xff]  }
 0x3e9   : > { %7241 = vmatprep.subr.bf16.mxu0 %v10769_v8  ;;  %7897 = vmatprep.subr.bf16.mxu1 %v10772_v9  ;;  %v10863_v8 = vld [vmem:[%s11137_s23 + $0x1f2c] ss:$16 sps:$4 sm:$0xff]   ;;  %v10858_v9 = vld [vmem:[%s11137_s23 + $0x1f20] ss:$16 sps:$4 sm:$0xff]  }
 0x3ec   : > { %7242 = vmatpush1.bf16.msra.mxu0 %v10767_v11  ;;  %7898 = vmatpush1.bf16.msra.mxu1 %v10770_v13  ;;  %v10861_v11 = vld [vmem:[%s11137_s23 + $0x1f28] ss:$16 sps:$4 sm:$0xff]   ;;  %v10866_v13 = vld [vmem:[%s11137_s23 + $0x1f44] ss:$16 sps:$4 sm:$0xff]  }
 0x3ed   : > { %7243 = vmatprep.subr.bf16.mxu0 %v10775_v15  ;;  %7899 = vmatprep.subr.bf16.mxu1 %v10778_v17  ;;  %v10869_v15 = vld [vmem:[%s11137_s23 + $0x1f4c] ss:$16 sps:$4 sm:$0xff]   ;;  %v10864_v17 = vld [vmem:[%s11137_s23 + $0x1f40] ss:$16 sps:$4 sm:$0xff]  }
 0x3f0   : > { %7244 = vmatpush1.bf16.msra.mxu0 %v10773_v2  ;;  %7900 = vmatpush1.bf16.msra.mxu1 %v10776_v53  ;;  %v10867_v2 = vld [vmem:[%s11137_s23 + $0x1f48] ss:$16 sps:$4 sm:$0xff]   ;;  %v10872_v53 = vld [vmem:[%s11137_s23 + $0x1f64] ss:$16 sps:$4 sm:$0xff]  }
 0x3f1   : > { %7245 = vmatprep.subr.bf16.mxu0 %v10781_v18  ;;  %7901 = vmatprep.subr.bf16.mxu1 %v10784_v19  ;;  %v10875_v18 = vld [vmem:[%s11137_s23 + $0x1f6c] ss:$16 sps:$4 sm:$0xff]   ;;  %v10870_v19 = vld [vmem:[%s11137_s23 + $0x1f60] ss:$16 sps:$4 sm:$0xff]  }
 0x3f4   : > { %7246 = vmatpush1.bf16.msra.mxu0 %v10779_v10  ;;  %7902 = vmatpush1.bf16.msra.mxu1 %v10782_v20  ;;  %v10873_v10 = vld [vmem:[%s11137_s23 + $0x1f68] ss:$16 sps:$4 sm:$0xff]   ;;  %v10878_v20 = vld [vmem:[%s11137_s23 + $0x1f84] ss:$16 sps:$4 sm:$0xff]  }
 0x3f5   : > { %7247 = vmatprep.subr.bf16.mxu0 %v10787_v21  ;;  %7903 = vmatprep.subr.bf16.mxu1 %v10790_v63  ;;  %v10881_v21 = vld [vmem:[%s11137_s23 + $0x1f8c] ss:$16 sps:$4 sm:$0xff]   ;;  %v10876_v63 = vld [vmem:[%s11137_s23 + $0x1f80] ss:$16 sps:$4 sm:$0xff]  }
 0x3f8   : > { %7248 = vmatpush1.bf16.msra.mxu0 %v10785_v25  ;;  %7904 = vmatpush1.bf16.msra.mxu1 %v10788_v27  ;;  %v10879_v25 = vld [vmem:[%s11137_s23 + $0x1f88] ss:$16 sps:$4 sm:$0xff]   ;;  %v10884_v27 = vld [vmem:[%s11137_s23 + $0x1fa4] ss:$16 sps:$4 sm:$0xff]  }
 0x3f9   : > { %7249 = vmatprep.subr.bf16.mxu0 %v10793_v7  ;;  %7905 = vmatprep.subr.bf16.mxu1 %v10796_v29  ;;  %v10887_v7 = vld [vmem:[%s11137_s23 + $0x1fac] ss:$16 sps:$4 sm:$0xff]   ;;  %v10882_v29 = vld [vmem:[%s11137_s23 + $0x1fa0] ss:$16 sps:$4 sm:$0xff]  }
 0x3fc   : > { %7250 = vmatpush1.bf16.msra.mxu0 %v10791_v30  ;;  %7906 = vmatpush1.bf16.msra.mxu1 %v10794_v12  ;;  %v10885_v30 = vld [vmem:[%s11137_s23 + $0x1fa8] ss:$16 sps:$4 sm:$0xff]   ;;  %v10890_v12 = vld [vmem:[%s11137_s23 + $0x1fc4] ss:$16 sps:$4 sm:$0xff]  }
 0x3fd   : > { %7251 = vmatprep.subr.bf16.mxu0 %v10799_v31  ;;  %7907 = vmatprep.subr.bf16.mxu1 %v10802_v16  ;;  %v10893_v31 = vld [vmem:[%s11137_s23 + $0x1fcc] ss:$16 sps:$4 sm:$0xff]   ;;  %v10888_v16 = vld [vmem:[%s11137_s23 + $0x1fc0] ss:$16 sps:$4 sm:$0xff]  }
 0x400   : > { %7252 = vmatpush1.bf16.msra.mxu0 %v10797_v32  ;;  %7908 = vmatpush1.bf16.msra.mxu1 %v10800_v23  ;;  %v10891_v32 = vld [vmem:[%s11137_s23 + $0x1fc8] ss:$16 sps:$4 sm:$0xff]   ;;  %v10896_v23 = vld [vmem:[%s11137_s23 + $0x1fe4] ss:$16 sps:$4 sm:$0xff]  }
 0x401   : > { %7262 = vmatprep.subr.bf16.mxu0 %v10806_v33  ;;  %7918 = vmatprep.subr.bf16.mxu1 %v10809_v34  ;;  %v10899_v33 = vld [vmem:[%s11137_s23 + $0x1fec] ss:$16 sps:$4 sm:$0xff]   ;;  %v10894_v34 = vld [vmem:[%s11137_s23 + $0x1fe0] ss:$16 sps:$4 sm:$0xff]  }
 0x403   : > { %7254 = vmatmul.mubr.bf16.vlgmr.msra.gmra.mrb[0].mxu0 %v12279_v24  ;;  %7910 = vmatmul.mubr.bf16.vlgmr.msra.gmra.mrb[0].mxu1 %v12279_v24 }
 0x404   : > { %7263 = vmatpush1.bf16.msra.mxu0 %v10804_v35  ;;  %7919 = vmatpush1.bf16.msra.mxu1 %v10807_v37  ;;  %v10897_v35 = vld [vmem:[%s11137_s23 + $0x1fe8] ss:$16 sps:$4 sm:$0xff]   ;;  %v1492_v37 = vcombine.high %v12279_v24, %v12279_v24 }
 0x405   : > { %7264 = vmatprep.subr.bf16.mxu0 %v10812_v38  ;;  %7920 = vmatprep.subr.bf16.mxu1 %v10815_v40  ;;  %v11005_v38 = vmov 1983009808  }
 0x406   : > { %7294 = vmatprep.mubr.bf16.mxu0 %v1494_v41  ;;  %7950 = vmatprep.mubr.bf16.mxu1 %v1494_v41  ;;  %v7966_v40 = vunpack.c.l.s4 %v11005_v38 }
 0x408   : > { %7265 = vmatpush1.bf16.msra.mxu0 %v10810_v50  ;;  %7921 = vmatpush1.bf16.msra.mxu1 %v10813_v28  ;;  %v7967_v41 = vunpack.c.0.s8 %v7966_v40 }
 0x409   : > { %7266 = vmatprep.subr.bf16.mxu0 %v10818_v22  ;;  %7922 = vmatprep.subr.bf16.mxu1 %v10821_v42 }
 0x40a   : > { %v7970_v22 = vsub.s32 %v7967_v41, %v11191_v44 }
 0x40c   : > { %7267 = vmatpush1.bf16.msra.mxu0 %v10816_v26  ;;  %7923 = vmatpush1.bf16.msra.mxu1 %v10819_v43 }
 0x40d   : > { %7268 = vmatprep.subr.bf16.mxu0 %v10824_v45  ;;  %7924 = vmatprep.subr.bf16.mxu1 %v10827_v46 }
 0x410   : > { %7269 = vmatpush1.bf16.msra.mxu0 %v10822_v47  ;;  %7925 = vmatpush1.bf16.msra.mxu1 %v10825_v48 }
 0x411   : > { %7270 = vmatprep.subr.bf16.mxu0 %v10830_v51  ;;  %7926 = vmatprep.subr.bf16.mxu1 %v10833_v54 }
 0x414   : > { %7271 = vmatpush1.bf16.msra.mxu0 %v10828_v55  ;;  %7927 = vmatpush1.bf16.msra.mxu1 %v10831_v56  ;;  %v266_v55 = vld [vmem:[#allocation2] sm:$0xff] }
 0x415   : > { %7272 = vmatprep.subr.bf16.mxu0 %v10836_v39  ;;  %7928 = vmatprep.subr.bf16.mxu1 %v10839_v57  ;;  %v7991_v57 = vld [vmem:[%s12394_s2] sm:$0xf] (!%p12351_p11) }
 0x418   : > { %7273 = vmatpush1.bf16.msra.mxu0 %v10834_v58  ;;  %7929 = vmatpush1.bf16.msra.mxu1 %v10837_v59  ;;  %v7995_v58 = vsub.s32 (!%p12351_p11), 0, %v11191_v44  ;;  %v7999_v59 = vsub.s32 (!%p12351_p11), 1, %v11191_v44 }
 0x419   : > { %7274 = vmatprep.subr.bf16.mxu0 %v10842_v49  ;;  %7930 = vmatprep.subr.bf16.mxu1 %v10845_v60  ;;  %v8003_v49 = vsub.s32 (!%p12351_p11), 2, %v11191_v44  ;;  %v8007_v60 = vsub.s32 (!%p12351_p11), 3, %v11191_v44 }
 0x41c   : > { %7275 = vmatpush1.bf16.msra.mxu0 %v10840_v61  ;;  %7931 = vmatpush1.bf16.msra.mxu1 %v10843_v14  ;;  %v7996_v61 = vrot.slane (!%p12351_p11), %v7991_v57, %v7995_v58  ;;  %v8000_v14 = vrot.slane (!%p12351_p11), %v7991_v57, %v7999_v59 }
 0x41d   : > { %7276 = vmatprep.subr.bf16.mxu0 %v10848_v0  ;;  %7932 = vmatprep.subr.bf16.mxu1 %v10851_v1  ;;  %v8004_v0 = vrot.slane (!%p12351_p11), %v7991_v57, %v8003_v49  ;;  %v8008_v1 = vrot.slane (!%p12351_p11), %v7991_v57, %v8007_v60 }
 0x420   : > { %7277 = vmatpush1.bf16.msra.mxu0 %v10846_v36  ;;  %7933 = vmatpush1.bf16.msra.mxu1 %v10849_v3  ;;  %v8009_v3 = vcombine.low (!%p12351_p11), %v7996_v61, %v8000_v14 }
 0x421   : > { %7278 = vmatprep.subr.bf16.mxu0 %v10854_v4  ;;  %7934 = vmatprep.subr.bf16.mxu1 %v10857_v52  ;;  %v8010_v4 = vcombine.low (!%p12351_p11), %v8004_v0, %v8008_v1 }
 0x422   : > { %v8017_v52 = vrot.slane (!%p12351_p11), %v8009_v3, %v7970_v22 }
 0x424   : > { %7279 = vmatpush1.bf16.msra.mxu0 %v10852_v5  ;;  %7935 = vmatpush1.bf16.msra.mxu1 %v10855_v6  ;;  %v8024_v6 = vrot.slane (!%p12351_p11), %v8010_v4, %v7970_v22 }
 0x425   : > { %7280 = vmatprep.subr.bf16.mxu0 %v10860_v62  ;;  %7936 = vmatprep.subr.bf16.mxu1 %v10863_v8 }
 0x426   : > { %v8025_v62 = vcombine.low (!%p12351_p11), %v8017_v52, %v8024_v6 }
 0x428   : > { %7281 = vmatpush1.bf16.msra.mxu0 %v10858_v9  ;;  %7937 = vmatpush1.bf16.msra.mxu1 %v10861_v11 }
 0x429   : > { %7282 = vmatprep.subr.bf16.mxu0 %v10866_v13  ;;  %7938 = vmatprep.subr.bf16.mxu1 %v10869_v15 }
 0x42c   : > { %7283 = vmatpush1.bf16.msra.mxu0 %v10864_v17  ;;  %7939 = vmatpush1.bf16.msra.mxu1 %v10867_v2 }
 0x42d   : > { %7284 = vmatprep.subr.bf16.mxu0 %v10872_v53  ;;  %7940 = vmatprep.subr.bf16.mxu1 %v10875_v18 }
 0x430   : > { %7285 = vmatpush1.bf16.msra.mxu0 %v10870_v19  ;;  %7941 = vmatpush1.bf16.msra.mxu1 %v10873_v10 }
 0x431   : > { %7286 = vmatprep.subr.bf16.mxu0 %v10878_v20  ;;  %7942 = vmatprep.subr.bf16.mxu1 %v10881_v21 }
 0x434   : > { %7287 = vmatpush1.bf16.msra.mxu0 %v10876_v63  ;;  %7943 = vmatpush1.bf16.msra.mxu1 %v10879_v25 }
 0x435   : > { %7288 = vmatprep.subr.bf16.mxu0 %v10884_v27  ;;  %7944 = vmatprep.subr.bf16.mxu1 %v10887_v7 }
 0x438   : > { %7289 = vmatpush1.bf16.msra.mxu0 %v10882_v29  ;;  %7945 = vmatpush1.bf16.msra.mxu1 %v10885_v30 }
 0x439   : > { %7290 = vmatprep.subr.bf16.mxu0 %v10890_v12  ;;  %7946 = vmatprep.subr.bf16.mxu1 %v10893_v31 }
 0x43c   : > { %7291 = vmatpush1.bf16.msra.mxu0 %v10888_v16  ;;  %7947 = vmatpush1.bf16.msra.mxu1 %v10891_v32 }
 0x43d   : > { %7292 = vmatprep.subr.bf16.mxu0 %v10896_v23  ;;  %7948 = vmatprep.subr.bf16.mxu1 %v10899_v33 }
 0x440   : > { %7293 = vmatpush1.bf16.msra.mxu0 %v10894_v34  ;;  %7949 = vmatpush1.bf16.msra.mxu1 %v10897_v35 }
 0x443   : > { %7295 = vmatmul.mubr.bf16.vlgmr.msra.gmra.mrb[0].mxu0 %v1492_v37  ;;  %7951 = vmatmul.mubr.bf16.vlgmr.msra.gmra.mrb[0].mxu1 %v1492_v37 }
 0x516   : > { %v7296_v50 = vpop.f32.mrb[0].mxu0  ;;  %v7952_v28 = vpop.f32.mrb[0].mxu1 }
 0x517   : > { %v7298_v42 = vpop.f32.mrb[1].mxu0  ;;  %v7954_v26 = vpop.f32.mrb[1].mxu1 }
 0x518   : > { %v7963_v24 = vcombine.low %v7296_v50, %v7298_v42  ;;  %v7964_v43 = vcombine.low %v7952_v28, %v7954_v26  ;;  %v7300_v45 = vpop.f32.mrb[2].mxu0  ;;  %v7956_v46 = vpop.f32.mrb[2].mxu1 }
 0x519   : > { %v7301_v47 = vpop.f32.mrb[3].mxu0  ;;  %v7957_v48 = vpop.f32.mrb[3].mxu1 }
 0x51a   : > { %v7971_v51 = vrot.slane %v7963_v24, %v7970_v22  ;;  %v7978_v54 = vrot.slane %v7964_v43, %v7970_v22  ;;  %7988 = sbr.rel (%p12351_p11) target bundleno = 1325 (0x52d), region = 44 }
 0x51c   : > { %v7979_v56 = vcombine.low %v7971_v51, %v7978_v54 }
 0x51e   : > { %v7981_v39 = vadd.f32 %v7979_v56, %v266_v55 }
 0x520   : > { %7982 = vst [vmem:[#allocation2] sm:$0xff] %v7981_v39 }
 0x527   : > { %v7989_v36 = vld [vmem:[#allocation2] sm:$0xff] }
 0x528   : > { %v7990_v5 = vmul.f32 0.5, %v7989_v36 }
 0x52a   : > { %v8027_v8 = vadd.f32 %v8025_v62, %v7990_v5 }
 0x52c   : > { %8028 = vst [vmem:[%s12395_s3] sm:$0xff] %v8027_v8 }
 0x52d PF: > { %s16_s19 = sadd.s32 1, %s10998_s19   ;;  %s12400_s12 = smov %s10974_s13 }
 0x52e   : > { %p13_p13 = scmp.ge.s32.totalorder %s16_s19, 18   ;;  %s12401_s13 = smov %s10978_s14 }
 0x52f   : > { %s12402_s14 = smov %s11091_s30  ;;  %s12403_s15 = smov %s10990_s17 }
 0x530   : > { %s12404_s16 = smov %s10994_s18  ;;  %s12405_s17 = smov %s12408_s21 }
 0x531   : > { %s12406_s18 = smov %s12412_s22  ;;  %15 = sbr.rel (!%p13_p13) target bundleno = 5 (0x5), region = 83 }
 0x538   :  { %8050 = vsyncpa [#allocation4], 1 }
 0x539   :  { %8052 = vsyncpa [#allocation4 + $0x1], 1 }

</bundles_post_ra>
